<compile_context>
chip_gen: v6e
topology: v6e:2x2x1
jax: 0.10.0
libtpu: 0.0.40
codegen_flags: <defaults>
</compile_context>

<pallas_src>
import numpy as np

import jax
import jax.numpy as jnp
from jax.experimental import pallas as pl
from jax.experimental.pallas import tpu as pltpu

# Small, self-consistent stand-ins for the dataset-derived constants.
IMAGE_HEIGHT = 16   # must be divisible by 8 (three 2x2 pools)
IMAGE_WIDTH = 8     # the real module implies width // 8 == 1 (fc_in == 32*H/8)
N_CLASSES = 4
EPS = 1e-5          # nn.BatchNorm2d default eps
MAX_BATCH_TILE = 8  # images processed per grid step (rows stay 8-aligned)

# 3x3 conv taps, row-major over (ky, kx):  tap = (dy + 1) * 3 + (dx + 1)
TAPS = tuple((dy, dx) for dy in (-1, 0, 1) for dx in (-1, 0, 1))


# ----------------------------------------------------------------------------
# Fused kernel
# ----------------------------------------------------------------------------
def _shift_rows(a, s):
    """Cyclic row shift of a 2-D value: out[r] = a[(r + s) % rows] (s static)."""
    rows = a.shape[0]
    s = s % rows
    if s == 0:
        return a
    return jnp.concatenate([a[s:], a[:s]], axis=0)


def make_ssann_kernel(nb, height, width, n_classes):
    """Builds the fused forward kernel for one batch tile of `nb` images."""
    width1 = width
    width2 = width // 2
    width3 = width // 4
    n_pos = (height // 8) * (width // 8)   # pooled spatial positions into fc1

    def conv_bn_relu(a, w_ref, b_ref, m_ref, wdt, use_mxu):
        # a:     (rows, cin) activations, rows ordered (n, y, x)
        # w_ref: (9, cin, cout) conv weights with the BN scale folded in
        # m_ref: (9, rows, 1) 0/1 masks zeroing out-of-image taps
        rows = a.shape[0]
        cout = w_ref.shape[-1]
        acc = jnp.zeros((rows, cout), jnp.float32)
        for tap, (dy, dx) in enumerate(TAPS):
            src = _shift_rows(a, dy * wdt + dx)
            if not (dy == 0 and dx == 0):
                src = src * m_ref[tap]          # lane-broadcast of (rows, 1)
            wt = w_ref[tap]                      # (cin, cout)
            if use_mxu:
                acc = acc + jnp.dot(src, wt,
                                    preferred_element_type=jnp.float32)
            else:
                # cin == 1: VPU broadcast FMA, skip a degenerate K=1 MXU pass.
                acc = acc + src * wt
        return jnp.maximum(acc + b_ref[...], 0.0)

    def pool_window_max(a, wdt):
        # Max over the 2x2 window anchored at every (y, x); even-(y, x)
        # anchors are picked afterwards by an exact 0/1 selection matmul.
        hmax = jnp.maximum(a, _shift_rows(a, 1))            # (y,x), (y,x+1)
        return jnp.maximum(hmax, _shift_rows(hmax, wdt))     # + row y+1

    def kernel(x_ref, w1_ref, b1_ref, m1_ref, s1_ref,
               w2_ref, b2_ref, m2_ref, s2_ref,
               w3_ref, b3_ref, m3_ref, s3_ref,
               wfc_ref, bfc_ref, o_ref):
        # ---- block 1 (Cin = 1, VPU) ----------------------------------------
        a1 = conv_bn_relu(x_ref[...], w1_ref, b1_ref, m1_ref, width1,
                          use_mxu=False)
        p1 = jnp.dot(s1_ref[...], pool_window_max(a1, width1),
                     preferred_element_type=jnp.float32)
        # ---- block 2 ---------------------------------------------------------
        a2 = conv_bn_relu(p1, w2_ref, b2_ref, m2_ref, width2, use_mxu=True)
        p2 = jnp.dot(s2_ref[...], pool_window_max(a2, width2),
                     preferred_element_type=jnp.float32)
        # ---- block 3 + pool + channel-major flatten + fc1 --------------------
        a3 = conv_bn_relu(p2, w3_ref, b3_ref, m3_ref, width3, use_mxu=True)
        v3 = pool_window_max(a3, width3)
        # Per pooled spatial position p, pick row (n, p) of v3, then lay the
        # positions side by side along lanes -> (nb, n_pos * C3).  The FC
        # weight was re-laid-out host-side to match, so torch.flatten(x, 1)
        # channel-major semantics need no transpose here.
        feats = jnp.concatenate(
            [jnp.dot(s3_ref[p], v3, preferred_element_type=jnp.float32)
             for p in range(n_pos)], axis=1)
        o_ref[...] = (jnp.dot(feats, wfc_ref[...],
                              preferred_element_type=jnp.float32)
                      + bfc_ref[...])

    return kernel


# ----------------------------------------------------------------------------
# Host-side constant builders (static, trace-time, sized for ONE batch tile)
# ----------------------------------------------------------------------------
def _tap_masks(nb, h, w):
    """(9, nb*h*w, 1) 0/1 masks: is tap (dy, dx) inside the image at (y,x)?"""
    rows = nb * h * w
    idx = np.arange(rows)
    y = (idx // w) % h
    x = idx % w
    m = np.zeros((9, rows, 1), np.float32)
    for t, (dy, dx) in enumerate(TAPS):
        ok = (y + dy >= 0) & (y + dy < h) & (x + dx >= 0) & (x + dx < w)
        m[t, :, 0] = ok
    return m


def _pool_select(nb, h, w):
    """0/1 matrix picking the 2x2-window anchors (even y, even x) -- exact pool."""
    hh, wh = h // 2, w // 2
    sel = np.zeros((nb * hh * wh, nb * h * w), np.float32)
    for n in range(nb):
        for yh in range(hh):
            for xh in range(wh):
                sel[(n * hh + yh) * wh + xh,
                    (n * h + 2 * yh) * w + 2 * xh] = 1.0
    return sel


def _pool_select_final(nb, h, w):
    """(P, nb, nb*h*w): per pooled spatial position p, pick row (n, p)."""
    hh, wh = h // 2, w // 2
    sel = np.zeros((hh * wh, nb, nb * h * w), np.float32)
    for p in range(hh * wh):
        yh, xh = divmod(p, wh)
        for n in range(nb):
            sel[p, n, (n * h + 2 * yh) * w + 2 * xh] = 1.0
    return sel


def _fold_conv_bn(w_hwio, conv_b, gamma, beta, mean, var):
    """Fold inference-mode BN into the conv: scale into weights, single bias."""
    scale = gamma / jnp.sqrt(var + EPS)                       # (cout,)
    kh, kw, cin, cout = w_hwio.shape
    w_folded = (w_hwio * scale).reshape(kh * kw, cin, cout)   # (9, cin, cout)
    b_folded = (beta + (conv_b - mean) * scale).reshape(1, cout)
    return w_folded.astype(jnp.float32), b_folded.astype(jnp.float32)


def _const_spec(shape):
    """Full-array block, same block every grid step (DMA'd once, reused)."""
    nd = len(shape)
    return pl.BlockSpec(tuple(shape), lambda b, _nd=nd: (0,) * _nd)


@jax.jit
def ssann_forward(x_nchw, params):
    n, _, h, w = x_nchw.shape

    # Batch tiling: up to MAX_BATCH_TILE images per grid step.  nb is either
    # the whole (small) batch, or 8 (keeps the output block sublane-aligned).
    nb = n if n <= MAX_BATCH_TILE else MAX_BATCH_TILE
    n_steps = pl.cdiv(n, nb)
    n_pad = n_steps * nb
    if n_pad != n:
        x_nchw = jnp.pad(x_nchw, ((0, n_pad - n), (0, 0), (0, 0), (0, 0)))

    # Cin == 1, so NCHW -> (n*h*w, 1) is a pure reshape (rows ordered (n,y,x)).
    x2d = x_nchw.astype(jnp.float32).reshape(n_pad * h * w, 1)

    w1, b1 = _fold_conv_bn(params["conv1_w"], params["conv1_b"],
                           params["bn1_gamma"], params["bn1_beta"],
                           params["bn1_mean"], params["bn1_var"])
    w2, b2 = _fold_conv_bn(params["conv2_w"], params["conv2_b"],
                           params["bn2_gamma"], params["bn2_beta"],
                           params["bn2_mean"], params["bn2_var"])
    w3, b3 = _fold_conv_bn(params["conv3_w"], params["conv3_b"],
                           params["bn3_gamma"], params["bn3_beta"],
                           params["bn3_mean"], params["bn3_var"])

    # Per-TILE constants (independent of the total batch size).
    m1 = jnp.asarray(_tap_masks(nb, h, w))
    m2 = jnp.asarray(_tap_masks(nb, h // 2, w // 2))
    m3 = jnp.asarray(_tap_masks(nb, h // 4, w // 4))
    s1 = jnp.asarray(_pool_select(nb, h, w))
    s2 = jnp.asarray(_pool_select(nb, h // 2, w // 2))
    s3 = jnp.asarray(_pool_select_final(nb, h // 4, w // 4))

    c3 = params["conv3_w"].shape[-1]
    n_classes = params["fc1_w"].shape[1]
    n_pos = s3.shape[0]
    # torch.flatten(x, 1) on NCHW orders features (c, p); regroup to (p, c) so
    # the kernel's lane-concat over positions feeds one plain matmul.
    wfc = params["fc1_w"].reshape(c3, n_pos, n_classes).transpose(1, 0, 2)
    wfc = wfc.reshape(n_pos * c3, n_classes).astype(jnp.float32)
    bfc = params["fc1_b"].reshape(1, n_classes).astype(jnp.float32)

    consts = (w1, b1, m1, s1, w2, b2, m2, s2, w3, b3, m3, s3, wfc, bfc)
    kernel = make_ssann_kernel(nb, h, w, n_classes)

    out = pl.pallas_call(
        kernel,
        out_shape=jax.ShapeDtypeStruct((n_pad, n_classes), jnp.float32),
        grid=(n_steps,),
        in_specs=[pl.BlockSpec((nb * h * w, 1), lambda b: (b, 0))]
                 + [_const_spec(a.shape) for a in consts],
        out_specs=pl.BlockSpec((nb, n_classes), lambda b: (b, 0)),
        compiler_params=pltpu.CompilerParams(
            dimension_semantics=("parallel",)),
    )(x2d, *consts)
    return out[:n] if n_pad != n else out


# ----------------------------------------------------------------------------
# Deterministic parameter init (synthetic, matches module shapes)
# ----------------------------------------------------------------------------
def init_params(key, n_classes):
    # Conv weights stored as HWIO (KH, KW, Cin, Cout) == PyTorch OIHW transposed.
    chans = [(1, 8), (8, 16), (16, 32)]
    fc_in = 32 * (IMAGE_HEIGHT // 8) * (IMAGE_WIDTH // 8)
    assert IMAGE_WIDTH // 8 == 1  # so fc_in == int(32 * IMAGE_HEIGHT / 8)
    keys = iter(jax.random.split(key, 32))
    p = {}
    for i, (cin, cout) in enumerate(chans, start=1):
        p[f"conv{i}_w"] = 0.1 * jax.random.normal(
            next(keys), (3, 3, cin, cout), jnp.float32)
        p[f"conv{i}_b"] = 0.05 * jax.random.normal(
            next(keys), (cout,), jnp.float32)
        p[f"bn{i}_gamma"] = 1.0 + 0.1 * jax.random.normal(
            next(keys), (cout,), jnp.float32)
        p[f"bn{i}_beta"] = 0.1 * jax.random.normal(
            next(keys), (cout,), jnp.float32)
        p[f"bn{i}_mean"] = 0.1 * jax.random.normal(
            next(keys), (cout,), jnp.float32)
        p[f"bn{i}_var"] = 1.0 + 0.2 * jnp.abs(
            jax.random.normal(next(keys), (cout,), jnp.float32))
    p["fc1_w"] = 0.1 * jax.random.normal(
        next(keys), (fc_in, n_classes), jnp.float32)
    p["fc1_b"] = 0.05 * jax.random.normal(
        next(keys), (n_classes,), jnp.float32)
    return p


# ----------------------------------------------------------------------------
# Pure-JAX reference (independent path) for a correctness check
# ----------------------------------------------------------------------------
def reference_forward(x_nchw, params):
    x = jnp.transpose(x_nchw.astype(jnp.float32), (0, 2, 3, 1))
    for i in (1, 2, 3):
        w = params[f"conv{i}_w"]  # HWIO
        y = jax.lax.conv_general_dilated(
            x, w, window_strides=(1, 1), padding="SAME",
            dimension_numbers=("NHWC", "HWIO", "NHWC"))
        y = y + params[f"conv{i}_b"]
        scale = params[f"bn{i}_gamma"] / jnp.sqrt(params[f"bn{i}_var"] + EPS)
        y = (y - params[f"bn{i}_mean"]) * scale + params[f"bn{i}_beta"]
        y = jax.nn.relu(y)
        x = jax.lax.reduce_window(y, -jnp.inf, jax.lax.max,
                                  (1, 2, 2, 1), (1, 2, 2, 1), "VALID")
    feats = jnp.transpose(x, (0, 3, 1, 2)).reshape(x.shape[0], -1)
    return feats @ params["fc1_w"] + params["fc1_b"]


if __name__ == "__main__":
    key = jax.random.PRNGKey(0)
    kx, kp = jax.random.split(key)
    x = jax.random.normal(kx, (2, 1, IMAGE_HEIGHT, IMAGE_WIDTH), jnp.float32)
    params = init_params(kp, N_CLASSES)

    out = jax.block_until_ready(ssann_forward(x, params))

    ref = reference_forward(x, params)
    assert out.shape == (2, N_CLASSES), out.shape
    assert jnp.allclose(out, ref, rtol=1e-3, atol=1e-4), (out, ref)

    print("KERNEL_OK")
</pallas_src>

<mosaic_0001>
module attributes {stable_mosaic.version = 11 : i64} {
  func.func @kernel(%arg0: i32, %arg1: memref<256x1xf32, #tpu.memory_space<vmem>>, %arg2: memref<9x1x8xf32, #tpu.memory_space<vmem>>, %arg3: memref<1x8xf32, #tpu.memory_space<vmem>>, %arg4: memref<9x256x1xf32, #tpu.memory_space<vmem>>, %arg5: memref<64x256xf32, #tpu.memory_space<vmem>>, %arg6: memref<9x8x16xf32, #tpu.memory_space<vmem>>, %arg7: memref<1x16xf32, #tpu.memory_space<vmem>>, %arg8: memref<9x64x1xf32, #tpu.memory_space<vmem>>, %arg9: memref<16x64xf32, #tpu.memory_space<vmem>>, %arg10: memref<9x16x32xf32, #tpu.memory_space<vmem>>, %arg11: memref<1x32xf32, #tpu.memory_space<vmem>>, %arg12: memref<9x16x1xf32, #tpu.memory_space<vmem>>, %arg13: memref<2x2x16xf32, #tpu.memory_space<vmem>>, %arg14: memref<64x4xf32, #tpu.memory_space<vmem>>, %arg15: memref<1x4xf32, #tpu.memory_space<vmem>>, %arg16: memref<2x4xf32, #tpu.memory_space<vmem>>) attributes {dimension_semantics = [#tpu.dimension_semantics<parallel>], iteration_bounds = array<i64: 1>, scalar_prefetch = 0 : i64, scratch_operands = 0 : i64, tpu.core_type = #tpu.core_type<tc>, window_params = [{transform_indices = @transform_0, window_bounds = array<i64: 256, 1>}, {pipeline_mode = #tpu.pipeline_mode<synchronous>, transform_indices = @transform_1, window_bounds = array<i64: 9, 1, 8>}, {pipeline_mode = #tpu.pipeline_mode<synchronous>, transform_indices = @transform_2, window_bounds = array<i64: 1, 8>}, {pipeline_mode = #tpu.pipeline_mode<synchronous>, transform_indices = @transform_3, window_bounds = array<i64: 9, 256, 1>}, {pipeline_mode = #tpu.pipeline_mode<synchronous>, transform_indices = @transform_4, window_bounds = array<i64: 64, 256>}, {pipeline_mode = #tpu.pipeline_mode<synchronous>, transform_indices = @transform_5, window_bounds = array<i64: 9, 8, 16>}, {pipeline_mode = #tpu.pipeline_mode<synchronous>, transform_indices = @transform_6, window_bounds = array<i64: 1, 16>}, {pipeline_mode = #tpu.pipeline_mode<synchronous>, transform_indices = @transform_7, window_bounds = array<i64: 9, 64, 1>}, {pipeline_mode = #tpu.pipeline_mode<synchronous>, transform_indices = @transform_8, window_bounds = array<i64: 16, 64>}, {pipeline_mode = #tpu.pipeline_mode<synchronous>, transform_indices = @transform_9, window_bounds = array<i64: 9, 16, 32>}, {pipeline_mode = #tpu.pipeline_mode<synchronous>, transform_indices = @transform_10, window_bounds = array<i64: 1, 32>}, {pipeline_mode = #tpu.pipeline_mode<synchronous>, transform_indices = @transform_11, window_bounds = array<i64: 9, 16, 1>}, {pipeline_mode = #tpu.pipeline_mode<synchronous>, transform_indices = @transform_12, window_bounds = array<i64: 2, 2, 16>}, {pipeline_mode = #tpu.pipeline_mode<synchronous>, transform_indices = @transform_13, window_bounds = array<i64: 64, 4>}, {pipeline_mode = #tpu.pipeline_mode<synchronous>, transform_indices = @transform_14, window_bounds = array<i64: 1, 4>}, {transform_indices = @transform_15, window_bounds = array<i64: 2, 4>}]} {
    %c0 = arith.constant 0 : index
    %c0_0 = arith.constant 0 : index
    %0 = vector.load %arg1[%c0, %c0_0] : memref<256x1xf32, #tpu.memory_space<vmem>>, vector<256x1xf32>
    %cst = arith.constant 0.000000e+00 : f32
    %1 = vector.broadcast %cst : f32 to vector<256x8xf32>
    %2 = vector.extract_strided_slice %0 {offsets = [247, 0], sizes = [9, 1], strides = [1, 1]} : vector<256x1xf32> to vector<9x1xf32>
    %3 = vector.extract_strided_slice %0 {offsets = [0, 0], sizes = [247, 1], strides = [1, 1]} : vector<256x1xf32> to vector<247x1xf32>
    %4 = tpu.concatenate %2, %3 in 0 : vector<9x1xf32>, vector<247x1xf32> -> vector<256x1xf32>
    %c0_1 = arith.constant 0 : index
    %c0_2 = arith.constant 0 : index
    %c0_3 = arith.constant 0 : index
    %5 = vector.load %arg4[%c0_1, %c0_2, %c0_3] : memref<9x256x1xf32, #tpu.memory_space<vmem>>, vector<1x256x1xf32>
    %6 = vector.shape_cast %5 : vector<1x256x1xf32> to vector<256x1xf32>
    %7 = arith.mulf %4, %6 : vector<256x1xf32>
    %c0_4 = arith.constant 0 : index
    %c0_5 = arith.constant 0 : index
    %c0_6 = arith.constant 0 : index
    %8 = vector.load %arg2[%c0_4, %c0_5, %c0_6] : memref<9x1x8xf32, #tpu.memory_space<vmem>>, vector<1x1x8xf32>
    %9 = vector.shape_cast %8 : vector<1x1x8xf32> to vector<1x8xf32>
    %10 = vector.broadcast %7 : vector<256x1xf32> to vector<256x8xf32>
    %11 = vector.broadcast %9 : vector<1x8xf32> to vector<256x8xf32>
    %12 = arith.mulf %10, %11 : vector<256x8xf32>
    %13 = arith.addf %1, %12 : vector<256x8xf32>
    %14 = vector.extract_strided_slice %0 {offsets = [248, 0], sizes = [8, 1], strides = [1, 1]} : vector<256x1xf32> to vector<8x1xf32>
    %15 = vector.extract_strided_slice %0 {offsets = [0, 0], sizes = [248, 1], strides = [1, 1]} : vector<256x1xf32> to vector<248x1xf32>
    %16 = tpu.concatenate %14, %15 in 0 : vector<8x1xf32>, vector<248x1xf32> -> vector<256x1xf32>
    %c1 = arith.constant 1 : index
    %c0_7 = arith.constant 0 : index
    %c0_8 = arith.constant 0 : index
    %17 = vector.load %arg4[%c1, %c0_7, %c0_8] : memref<9x256x1xf32, #tpu.memory_space<vmem>>, vector<1x256x1xf32>
    %18 = vector.shape_cast %17 : vector<1x256x1xf32> to vector<256x1xf32>
    %19 = arith.mulf %16, %18 : vector<256x1xf32>
    %c1_9 = arith.constant 1 : index
    %c0_10 = arith.constant 0 : index
    %c0_11 = arith.constant 0 : index
    %20 = vector.load %arg2[%c1_9, %c0_10, %c0_11] : memref<9x1x8xf32, #tpu.memory_space<vmem>>, vector<1x1x8xf32>
    %21 = vector.shape_cast %20 : vector<1x1x8xf32> to vector<1x8xf32>
    %22 = vector.broadcast %19 : vector<256x1xf32> to vector<256x8xf32>
    %23 = vector.broadcast %21 : vector<1x8xf32> to vector<256x8xf32>
    %24 = arith.mulf %22, %23 : vector<256x8xf32>
    %25 = arith.addf %13, %24 : vector<256x8xf32>
    %26 = vector.extract_strided_slice %0 {offsets = [249, 0], sizes = [7, 1], strides = [1, 1]} : vector<256x1xf32> to vector<7x1xf32>
    %27 = vector.extract_strided_slice %0 {offsets = [0, 0], sizes = [249, 1], strides = [1, 1]} : vector<256x1xf32> to vector<249x1xf32>
    %28 = tpu.concatenate %26, %27 in 0 : vector<7x1xf32>, vector<249x1xf32> -> vector<256x1xf32>
    %c2 = arith.constant 2 : index
    %c0_12 = arith.constant 0 : index
    %c0_13 = arith.constant 0 : index
    %29 = vector.load %arg4[%c2, %c0_12, %c0_13] : memref<9x256x1xf32, #tpu.memory_space<vmem>>, vector<1x256x1xf32>
    %30 = vector.shape_cast %29 : vector<1x256x1xf32> to vector<256x1xf32>
    %31 = arith.mulf %28, %30 : vector<256x1xf32>
    %c2_14 = arith.constant 2 : index
    %c0_15 = arith.constant 0 : index
    %c0_16 = arith.constant 0 : index
    %32 = vector.load %arg2[%c2_14, %c0_15, %c0_16] : memref<9x1x8xf32, #tpu.memory_space<vmem>>, vector<1x1x8xf32>
    %33 = vector.shape_cast %32 : vector<1x1x8xf32> to vector<1x8xf32>
    %34 = vector.broadcast %31 : vector<256x1xf32> to vector<256x8xf32>
    %35 = vector.broadcast %33 : vector<1x8xf32> to vector<256x8xf32>
    %36 = arith.mulf %34, %35 : vector<256x8xf32>
    %37 = arith.addf %25, %36 : vector<256x8xf32>
    %38 = vector.extract_strided_slice %0 {offsets = [255, 0], sizes = [1, 1], strides = [1, 1]} : vector<256x1xf32> to vector<1x1xf32>
    %39 = vector.extract_strided_slice %0 {offsets = [0, 0], sizes = [255, 1], strides = [1, 1]} : vector<256x1xf32> to vector<255x1xf32>
    %40 = tpu.concatenate %38, %39 in 0 : vector<1x1xf32>, vector<255x1xf32> -> vector<256x1xf32>
    %c3 = arith.constant 3 : index
    %c0_17 = arith.constant 0 : index
    %c0_18 = arith.constant 0 : index
    %41 = vector.load %arg4[%c3, %c0_17, %c0_18] : memref<9x256x1xf32, #tpu.memory_space<vmem>>, vector<1x256x1xf32>
    %42 = vector.shape_cast %41 : vector<1x256x1xf32> to vector<256x1xf32>
    %43 = arith.mulf %40, %42 : vector<256x1xf32>
    %c3_19 = arith.constant 3 : index
    %c0_20 = arith.constant 0 : index
    %c0_21 = arith.constant 0 : index
    %44 = vector.load %arg2[%c3_19, %c0_20, %c0_21] : memref<9x1x8xf32, #tpu.memory_space<vmem>>, vector<1x1x8xf32>
    %45 = vector.shape_cast %44 : vector<1x1x8xf32> to vector<1x8xf32>
    %46 = vector.broadcast %43 : vector<256x1xf32> to vector<256x8xf32>
    %47 = vector.broadcast %45 : vector<1x8xf32> to vector<256x8xf32>
    %48 = arith.mulf %46, %47 : vector<256x8xf32>
    %49 = arith.addf %37, %48 : vector<256x8xf32>
    %c4 = arith.constant 4 : index
    %c0_22 = arith.constant 0 : index
    %c0_23 = arith.constant 0 : index
    %50 = vector.load %arg2[%c4, %c0_22, %c0_23] : memref<9x1x8xf32, #tpu.memory_space<vmem>>, vector<1x1x8xf32>
    %51 = vector.shape_cast %50 : vector<1x1x8xf32> to vector<1x8xf32>
    %52 = vector.broadcast %0 : vector<256x1xf32> to vector<256x8xf32>
    %53 = vector.broadcast %51 : vector<1x8xf32> to vector<256x8xf32>
    %54 = arith.mulf %52, %53 : vector<256x8xf32>
    %55 = arith.addf %49, %54 : vector<256x8xf32>
    %56 = vector.extract_strided_slice %0 {offsets = [1, 0], sizes = [255, 1], strides = [1, 1]} : vector<256x1xf32> to vector<255x1xf32>
    %57 = vector.extract_strided_slice %0 {offsets = [0, 0], sizes = [1, 1], strides = [1, 1]} : vector<256x1xf32> to vector<1x1xf32>
    %58 = tpu.concatenate %56, %57 in 0 : vector<255x1xf32>, vector<1x1xf32> -> vector<256x1xf32>
    %c5 = arith.constant 5 : index
    %c0_24 = arith.constant 0 : index
    %c0_25 = arith.constant 0 : index
    %59 = vector.load %arg4[%c5, %c0_24, %c0_25] : memref<9x256x1xf32, #tpu.memory_space<vmem>>, vector<1x256x1xf32>
    %60 = vector.shape_cast %59 : vector<1x256x1xf32> to vector<256x1xf32>
    %61 = arith.mulf %58, %60 : vector<256x1xf32>
    %c5_26 = arith.constant 5 : index
    %c0_27 = arith.constant 0 : index
    %c0_28 = arith.constant 0 : index
    %62 = vector.load %arg2[%c5_26, %c0_27, %c0_28] : memref<9x1x8xf32, #tpu.memory_space<vmem>>, vector<1x1x8xf32>
    %63 = vector.shape_cast %62 : vector<1x1x8xf32> to vector<1x8xf32>
    %64 = vector.broadcast %61 : vector<256x1xf32> to vector<256x8xf32>
    %65 = vector.broadcast %63 : vector<1x8xf32> to vector<256x8xf32>
    %66 = arith.mulf %64, %65 : vector<256x8xf32>
    %67 = arith.addf %55, %66 : vector<256x8xf32>
    %68 = vector.extract_strided_slice %0 {offsets = [7, 0], sizes = [249, 1], strides = [1, 1]} : vector<256x1xf32> to vector<249x1xf32>
    %69 = vector.extract_strided_slice %0 {offsets = [0, 0], sizes = [7, 1], strides = [1, 1]} : vector<256x1xf32> to vector<7x1xf32>
    %70 = tpu.concatenate %68, %69 in 0 : vector<249x1xf32>, vector<7x1xf32> -> vector<256x1xf32>
    %c6 = arith.constant 6 : index
    %c0_29 = arith.constant 0 : index
    %c0_30 = arith.constant 0 : index
    %71 = vector.load %arg4[%c6, %c0_29, %c0_30] : memref<9x256x1xf32, #tpu.memory_space<vmem>>, vector<1x256x1xf32>
    %72 = vector.shape_cast %71 : vector<1x256x1xf32> to vector<256x1xf32>
    %73 = arith.mulf %70, %72 : vector<256x1xf32>
    %c6_31 = arith.constant 6 : index
    %c0_32 = arith.constant 0 : index
    %c0_33 = arith.constant 0 : index
    %74 = vector.load %arg2[%c6_31, %c0_32, %c0_33] : memref<9x1x8xf32, #tpu.memory_space<vmem>>, vector<1x1x8xf32>
    %75 = vector.shape_cast %74 : vector<1x1x8xf32> to vector<1x8xf32>
    %76 = vector.broadcast %73 : vector<256x1xf32> to vector<256x8xf32>
    %77 = vector.broadcast %75 : vector<1x8xf32> to vector<256x8xf32>
    %78 = arith.mulf %76, %77 : vector<256x8xf32>
    %79 = arith.addf %67, %78 : vector<256x8xf32>
    %80 = vector.extract_strided_slice %0 {offsets = [8, 0], sizes = [248, 1], strides = [1, 1]} : vector<256x1xf32> to vector<248x1xf32>
    %81 = vector.extract_strided_slice %0 {offsets = [0, 0], sizes = [8, 1], strides = [1, 1]} : vector<256x1xf32> to vector<8x1xf32>
    %82 = tpu.concatenate %80, %81 in 0 : vector<248x1xf32>, vector<8x1xf32> -> vector<256x1xf32>
    %c7 = arith.constant 7 : index
    %c0_34 = arith.constant 0 : index
    %c0_35 = arith.constant 0 : index
    %83 = vector.load %arg4[%c7, %c0_34, %c0_35] : memref<9x256x1xf32, #tpu.memory_space<vmem>>, vector<1x256x1xf32>
    %84 = vector.shape_cast %83 : vector<1x256x1xf32> to vector<256x1xf32>
    %85 = arith.mulf %82, %84 : vector<256x1xf32>
    %c7_36 = arith.constant 7 : index
    %c0_37 = arith.constant 0 : index
    %c0_38 = arith.constant 0 : index
    %86 = vector.load %arg2[%c7_36, %c0_37, %c0_38] : memref<9x1x8xf32, #tpu.memory_space<vmem>>, vector<1x1x8xf32>
    %87 = vector.shape_cast %86 : vector<1x1x8xf32> to vector<1x8xf32>
    %88 = vector.broadcast %85 : vector<256x1xf32> to vector<256x8xf32>
    %89 = vector.broadcast %87 : vector<1x8xf32> to vector<256x8xf32>
    %90 = arith.mulf %88, %89 : vector<256x8xf32>
    %91 = arith.addf %79, %90 : vector<256x8xf32>
    %92 = vector.extract_strided_slice %0 {offsets = [9, 0], sizes = [247, 1], strides = [1, 1]} : vector<256x1xf32> to vector<247x1xf32>
    %93 = vector.extract_strided_slice %0 {offsets = [0, 0], sizes = [9, 1], strides = [1, 1]} : vector<256x1xf32> to vector<9x1xf32>
    %94 = tpu.concatenate %92, %93 in 0 : vector<247x1xf32>, vector<9x1xf32> -> vector<256x1xf32>
    %c8 = arith.constant 8 : index
    %c0_39 = arith.constant 0 : index
    %c0_40 = arith.constant 0 : index
    %95 = vector.load %arg4[%c8, %c0_39, %c0_40] : memref<9x256x1xf32, #tpu.memory_space<vmem>>, vector<1x256x1xf32>
    %96 = vector.shape_cast %95 : vector<1x256x1xf32> to vector<256x1xf32>
    %97 = arith.mulf %94, %96 : vector<256x1xf32>
    %c8_41 = arith.constant 8 : index
    %c0_42 = arith.constant 0 : index
    %c0_43 = arith.constant 0 : index
    %98 = vector.load %arg2[%c8_41, %c0_42, %c0_43] : memref<9x1x8xf32, #tpu.memory_space<vmem>>, vector<1x1x8xf32>
    %99 = vector.shape_cast %98 : vector<1x1x8xf32> to vector<1x8xf32>
    %100 = vector.broadcast %97 : vector<256x1xf32> to vector<256x8xf32>
    %101 = vector.broadcast %99 : vector<1x8xf32> to vector<256x8xf32>
    %102 = arith.mulf %100, %101 : vector<256x8xf32>
    %103 = arith.addf %91, %102 : vector<256x8xf32>
    %c0_44 = arith.constant 0 : index
    %c0_45 = arith.constant 0 : index
    %104 = vector.load %arg3[%c0_44, %c0_45] : memref<1x8xf32, #tpu.memory_space<vmem>>, vector<1x8xf32>
    %105 = vector.broadcast %104 : vector<1x8xf32> to vector<256x8xf32>
    %106 = arith.addf %103, %105 : vector<256x8xf32>
    %cst_46 = arith.constant 0.000000e+00 : f32
    %107 = vector.broadcast %cst_46 : f32 to vector<256x8xf32>
    %108 = arith.maximumf %106, %107 : vector<256x8xf32>
    %c0_47 = arith.constant 0 : index
    %c0_48 = arith.constant 0 : index
    %109 = vector.load %arg5[%c0_47, %c0_48] : memref<64x256xf32, #tpu.memory_space<vmem>>, vector<64x256xf32>
    %110 = vector.extract_strided_slice %108 {offsets = [1, 0], sizes = [255, 8], strides = [1, 1]} : vector<256x8xf32> to vector<255x8xf32>
    %111 = vector.extract_strided_slice %108 {offsets = [0, 0], sizes = [1, 8], strides = [1, 1]} : vector<256x8xf32> to vector<1x8xf32>
    %112 = tpu.concatenate %110, %111 in 0 : vector<255x8xf32>, vector<1x8xf32> -> vector<256x8xf32>
    %113 = arith.maximumf %108, %112 : vector<256x8xf32>
    %114 = vector.extract_strided_slice %113 {offsets = [8, 0], sizes = [248, 8], strides = [1, 1]} : vector<256x8xf32> to vector<248x8xf32>
    %115 = vector.extract_strided_slice %113 {offsets = [0, 0], sizes = [8, 8], strides = [1, 1]} : vector<256x8xf32> to vector<8x8xf32>
    %116 = tpu.concatenate %114, %115 in 0 : vector<248x8xf32>, vector<8x8xf32> -> vector<256x8xf32>
    %117 = arith.maximumf %113, %116 : vector<256x8xf32>
    %cst_49 = arith.constant dense<0.000000e+00> : vector<64x8xf32>
    %118 = tpu.matmul %109, %117, %cst_49 {dimension_numbers = #tpu.dot_dimension_numbers<[1], [0], [0], [1], [0, 0, 1, 1], [], []>} : vector<64x256xf32>, vector<256x8xf32>, vector<64x8xf32> -> vector<64x8xf32>
    %cst_50 = arith.constant 0.000000e+00 : f32
    %119 = vector.broadcast %cst_50 : f32 to vector<64x16xf32>
    %120 = vector.extract_strided_slice %118 {offsets = [59, 0], sizes = [5, 8], strides = [1, 1]} : vector<64x8xf32> to vector<5x8xf32>
    %121 = vector.extract_strided_slice %118 {offsets = [0, 0], sizes = [59, 8], strides = [1, 1]} : vector<64x8xf32> to vector<59x8xf32>
    %122 = tpu.concatenate %120, %121 in 0 : vector<5x8xf32>, vector<59x8xf32> -> vector<64x8xf32>
    %c0_51 = arith.constant 0 : index
    %c0_52 = arith.constant 0 : index
    %c0_53 = arith.constant 0 : index
    %123 = vector.load %arg8[%c0_51, %c0_52, %c0_53] : memref<9x64x1xf32, #tpu.memory_space<vmem>>, vector<1x64x1xf32>
    %124 = vector.shape_cast %123 : vector<1x64x1xf32> to vector<64x1xf32>
    %125 = vector.broadcast %124 : vector<64x1xf32> to vector<64x8xf32>
    %126 = arith.mulf %122, %125 : vector<64x8xf32>
    %c0_54 = arith.constant 0 : index
    %c0_55 = arith.constant 0 : index
    %c0_56 = arith.constant 0 : index
    %127 = vector.load %arg6[%c0_54, %c0_55, %c0_56] : memref<9x8x16xf32, #tpu.memory_space<vmem>>, vector<1x8x16xf32>
    %128 = vector.shape_cast %127 : vector<1x8x16xf32> to vector<8x16xf32>
    %cst_57 = arith.constant dense<0.000000e+00> : vector<64x16xf32>
    %129 = tpu.matmul %126, %128, %cst_57 {dimension_numbers = #tpu.dot_dimension_numbers<[1], [0], [0], [1], [0, 0, 1, 1], [], []>} : vector<64x8xf32>, vector<8x16xf32>, vector<64x16xf32> -> vector<64x16xf32>
    %130 = arith.addf %119, %129 : vector<64x16xf32>
    %131 = vector.extract_strided_slice %118 {offsets = [60, 0], sizes = [4, 8], strides = [1, 1]} : vector<64x8xf32> to vector<4x8xf32>
    %132 = vector.extract_strided_slice %118 {offsets = [0, 0], sizes = [60, 8], strides = [1, 1]} : vector<64x8xf32> to vector<60x8xf32>
    %133 = tpu.concatenate %131, %132 in 0 : vector<4x8xf32>, vector<60x8xf32> -> vector<64x8xf32>
    %c1_58 = arith.constant 1 : index
    %c0_59 = arith.constant 0 : index
    %c0_60 = arith.constant 0 : index
    %134 = vector.load %arg8[%c1_58, %c0_59, %c0_60] : memref<9x64x1xf32, #tpu.memory_space<vmem>>, vector<1x64x1xf32>
    %135 = vector.shape_cast %134 : vector<1x64x1xf32> to vector<64x1xf32>
    %136 = vector.broadcast %135 : vector<64x1xf32> to vector<64x8xf32>
    %137 = arith.mulf %133, %136 : vector<64x8xf32>
    %c1_61 = arith.constant 1 : index
    %c0_62 = arith.constant 0 : index
    %c0_63 = arith.constant 0 : index
    %138 = vector.load %arg6[%c1_61, %c0_62, %c0_63] : memref<9x8x16xf32, #tpu.memory_space<vmem>>, vector<1x8x16xf32>
    %139 = vector.shape_cast %138 : vector<1x8x16xf32> to vector<8x16xf32>
    %cst_64 = arith.constant dense<0.000000e+00> : vector<64x16xf32>
    %140 = tpu.matmul %137, %139, %cst_64 {dimension_numbers = #tpu.dot_dimension_numbers<[1], [0], [0], [1], [0, 0, 1, 1], [], []>} : vector<64x8xf32>, vector<8x16xf32>, vector<64x16xf32> -> vector<64x16xf32>
    %141 = arith.addf %130, %140 : vector<64x16xf32>
    %142 = vector.extract_strided_slice %118 {offsets = [61, 0], sizes = [3, 8], strides = [1, 1]} : vector<64x8xf32> to vector<3x8xf32>
    %143 = vector.extract_strided_slice %118 {offsets = [0, 0], sizes = [61, 8], strides = [1, 1]} : vector<64x8xf32> to vector<61x8xf32>
    %144 = tpu.concatenate %142, %143 in 0 : vector<3x8xf32>, vector<61x8xf32> -> vector<64x8xf32>
    %c2_65 = arith.constant 2 : index
    %c0_66 = arith.constant 0 : index
    %c0_67 = arith.constant 0 : index
    %145 = vector.load %arg8[%c2_65, %c0_66, %c0_67] : memref<9x64x1xf32, #tpu.memory_space<vmem>>, vector<1x64x1xf32>
    %146 = vector.shape_cast %145 : vector<1x64x1xf32> to vector<64x1xf32>
    %147 = vector.broadcast %146 : vector<64x1xf32> to vector<64x8xf32>
    %148 = arith.mulf %144, %147 : vector<64x8xf32>
    %c2_68 = arith.constant 2 : index
    %c0_69 = arith.constant 0 : index
    %c0_70 = arith.constant 0 : index
    %149 = vector.load %arg6[%c2_68, %c0_69, %c0_70] : memref<9x8x16xf32, #tpu.memory_space<vmem>>, vector<1x8x16xf32>
    %150 = vector.shape_cast %149 : vector<1x8x16xf32> to vector<8x16xf32>
    %cst_71 = arith.constant dense<0.000000e+00> : vector<64x16xf32>
    %151 = tpu.matmul %148, %150, %cst_71 {dimension_numbers = #tpu.dot_dimension_numbers<[1], [0], [0], [1], [0, 0, 1, 1], [], []>} : vector<64x8xf32>, vector<8x16xf32>, vector<64x16xf32> -> vector<64x16xf32>
    %152 = arith.addf %141, %151 : vector<64x16xf32>
    %153 = vector.extract_strided_slice %118 {offsets = [63, 0], sizes = [1, 8], strides = [1, 1]} : vector<64x8xf32> to vector<1x8xf32>
    %154 = vector.extract_strided_slice %118 {offsets = [0, 0], sizes = [63, 8], strides = [1, 1]} : vector<64x8xf32> to vector<63x8xf32>
    %155 = tpu.concatenate %153, %154 in 0 : vector<1x8xf32>, vector<63x8xf32> -> vector<64x8xf32>
    %c3_72 = arith.constant 3 : index
    %c0_73 = arith.constant 0 : index
    %c0_74 = arith.constant 0 : index
    %156 = vector.load %arg8[%c3_72, %c0_73, %c0_74] : memref<9x64x1xf32, #tpu.memory_space<vmem>>, vector<1x64x1xf32>
    %157 = vector.shape_cast %156 : vector<1x64x1xf32> to vector<64x1xf32>
    %158 = vector.broadcast %157 : vector<64x1xf32> to vector<64x8xf32>
    %159 = arith.mulf %155, %158 : vector<64x8xf32>
    %c3_75 = arith.constant 3 : index
    %c0_76 = arith.constant 0 : index
    %c0_77 = arith.constant 0 : index
    %160 = vector.load %arg6[%c3_75, %c0_76, %c0_77] : memref<9x8x16xf32, #tpu.memory_space<vmem>>, vector<1x8x16xf32>
    %161 = vector.shape_cast %160 : vector<1x8x16xf32> to vector<8x16xf32>
    %cst_78 = arith.constant dense<0.000000e+00> : vector<64x16xf32>
    %162 = tpu.matmul %159, %161, %cst_78 {dimension_numbers = #tpu.dot_dimension_numbers<[1], [0], [0], [1], [0, 0, 1, 1], [], []>} : vector<64x8xf32>, vector<8x16xf32>, vector<64x16xf32> -> vector<64x16xf32>
    %163 = arith.addf %152, %162 : vector<64x16xf32>
    %c4_79 = arith.constant 4 : index
    %c0_80 = arith.constant 0 : index
    %c0_81 = arith.constant 0 : index
    %164 = vector.load %arg6[%c4_79, %c0_80, %c0_81] : memref<9x8x16xf32, #tpu.memory_space<vmem>>, vector<1x8x16xf32>
    %165 = vector.shape_cast %164 : vector<1x8x16xf32> to vector<8x16xf32>
    %cst_82 = arith.constant dense<0.000000e+00> : vector<64x16xf32>
    %166 = tpu.matmul %118, %165, %cst_82 {dimension_numbers = #tpu.dot_dimension_numbers<[1], [0], [0], [1], [0, 0, 1, 1], [], []>} : vector<64x8xf32>, vector<8x16xf32>, vector<64x16xf32> -> vector<64x16xf32>
    %167 = arith.addf %163, %166 : vector<64x16xf32>
    %168 = vector.extract_strided_slice %118 {offsets = [1, 0], sizes = [63, 8], strides = [1, 1]} : vector<64x8xf32> to vector<63x8xf32>
    %169 = vector.extract_strided_slice %118 {offsets = [0, 0], sizes = [1, 8], strides = [1, 1]} : vector<64x8xf32> to vector<1x8xf32>
    %170 = tpu.concatenate %168, %169 in 0 : vector<63x8xf32>, vector<1x8xf32> -> vector<64x8xf32>
    %c5_83 = arith.constant 5 : index
    %c0_84 = arith.constant 0 : index
    %c0_85 = arith.constant 0 : index
    %171 = vector.load %arg8[%c5_83, %c0_84, %c0_85] : memref<9x64x1xf32, #tpu.memory_space<vmem>>, vector<1x64x1xf32>
    %172 = vector.shape_cast %171 : vector<1x64x1xf32> to vector<64x1xf32>
    %173 = vector.broadcast %172 : vector<64x1xf32> to vector<64x8xf32>
    %174 = arith.mulf %170, %173 : vector<64x8xf32>
    %c5_86 = arith.constant 5 : index
    %c0_87 = arith.constant 0 : index
    %c0_88 = arith.constant 0 : index
    %175 = vector.load %arg6[%c5_86, %c0_87, %c0_88] : memref<9x8x16xf32, #tpu.memory_space<vmem>>, vector<1x8x16xf32>
    %176 = vector.shape_cast %175 : vector<1x8x16xf32> to vector<8x16xf32>
    %cst_89 = arith.constant dense<0.000000e+00> : vector<64x16xf32>
    %177 = tpu.matmul %174, %176, %cst_89 {dimension_numbers = #tpu.dot_dimension_numbers<[1], [0], [0], [1], [0, 0, 1, 1], [], []>} : vector<64x8xf32>, vector<8x16xf32>, vector<64x16xf32> -> vector<64x16xf32>
    %178 = arith.addf %167, %177 : vector<64x16xf32>
    %179 = vector.extract_strided_slice %118 {offsets = [3, 0], sizes = [61, 8], strides = [1, 1]} : vector<64x8xf32> to vector<61x8xf32>
    %180 = vector.extract_strided_slice %118 {offsets = [0, 0], sizes = [3, 8], strides = [1, 1]} : vector<64x8xf32> to vector<3x8xf32>
    %181 = tpu.concatenate %179, %180 in 0 : vector<61x8xf32>, vector<3x8xf32> -> vector<64x8xf32>
    %c6_90 = arith.constant 6 : index
    %c0_91 = arith.constant 0 : index
    %c0_92 = arith.constant 0 : index
    %182 = vector.load %arg8[%c6_90, %c0_91, %c0_92] : memref<9x64x1xf32, #tpu.memory_space<vmem>>, vector<1x64x1xf32>
    %183 = vector.shape_cast %182 : vector<1x64x1xf32> to vector<64x1xf32>
    %184 = vector.broadcast %183 : vector<64x1xf32> to vector<64x8xf32>
    %185 = arith.mulf %181, %184 : vector<64x8xf32>
    %c6_93 = arith.constant 6 : index
    %c0_94 = arith.constant 0 : index
    %c0_95 = arith.constant 0 : index
    %186 = vector.load %arg6[%c6_93, %c0_94, %c0_95] : memref<9x8x16xf32, #tpu.memory_space<vmem>>, vector<1x8x16xf32>
    %187 = vector.shape_cast %186 : vector<1x8x16xf32> to vector<8x16xf32>
    %cst_96 = arith.constant dense<0.000000e+00> : vector<64x16xf32>
    %188 = tpu.matmul %185, %187, %cst_96 {dimension_numbers = #tpu.dot_dimension_numbers<[1], [0], [0], [1], [0, 0, 1, 1], [], []>} : vector<64x8xf32>, vector<8x16xf32>, vector<64x16xf32> -> vector<64x16xf32>
    %189 = arith.addf %178, %188 : vector<64x16xf32>
    %190 = vector.extract_strided_slice %118 {offsets = [4, 0], sizes = [60, 8], strides = [1, 1]} : vector<64x8xf32> to vector<60x8xf32>
    %191 = vector.extract_strided_slice %118 {offsets = [0, 0], sizes = [4, 8], strides = [1, 1]} : vector<64x8xf32> to vector<4x8xf32>
    %192 = tpu.concatenate %190, %191 in 0 : vector<60x8xf32>, vector<4x8xf32> -> vector<64x8xf32>
    %c7_97 = arith.constant 7 : index
    %c0_98 = arith.constant 0 : index
    %c0_99 = arith.constant 0 : index
    %193 = vector.load %arg8[%c7_97, %c0_98, %c0_99] : memref<9x64x1xf32, #tpu.memory_space<vmem>>, vector<1x64x1xf32>
    %194 = vector.shape_cast %193 : vector<1x64x1xf32> to vector<64x1xf32>
    %195 = vector.broadcast %194 : vector<64x1xf32> to vector<64x8xf32>
    %196 = arith.mulf %192, %195 : vector<64x8xf32>
    %c7_100 = arith.constant 7 : index
    %c0_101 = arith.constant 0 : index
    %c0_102 = arith.constant 0 : index
    %197 = vector.load %arg6[%c7_100, %c0_101, %c0_102] : memref<9x8x16xf32, #tpu.memory_space<vmem>>, vector<1x8x16xf32>
    %198 = vector.shape_cast %197 : vector<1x8x16xf32> to vector<8x16xf32>
    %cst_103 = arith.constant dense<0.000000e+00> : vector<64x16xf32>
    %199 = tpu.matmul %196, %198, %cst_103 {dimension_numbers = #tpu.dot_dimension_numbers<[1], [0], [0], [1], [0, 0, 1, 1], [], []>} : vector<64x8xf32>, vector<8x16xf32>, vector<64x16xf32> -> vector<64x16xf32>
    %200 = arith.addf %189, %199 : vector<64x16xf32>
    %201 = vector.extract_strided_slice %118 {offsets = [5, 0], sizes = [59, 8], strides = [1, 1]} : vector<64x8xf32> to vector<59x8xf32>
    %202 = vector.extract_strided_slice %118 {offsets = [0, 0], sizes = [5, 8], strides = [1, 1]} : vector<64x8xf32> to vector<5x8xf32>
    %203 = tpu.concatenate %201, %202 in 0 : vector<59x8xf32>, vector<5x8xf32> -> vector<64x8xf32>
    %c8_104 = arith.constant 8 : index
    %c0_105 = arith.constant 0 : index
    %c0_106 = arith.constant 0 : index
    %204 = vector.load %arg8[%c8_104, %c0_105, %c0_106] : memref<9x64x1xf32, #tpu.memory_space<vmem>>, vector<1x64x1xf32>
    %205 = vector.shape_cast %204 : vector<1x64x1xf32> to vector<64x1xf32>
    %206 = vector.broadcast %205 : vector<64x1xf32> to vector<64x8xf32>
    %207 = arith.mulf %203, %206 : vector<64x8xf32>
    %c8_107 = arith.constant 8 : index
    %c0_108 = arith.constant 0 : index
    %c0_109 = arith.constant 0 : index
    %208 = vector.load %arg6[%c8_107, %c0_108, %c0_109] : memref<9x8x16xf32, #tpu.memory_space<vmem>>, vector<1x8x16xf32>
    %209 = vector.shape_cast %208 : vector<1x8x16xf32> to vector<8x16xf32>
    %cst_110 = arith.constant dense<0.000000e+00> : vector<64x16xf32>
    %210 = tpu.matmul %207, %209, %cst_110 {dimension_numbers = #tpu.dot_dimension_numbers<[1], [0], [0], [1], [0, 0, 1, 1], [], []>} : vector<64x8xf32>, vector<8x16xf32>, vector<64x16xf32> -> vector<64x16xf32>
    %211 = arith.addf %200, %210 : vector<64x16xf32>
    %c0_111 = arith.constant 0 : index
    %c0_112 = arith.constant 0 : index
    %212 = vector.load %arg7[%c0_111, %c0_112] : memref<1x16xf32, #tpu.memory_space<vmem>>, vector<1x16xf32>
    %213 = vector.broadcast %212 : vector<1x16xf32> to vector<64x16xf32>
    %214 = arith.addf %211, %213 : vector<64x16xf32>
    %cst_113 = arith.constant 0.000000e+00 : f32
    %215 = vector.broadcast %cst_113 : f32 to vector<64x16xf32>
    %216 = arith.maximumf %214, %215 : vector<64x16xf32>
    %c0_114 = arith.constant 0 : index
    %c0_115 = arith.constant 0 : index
    %217 = vector.load %arg9[%c0_114, %c0_115] : memref<16x64xf32, #tpu.memory_space<vmem>>, vector<16x64xf32>
    %218 = vector.extract_strided_slice %216 {offsets = [1, 0], sizes = [63, 16], strides = [1, 1]} : vector<64x16xf32> to vector<63x16xf32>
    %219 = vector.extract_strided_slice %216 {offsets = [0, 0], sizes = [1, 16], strides = [1, 1]} : vector<64x16xf32> to vector<1x16xf32>
    %220 = tpu.concatenate %218, %219 in 0 : vector<63x16xf32>, vector<1x16xf32> -> vector<64x16xf32>
    %221 = arith.maximumf %216, %220 : vector<64x16xf32>
    %222 = vector.extract_strided_slice %221 {offsets = [4, 0], sizes = [60, 16], strides = [1, 1]} : vector<64x16xf32> to vector<60x16xf32>
    %223 = vector.extract_strided_slice %221 {offsets = [0, 0], sizes = [4, 16], strides = [1, 1]} : vector<64x16xf32> to vector<4x16xf32>
    %224 = tpu.concatenate %222, %223 in 0 : vector<60x16xf32>, vector<4x16xf32> -> vector<64x16xf32>
    %225 = arith.maximumf %221, %224 : vector<64x16xf32>
    %cst_116 = arith.constant dense<0.000000e+00> : vector<16x16xf32>
    %226 = tpu.matmul %217, %225, %cst_116 {dimension_numbers = #tpu.dot_dimension_numbers<[1], [0], [0], [1], [0, 0, 1, 1], [], []>} : vector<16x64xf32>, vector<64x16xf32>, vector<16x16xf32> -> vector<16x16xf32>
    %cst_117 = arith.constant 0.000000e+00 : f32
    %227 = vector.broadcast %cst_117 : f32 to vector<16x32xf32>
    %228 = vector.extract_strided_slice %226 {offsets = [13, 0], sizes = [3, 16], strides = [1, 1]} : vector<16x16xf32> to vector<3x16xf32>
    %229 = vector.extract_strided_slice %226 {offsets = [0, 0], sizes = [13, 16], strides = [1, 1]} : vector<16x16xf32> to vector<13x16xf32>
    %230 = tpu.concatenate %228, %229 in 0 : vector<3x16xf32>, vector<13x16xf32> -> vector<16x16xf32>
    %c0_118 = arith.constant 0 : index
    %c0_119 = arith.constant 0 : index
    %c0_120 = arith.constant 0 : index
    %231 = vector.load %arg12[%c0_118, %c0_119, %c0_120] : memref<9x16x1xf32, #tpu.memory_space<vmem>>, vector<1x16x1xf32>
    %232 = vector.shape_cast %231 : vector<1x16x1xf32> to vector<16x1xf32>
    %233 = vector.broadcast %232 : vector<16x1xf32> to vector<16x16xf32>
    %234 = arith.mulf %230, %233 : vector<16x16xf32>
    %c0_121 = arith.constant 0 : index
    %c0_122 = arith.constant 0 : index
    %c0_123 = arith.constant 0 : index
    %235 = vector.load %arg10[%c0_121, %c0_122, %c0_123] : memref<9x16x32xf32, #tpu.memory_space<vmem>>, vector<1x16x32xf32>
    %236 = vector.shape_cast %235 : vector<1x16x32xf32> to vector<16x32xf32>
    %cst_124 = arith.constant dense<0.000000e+00> : vector<16x32xf32>
    %237 = tpu.matmul %234, %236, %cst_124 {dimension_numbers = #tpu.dot_dimension_numbers<[1], [0], [0], [1], [0, 0, 1, 1], [], []>} : vector<16x16xf32>, vector<16x32xf32>, vector<16x32xf32> -> vector<16x32xf32>
    %238 = arith.addf %227, %237 : vector<16x32xf32>
    %239 = vector.extract_strided_slice %226 {offsets = [14, 0], sizes = [2, 16], strides = [1, 1]} : vector<16x16xf32> to vector<2x16xf32>
    %240 = vector.extract_strided_slice %226 {offsets = [0, 0], sizes = [14, 16], strides = [1, 1]} : vector<16x16xf32> to vector<14x16xf32>
    %241 = tpu.concatenate %239, %240 in 0 : vector<2x16xf32>, vector<14x16xf32> -> vector<16x16xf32>
    %c1_125 = arith.constant 1 : index
    %c0_126 = arith.constant 0 : index
    %c0_127 = arith.constant 0 : index
    %242 = vector.load %arg12[%c1_125, %c0_126, %c0_127] : memref<9x16x1xf32, #tpu.memory_space<vmem>>, vector<1x16x1xf32>
    %243 = vector.shape_cast %242 : vector<1x16x1xf32> to vector<16x1xf32>
    %244 = vector.broadcast %243 : vector<16x1xf32> to vector<16x16xf32>
    %245 = arith.mulf %241, %244 : vector<16x16xf32>
    %c1_128 = arith.constant 1 : index
    %c0_129 = arith.constant 0 : index
    %c0_130 = arith.constant 0 : index
    %246 = vector.load %arg10[%c1_128, %c0_129, %c0_130] : memref<9x16x32xf32, #tpu.memory_space<vmem>>, vector<1x16x32xf32>
    %247 = vector.shape_cast %246 : vector<1x16x32xf32> to vector<16x32xf32>
    %cst_131 = arith.constant dense<0.000000e+00> : vector<16x32xf32>
    %248 = tpu.matmul %245, %247, %cst_131 {dimension_numbers = #tpu.dot_dimension_numbers<[1], [0], [0], [1], [0, 0, 1, 1], [], []>} : vector<16x16xf32>, vector<16x32xf32>, vector<16x32xf32> -> vector<16x32xf32>
    %249 = arith.addf %238, %248 : vector<16x32xf32>
    %250 = vector.extract_strided_slice %226 {offsets = [15, 0], sizes = [1, 16], strides = [1, 1]} : vector<16x16xf32> to vector<1x16xf32>
    %251 = vector.extract_strided_slice %226 {offsets = [0, 0], sizes = [15, 16], strides = [1, 1]} : vector<16x16xf32> to vector<15x16xf32>
    %252 = tpu.concatenate %250, %251 in 0 : vector<1x16xf32>, vector<15x16xf32> -> vector<16x16xf32>
    %c2_132 = arith.constant 2 : index
    %c0_133 = arith.constant 0 : index
    %c0_134 = arith.constant 0 : index
    %253 = vector.load %arg12[%c2_132, %c0_133, %c0_134] : memref<9x16x1xf32, #tpu.memory_space<vmem>>, vector<1x16x1xf32>
    %254 = vector.shape_cast %253 : vector<1x16x1xf32> to vector<16x1xf32>
    %255 = vector.broadcast %254 : vector<16x1xf32> to vector<16x16xf32>
    %256 = arith.mulf %252, %255 : vector<16x16xf32>
    %c2_135 = arith.constant 2 : index
    %c0_136 = arith.constant 0 : index
    %c0_137 = arith.constant 0 : index
    %257 = vector.load %arg10[%c2_135, %c0_136, %c0_137] : memref<9x16x32xf32, #tpu.memory_space<vmem>>, vector<1x16x32xf32>
    %258 = vector.shape_cast %257 : vector<1x16x32xf32> to vector<16x32xf32>
    %cst_138 = arith.constant dense<0.000000e+00> : vector<16x32xf32>
    %259 = tpu.matmul %256, %258, %cst_138 {dimension_numbers = #tpu.dot_dimension_numbers<[1], [0], [0], [1], [0, 0, 1, 1], [], []>} : vector<16x16xf32>, vector<16x32xf32>, vector<16x32xf32> -> vector<16x32xf32>
    %260 = arith.addf %249, %259 : vector<16x32xf32>
    %261 = vector.extract_strided_slice %226 {offsets = [15, 0], sizes = [1, 16], strides = [1, 1]} : vector<16x16xf32> to vector<1x16xf32>
    %262 = vector.extract_strided_slice %226 {offsets = [0, 0], sizes = [15, 16], strides = [1, 1]} : vector<16x16xf32> to vector<15x16xf32>
    %263 = tpu.concatenate %261, %262 in 0 : vector<1x16xf32>, vector<15x16xf32> -> vector<16x16xf32>
    %c3_139 = arith.constant 3 : index
    %c0_140 = arith.constant 0 : index
    %c0_141 = arith.constant 0 : index
    %264 = vector.load %arg12[%c3_139, %c0_140, %c0_141] : memref<9x16x1xf32, #tpu.memory_space<vmem>>, vector<1x16x1xf32>
    %265 = vector.shape_cast %264 : vector<1x16x1xf32> to vector<16x1xf32>
    %266 = vector.broadcast %265 : vector<16x1xf32> to vector<16x16xf32>
    %267 = arith.mulf %263, %266 : vector<16x16xf32>
    %c3_142 = arith.constant 3 : index
    %c0_143 = arith.constant 0 : index
    %c0_144 = arith.constant 0 : index
    %268 = vector.load %arg10[%c3_142, %c0_143, %c0_144] : memref<9x16x32xf32, #tpu.memory_space<vmem>>, vector<1x16x32xf32>
    %269 = vector.shape_cast %268 : vector<1x16x32xf32> to vector<16x32xf32>
    %cst_145 = arith.constant dense<0.000000e+00> : vector<16x32xf32>
    %270 = tpu.matmul %267, %269, %cst_145 {dimension_numbers = #tpu.dot_dimension_numbers<[1], [0], [0], [1], [0, 0, 1, 1], [], []>} : vector<16x16xf32>, vector<16x32xf32>, vector<16x32xf32> -> vector<16x32xf32>
    %271 = arith.addf %260, %270 : vector<16x32xf32>
    %c4_146 = arith.constant 4 : index
    %c0_147 = arith.constant 0 : index
    %c0_148 = arith.constant 0 : index
    %272 = vector.load %arg10[%c4_146, %c0_147, %c0_148] : memref<9x16x32xf32, #tpu.memory_space<vmem>>, vector<1x16x32xf32>
    %273 = vector.shape_cast %272 : vector<1x16x32xf32> to vector<16x32xf32>
    %cst_149 = arith.constant dense<0.000000e+00> : vector<16x32xf32>
    %274 = tpu.matmul %226, %273, %cst_149 {dimension_numbers = #tpu.dot_dimension_numbers<[1], [0], [0], [1], [0, 0, 1, 1], [], []>} : vector<16x16xf32>, vector<16x32xf32>, vector<16x32xf32> -> vector<16x32xf32>
    %275 = arith.addf %271, %274 : vector<16x32xf32>
    %276 = vector.extract_strided_slice %226 {offsets = [1, 0], sizes = [15, 16], strides = [1, 1]} : vector<16x16xf32> to vector<15x16xf32>
    %277 = vector.extract_strided_slice %226 {offsets = [0, 0], sizes = [1, 16], strides = [1, 1]} : vector<16x16xf32> to vector<1x16xf32>
    %278 = tpu.concatenate %276, %277 in 0 : vector<15x16xf32>, vector<1x16xf32> -> vector<16x16xf32>
    %c5_150 = arith.constant 5 : index
    %c0_151 = arith.constant 0 : index
    %c0_152 = arith.constant 0 : index
    %279 = vector.load %arg12[%c5_150, %c0_151, %c0_152] : memref<9x16x1xf32, #tpu.memory_space<vmem>>, vector<1x16x1xf32>
    %280 = vector.shape_cast %279 : vector<1x16x1xf32> to vector<16x1xf32>
    %281 = vector.broadcast %280 : vector<16x1xf32> to vector<16x16xf32>
    %282 = arith.mulf %278, %281 : vector<16x16xf32>
    %c5_153 = arith.constant 5 : index
    %c0_154 = arith.constant 0 : index
    %c0_155 = arith.constant 0 : index
    %283 = vector.load %arg10[%c5_153, %c0_154, %c0_155] : memref<9x16x32xf32, #tpu.memory_space<vmem>>, vector<1x16x32xf32>
    %284 = vector.shape_cast %283 : vector<1x16x32xf32> to vector<16x32xf32>
    %cst_156 = arith.constant dense<0.000000e+00> : vector<16x32xf32>
    %285 = tpu.matmul %282, %284, %cst_156 {dimension_numbers = #tpu.dot_dimension_numbers<[1], [0], [0], [1], [0, 0, 1, 1], [], []>} : vector<16x16xf32>, vector<16x32xf32>, vector<16x32xf32> -> vector<16x32xf32>
    %286 = arith.addf %275, %285 : vector<16x32xf32>
    %287 = vector.extract_strided_slice %226 {offsets = [1, 0], sizes = [15, 16], strides = [1, 1]} : vector<16x16xf32> to vector<15x16xf32>
    %288 = vector.extract_strided_slice %226 {offsets = [0, 0], sizes = [1, 16], strides = [1, 1]} : vector<16x16xf32> to vector<1x16xf32>
    %289 = tpu.concatenate %287, %288 in 0 : vector<15x16xf32>, vector<1x16xf32> -> vector<16x16xf32>
    %c6_157 = arith.constant 6 : index
    %c0_158 = arith.constant 0 : index
    %c0_159 = arith.constant 0 : index
    %290 = vector.load %arg12[%c6_157, %c0_158, %c0_159] : memref<9x16x1xf32, #tpu.memory_space<vmem>>, vector<1x16x1xf32>
    %291 = vector.shape_cast %290 : vector<1x16x1xf32> to vector<16x1xf32>
    %292 = vector.broadcast %291 : vector<16x1xf32> to vector<16x16xf32>
    %293 = arith.mulf %289, %292 : vector<16x16xf32>
    %c6_160 = arith.constant 6 : index
    %c0_161 = arith.constant 0 : index
    %c0_162 = arith.constant 0 : index
    %294 = vector.load %arg10[%c6_160, %c0_161, %c0_162] : memref<9x16x32xf32, #tpu.memory_space<vmem>>, vector<1x16x32xf32>
    %295 = vector.shape_cast %294 : vector<1x16x32xf32> to vector<16x32xf32>
    %cst_163 = arith.constant dense<0.000000e+00> : vector<16x32xf32>
    %296 = tpu.matmul %293, %295, %cst_163 {dimension_numbers = #tpu.dot_dimension_numbers<[1], [0], [0], [1], [0, 0, 1, 1], [], []>} : vector<16x16xf32>, vector<16x32xf32>, vector<16x32xf32> -> vector<16x32xf32>
    %297 = arith.addf %286, %296 : vector<16x32xf32>
    %298 = vector.extract_strided_slice %226 {offsets = [2, 0], sizes = [14, 16], strides = [1, 1]} : vector<16x16xf32> to vector<14x16xf32>
    %299 = vector.extract_strided_slice %226 {offsets = [0, 0], sizes = [2, 16], strides = [1, 1]} : vector<16x16xf32> to vector<2x16xf32>
    %300 = tpu.concatenate %298, %299 in 0 : vector<14x16xf32>, vector<2x16xf32> -> vector<16x16xf32>
    %c7_164 = arith.constant 7 : index
    %c0_165 = arith.constant 0 : index
    %c0_166 = arith.constant 0 : index
    %301 = vector.load %arg12[%c7_164, %c0_165, %c0_166] : memref<9x16x1xf32, #tpu.memory_space<vmem>>, vector<1x16x1xf32>
    %302 = vector.shape_cast %301 : vector<1x16x1xf32> to vector<16x1xf32>
    %303 = vector.broadcast %302 : vector<16x1xf32> to vector<16x16xf32>
    %304 = arith.mulf %300, %303 : vector<16x16xf32>
    %c7_167 = arith.constant 7 : index
    %c0_168 = arith.constant 0 : index
    %c0_169 = arith.constant 0 : index
    %305 = vector.load %arg10[%c7_167, %c0_168, %c0_169] : memref<9x16x32xf32, #tpu.memory_space<vmem>>, vector<1x16x32xf32>
    %306 = vector.shape_cast %305 : vector<1x16x32xf32> to vector<16x32xf32>
    %cst_170 = arith.constant dense<0.000000e+00> : vector<16x32xf32>
    %307 = tpu.matmul %304, %306, %cst_170 {dimension_numbers = #tpu.dot_dimension_numbers<[1], [0], [0], [1], [0, 0, 1, 1], [], []>} : vector<16x16xf32>, vector<16x32xf32>, vector<16x32xf32> -> vector<16x32xf32>
    %308 = arith.addf %297, %307 : vector<16x32xf32>
    %309 = vector.extract_strided_slice %226 {offsets = [3, 0], sizes = [13, 16], strides = [1, 1]} : vector<16x16xf32> to vector<13x16xf32>
    %310 = vector.extract_strided_slice %226 {offsets = [0, 0], sizes = [3, 16], strides = [1, 1]} : vector<16x16xf32> to vector<3x16xf32>
    %311 = tpu.concatenate %309, %310 in 0 : vector<13x16xf32>, vector<3x16xf32> -> vector<16x16xf32>
    %c8_171 = arith.constant 8 : index
    %c0_172 = arith.constant 0 : index
    %c0_173 = arith.constant 0 : index
    %312 = vector.load %arg12[%c8_171, %c0_172, %c0_173] : memref<9x16x1xf32, #tpu.memory_space<vmem>>, vector<1x16x1xf32>
    %313 = vector.shape_cast %312 : vector<1x16x1xf32> to vector<16x1xf32>
    %314 = vector.broadcast %313 : vector<16x1xf32> to vector<16x16xf32>
    %315 = arith.mulf %311, %314 : vector<16x16xf32>
    %c8_174 = arith.constant 8 : index
    %c0_175 = arith.constant 0 : index
    %c0_176 = arith.constant 0 : index
    %316 = vector.load %arg10[%c8_174, %c0_175, %c0_176] : memref<9x16x32xf32, #tpu.memory_space<vmem>>, vector<1x16x32xf32>
    %317 = vector.shape_cast %316 : vector<1x16x32xf32> to vector<16x32xf32>
    %cst_177 = arith.constant dense<0.000000e+00> : vector<16x32xf32>
    %318 = tpu.matmul %315, %317, %cst_177 {dimension_numbers = #tpu.dot_dimension_numbers<[1], [0], [0], [1], [0, 0, 1, 1], [], []>} : vector<16x16xf32>, vector<16x32xf32>, vector<16x32xf32> -> vector<16x32xf32>
    %319 = arith.addf %308, %318 : vector<16x32xf32>
    %c0_178 = arith.constant 0 : index
    %c0_179 = arith.constant 0 : index
    %320 = vector.load %arg11[%c0_178, %c0_179] : memref<1x32xf32, #tpu.memory_space<vmem>>, vector<1x32xf32>
    %321 = vector.broadcast %320 : vector<1x32xf32> to vector<16x32xf32>
    %322 = arith.addf %319, %321 : vector<16x32xf32>
    %cst_180 = arith.constant 0.000000e+00 : f32
    %323 = vector.broadcast %cst_180 : f32 to vector<16x32xf32>
    %324 = arith.maximumf %322, %323 : vector<16x32xf32>
    %325 = vector.extract_strided_slice %324 {offsets = [1, 0], sizes = [15, 32], strides = [1, 1]} : vector<16x32xf32> to vector<15x32xf32>
    %326 = vector.extract_strided_slice %324 {offsets = [0, 0], sizes = [1, 32], strides = [1, 1]} : vector<16x32xf32> to vector<1x32xf32>
    %327 = tpu.concatenate %325, %326 in 0 : vector<15x32xf32>, vector<1x32xf32> -> vector<16x32xf32>
    %328 = arith.maximumf %324, %327 : vector<16x32xf32>
    %329 = vector.extract_strided_slice %328 {offsets = [2, 0], sizes = [14, 32], strides = [1, 1]} : vector<16x32xf32> to vector<14x32xf32>
    %330 = vector.extract_strided_slice %328 {offsets = [0, 0], sizes = [2, 32], strides = [1, 1]} : vector<16x32xf32> to vector<2x32xf32>
    %331 = tpu.concatenate %329, %330 in 0 : vector<14x32xf32>, vector<2x32xf32> -> vector<16x32xf32>
    %332 = arith.maximumf %328, %331 : vector<16x32xf32>
    %c0_181 = arith.constant 0 : index
    %c0_182 = arith.constant 0 : index
    %c0_183 = arith.constant 0 : index
    %333 = vector.load %arg13[%c0_181, %c0_182, %c0_183] : memref<2x2x16xf32, #tpu.memory_space<vmem>>, vector<1x2x16xf32>
    %334 = vector.shape_cast %333 : vector<1x2x16xf32> to vector<2x16xf32>
    %cst_184 = arith.constant dense<0.000000e+00> : vector<2x32xf32>
    %335 = tpu.matmul %334, %332, %cst_184 {dimension_numbers = #tpu.dot_dimension_numbers<[1], [0], [0], [1], [0, 0, 1, 1], [], []>} : vector<2x16xf32>, vector<16x32xf32>, vector<2x32xf32> -> vector<2x32xf32>
    %c1_185 = arith.constant 1 : index
    %c0_186 = arith.constant 0 : index
    %c0_187 = arith.constant 0 : index
    %336 = vector.load %arg13[%c1_185, %c0_186, %c0_187] : memref<2x2x16xf32, #tpu.memory_space<vmem>>, vector<1x2x16xf32>
    %337 = vector.shape_cast %336 : vector<1x2x16xf32> to vector<2x16xf32>
    %cst_188 = arith.constant dense<0.000000e+00> : vector<2x32xf32>
    %338 = tpu.matmul %337, %332, %cst_188 {dimension_numbers = #tpu.dot_dimension_numbers<[1], [0], [0], [1], [0, 0, 1, 1], [], []>} : vector<2x16xf32>, vector<16x32xf32>, vector<2x32xf32> -> vector<2x32xf32>
    %339 = tpu.concatenate %335, %338 in 1 : vector<2x32xf32>, vector<2x32xf32> -> vector<2x64xf32>
    %c0_189 = arith.constant 0 : index
    %c0_190 = arith.constant 0 : index
    %340 = vector.load %arg14[%c0_189, %c0_190] : memref<64x4xf32, #tpu.memory_space<vmem>>, vector<64x4xf32>
    %cst_191 = arith.constant dense<0.000000e+00> : vector<2x4xf32>
    %341 = tpu.matmul %339, %340, %cst_191 {dimension_numbers = #tpu.dot_dimension_numbers<[1], [0], [0], [1], [0, 0, 1, 1], [], []>} : vector<2x64xf32>, vector<64x4xf32>, vector<2x4xf32> -> vector<2x4xf32>
    %c0_192 = arith.constant 0 : index
    %c0_193 = arith.constant 0 : index
    %342 = vector.load %arg15[%c0_192, %c0_193] : memref<1x4xf32, #tpu.memory_space<vmem>>, vector<1x4xf32>
    %343 = vector.broadcast %342 : vector<1x4xf32> to vector<2x4xf32>
    %344 = arith.addf %341, %343 : vector<2x4xf32>
    %c0_194 = arith.constant 0 : index
    %c0_195 = arith.constant 0 : index
    %345 = vector.load %arg16[%c0_194, %c0_195] : memref<2x4xf32, #tpu.memory_space<vmem>>, vector<2x4xf32>
    tpu.vector_store %arg16[%c0_194, %c0_195], %344 {strides = array<i32>} : memref<2x4xf32, #tpu.memory_space<vmem>>, vector<2x4xf32>,
    return
  }
  func.func @transform_0(%arg0: i32) -> (i32, i32) {
    %c0_i32 = arith.constant 0 : i32
    %c0_i32_0 = arith.constant 0 : i32
    return %arg0, %c0_i32 : i32, i32
  }
  func.func @transform_1(%arg0: i32) -> (i32, i32, i32) {
    %c0_i32 = arith.constant 0 : i32
    %c0_i32_0 = arith.constant 0 : i32
    %c0_i32_1 = arith.constant 0 : i32
    %c0_i32_2 = arith.constant 0 : i32
    return %c0_i32, %c0_i32_0, %c0_i32_1 : i32, i32, i32
  }
  func.func @transform_2(%arg0: i32) -> (i32, i32) {
    %c0_i32 = arith.constant 0 : i32
    %c0_i32_0 = arith.constant 0 : i32
    %c0_i32_1 = arith.constant 0 : i32
    return %c0_i32, %c0_i32_0 : i32, i32
  }
  func.func @transform_3(%arg0: i32) -> (i32, i32, i32) {
    %c0_i32 = arith.constant 0 : i32
    %c0_i32_0 = arith.constant 0 : i32
    %c0_i32_1 = arith.constant 0 : i32
    %c0_i32_2 = arith.constant 0 : i32
    return %c0_i32, %c0_i32_0, %c0_i32_1 : i32, i32, i32
  }
  func.func @transform_4(%arg0: i32) -> (i32, i32) {
    %c0_i32 = arith.constant 0 : i32
    %c0_i32_0 = arith.constant 0 : i32
    %c0_i32_1 = arith.constant 0 : i32
    return %c0_i32, %c0_i32_0 : i32, i32
  }
  func.func @transform_5(%arg0: i32) -> (i32, i32, i32) {
    %c0_i32 = arith.constant 0 : i32
    %c0_i32_0 = arith.constant 0 : i32
    %c0_i32_1 = arith.constant 0 : i32
    %c0_i32_2 = arith.constant 0 : i32
    return %c0_i32, %c0_i32_0, %c0_i32_1 : i32, i32, i32
  }
  func.func @transform_6(%arg0: i32) -> (i32, i32) {
    %c0_i32 = arith.constant 0 : i32
    %c0_i32_0 = arith.constant 0 : i32
    %c0_i32_1 = arith.constant 0 : i32
    return %c0_i32, %c0_i32_0 : i32, i32
  }
  func.func @transform_7(%arg0: i32) -> (i32, i32, i32) {
    %c0_i32 = arith.constant 0 : i32
    %c0_i32_0 = arith.constant 0 : i32
    %c0_i32_1 = arith.constant 0 : i32
    %c0_i32_2 = arith.constant 0 : i32
    return %c0_i32, %c0_i32_0, %c0_i32_1 : i32, i32, i32
  }
  func.func @transform_8(%arg0: i32) -> (i32, i32) {
    %c0_i32 = arith.constant 0 : i32
    %c0_i32_0 = arith.constant 0 : i32
    %c0_i32_1 = arith.constant 0 : i32
    return %c0_i32, %c0_i32_0 : i32, i32
  }
  func.func @transform_9(%arg0: i32) -> (i32, i32, i32) {
    %c0_i32 = arith.constant 0 : i32
    %c0_i32_0 = arith.constant 0 : i32
    %c0_i32_1 = arith.constant 0 : i32
    %c0_i32_2 = arith.constant 0 : i32
    return %c0_i32, %c0_i32_0, %c0_i32_1 : i32, i32, i32
  }
  func.func @transform_10(%arg0: i32) -> (i32, i32) {
    %c0_i32 = arith.constant 0 : i32
    %c0_i32_0 = arith.constant 0 : i32
    %c0_i32_1 = arith.constant 0 : i32
    return %c0_i32, %c0_i32_0 : i32, i32
  }
  func.func @transform_11(%arg0: i32) -> (i32, i32, i32) {
    %c0_i32 = arith.constant 0 : i32
    %c0_i32_0 = arith.constant 0 : i32
    %c0_i32_1 = arith.constant 0 : i32
    %c0_i32_2 = arith.constant 0 : i32
    return %c0_i32, %c0_i32_0, %c0_i32_1 : i32, i32, i32
  }
  func.func @transform_12(%arg0: i32) -> (i32, i32, i32) {
    %c0_i32 = arith.constant 0 : i32
    %c0_i32_0 = arith.constant 0 : i32
    %c0_i32_1 = arith.constant 0 : i32
    %c0_i32_2 = arith.constant 0 : i32
    return %c0_i32, %c0_i32_0, %c0_i32_1 : i32, i32, i32
  }
  func.func @transform_13(%arg0: i32) -> (i32, i32) {
    %c0_i32 = arith.constant 0 : i32
    %c0_i32_0 = arith.constant 0 : i32
    %c0_i32_1 = arith.constant 0 : i32
    return %c0_i32, %c0_i32_0 : i32, i32
  }
  func.func @transform_14(%arg0: i32) -> (i32, i32) {
    %c0_i32 = arith.constant 0 : i32
    %c0_i32_0 = arith.constant 0 : i32
    %c0_i32_1 = arith.constant 0 : i32
    return %c0_i32, %c0_i32_0 : i32, i32
  }
  func.func @transform_15(%arg0: i32) -> (i32, i32) {
    %c0_i32 = arith.constant 0 : i32
    %c0_i32_0 = arith.constant 0 : i32
    return %arg0, %c0_i32 : i32, i32
  }
}

</mosaic_0001>

<bundles_post_ra>
// kernel: ssann_forward.1
= control target key start
LH: loop header
LB: loop body
LE: loop exit
PB: predicated region body
PF: predicated region fallthrough
CT: control target
= control target key end

     0   :  { %20 = vsyncpa [#allocation3], 0  ;;  %s10757_s0 = inlined_call_operand.vmem [shape: f32[256,1], index: 0, kind: input, shape index: {}]   ;;  %s10758_s1 = inlined_call_operand.vmem [shape: f32[9,1,8], index: 1, kind: input, shape index: {}]   ;;  %s10759_s2 = inlined_call_operand.vmem [shape: f32[1,8], index: 2, kind: input, shape index: {}]   ;;  %s10760_s3 = inlined_call_operand.hbm [shape: f32[9,256,1], index: 3, kind: input, shape index: {}]   ;;  %s10761_s4 = inlined_call_operand.hbm [shape: f32[64,256], index: 4, kind: input, shape index: {}]   ;;  %s10762_s5 = inlined_call_operand.vmem [shape: f32[9,8,16], index: 5, kind: input, shape index: {}]   ;;  %s10763_s6 = inlined_call_operand.vmem [shape: f32[1,16], index: 6, kind: input, shape index: {}]   ;;  %s10764_s7 = inlined_call_operand.hbm [shape: f32[9,64,1], index: 7, kind: input, shape index: {}]   ;;  %s10765_s8 = inlined_call_operand.hbm [shape: f32[16,64], index: 8, kind: input, shape index: {}]   ;;  %s10766_s9 = inlined_call_operand.vmem [shape: f32[9,16,32], index: 9, kind: input, shape index: {}]   ;;  %s10767_s10 = inlined_call_operand.vmem [shape: f32[1,32], index: 10, kind: input, shape index: {}]   ;;  %s10768_s11 = inlined_call_operand.hbm [shape: f32[9,16,1], index: 11, kind: input, shape index: {}]   ;;  %s10769_s12 = inlined_call_operand.hbm [shape: f32[2,2,16], index: 12, kind: input, shape index: {}]   ;;  %s10770_s13 = inlined_call_operand.vmem [shape: f32[64,4], index: 13, kind: input, shape index: {}]   ;;  %s10771_s14 = inlined_call_operand.hbm [shape: f32[1,4], index: 14, kind: input, shape index: {}]   ;;  %s10772_s15 = inlined_call_operand.hbm [shape: f32[2,4], index: 15, kind: output, shape index: {}]  }
   0x1   :  { %21 = vsyncpa [#allocation6], 0 }
   0x2   :  { %22 = vsyncpa [#allocation9], 0 }
   0x3   :  { %23 = vsyncpa [#allocation12], 0 }
   0x4   :  { %24 = vsyncpa [#allocation4], 0  ;;  %s7417_s18 = smov [#allocation5]  }
   0x5   :  { %s48_s19 = sshll.u32 %s7417_s18, 4  ;;  %s49_s19 = int_to_ptr.vmem [resolvable:$true] %s48_s19 }
   0x6   :  { %s7255_s20 = scalar_lea.vmem %s49_s19, 2048  ;;  %p7260_p1 = scmp.lt.s32.totalorder %s49_s19, %s49_s19 }
   0x7   :  { %p7256_p0 = scmp.ne.s32.totalorder %s49_s19, %s7255_s20  ;;  %p7261_p2 = scmp.lt.s32.totalorder %s7255_s20, %s7255_s20 }
   0x9   :  { %p7262_p3 = por %p7261_p2, %p7260_p1 }
   0xb   :  { %p7263_p4 = pnand %p7262_p3, %p7256_p0 }
   0xd   :  { %7266 = shalt.err (!%p7263_p4)
}
   0xe   :  { %s7418_s21 = smov 256   ;;  %s7419_s22 = smov 16  }
   0xf   :  { %54 = dma.hbm_to_vmem [thread:$0]  %s10761_s4, 2048, %s49_s19, [#allocation6], %s7418_s21, %s7418_s21, %s7419_s22  }
  0x10   :  { %s7420_s25 = smov [#allocation8]   ;;  %s7421_s27 = smov [#allocation11]  }
  0x11   :  { %s76_s26 = sshll.u32 %s7420_s25, 4  ;;  %s104_s28 = sshll.u32 %s7421_s27, 4  ;;  %s77_s26 = int_to_ptr.vmem [resolvable:$true] %s76_s26  ;;  %s105_s28 = int_to_ptr.vmem [resolvable:$true] %s104_s28 }
  0x12   :  { %s7275_s29 = scalar_lea.vmem %s77_s26, 256  ;;  %p7280_p6 = scmp.lt.s32.totalorder %s77_s26, %s77_s26 }
  0x13   :  { %p7276_p5 = scmp.ne.s32.totalorder %s77_s26, %s7275_s29  ;;  %p7281_p7 = scmp.lt.s32.totalorder %s7275_s29, %s7275_s29 }
  0x15   :  { %p7282_p8 = por %p7281_p7, %p7280_p6 }
  0x17   :  { %p7283_p9 = pnand %p7282_p8, %p7276_p5 }
  0x19   :  { %7286 = shalt.err (!%p7283_p9)
}
  0x1a   :  { %s7422_s30 = smov 128   ;;  %s7423_s16 = smov 8  }
  0x1b   :  { %82 = dma.hbm_to_vmem [thread:$0]  %s10765_s8, 256, %s77_s26, [#allocation9], %s7422_s30, %s7422_s30, %s7423_s16  }
  0x1c   :  { %s7295_s4 = scalar_lea.vmem %s105_s28, 64  ;;  %p7300_p11 = scmp.lt.s32.totalorder %s105_s28, %s105_s28 }
  0x1d   :  { %p7296_p10 = scmp.ne.s32.totalorder %s105_s28, %s7295_s4  ;;  %p7301_p12 = scmp.lt.s32.totalorder %s7295_s4, %s7295_s4 }
  0x1f   :  { %p7302_p13 = por %p7301_p12, %p7300_p11 }
  0x21   :  { %p7303_p0 = pnand %p7302_p13, %p7296_p10 }
  0x23   :  { %7306 = shalt.err (!%p7303_p0)
}
  0x24   :  { %s7424_s19 = smov 32   ;;  %s7425_s20 = smov 2  }
  0x25   :  { %110 = dma.hbm_to_vmem [thread:$0]  %s10769_s12, 64, %s105_s28, [#allocation12], %s7424_s19, %s7424_s19, %s7425_s20  }
  0x26   :  { %s7426_s23 = smov [#allocation2]   ;;  %s7427_s8 = smov [#allocation7]  }
  0x27   :  { %s36_s24 = sshll.u32 %s7426_s23, 4  ;;  %s64_s25 = sshll.u32 %s7427_s8, 4  ;;  %s37_s24 = int_to_ptr.vmem [resolvable:$true] %s36_s24  ;;  %s65_s25 = int_to_ptr.vmem [resolvable:$true] %s64_s25 }
  0x28   :  { %s7315_s26 = scalar_lea.vmem %s37_s24, 36864  ;;  %p7320_p2 = scmp.lt.s32.totalorder %s37_s24, %s37_s24 }
  0x29   :  { %p7316_p1 = scmp.ne.s32.totalorder %s37_s24, %s7315_s26  ;;  %p7321_p3 = scmp.lt.s32.totalorder %s7315_s26, %s7315_s26 }
  0x2b   :  { %p7322_p4 = por %p7321_p3, %p7320_p2 }
  0x2d   :  { %p7323_p5 = pnand %p7322_p4, %p7316_p1 }
  0x2f   :  { %7326 = shalt.err (!%p7323_p5)
}
  0x30   :  { %42 = dma.hbm_to_vmem [thread:$0]  %s10760_s3, 36864, %s37_s24, [#allocation3], %s7422_s30, %s7422_s30, %s7423_s16  }
  0x31   :  { %s7335_s12 = scalar_lea.vmem %s65_s25, 9216  ;;  %p7340_p7 = scmp.lt.s32.totalorder %s65_s25, %s65_s25 }
  0x32   :  { %p7336_p6 = scmp.ne.s32.totalorder %s65_s25, %s7335_s12  ;;  %p7341_p8 = scmp.lt.s32.totalorder %s7335_s12, %s7335_s12 }
  0x34   :  { %p7342_p9 = por %p7341_p8, %p7340_p7 }
  0x36   :  { %p7343_p10 = pnand %p7342_p9, %p7336_p6 }
  0x38   :  { %7346 = shalt.err (!%p7343_p10)
}
  0x39   :  { %70 = dma.hbm_to_vmem [thread:$0]  %s10764_s7, 9216, %s65_s25, [#allocation6], %s7422_s30, %s7422_s30, %s7423_s16  }
  0x3a   :  { %s7428_s18 = smov [#allocation10]   ;;  %s7429_s20 = smov [#allocation13]  }
  0x3b   :  { %s92_s4 = sshll.u32 %s7428_s18, 4  ;;  %s119_s3 = sshll.u32 %s7429_s20, 4  ;;  %s93_s4 = int_to_ptr.vmem [resolvable:$true] %s92_s4  ;;  %s120_s3 = int_to_ptr.vmem [resolvable:$true] %s119_s3 }
  0x3c   :  { %s7355_s21 = scalar_lea.vmem %s93_s4, 2304  ;;  %p7360_p12 = scmp.lt.s32.totalorder %s93_s4, %s93_s4 }
  0x3d   :  { %p7356_p11 = scmp.ne.s32.totalorder %s93_s4, %s7355_s21  ;;  %p7361_p13 = scmp.lt.s32.totalorder %s7355_s21, %s7355_s21 }
  0x3f   :  { %p7362_p0 = por %p7361_p13, %p7360_p12 }
  0x41   :  { %p7363_p1 = pnand %p7362_p0, %p7356_p11 }
  0x43   :  { %7366 = shalt.err (!%p7363_p1)
}
  0x44   :  { %98 = dma.hbm_to_vmem [thread:$0]  %s10768_s11, 2304, %s93_s4, [#allocation9], %s7422_s30, %s7422_s30, %s7423_s16  }
  0x45   :  { %s7375_s7 = scalar_lea.vmem %s120_s3, 16  ;;  %s7379_s24 = scalar_lea.vmem %s120_s3, 32 }
  0x46   :  { %p7376_p2 = scmp.ne.s32.totalorder %s120_s3, %s7375_s7  ;;  %p7380_p3 = scmp.lt.s32.totalorder %s120_s3, %s120_s3 }
  0x47   :  { %p7381_p4 = scmp.lt.s32.totalorder %s7379_s24, %s7375_s7 }
  0x49   :  { %p7382_p5 = por %p7381_p4, %p7380_p3 }
  0x4b   :  { %p7383_p6 = pnand %p7382_p5, %p7376_p2 }
  0x4d   :  { %7386 = shalt.err (!%p7383_p6)
}
  0x4e   :  { %122 = dma.hbm_to_vmem [thread:$0]  %s10771_s14, 16, %s120_s3, [#allocation12]  }
  0x4f   :  { %7407 = dma.done.wait [#allocation3], 36864  }
  0x50   :  { %7408 = vsyncadd [#allocation3], 4294930432 }
  0x51   :  { %7409 = dma.done.wait [#allocation6], 11264  }
  0x52   :  { %7410 = vsyncadd [#allocation6], 4294956032 }
  0x53   :  { %7411 = dma.done.wait [#allocation9], 2560  }
  0x54   :  { %7412 = vsyncadd [#allocation9], 4294964736 }
  0x55   :  { %7413 = dma.done.wait [#allocation12], 80  }
  0x56   :  { %7414 = vsyncadd [#allocation12], 4294967216  ;;  %v7430_v0 = vmov 0   ;;  %v7552_v1 = vld [vmem:[%s10757_s0 + $0xf8] sm:$0xff]  ;;  %v602_v2 = vld [vmem:[#allocation2 + $0x100] sm:$0xff]  ;;  %vm178_vm0 = vcmask 1040384  }
  0x57   :  { %7198 = vset.pattern.permute.xlu0 %v7430_v0  ;;  %7197 = vset.pattern.permute.xlu1 %v7430_v0  ;;  %v7557_v3 = vld [vmem:[%s10757_s0] sm:$0xff]  ;;  %v634_v4 = vmul.f32 %v602_v2, %v7552_v1  ;;  %v603_v5 = vld [vmem:[#allocation2 + $0x108] sm:$0xff]  ;;  %v7563_v6 = vld [vmem:[%s10757_s0 + $0xf0] sm:$0xff]  ;;  %v180_v8 = vrot.slane %v7552_v1, 7  ;;  %vm900_vm1 = vcmask 1046528   ;;  %v898_v55 = vrot.slane %v7552_v1, 1 }
  0x58   :  { %v633_v7 = vld [vmem:[#allocation2 + $0x1f8] sm:$0xff]  ;;  %v214_v9 = vrot.slane %v7557_v3, 7  ;;  %v635_v10 = vmul.f32 %v603_v5, %v7557_v3  ;;  %v179_v11 = vrot.slane %v7563_v6, 7  ;;  %v306_v12 = vld [vmem:[#allocation2] sm:$0xff]  ;;  %v7572_v13 = vld [vmem:[%s10757_s0 + $0xe8] sm:$0xff]  ;;  %v901_v51 = vrot.slane %v7557_v3, 1 }
  0x59   :  { %670 = vperm.xlu1 %7197, %v634_v4   ;;  %v665_v14 = vmul.f32 %v633_v7, %v7563_v6  ;;  %v271_v15 = vrot.slane %v7572_v13, 7  ;;  %v7579_v16 = vld [vmem:[%s10757_s0 + $0x70] sm:$0xff]  ;;  %v7584_v17 = vld [vmem:[%s10757_s0 + $0x78] sm:$0xff]  ;;  %v7594_v22 = vld [vmem:[%s10757_s0 + $0x68] sm:$0xff]  ;;  %v960_v0 = vrot.slane %v7563_v6, 1  ;;  %vm3539_vm2 = vcmask 64512  }
  0x5a   :  { %675 = vperm.xlu0 %7198, %v635_v10   ;;  %v7587_v18 = vsel %vm178_vm0, %v179_v11, %v180_v8  ;;  %v337_v19 = vld [vmem:[#allocation2 + $0xf8] sm:$0xff]  ;;  %v241_v20 = vrot.slane %v7579_v16, 7  ;;  %v243_v21 = vrot.slane %v7584_v17, 7  ;;  %v7603_v25 = vsel %vm178_vm0, %v180_v8, %v214_v9  ;;  %v307_v26 = vld [vmem:[#allocation2 + $0x8] sm:$0xff]  ;;  %v7609_v28 = vld [vmem:[%s10757_s0 + $0x80] sm:$0xff] }
  0x5b   :  { %v338_v23 = vmul.f32 %v306_v12, %v7587_v18  ;;  %v7598_v24 = vsel %vm178_vm0, %v271_v15, %v179_v11  ;;  %v239_v27 = vrot.slane %v7594_v22, 7  ;;  %v339_v30 = vmul.f32 %v307_v26, %v7603_v25  ;;  %v322_v32 = vld [vmem:[#allocation2 + $0x80] sm:$0xff]  ;;  %v321_v34 = vld [vmem:[#allocation2 + $0x78] sm:$0xff]  ;;  %v323_v40 = vld [vmem:[#allocation2 + $0x88] sm:$0xff] }
  0x5c   :  { %v369_v29 = vmul.f32 %v337_v19, %v7598_v24  ;;  %v7614_v31 = vsel %vm178_vm0, %v241_v20, %v243_v21  ;;  %v245_v35 = vrot.slane %v7609_v28, 7  ;;  %v617_v38 = vld [vmem:[#allocation2 + $0x178] sm:$0xff]  ;;  %v7630_v41 = vld [vmem:[%s10757_s0 + $0xe0] sm:$0xff]  ;;  %v619_v44 = vld [vmem:[#allocation2 + $0x188] sm:$0xff]  ;;  %v7662_v62 = vsel %vm900_vm1, %v898_v55, %v901_v51 }
  0x5d   :  { %825 = vperm.xlu1 %7197, %v665_v14   ;;  %v7617_v33 = vsel %vm178_vm0, %v239_v27, %v241_v20  ;;  %v354_v36 = vmul.f32 %v322_v32, %v7614_v31  ;;  %v649_v42 = vmul.f32 %v617_v38, %v7579_v16  ;;  %v618_v45 = vld [vmem:[#allocation2 + $0x180] sm:$0xff]  ;;  %v269_v46 = vrot.slane %v7630_v41, 7  ;;  %v7638_v47 = vld [vmem:[%s10757_s0 + $0x8] sm:$0xff]  ;;  %v632_v50 = vld [vmem:[#allocation2 + $0x1f0] sm:$0xff] }
  0x5e   :  { %373 = vperm.xlu0 %7198, %v338_v23   ;;  %v353_v37 = vmul.f32 %v321_v34, %v7617_v33  ;;  %v7625_v39 = vsel %vm178_vm0, %v243_v21, %v245_v35  ;;  %v651_v48 = vmul.f32 %v619_v44, %v7609_v28  ;;  %v650_v49 = vmul.f32 %v618_v45, %v7584_v17  ;;  %v336_v54 = vld [vmem:[#allocation2 + $0xf0] sm:$0xff]  ;;  %v7651_v56 = vld [vmem:[%s10757_s0 + $0x60] sm:$0xff]  ;;  %v998_v60 = vld [vmem:[#allocation2 + $0x208] sm:$0xff] }
  0x5f   :  { %v355_v43 = vmul.f32 %v323_v40, %v7625_v39  ;;  %v902_v52 = vrot.slane %v7638_v47, 1  ;;  %v7645_v53 = vsel %vm178_vm0, %v269_v46, %v271_v15  ;;  %v664_v57 = vmul.f32 %v632_v50, %v7572_v13  ;;  %v997_v63 = vld [vmem:[#allocation2 + $0x200] sm:$0xff]  ;;  %v320_v7 = vld [vmem:[#allocation2 + $0x70] sm:$0xff]  ;;  %v1028_v12 = vld [vmem:[#allocation2 + $0x2f8] sm:$0xff] }
  0x60   :  { %v368_v58 = vmul.f32 %v336_v54, %v7645_v53  ;;  %v237_v61 = vrot.slane %v7651_v56, 7  ;;  %v1029_v4 = vmul.f32 %v997_v63, %v7662_v62  ;;  %v928_v8 = vrot.slane %v7579_v16, 1  ;;  %v7680_v14 = vld [vmem:[%s10757_s0 + $0x88] sm:$0xff]  ;;  %v1012_v21 = vld [vmem:[#allocation2 + $0x278] sm:$0xff]  ;;  %v1013_v38 = vld [vmem:[#allocation2 + $0x280] sm:$0xff] }
  0x61   :  { %528 = vperm.xlu1 %7197, %v369_v29   ;;  %v7658_v59 = vsel %vm900_vm1, %v901_v51, %v902_v52  ;;  %v930_v10 = vrot.slane %v7584_v17, 1  ;;  %v7675_v11 = vsel %vm900_vm1, %v960_v0, %v898_v55  ;;  %v932_v23 = vrot.slane %v7609_v28, 1  ;;  %v7694_v29 = vld [vmem:[%s10757_s0 + $0xd8] sm:$0xff]  ;;  %v631_v44 = vld [vmem:[#allocation2 + $0x1e8] sm:$0xff]  ;;  %v1294_v54 = vld [vmem:[#allocation2 + $0x300] sm:$0xff] }
  0x62   :  { %378 = vperm.xlu0 %7198, %v339_v30   ;;  %v1030_v2 = vmul.f32 %v998_v60, %v7658_v59  ;;  %v7670_v5 = vsel %vm178_vm0, %v237_v61, %v239_v27  ;;  %10886 = vst [vmem:[#allocation20_spill] sm:$0xff] %v7675_v11  ;;  %v1060_v19 = vmul.f32 %v1028_v12, %v7675_v11  ;;  %v934_v26 = vrot.slane %v7680_v14, 1  ;;  %v616_v27 = vld [vmem:[#allocation2 + $0x170] sm:$0xff] }
  0x63   :  { %v352_v15 = vmul.f32 %v320_v7, %v7670_v5  ;;  %v7687_v20 = vsel %vm900_vm1, %v928_v8, %v930_v10  ;;  %v648_v32 = vmul.f32 %v616_v27, %v7594_v22  ;;  %v267_v40 = vrot.slane %v7694_v29, 7 }
  0x64   :  { %v1044_v30 = vmul.f32 %v1012_v21, %v7687_v20  ;;  %v7701_v34 = vsel %vm900_vm1, %v932_v23, %v934_v26  ;;  %v663_v50 = vmul.f32 %v631_v44, %v7630_v41  ;;  %v1326_v60 = vmul.f32 %v1294_v54, %v7603_v25  ;;  %v319_v21 = vld [vmem:[#allocation2 + $0x68] sm:$0xff] }
  0x65   :  { %453 = vperm.xlu1 %7197, %v354_v36   ;;  %v1014_v36 = vld [vmem:[#allocation2 + $0x288] sm:$0xff]  ;;  %v7710_v45 = vsel %vm178_vm0, %v267_v40, %v269_v46  ;;  %v7722_v46 = vld [vmem:[%s10757_s0 + $0x58] sm:$0xff]  ;;  %vm3373_vm3 = vcmask 1044480   ;;  %vm3456_vm4 = vcmask 1043456   ;;  %vm3800_vm5 = vcmask 1042432  }
  0x66   :  { %448 = vperm.xlu0 %7198, %v353_v37   ;;  %v7704_v37 = vsel %vm900_vm1, %v930_v10, %v932_v23  ;;  %10887 = vst [vmem:[#allocation21_spill] sm:$0xff] %v7710_v45  ;;  %v235_v7 = vrot.slane %v7722_v46, 7  ;;  %v926_v23 = vrot.slane %v7594_v22, 1  ;;  %vm5288_vm6 = vcmask 523264  }
  0x67   :  { %vm5397_vm7 = vcmask 1041408   ;;  %vm5421_vm8 = vcmask 130048   ;;  %vm6086_vm9 = vcmask 1045504   ;;  %vm7432_vm10 = vmmov 0  }
  0x68   :  { %vm6489_vm11 = vcmask 261120   ;;  %vm6579_vm12 = vcmask 25600  }
  0x69   :  { %745 = vperm.xlu1 %7197, %v649_v42   ;;  %v1046_v42 = vmul.f32 %v1014_v36, %v7701_v34  ;;  %v7748_v36 = vsel %vm900_vm1, %v926_v23, %v928_v8  ;;  %v1311_v8 = vld [vmem:[#allocation2 + $0x388] sm:$0xff] }
  0x6a   :  { %458 = vperm.xlu0 %7198, %v355_v43   ;;  %v1045_v43 = vmul.f32 %v1013_v38, %v7704_v37  ;;  %v1011_v38 = vld [vmem:[#allocation2 + $0x270] sm:$0xff] }
  0x6d   :  { %755 = vperm.xlu1 %7197, %v651_v48   ;;  %v335_v48 = vld [vmem:[#allocation2 + $0xe8] sm:$0xff] }
  0x6e   :  { %750 = vperm.xlu0 %7198, %v650_v49   ;;  %v958_v49 = vrot.slane %v7572_v13, 1  ;;  %v367_v51 = vmul.f32 %v335_v48, %v7710_v45  ;;  %v1310_v48 = vld [vmem:[#allocation2 + $0x380] sm:$0xff] }
  0x6f   :  { %v1342_v54 = vmul.f32 %v1310_v48, %v7625_v39  ;;  %v614_v48 = vld [vmem:[#allocation2 + $0x160] sm:$0xff] }
  0x70   :  { %v7716_v55 = vsel %vm900_vm1, %v958_v49, %v960_v0 }
  0x71   :  { %820 = vperm.xlu1 %7197, %v664_v57   ;;  %10888 = vst [vmem:[#allocation22_spill] sm:$0xff] %v7716_v55  ;;  %v1027_v57 = vld [vmem:[#allocation2 + $0x2f0] sm:$0xff] }
  0x72   :  { %523 = vperm.xlu0 %7198, %v368_v58   ;;  %v10779_v58 = vrot.slane %v7638_v47, 7  ;;  %v1059_v63 = vmul.f32 %v1027_v57, %v7716_v55  ;;  %v630_v57 = vld [vmem:[#allocation2 + $0x1e0] sm:$0xff] }
  0x74   :  { %v7731_v0 = vsel %vm178_vm0, %v214_v9, %v10779_v58 }
  0x75   :  { %1070 = vperm.xlu1 %7197, %v1030_v2   ;;  %v1325_v2 = vld [vmem:[#allocation2 + $0x3f8] sm:$0xff]  ;;  %10889 = vst [vmem:[#allocation23_spill] sm:$0xff] %v7731_v0 }
  0x76   :  { %1065 = vperm.xlu0 %7198, %v1029_v4   ;;  %v1295_v4 = vld [vmem:[#allocation2 + $0x308] sm:$0xff]  ;;  %v1357_v10 = vmul.f32 %v1325_v2, %v7587_v18  ;;  %v956_v2 = vrot.slane %v7630_v41, 1 }
  0x77   :  { %v1327_v12 = vmul.f32 %v1295_v4, %v7731_v0 }
  0x79   :  { %443 = vperm.xlu1 %7197, %v352_v15   ;;  %v615_v15 = vld [vmem:[#allocation2 + $0x168] sm:$0xff] }
  0x7a   :  { %1220 = vperm.xlu0 %7198, %v1060_v19   ;;  %v7739_v19 = vsel %vm178_vm0, %v235_v7, %v237_v61  ;;  %v647_v9 = vmul.f32 %v615_v15, %v7651_v56  ;;  %v7753_v61 = vld [vmem:[%s10757_s0 + $0xd0] sm:$0xff]  ;;  %v1026_v15 = vld [vmem:[#allocation2 + $0x2e8] sm:$0xff] }
  0x7b   :  { %v351_v27 = vmul.f32 %v319_v21, %v7739_v19  ;;  %v7779_v21 = vld [vmem:[%s10757_s0 + $0x50] sm:$0xff] }
  0x7d   :  { %1140 = vperm.xlu1 %7197, %v1044_v30   ;;  %v1309_v30 = vld [vmem:[#allocation2 + $0x378] sm:$0xff] }
  0x7e   :  { %740 = vperm.xlu0 %7198, %v648_v32   ;;  %v10774_v32 = vrot.slane %v7680_v14, 7 }
  0x80   :  { %v7762_v44 = vsel %vm178_vm0, %v245_v35, %v10774_v32  ;;  %v662_v35 = vmul.f32 %v630_v57, %v7694_v29  ;;  %v7800_v57 = vld [vmem:[%s10757_s0 + $0xc8] sm:$0xff] }
  0x81   :  { %1150 = vperm.xlu1 %7197, %v1046_v42   ;;  %v1341_v42 = vmul.f32 %v1309_v30, %v7614_v31  ;;  %10890 = vst [vmem:[#allocation24_spill] sm:$0xff] %v7762_v44 }
  0x82   :  { %1145 = vperm.xlu0 %7198, %v1045_v43   ;;  %v1043_v43 = vmul.f32 %v1011_v38, %v7748_v36  ;;  %v924_v38 = vrot.slane %v7651_v56, 1 }
  0x85   :  { %815 = vperm.xlu1 %7197, %v663_v50   ;;  %v265_v50 = vrot.slane %v7753_v61, 7 }
  0x86   :  { %518 = vperm.xlu0 %7198, %v367_v51   ;;  %v1343_v51 = vmul.f32 %v1311_v8, %v7762_v44  ;;  %v1010_v8 = vld [vmem:[#allocation2 + $0x268] sm:$0xff] }
  0x89   :  { %1362 = vperm.xlu1 %7197, %v1326_v60   ;;  %v7768_v60 = vsel %vm178_vm0, %v265_v50, %v267_v40 }
  0x8a   :  { %1215 = vperm.xlu0 %7198, %v1059_v63   ;;  %v334_v63 = vld [vmem:[#allocation2 + $0xe0] sm:$0xff] }
  0x8b   :  { %v366_v4 = vmul.f32 %v334_v63, %v7768_v60  ;;  %v263_v63 = vrot.slane %v7800_v57, 7 }
  0x8d   :  { %1517 = vperm.xlu1 %7197, %v1357_v10   ;;  %v1324_v10 = vld [vmem:[#allocation2 + $0x3f0] sm:$0xff] }
  0x8e   :  { %1367 = vperm.xlu0 %7198, %v1327_v12   ;;  %v7774_v12 = vsel %vm900_vm1, %v956_v2, %v958_v49  ;;  %v1356_v40 = vmul.f32 %v1324_v10, %v7598_v24  ;;  %v318_v49 = vld [vmem:[#allocation2 + $0x60] sm:$0xff]  ;;  %v333_v10 = vld [vmem:[#allocation2 + $0xd8] sm:$0xff] }
  0x8f   :  { %10891 = vst [vmem:[#allocation25_spill] sm:$0xff] %v7774_v12 }
  0x91   :  { %735 = vperm.xlu1 %7197, %v647_v9   ;;  %v1058_v9 = vmul.f32 %v1026_v15, %v7774_v12  ;;  %v954_v15 = vrot.slane %v7694_v29, 1 }
  0x92   :  { %438 = vperm.xlu0 %7198, %v351_v27   ;;  %v233_v27 = vrot.slane %v7779_v21, 7 }
  0x94   :  { %v7785_v30 = vsel %vm178_vm0, %v233_v27, %v235_v7  ;;  %v646_v7 = vmul.f32 %v614_v48, %v7722_v46 }
  0x95   :  { %1437 = vperm.xlu1 %7197, %v1341_v42   ;;  %v350_v42 = vmul.f32 %v318_v49, %v7785_v30  ;;  %v1323_v49 = vld [vmem:[#allocation2 + $0x3e8] sm:$0xff] }
  0x96   :  { %1135 = vperm.xlu0 %7198, %v1043_v43   ;;  %v7792_v43 = vsel %vm900_vm1, %v924_v38, %v926_v23  ;;  %v1355_v48 = vmul.f32 %v1323_v49, %v7645_v53 }
  0x97   :  { %10892 = vst [vmem:[#allocation26_spill] sm:$0xff] %v7792_v43 }
  0x99   :  { %1447 = vperm.xlu1 %7197, %v1343_v51   ;;  %v1042_v51 = vmul.f32 %v1010_v8, %v7792_v43  ;;  %v1025_v8 = vld [vmem:[#allocation2 + $0x2e0] sm:$0xff] }
  0x9a   :  { %1442 = vperm.xlu0 %7198, %v1342_v54   ;;  %v1308_v54 = vld [vmem:[#allocation2 + $0x370] sm:$0xff] }
  0x9b   :  { %v1340_v23 = vmul.f32 %v1308_v54, %v7617_v33 }
  0x9d   :  { %810 = vperm.xlu1 %7197, %v662_v35   ;;  %v629_v35 = vld [vmem:[#allocation2 + $0x1d8] sm:$0xff] }
  0x9e   :  { %513 = vperm.xlu0 %7198, %v366_v4   ;;  %v7808_v4 = vsel %vm178_vm0, %v263_v63, %v265_v50  ;;  %v7823_v50 = vld [vmem:[%s10757_s0 + $0x10] sm:$0xff] }
  0x9f   :  { %10893 = vst [vmem:[#allocation27_spill] sm:$0xff] %v7808_v4  ;;  %10895 = vst [vmem:[#allocation29_spill] sm:$0xff] %v7823_v50  ;;  %v10773_v54 = vrot.slane %v7823_v50, 1 }
  0xa1   :  { %1512 = vperm.xlu1 %7197, %v1356_v40   ;;  %v661_v40 = vmul.f32 %v629_v35, %v7753_v61  ;;  %v1822_v35 = vld [vmem:[#allocation2 + $0x5f8] sm:$0xff] }
  0xa2   :  { %1210 = vperm.xlu0 %7198, %v1058_v9   ;;  %v365_v9 = vmul.f32 %v333_v10, %v7808_v4  ;;  %v7839_v10 = vsel %vm900_vm1, %v902_v52, %v10773_v54  ;;  %v1854_v49 = vmul.f32 %v1822_v35, %v7662_v62  ;;  %v10775_v52 = vrot.slane %v7722_v46, 1  ;;  %v1307_v35 = vld [vmem:[#allocation2 + $0x368] sm:$0xff] }
  0xa3   :  { %10896 = vst [vmem:[#allocation30_spill] sm:$0xff] %v7839_v10 }
  0xa5   :  { %1597 = vperm.xlu1 %7197, %v7638_v47  }
  0xa6   :  { %1593 = vperm.xlu0 %7198, %v7557_v3  }
  0xa9   :  { %433 = vperm.xlu1 %7197, %v350_v42   ;;  %v7818_v42 = vsel %vm900_vm1, %v954_v15, %v956_v2  ;;  %v7831_v2 = vld [vmem:[%s10757_s0 + $0x48] sm:$0xff] }
  0xaa   :  { %1717 = vperm.xlu0 %7198, %v7552_v1   ;;  %10894 = vst [vmem:[#allocation28_spill] sm:$0xff] %v7818_v42 }
  0xad   :  { %1130 = vperm.xlu1 %7197, %v1042_v51   ;;  %v1057_v51 = vmul.f32 %v1025_v8, %v7818_v42 }
  0xae   :  { %730 = vperm.xlu0 %7198, %v646_v7   ;;  %v1791_v7 = vld [vmem:[#allocation2 + $0x500] sm:$0xff] }
  0xb1   :  { %1653 = vperm.xlu1 %7197, %v7584_v17  }
  0xb2   :  { %1432 = vperm.xlu0 %7198, %v1340_v23   ;;  %v1823_v23 = vmul.f32 %v1791_v7, %v7658_v59  ;;  %v317_v7 = vld [vmem:[#allocation2 + $0x58] sm:$0xff] }
  0xb5   :  { %1661 = vperm.xlu1 %7197, %v7680_v14  }
  0xb6   :  { %1657 = vperm.xlu0 %7198, %v7609_v28  }
  0xb9   :  { %805 = vperm.xlu1 %7197, %v661_v40   ;;  %v1792_v40 = vld [vmem:[#allocation2 + $0x508] sm:$0xff] }
  0xba   :  { %508 = vperm.xlu0 %7198, %v365_v9   ;;  %v10777_v9 = vrot.slane %v7831_v2, 7  ;;  %v1824_v8 = vmul.f32 %v1792_v40, %v7839_v10  ;;  %v1009_v40 = vld [vmem:[#allocation2 + $0x260] sm:$0xff] }
  0xbd   :  { %1507 = vperm.xlu1 %7197, %v1355_v48   ;;  %v613_v48 = vld [vmem:[#allocation2 + $0x158] sm:$0xff] }
  0xbe   :  { %1205 = vperm.xlu0 %7198, %v1057_v51   ;;  %v7848_v51 = vsel %vm178_vm0, %v10777_v9, %v233_v27  ;;  %v645_v54 = vmul.f32 %v613_v48, %v7779_v21  ;;  %v7861_v27 = vld [vmem:[%s10757_s0 + $0x90] sm:$0xff]  ;;  %v1806_v48 = vld [vmem:[#allocation2 + $0x578] sm:$0xff] }
  0xbf   :  { %10897 = vst [vmem:[#allocation31_spill] sm:$0xff] %v7848_v51  ;;  %v1838_v32 = vmul.f32 %v1806_v48, %v7704_v37  ;;  %v628_v48 = vld [vmem:[#allocation2 + $0x1d0] sm:$0xff] }
  0xc1   :  { %1859 = vperm.xlu1 %7197, %v1823_v23   ;;  %v349_v23 = vmul.f32 %v317_v7, %v7848_v51  ;;  %v10776_v7 = vrot.slane %v7861_v27, 1 }
  0xc2   :  { %1713 = vperm.xlu0 %7198, %v7563_v6   ;;  %v7856_v6 = vsel %vm900_vm1, %v10775_v52, %v924_v38  ;;  %v7869_v38 = vld [vmem:[%s10757_s0 + $0xc0] sm:$0xff] }
  0xc3   :  { %10898 = vst [vmem:[#allocation32_spill] sm:$0xff] %v7856_v6 }
  0xc5   :  { %2014 = vperm.xlu1 %7197, %v1854_v49   ;;  %v1339_v49 = vmul.f32 %v1307_v35, %v7670_v5  ;;  %v1807_v35 = vld [vmem:[#allocation2 + $0x580] sm:$0xff] }
  0xc6   :  { %1864 = vperm.xlu0 %7198, %v1824_v8   ;;  %v1041_v8 = vmul.f32 %v1009_v40, %v7856_v6  ;;  %v10778_v40 = vrot.slane %v7869_v38, 7 }
  0xc9   :  { %725 = vperm.xlu1 %7197, %v645_v54   ;;  %v7877_v54 = vsel %vm900_vm1, %v934_v26, %v10776_v7  ;;  %v332_v26 = vld [vmem:[#allocation2 + $0xd0] sm:$0xff]  ;;  %v10780_v7 = vrot.slane %v7753_v61, 1 }
  0xca   :  { %428 = vperm.xlu0 %7198, %v349_v23   ;;  %10899 = vst [vmem:[#allocation33_spill] sm:$0xff] %v7877_v54  ;;  %v1808_v23 = vld [vmem:[#allocation2 + $0x588] sm:$0xff] }
  0xcb   :  { %v1840_v52 = vmul.f32 %v1808_v23, %v7877_v54 }
  0xcd   :  { %1427 = vperm.xlu1 %7197, %v1339_v49   ;;  %v1839_v49 = vmul.f32 %v1807_v35, %v7701_v34  ;;  %v1322_v35 = vld [vmem:[#allocation2 + $0x3e0] sm:$0xff] }
  0xce   :  { %1125 = vperm.xlu0 %7198, %v1041_v8   ;;  %v7888_v8 = vsel %vm178_vm0, %v10778_v40, %v263_v63  ;;  %v7902_v63 = vsel %vm900_vm1, %v10780_v7, %v954_v15  ;;  %v1024_v40 = vld [vmem:[#allocation2 + $0x2d8] sm:$0xff] }
  0xcf   :  { %10900 = vst [vmem:[#allocation34_spill] sm:$0xff] %v7888_v8  ;;  %v364_v23 = vmul.f32 %v332_v26, %v7888_v8  ;;  %10903 = vst [vmem:[#allocation37_spill] sm:$0xff] %v7902_v63  ;;  %v10782_v26 = vrot.slane %v7823_v50, 7 }
  0xd1   :  { %1934 = vperm.xlu1 %7197, %v1838_v32  }
  0xd2   :  { %1649 = vperm.xlu0 %7198, %v7579_v16   ;;  %v660_v16 = vmul.f32 %v628_v48, %v7800_v57  ;;  %v1821_v48 = vld [vmem:[#allocation2 + $0x5f0] sm:$0xff] }
  0xd4   :  { %v7891_v9 = vpop.permute.xlu1 %670 }
  0xd5   :  { %10901 = vst [vmem:[#allocation35_spill] sm:$0xff] %v7891_v9  ;;  %v7893_v32 = vpop.permute.xlu0 %675  ;;  %1944 = vperm.xlu1 %7197, %v1840_v52   ;;  %v1354_v52 = vmul.f32 %v1322_v35, %v7710_v45  ;;  %v2089_v35 = vld [vmem:[#allocation2 + $0x608] sm:$0xff] }
  0xd6   :  { %10902 = vst [vmem:[#allocation36_spill] sm:$0xff] %v7893_v32  ;;  %1939 = vperm.xlu0 %7198, %v1839_v49   ;;  %v1056_v49 = vmul.f32 %v1024_v40, %v7902_v63  ;;  %v7914_v32 = vld [vmem:[%s10757_s0 + $0x40] sm:$0xff]  ;;  %v10908_v40 = vrot.slane %v7638_v47, 7 }
  0xd8   :  { %v7904_v58 = vpop.permute.xlu1 %825 }
  0xd9   :  { %10904 = vst [vmem:[#allocation38_spill] sm:$0xff] %v7904_v58  ;;  %v7906_v9 = vpop.permute.xlu0 %373  ;;  %800 = vperm.xlu1 %7197, %v660_v16   ;;  %v1853_v16 = vmul.f32 %v1821_v48, %v7675_v11  ;;  %v10784_v58 = vrot.slane %v7914_v32, 7  ;;  %v10912_v48 = vrot.slane %v7831_v2, 7 }
  0xda   :  { %10905 = vst [vmem:[#allocation39_spill] sm:$0xff] %v7906_v9  ;;  %503 = vperm.xlu0 %7198, %v364_v23   ;;  %v7926_v23 = vsel %vm178_vm0, %v10908_v40, %v10782_v26  ;;  %v2088_v9 = vld [vmem:[#allocation2 + $0x600] sm:$0xff]  ;;  %v316_v26 = vld [vmem:[#allocation2 + $0x50] sm:$0xff] }
  0xdb   :  { %10909 = vst [vmem:[#allocation42_spill] sm:$0xff] %v7926_v23  ;;  %v7941_v40 = vsel %vm178_vm0, %v10784_v58, %v10912_v48  ;;  %v1008_v58 = vld [vmem:[#allocation2 + $0x258] sm:$0xff] }
  0xdc   :  { %v7916_v15 = vpop.permute.xlu1 %528  ;;  %10913 = vst [vmem:[#allocation45_spill] sm:$0xff] %v7941_v40 }
  0xdd   :  { %10906 = vst [vmem:[#allocation40_spill] sm:$0xff] %v7916_v15  ;;  %v7918_v7 = vpop.permute.xlu0 %378  ;;  %1502 = vperm.xlu1 %7197, %v1354_v52   ;;  %v2121_v52 = vmul.f32 %v2089_v35, %v7926_v23  ;;  %v10916_v35 = vrot.slane %v7722_v46, 1 }
  0xde   :  { %10907 = vst [vmem:[#allocation41_spill] sm:$0xff] %v7918_v7  ;;  %1200 = vperm.xlu0 %7198, %v1056_v49   ;;  %v2120_v49 = vmul.f32 %v2088_v9, %v7731_v0  ;;  %v10788_v7 = vrot.slane %v7779_v21, 1  ;;  %v612_v0 = vld [vmem:[#allocation2 + $0x150] sm:$0xff] }
  0xe0   :  { %v7929_v45 = vpop.permute.xlu1 %453  ;;  %v7955_v48 = vsel %vm900_vm1, %v10788_v7, %v10916_v35  ;;  %v2103_v7 = vld [vmem:[#allocation2 + $0x678] sm:$0xff] }
  0xe1   :  { %10910 = vst [vmem:[#allocation43_spill] sm:$0xff] %v7929_v45  ;;  %v7931_v15 = vpop.permute.xlu0 %448  ;;  %2009 = vperm.xlu1 %7197, %v1853_v16   ;;  %v2119_v45 = vld [vmem:[#allocation2 + $0x6f8] sm:$0xff]  ;;  %10917 = vst [vmem:[#allocation48_spill] sm:$0xff] %v7955_v48 }
  0xe2   :  { %10911 = vst [vmem:[#allocation44_spill] sm:$0xff] %v7931_v15  ;;  %1709 = vperm.xlu0 %7198, %v7572_v13   ;;  %v348_v13 = vmul.f32 %v316_v26, %v7941_v40  ;;  %v2151_v9 = vmul.f32 %v2119_v45, %v7603_v25  ;;  %v644_v26 = vmul.f32 %v612_v0, %v7831_v2  ;;  %v1306_v25 = vld [vmem:[#allocation2 + $0x360] sm:$0xff] }
  0xe3   :  { %v1338_v35 = vmul.f32 %v1306_v25, %v7739_v19  ;;  %v2105_v25 = vld [vmem:[#allocation2 + $0x688] sm:$0xff] }
  0xe4   :  { %v7944_v11 = vpop.permute.xlu1 %745 }
  0xe5   :  { %10914 = vst [vmem:[#allocation46_spill] sm:$0xff] %v7944_v11  ;;  %v7946_v16 = vpop.permute.xlu0 %458  ;;  %2161 = vperm.xlu1 %7197, %v2121_v52   ;;  %v1040_v52 = vmul.f32 %v1008_v58, %v7955_v48  ;;  %v7974_v58 = vld [vmem:[%s10757_s0 + $0xb8] sm:$0xff] }
  0xe6   :  { %10915 = vst [vmem:[#allocation47_spill] sm:$0xff] %v7946_v16  ;;  %2156 = vperm.xlu0 %7198, %v2120_v49   ;;  %v1805_v16 = vld [vmem:[#allocation2 + $0x570] sm:$0xff] }
  0xe8   :  { %v7957_v23 = vpop.permute.xlu1 %755 }
  0xe9   :  { %10918 = vst [vmem:[#allocation49_spill] sm:$0xff] %v7957_v23  ;;  %v7959_v15 = vpop.permute.xlu0 %750  ;;  %423 = vperm.xlu1 %7197, %v348_v13   ;;  %v10789_v23 = vrot.slane %v7861_v27, 7  ;;  %v2135_v13 = vmul.f32 %v2103_v7, %v7625_v39  ;;  %v627_v7 = vld [vmem:[#allocation2 + $0x1c8] sm:$0xff] }
  0xea   :  { %10919 = vst [vmem:[#allocation50_spill] sm:$0xff] %v7959_v15  ;;  %2311 = vperm.xlu0 %7198, %v2151_v9   ;;  %v1837_v9 = vmul.f32 %v1805_v16, %v7687_v20  ;;  %v10927_v16 = vrot.slane %v7869_v38, 7 }
  0xec   :  { %v7963_v45 = vpop.permute.xlu1 %820 }
  0xed   :  { %10920 = vst [vmem:[#allocation51_spill] sm:$0xff] %v7963_v45  ;;  %v7965_v49 = vpop.permute.xlu0 %523  ;;  %1120 = vperm.xlu1 %7197, %v1040_v52   ;;  %v10923_v52 = vrot.slane %v7680_v14, 7  ;;  %v10790_v45 = vrot.slane %v7974_v58, 7 }
  0xee   :  { %10921 = vst [vmem:[#allocation52_spill] sm:$0xff] %v7965_v49  ;;  %720 = vperm.xlu0 %7198, %v644_v26   ;;  %v2104_v49 = vld [vmem:[#allocation2 + $0x680] sm:$0xff] }
  0xef   :  { %v7986_v26 = vsel %vm178_vm0, %v10923_v52, %v10789_v23  ;;  %v2136_v39 = vmul.f32 %v2104_v49, %v7762_v44  ;;  %v331_v52 = vld [vmem:[#allocation2 + $0xc8] sm:$0xff]  ;;  %v10794_v23 = vrot.slane %v7800_v57, 1 }
  0xf0   :  { %v7969_v15 = vpop.permute.xlu1 %1070  ;;  %10924 = vst [vmem:[#allocation54_spill] sm:$0xff] %v7986_v26 }
  0xf1   :  { %v7976_v0 = vpop.permute.xlu0 %1065  ;;  %1645 = vperm.xlu1 %7197, %v7594_v22   ;;  %v2137_v22 = vmul.f32 %v2105_v25, %v7986_v26  ;;  %v10931_v25 = vrot.slane %v7753_v61, 1 }
  0xf2   :  { %10922 = vst [vmem:[#allocation53_spill] sm:$0xff] %v7976_v0  ;;  %1422 = vperm.xlu0 %7198, %v1338_v35   ;;  %v8000_v35 = vsel %vm178_vm0, %v10790_v45, %v10927_v16  ;;  %v1023_v45 = vld [vmem:[#allocation2 + $0x2d0] sm:$0xff] }
  0xf3   :  { %10928 = vst [vmem:[#allocation57_spill] sm:$0xff] %v8000_v35  ;;  %v363_v49 = vmul.f32 %v331_v52, %v8000_v35  ;;  %v8014_v16 = vsel %vm900_vm1, %v10794_v23, %v10931_v25  ;;  %v2385_v23 = vld [vmem:[#allocation2 + $0x700] sm:$0xff] }
  0xf4   :  { %v7989_v11 = vpop.permute.xlu1 %443  ;;  %10932 = vst [vmem:[#allocation60_spill] sm:$0xff] %v8014_v16 }
  0xf5   :  { %10925 = vst [vmem:[#allocation55_spill] sm:$0xff] %v7989_v11  ;;  %v7991_v0 = vpop.permute.xlu0 %1220  ;;  %2231 = vperm.xlu1 %7197, %v2135_v13   ;;  %v659_v13 = vmul.f32 %v627_v7, %v7869_v38  ;;  %v1820_v7 = vld [vmem:[#allocation2 + $0x5e8] sm:$0xff] }
  0xf6   :  { %10926 = vst [vmem:[#allocation56_spill] sm:$0xff] %v7991_v0  ;;  %1929 = vperm.xlu0 %7198, %v1837_v9   ;;  %v1321_v9 = vld [vmem:[#allocation2 + $0x3d8] sm:$0xff]  ;;  %v1852_v25 = vmul.f32 %v1820_v7, %v7716_v55  ;;  %v2102_v55 = vld [vmem:[#allocation2 + $0x670] sm:$0xff] }
  0xf8   :  { %v8003_v11 = vpop.permute.xlu1 %1140 }
  0xf9   :  { %10929 = vst [vmem:[#allocation58_spill] sm:$0xff] %v8003_v11  ;;  %v8005_v0 = vpop.permute.xlu0 %740  ;;  %2241 = vperm.xlu1 %7197, %v2137_v22   ;;  %v1353_v22 = vmul.f32 %v1321_v9, %v7768_v60  ;;  %v2118_v11 = vld [vmem:[#allocation2 + $0x6f0] sm:$0xff] }
  0xfa   :  { %10930 = vst [vmem:[#allocation59_spill] sm:$0xff] %v8005_v0  ;;  %2236 = vperm.xlu0 %7198, %v2136_v39   ;;  %v1055_v39 = vmul.f32 %v1023_v45, %v8014_v16  ;;  %v2417_v45 = vmul.f32 %v2385_v23, %v7638_v47  ;;  %v2150_v9 = vmul.f32 %v2118_v11, %v7587_v18  ;;  %v10939_v47 = vrot.slane %v7914_v32, 7 }
  0xfb   :  { %v10796_v11 = vrot.slane %v7831_v2, 1 }
  0xfc   :  { %v8016_v44 = vpop.permute.xlu1 %1150 }
  0xfd   :  { %10933 = vst [vmem:[#allocation61_spill] sm:$0xff] %v8016_v44  ;;  %v8018_v26 = vpop.permute.xlu0 %1145  ;;  %795 = vperm.xlu1 %7197, %v659_v13   ;;  %v8032_v13 = vld [vmem:[%s10757_s0 + $0x38] sm:$0xff] }
  0xfe   :  { %10934 = vst [vmem:[#allocation62_spill] sm:$0xff] %v8018_v26  ;;  %498 = vperm.xlu0 %7198, %v363_v49   ;;  %v10795_v7 = vrot.slane %v8032_v13, 7 }
 0x100   :  { %v8022_v52 = vpop.permute.xlu1 %815  ;;  %v8051_v18 = vsel %vm178_vm0, %v10795_v7, %v10939_v47  ;;  %v1007_v47 = vld [vmem:[#allocation2 + $0x250] sm:$0xff] }
 0x101   :  { %10935 = vst [vmem:[#allocation63_spill] sm:$0xff] %v8022_v52  ;;  %v8024_v0 = vpop.permute.xlu0 %518  ;;  %1497 = vperm.xlu1 %7197, %v1353_v22   ;;  %v2416_v22 = vld [vmem:[#allocation2 + $0x7f8] sm:$0xff]  ;;  %10940 = vst [vmem:[#allocation67_spill] sm:$0xff] %v8051_v18 }
 0x102   :  { %10936 = vst [vmem:[#allocation64_spill] sm:$0xff] %v8024_v0  ;;  %1195 = vperm.xlu0 %7198, %v1055_v39   ;;  %v2386_v39 = vld [vmem:[#allocation2 + $0x708] sm:$0xff]  ;;  %v2448_v26 = vmul.f32 %v2416_v22, %v7557_v3  ;;  %v10943_v22 = vrot.slane %v7779_v21, 1 }
 0x104   :  { %v8027_v44 = vpop.permute.xlu1 %1362 }
 0x105   :  { %v8034_v49 = vpop.permute.xlu0 %1215  ;;  %2004 = vperm.xlu1 %7197, %v1852_v25   ;;  %v2418_v25 = vmul.f32 %v2386_v39, %v7823_v50  ;;  %v8065_v39 = vsel %vm900_vm1, %v10796_v11, %v10943_v22  ;;  %v2400_v11 = vld [vmem:[#allocation2 + $0x778] sm:$0xff] }
 0x106   :  { %10937 = vst [vmem:[#allocation65_spill] sm:$0xff] %v8034_v49  ;;  %1705 = vperm.xlu0 %7198, %v7630_v41   ;;  %v611_v49 = vld [vmem:[#allocation2 + $0x148] sm:$0xff] }
 0x107   :  { %v315_v41 = vld [vmem:[#allocation2 + $0x48] sm:$0xff]  ;;  %v643_v3 = vmul.f32 %v611_v49, %v7914_v32  ;;  %v1039_v49 = vmul.f32 %v1007_v47, %v8065_v39  ;;  %v2134_v47 = vmul.f32 %v2102_v55, %v7614_v31  ;;  %v10799_v55 = vrot.slane %v7869_v38, 1 }
 0x108   :  { %v8040_v0 = vpop.permute.xlu1 %1517 }
 0x109   :  { %10938 = vst [vmem:[#allocation66_spill] sm:$0xff] %v8040_v0  ;;  %v8042_v52 = vpop.permute.xlu0 %1367  ;;  %2453 = vperm.xlu1 %7197, %v2417_v45   ;;  %v347_v45 = vmul.f32 %v315_v41, %v8051_v18 }
 0x10a   :  { %2306 = vperm.xlu0 %7198, %v2150_v9   ;;  %v1305_v9 = vld [vmem:[#allocation2 + $0x358] sm:$0xff] }
 0x10c   :  { %v8054_v23 = vpop.permute.xlu1 %735 }
 0x10d   :  { %10941 = vst [vmem:[#allocation68_spill] sm:$0xff] %v8054_v23  ;;  %v8056_v0 = vpop.permute.xlu0 %438  ;;  %2608 = vperm.xlu1 %7197, %v2448_v26   ;;  %v1337_v26 = vmul.f32 %v1305_v9, %v7785_v30  ;;  %v2432_v9 = vmul.f32 %v2400_v11, %v7609_v28  ;;  %v10952_v28 = vrot.slane %v7974_v58, 7 }
 0x10e   :  { %10942 = vst [vmem:[#allocation69_spill] sm:$0xff] %v8056_v0  ;;  %2458 = vperm.xlu0 %7198, %v2418_v25   ;;  %v1804_v25 = vld [vmem:[#allocation2 + $0x568] sm:$0xff] }
 0x10f   :  { %v1836_v22 = vmul.f32 %v1804_v25, %v7748_v36 }
 0x110   :  { %v8067_v7 = vpop.permute.xlu1 %1437 }
 0x111   :  { %10944 = vst [vmem:[#allocation70_spill] sm:$0xff] %v8067_v7  ;;  %v8069_v23 = vpop.permute.xlu0 %1135  ;;  %715 = vperm.xlu1 %7197, %v643_v3   ;;  %v8083_v3 = vld [vmem:[%s10757_s0 + $0xb0] sm:$0xff] }
 0x112   :  { %10945 = vst [vmem:[#allocation71_spill] sm:$0xff] %v8069_v23  ;;  %418 = vperm.xlu0 %7198, %v347_v45   ;;  %v10798_v25 = vrot.slane %v8083_v3, 7 }
 0x114   :  { %v8073_v41 = vpop.permute.xlu1 %1447  ;;  %v8102_v31 = vsel %vm178_vm0, %v10798_v25, %v10952_v28  ;;  %v1022_v28 = vld [vmem:[#allocation2 + $0x2c8] sm:$0xff] }
 0x115   :  { %10946 = vst [vmem:[#allocation72_spill] sm:$0xff] %v8073_v41  ;;  %v8075_v0 = vpop.permute.xlu0 %1442  ;;  %1417 = vperm.xlu1 %7197, %v1337_v26   ;;  %v2402_v26 = vld [vmem:[#allocation2 + $0x788] sm:$0xff]  ;;  %10953 = vst [vmem:[#allocation78_spill] sm:$0xff] %v8102_v31 }
 0x116   :  { %10947 = vst [vmem:[#allocation73_spill] sm:$0xff] %v8075_v0  ;;  %1115 = vperm.xlu0 %7198, %v1039_v49   ;;  %v2401_v49 = vld [vmem:[#allocation2 + $0x780] sm:$0xff]  ;;  %v2434_v0 = vmul.f32 %v2402_v26, %v7861_v27  ;;  %v10954_v26 = vrot.slane %v7800_v57, 1 }
 0x118   :  { %v8078_v7 = vpop.permute.xlu1 %810 }
 0x119   :  { %10948 = vst [vmem:[#allocation74_spill] sm:$0xff] %v8078_v7  ;;  %v8085_v45 = vpop.permute.xlu0 %513  ;;  %1924 = vperm.xlu1 %7197, %v1836_v22   ;;  %v2433_v22 = vmul.f32 %v2401_v49, %v7680_v14  ;;  %v8116_v49 = vsel %vm900_vm1, %v10799_v55, %v10954_v26 }
 0x11a   :  { %10949 = vst [vmem:[#allocation75_spill] sm:$0xff] %v8085_v45  ;;  %1641 = vperm.xlu0 %7198, %v7651_v56   ;;  %v626_v45 = vld [vmem:[#allocation2 + $0x1c0] sm:$0xff]  ;;  %10955 = vst [vmem:[#allocation79_spill] sm:$0xff] %v8116_v49 }
 0x11b   :  { %v330_v56 = vld [vmem:[#allocation2 + $0xc0] sm:$0xff] }
 0x11c   :  { %v8091_v23 = vpop.permute.xlu1 %1512  ;;  %v362_v14 = vmul.f32 %v330_v56, %v8102_v31  ;;  %v8127_v56 = vld [vmem:[%s10757_s0 + $0x18] sm:$0xff] }
 0x11d   :  { %10950 = vst [vmem:[#allocation76_spill] sm:$0xff] %v8091_v23  ;;  %v8093_v7 = vpop.permute.xlu0 %1210  ;;  %2528 = vperm.xlu1 %7197, %v2432_v9   ;;  %v658_v9 = vmul.f32 %v626_v45, %v7974_v58  ;;  %v1054_v45 = vmul.f32 %v1022_v28, %v8116_v49  ;;  %10957 = vst [vmem:[#allocation81_spill] sm:$0xff] %v8127_v56  ;;  %v8138_v28 = vld [vmem:[%s10757_s0 + $0x30] sm:$0xff]  ;;  %v2682_v49 = vld [vmem:[#allocation2 + $0x800] sm:$0xff] }
 0x11e   :  { %10951 = vst [vmem:[#allocation77_spill] sm:$0xff] %v8093_v7  ;;  %2226 = vperm.xlu0 %7198, %v2134_v47   ;;  %v1320_v47 = vld [vmem:[#allocation2 + $0x3d0] sm:$0xff] }
 0x120   :  { %v8105_v11 = vpop.permute.xlu1 %1597 }
 0x121   :  { %v8107_v7 = vpop.permute.xlu0 %1593  ;;  %2538 = vperm.xlu1 %7197, %v2434_v0   ;;  %v1352_v0 = vmul.f32 %v1320_v47, %v7808_v4  ;;  %v10804_v47 = vrot.slane %v8127_v56, 1 }
 0x122   :  { %2533 = vperm.xlu0 %7198, %v2433_v22   ;;  %v1819_v22 = vld [vmem:[#allocation2 + $0x5e0] sm:$0xff] }
 0x123   :  { %v1851_v55 = vmul.f32 %v1819_v22, %v7774_v12  ;;  %v10806_v12 = vrot.slane %v8138_v28, 7 }
 0x124   :  { %v8118_v25 = vpop.permute.xlu1 %433 }
 0x125   :  { %10956 = vst [vmem:[#allocation80_spill] sm:$0xff] %v8118_v25  ;;  %v8120_v23 = vpop.permute.xlu0 %1717  ;;  %790 = vperm.xlu1 %7197, %v658_v9   ;;  %v2415_v9 = vld [vmem:[#allocation2 + $0x7f0] sm:$0xff] }
 0x126   :  { %493 = vperm.xlu0 %7198, %v362_v14   ;;  %v2117_v14 = vld [vmem:[#allocation2 + $0x6e8] sm:$0xff] }
 0x128   :  { %v8129_v41 = vpop.permute.xlu1 %1130 }
 0x129   :  { %10958 = vst [vmem:[#allocation82_spill] sm:$0xff] %v8129_v41  ;;  %v8131_v26 = vpop.permute.xlu0 %730  ;;  %1492 = vperm.xlu1 %7197, %v1352_v0   ;;  %v2149_v0 = vmul.f32 %v2117_v14, %v7598_v24  ;;  %v2683_v41 = vld [vmem:[#allocation2 + $0x808] sm:$0xff]  ;;  %v2714_v24 = vmul.f32 %v2682_v49, %v7839_v10  ;;  %v314_v14 = vld [vmem:[#allocation2 + $0x40] sm:$0xff] }
 0x12a   :  { %10959 = vst [vmem:[#allocation83_spill] sm:$0xff] %v8131_v26  ;;  %1190 = vperm.xlu0 %7198, %v1054_v45   ;;  %v2447_v26 = vmul.f32 %v2415_v9, %v7552_v1  ;;  %v10962_v45 = vrot.slane %v7823_v50, 1 }
 0x12c   :  { %v8140_v25 = vpop.permute.xlu1 %1653  ;;  %v8152_v22 = vsel %vm900_vm1, %v10962_v45, %v10804_v47  ;;  %v10808_v45 = vrot.slane %v7914_v32, 1  ;;  %v2713_v47 = vld [vmem:[#allocation2 + $0x8f8] sm:$0xff] }
 0x12d   :  { %10960 = vst [vmem:[#allocation84_spill] sm:$0xff] %v8140_v25  ;;  %v8142_v4 = vpop.permute.xlu0 %1432  ;;  %1999 = vperm.xlu1 %7197, %v1851_v55   ;;  %10963 = vst [vmem:[#allocation86_spill] sm:$0xff] %v8152_v22  ;;  %v2715_v1 = vmul.f32 %v2683_v41, %v8152_v22  ;;  %v2745_v49 = vmul.f32 %v2713_v47, %v7658_v59  ;;  %v1304_v59 = vld [vmem:[#allocation2 + $0x350] sm:$0xff] }
 0x12e   :  { %10961 = vst [vmem:[#allocation85_spill] sm:$0xff] %v8142_v4  ;;  %1701 = vperm.xlu0 %7198, %v7694_v29   ;;  %v10964_v29 = vrot.slane %v8032_v13, 7 }
 0x130   :  { %v8155_v25 = vpop.permute.xlu1 %1661  ;;  %v8166_v9 = vsel %vm178_vm0, %v10806_v12, %v10964_v29  ;;  %v1006_v29 = vld [vmem:[#allocation2 + $0x248] sm:$0xff]  ;;  %v610_v12 = vld [vmem:[#allocation2 + $0x140] sm:$0xff] }
 0x131   :  { %v8157_v55 = vpop.permute.xlu0 %1657  ;;  %2603 = vperm.xlu1 %7197, %v2447_v26   ;;  %v346_v41 = vmul.f32 %v314_v14, %v8166_v9  ;;  %v10967_v26 = vrot.slane %v7831_v2, 1 }
 0x132   :  { %2301 = vperm.xlu0 %7198, %v2149_v0  }
 0x133   :  { %v8180_v0 = vsel %vm900_vm1, %v10808_v45, %v10967_v26  ;;  %v1336_v26 = vmul.f32 %v1304_v59, %v7848_v51  ;;  %v2101_v45 = vld [vmem:[#allocation2 + $0x668] sm:$0xff] }
 0x134   :  { %v8169_v4 = vpop.permute.xlu1 %805  ;;  %10968 = vst [vmem:[#allocation89_spill] sm:$0xff] %v8180_v0 }
 0x135   :  { %10965 = vst [vmem:[#allocation87_spill] sm:$0xff] %v8169_v4  ;;  %v8171_v50 = vpop.permute.xlu0 %508  ;;  %2755 = vperm.xlu1 %7197, %v2715_v1   ;;  %v1038_v1 = vmul.f32 %v1006_v29, %v8180_v0 }
 0x136   :  { %10966 = vst [vmem:[#allocation88_spill] sm:$0xff] %v8171_v50  ;;  %2750 = vperm.xlu0 %7198, %v2714_v24   ;;  %v642_v24 = vmul.f32 %v610_v12, %v8032_v13  ;;  %v1803_v50 = vld [vmem:[#allocation2 + $0x560] sm:$0xff]  ;;  %v2133_v12 = vmul.f32 %v2101_v45, %v7617_v33 }
 0x138   :  { %v8182_v10 = vpop.permute.xlu1 %1507 }
 0x139   :  { %10969 = vst [vmem:[#allocation90_spill] sm:$0xff] %v8182_v10  ;;  %v8184_v4 = vpop.permute.xlu0 %1205  ;;  %413 = vperm.xlu1 %7197, %v346_v41   ;;  %v8196_v41 = vld [vmem:[%s10757_s0 + $0x98] sm:$0xff]  ;;  %v8211_v10 = vld [vmem:[%s10757_s0 + $0xa8] sm:$0xff] }
 0x13a   :  { %10970 = vst [vmem:[#allocation91_spill] sm:$0xff] %v8184_v4  ;;  %2905 = vperm.xlu0 %7198, %v2745_v49   ;;  %v10815_v59 = vrot.slane %v8196_v41, 1  ;;  %v2399_v4 = vld [vmem:[#allocation2 + $0x770] sm:$0xff] }
 0x13b   :  { %v2431_v33 = vmul.f32 %v2399_v4, %v7584_v17  ;;  %v625_v4 = vld [vmem:[#allocation2 + $0x1b8] sm:$0xff] }
 0x13c   :  { %v8188_v47 = vpop.permute.xlu1 %1859 }
 0x13d   :  { %v8190_v14 = vpop.permute.xlu0 %1713  ;;  %1110 = vperm.xlu1 %7197, %v1038_v1   ;;  %v1835_v1 = vmul.f32 %v1803_v50, %v7792_v43  ;;  %v10974_v50 = vrot.slane %v7861_v27, 1  ;;  %v10816_v43 = vrot.slane %v8211_v10, 7 }
 0x13e   :  { %10971 = vst [vmem:[#allocation92_spill] sm:$0xff] %v8190_v14  ;;  %710 = vperm.xlu0 %7198, %v642_v24   ;;  %v2697_v24 = vld [vmem:[#allocation2 + $0x878] sm:$0xff] }
 0x13f   :  { %v8222_v45 = vsel %vm900_vm1, %v10974_v50, %v10815_v59  ;;  %v10820_v50 = vrot.slane %v7974_v58, 1 }
 0x140   :  { %v8198_v29 = vpop.permute.xlu1 %2014  ;;  %10975 = vst [vmem:[#allocation95_spill] sm:$0xff] %v8222_v45 }
 0x141   :  { %v8200_v49 = vpop.permute.xlu0 %1864  ;;  %1637 = vperm.xlu1 %7197, %v7722_v46   ;;  %v2729_v46 = vmul.f32 %v2697_v24, %v7701_v34  ;;  %v329_v24 = vld [vmem:[#allocation2 + $0xb8] sm:$0xff] }
 0x142   :  { %1412 = vperm.xlu0 %7198, %v1336_v26   ;;  %v2699_v26 = vld [vmem:[#allocation2 + $0x888] sm:$0xff] }
 0x143   :  { %v2731_v34 = vmul.f32 %v2699_v26, %v8222_v45  ;;  %v10980_v26 = vrot.slane %v7869_v38, 1 }
 0x144   :  { %v8206_v22 = vpop.permute.xlu1 %725 }
 0x145   :  { %10972 = vst [vmem:[#allocation93_spill] sm:$0xff] %v8206_v22  ;;  %v8213_v0 = vpop.permute.xlu0 %428  ;;  %2221 = vperm.xlu1 %7197, %v2133_v12   ;;  %v2698_v22 = vld [vmem:[#allocation2 + $0x880] sm:$0xff]  ;;  %v10978_v12 = vrot.slane %v8083_v3, 7 }
 0x146   :  { %10973 = vst [vmem:[#allocation94_spill] sm:$0xff] %v8213_v0  ;;  %1919 = vperm.xlu0 %7198, %v1835_v1   ;;  %v2730_v17 = vmul.f32 %v2698_v22, %v7877_v54 }
 0x147   :  { %v8236_v1 = vsel %vm178_vm0, %v10816_v43, %v10978_v12  ;;  %v8250_v12 = vsel %vm900_vm1, %v10820_v50, %v10980_v26  ;;  %v1021_v43 = vld [vmem:[#allocation2 + $0x2c0] sm:$0xff] }
 0x148   :  { %v8225_v51 = vpop.permute.xlu1 %1427  ;;  %v361_v22 = vmul.f32 %v329_v24, %v8236_v1  ;;  %10981 = vst [vmem:[#allocation99_spill] sm:$0xff] %v8250_v12  ;;  %v8261_v24 = vld [vmem:[%s10757_s0 + $0x28] sm:$0xff] }
 0x149   :  { %10976 = vst [vmem:[#allocation96_spill] sm:$0xff] %v8225_v51  ;;  %v8227_v0 = vpop.permute.xlu0 %1125  ;;  %2825 = vperm.xlu1 %7197, %v2729_v46   ;;  %v657_v46 = vmul.f32 %v625_v4, %v8083_v3  ;;  %v1818_v4 = vld [vmem:[#allocation2 + $0x5d8] sm:$0xff] }
 0x14a   :  { %10977 = vst [vmem:[#allocation97_spill] sm:$0xff] %v8227_v0  ;;  %2523 = vperm.xlu0 %7198, %v2431_v33   ;;  %v1319_v33 = vld [vmem:[#allocation2 + $0x3c8] sm:$0xff]  ;;  %v1850_v50 = vmul.f32 %v1818_v4, %v7818_v42 }
 0x14c   :  { %v8239_v59 = vpop.permute.xlu1 %1934 }
 0x14d   :  { %v8241_v0 = vpop.permute.xlu0 %1649  ;;  %2835 = vperm.xlu1 %7197, %v2731_v34   ;;  %v1351_v34 = vmul.f32 %v1319_v33, %v7888_v8  ;;  %v10825_v33 = vrot.slane %v8261_v24, 7 }
 0x14e   :  { %10979 = vst [vmem:[#allocation98_spill] sm:$0xff] %v8241_v0  ;;  %2830 = vperm.xlu0 %7198, %v2730_v17   ;;  %v1053_v17 = vmul.f32 %v1021_v43, %v8250_v12  ;;  %v7199_v12 = vld [vmem:[%s10757_s0 + $0xf0] sm:$0xff] }
 0x150   :  { %v8252_v54 = vpop.permute.xlu1 %1944 }
 0x151   :  { %v8254_v45 = vpop.permute.xlu0 %1939  ;;  %785 = vperm.xlu1 %7197, %v657_v46   ;;  %v2414_v46 = vld [vmem:[#allocation2 + $0x7e8] sm:$0xff] }
 0x152   :  { %488 = vperm.xlu0 %7198, %v361_v22   ;;  %v2116_v22 = vld [vmem:[#allocation2 + $0x6e0] sm:$0xff] }
 0x154   :  { %v8263_v51 = vpop.permute.xlu1 %800 }
 0x155   :  { %10982 = vst [vmem:[#allocation100_spill] sm:$0xff] %v8263_v51  ;;  %v8265_v26 = vpop.permute.xlu0 %503  ;;  %1487 = vperm.xlu1 %7197, %v1351_v34   ;;  %v2446_v51 = vmul.f32 %v7199_v12, %v2414_v46  ;;  %v2148_v34 = vmul.f32 %v2116_v22, %v7645_v53  ;;  %v10990_v12 = vrot.slane %v7914_v32, 1  ;;  %v1005_v22 = vld [vmem:[#allocation2 + $0x240] sm:$0xff] }
 0x156   :  { %10983 = vst [vmem:[#allocation101_spill] sm:$0xff] %v8265_v26  ;;  %1185 = vperm.xlu0 %7198, %v1053_v17   ;;  %v10986_v17 = vrot.slane %v8138_v28, 7  ;;  %v313_v26 = vld [vmem:[#allocation2 + $0x38] sm:$0xff] }
 0x158   :  { %v8269_v8 = vpop.permute.xlu1 %1502  ;;  %v8283_v4 = vsel %vm178_vm0, %v10825_v33, %v10986_v17  ;;  %v609_v17 = vld [vmem:[#allocation2 + $0x138] sm:$0xff] }
 0x159   :  { %10984 = vst [vmem:[#allocation102_spill] sm:$0xff] %v8269_v8  ;;  %v8271_v43 = vpop.permute.xlu0 %1200  ;;  %1994 = vperm.xlu1 %7197, %v1850_v50   ;;  %10987 = vst [vmem:[#allocation104_spill] sm:$0xff] %v8283_v4  ;;  %v2712_v50 = vld [vmem:[#allocation2 + $0x8f0] sm:$0xff] }
 0x15a   :  { %10985 = vst [vmem:[#allocation103_spill] sm:$0xff] %v8271_v43  ;;  %1697 = vperm.xlu0 %7198, %v7753_v61   ;;  %v10826_v43 = vrot.slane %v8032_v13, 1  ;;  %v345_v61 = vmul.f32 %v313_v26, %v8283_v4  ;;  %v2744_v53 = vmul.f32 %v2712_v50, %v7662_v62  ;;  %v641_v26 = vmul.f32 %v609_v17, %v8138_v28  ;;  %v1303_v62 = vld [vmem:[#allocation2 + $0x348] sm:$0xff] }
 0x15b   :  { %v1335_v50 = vmul.f32 %v1303_v62, %v7941_v40 }
 0x15c   :  { %v8286_v8 = vpop.permute.xlu1 %2009  ;;  %v8297_v46 = vsel %vm900_vm1, %v10826_v43, %v10990_v12  ;;  %v2100_v12 = vld [vmem:[#allocation2 + $0x660] sm:$0xff]  ;;  %v1802_v43 = vld [vmem:[#allocation2 + $0x558] sm:$0xff] }
 0x15d   :  { %10988 = vst [vmem:[#allocation105_spill] sm:$0xff] %v8286_v8  ;;  %v8288_v42 = vpop.permute.xlu0 %1709  ;;  %2598 = vperm.xlu1 %7197, %v2446_v51   ;;  %10991 = vst [vmem:[#allocation107_spill] sm:$0xff] %v8297_v46  ;;  %v1037_v51 = vmul.f32 %v1005_v22, %v8297_v46  ;;  %v2132_v22 = vmul.f32 %v2100_v12, %v7670_v5  ;;  %v1834_v17 = vmul.f32 %v1802_v43, %v7856_v6 }
 0x15e   :  { %10989 = vst [vmem:[#allocation106_spill] sm:$0xff] %v8288_v42  ;;  %2296 = vperm.xlu0 %7198, %v2148_v34   ;;  %v10997_v43 = vrot.slane %v8211_v10, 7 }
 0x160   :  { %v8299_v33 = vpop.permute.xlu1 %2161 }
 0x161   :  { %v8301_v0 = vpop.permute.xlu0 %2156  ;;  %408 = vperm.xlu1 %7197, %v345_v61   ;;  %v8315_v61 = vld [vmem:[%s10757_s0 + $0xa0] sm:$0xff] }
 0x162   :  { %2900 = vperm.xlu0 %7198, %v2744_v53   ;;  %v10829_v62 = vrot.slane %v8315_v61, 7 }
 0x164   :  { %v8305_v34 = vpop.permute.xlu1 %423  ;;  %v8336_v12 = vsel %vm178_vm0, %v10829_v62, %v10997_v43  ;;  %v1020_v62 = vld [vmem:[#allocation2 + $0x2b8] sm:$0xff] }
 0x165   :  { %10992 = vst [vmem:[#allocation108_spill] sm:$0xff] %v8305_v34  ;;  %v8307_v32 = vpop.permute.xlu0 %2311  ;;  %1105 = vperm.xlu1 %7197, %v1037_v51   ;;  %v2696_v51 = vld [vmem:[#allocation2 + $0x870] sm:$0xff]  ;;  %10998 = vst [vmem:[#allocation113_spill] sm:$0xff] %v8336_v12 }
 0x166   :  { %705 = vperm.xlu0 %7198, %v641_v26   ;;  %v2398_v26 = vld [vmem:[#allocation2 + $0x768] sm:$0xff]  ;;  %v2728_v46 = vmul.f32 %v2696_v51, %v7704_v37 }
 0x168   :  { %v8310_v42 = vpop.permute.xlu1 %1120 }
 0x169   :  { %10993 = vst [vmem:[#allocation109_spill] sm:$0xff] %v8310_v42  ;;  %v8317_v53 = vpop.permute.xlu0 %720  ;;  %1633 = vperm.xlu1 %7197, %v7779_v21   ;;  %v7200_v21 = vld [vmem:[%s10757_s0 + $0x70] sm:$0xff] }
 0x16a   :  { %10994 = vst [vmem:[#allocation110_spill] sm:$0xff] %v8317_v53  ;;  %1407 = vperm.xlu0 %7198, %v1335_v50   ;;  %v2430_v5 = vmul.f32 %v7200_v21, %v2398_v26  ;;  %v624_v50 = vld [vmem:[#allocation2 + $0x1b0] sm:$0xff]  ;;  %v1318_v26 = vld [vmem:[#allocation2 + $0x3c0] sm:$0xff]  ;;  %v11000_v21 = vrot.slane %v7974_v58, 1 }
 0x16b   :  { %v328_v53 = vld [vmem:[#allocation2 + $0xb0] sm:$0xff]  ;;  %v8361_v58 = vld [vmem:[%s10757_s0 + $0x20] sm:$0xff] }
 0x16c   :  { %v8323_v34 = vpop.permute.xlu1 %1645  ;;  %v360_v51 = vmul.f32 %v328_v53, %v8336_v12  ;;  %v1817_v53 = vld [vmem:[#allocation2 + $0x5d0] sm:$0xff]  ;;  %v11038_v12 = vld [vmem:[#allocation38_spill] sm:$0xff] }
 0x16d   :  { %10995 = vst [vmem:[#allocation111_spill] sm:$0xff] %v8323_v34  ;;  %v8325_v42 = vpop.permute.xlu0 %1422  ;;  %2216 = vperm.xlu1 %7197, %v2132_v22  }
 0x16e   :  { %10996 = vst [vmem:[#allocation112_spill] sm:$0xff] %v8325_v42  ;;  %1914 = vperm.xlu0 %7198, %v1834_v17   ;;  %v10831_v42 = vrot.slane %v8083_v3, 1  ;;  %v656_v17 = vmul.f32 %v624_v50, %v8211_v10 }
 0x170   :  { %v8339_v22 = vpop.permute.xlu1 %2231  ;;  %v8350_v43 = vsel %vm900_vm1, %v10831_v42, %v11000_v21  ;;  %v1849_v42 = vmul.f32 %v1817_v53, %v7902_v63 }
 0x171   :  { %v8341_v37 = vpop.permute.xlu0 %1929  ;;  %2820 = vperm.xlu1 %7197, %v2728_v46   ;;  %11001 = vst [vmem:[#allocation115_spill] sm:$0xff] %v8350_v43  ;;  %v1350_v46 = vmul.f32 %v1318_v26, %v8000_v35  ;;  %v10837_v26 = vrot.slane %v8361_v58, 7 }
 0x172   :  { %10999 = vst [vmem:[#allocation114_spill] sm:$0xff] %v8341_v37  ;;  %2518 = vperm.xlu0 %7198, %v2430_v5   ;;  %v1052_v5 = vmul.f32 %v1020_v62, %v8350_v43  ;;  %v7201_v43 = vld [vmem:[%s10757_s0 + $0xe8] sm:$0xff] }
 0x174   :  { %v8352_v34 = vpop.permute.xlu1 %2241 }
 0x175   :  { %v8354_v6 = vpop.permute.xlu0 %2236  ;;  %780 = vperm.xlu1 %7197, %v656_v17   ;;  %v2413_v17 = vld [vmem:[#allocation2 + $0x7e0] sm:$0xff] }
 0x176   :  { %483 = vperm.xlu0 %7198, %v360_v51   ;;  %v2115_v51 = vld [vmem:[#allocation2 + $0x6d8] sm:$0xff] }
 0x178   :  { %v8363_v50 = vpop.permute.xlu1 %795 }
 0x179   :  { %11002 = vst [vmem:[#allocation116_spill] sm:$0xff] %v8363_v50  ;;  %v8365_v21 = vpop.permute.xlu0 %498  ;;  %1482 = vperm.xlu1 %7197, %v1350_v46   ;;  %v2445_v50 = vmul.f32 %v7201_v43, %v2413_v17  ;;  %v11006_v46 = vld [vmem:[#allocation21_spill] sm:$0xff]  ;;  %v11011_v43 = vld [vmem:[#allocation20_spill] sm:$0xff] }
 0x17a   :  { %11003 = vst [vmem:[#allocation117_spill] sm:$0xff] %v8365_v21  ;;  %1180 = vperm.xlu0 %7198, %v1052_v5   ;;  %v2147_v21 = vmul.f32 %v2115_v51, %v11006_v46  ;;  %v11007_v5 = vrot.slane %v8261_v24, 7  ;;  %v11012_v51 = vrot.slane %v8032_v13, 1 }
 0x17c   :  { %v8369_v35 = vpop.permute.xlu1 %1497  ;;  %v8383_v53 = vsel %vm178_vm0, %v10837_v26, %v11007_v5  ;;  %v1004_v5 = vld [vmem:[#allocation2 + $0x238] sm:$0xff]  ;;  %v608_v26 = vld [vmem:[#allocation2 + $0x130] sm:$0xff] }
 0x17d   :  { %11004 = vst [vmem:[#allocation118_spill] sm:$0xff] %v8369_v35  ;;  %v8371_v62 = vpop.permute.xlu0 %1195  ;;  %1989 = vperm.xlu1 %7197, %v1849_v42   ;;  %11008 = vst [vmem:[#allocation21_spill] sm:$0xff] %v8383_v53  ;;  %v312_v35 = vld [vmem:[#allocation2 + $0x30] sm:$0xff]  ;;  %v2711_v42 = vld [vmem:[#allocation2 + $0x8e8] sm:$0xff] }
 0x17e   :  { %11005 = vst [vmem:[#allocation119_spill] sm:$0xff] %v8371_v62  ;;  %1693 = vperm.xlu0 %7198, %v7800_v57   ;;  %v10838_v62 = vrot.slane %v8138_v28, 1  ;;  %v344_v57 = vmul.f32 %v312_v35, %v8383_v53  ;;  %v2743_v17 = vmul.f32 %v2711_v42, %v11011_v43  ;;  %v640_v35 = vmul.f32 %v608_v26, %v8261_v24 }
 0x180   :  { %v8386_v63 = vpop.permute.xlu1 %2004  ;;  %v8397_v46 = vsel %vm900_vm1, %v10838_v62, %v11012_v51  ;;  %v2099_v51 = vld [vmem:[#allocation2 + $0x658] sm:$0xff]  ;;  %v1801_v62 = vld [vmem:[#allocation2 + $0x550] sm:$0xff] }
 0x181   :  { %11009 = vst [vmem:[#allocation120_spill] sm:$0xff] %v8386_v63  ;;  %v8388_v40 = vpop.permute.xlu0 %1705  ;;  %2593 = vperm.xlu1 %7197, %v2445_v50   ;;  %11013 = vst [vmem:[#allocation20_spill] sm:$0xff] %v8397_v46  ;;  %v1036_v50 = vmul.f32 %v1004_v5, %v8397_v46  ;;  %v1833_v26 = vmul.f32 %v1801_v62, %v7955_v48  ;;  %v2397_v5 = vld [vmem:[#allocation2 + $0x760] sm:$0xff]  ;;  %v11019_v62 = vrot.slane %v8315_v61, 7 }
 0x182   :  { %11010 = vst [vmem:[#allocation121_spill] sm:$0xff] %v8388_v40  ;;  %2291 = vperm.xlu0 %7198, %v2147_v21   ;;  %v1302_v21 = vld [vmem:[#allocation2 + $0x340] sm:$0xff] }
 0x183   :  { %v1334_v43 = vmul.f32 %v1302_v21, %v8051_v18 }
 0x184   :  { %v8399_v37 = vpop.permute.xlu1 %2453 }
 0x185   :  { %v8401_v63 = vpop.permute.xlu0 %2306  ;;  %403 = vperm.xlu1 %7197, %v344_v57   ;;  %v2131_v57 = vmul.f32 %v2099_v51, %v7739_v19 }
 0x186   :  { %11014 = vst [vmem:[#allocation122_spill] sm:$0xff] %v8401_v63  ;;  %2895 = vperm.xlu0 %7198, %v2743_v17   ;;  %v2695_v17 = vld [vmem:[#allocation2 + $0x868] sm:$0xff] }
 0x188   :  { %v8405_v42 = vpop.permute.xlu1 %2608 }
 0x189   :  { %v8407_v13 = vpop.permute.xlu0 %2458  ;;  %1100 = vperm.xlu1 %7197, %v1036_v50   ;;  %v10841_v50 = vrot.slane %v8196_v41, 7 }
 0x18a   :  { %700 = vperm.xlu0 %7198, %v640_v35  }
 0x18b   :  { %v8431_v51 = vsel %vm178_vm0, %v10841_v50, %v11019_v62  ;;  %v1019_v50 = vld [vmem:[#allocation2 + $0x2b0] sm:$0xff] }
 0x18c   :  { %v8410_v40 = vpop.permute.xlu1 %715  ;;  %11020 = vst [vmem:[#allocation127_spill] sm:$0xff] %v8431_v51 }
 0x18d   :  { %11015 = vst [vmem:[#allocation123_spill] sm:$0xff] %v8410_v40  ;;  %v8412_v53 = vpop.permute.xlu0 %418  ;;  %1629 = vperm.xlu1 %7197, %v7831_v2   ;;  %v2727_v40 = vmul.f32 %v2695_v17, %v7687_v20  ;;  %v7202_v2 = vld [vmem:[%s10757_s0 + $0x68] sm:$0xff] }
 0x18e   :  { %11016 = vst [vmem:[#allocation124_spill] sm:$0xff] %v8412_v53  ;;  %1402 = vperm.xlu0 %7198, %v1334_v43   ;;  %v2429_v19 = vmul.f32 %v7202_v2, %v2397_v5  ;;  %v623_v43 = vld [vmem:[#allocation2 + $0x1a8] sm:$0xff]  ;;  %v1317_v5 = vld [vmem:[#allocation2 + $0x3b8] sm:$0xff]  ;;  %v11023_v2 = vrot.slane %v8083_v3, 1 }
 0x18f   :  { %v327_v53 = vld [vmem:[#allocation2 + $0xa8] sm:$0xff] }
 0x190   :  { %v8418_v35 = vpop.permute.xlu1 %1417  ;;  %v359_v17 = vmul.f32 %v327_v53, %v8431_v51  ;;  %v1816_v53 = vld [vmem:[#allocation2 + $0x5c8] sm:$0xff] }
 0x191   :  { %11017 = vst [vmem:[#allocation125_spill] sm:$0xff] %v8418_v35  ;;  %v8420_v21 = vpop.permute.xlu0 %1115  ;;  %2211 = vperm.xlu1 %7197, %v2131_v57   ;;  %v11033_v51 = vld [vmem:[#allocation36_spill] sm:$0xff] }
 0x192   :  { %11018 = vst [vmem:[#allocation126_spill] sm:$0xff] %v8420_v21  ;;  %1909 = vperm.xlu0 %7198, %v1833_v26   ;;  %v10843_v21 = vrot.slane %v8211_v10, 1  ;;  %v655_v26 = vmul.f32 %v623_v43, %v8315_v61 }
 0x194   :  { %v8434_v57 = vpop.permute.xlu1 %1924  ;;  %v8445_v62 = vsel %vm900_vm1, %v10843_v21, %v11023_v2  ;;  %v1848_v2 = vmul.f32 %v1816_v53, %v8014_v16  ;;  %v2412_v21 = vld [vmem:[#allocation2 + $0x7d8] sm:$0xff]  ;;  %v7203_v16 = vld [vmem:[%s10757_s0 + $0xe0] sm:$0xff] }
 0x195   :  { %11021 = vst [vmem:[#allocation128_spill] sm:$0xff] %v8434_v57  ;;  %v8436_v20 = vpop.permute.xlu0 %1641  ;;  %2815 = vperm.xlu1 %7197, %v2727_v40   ;;  %11024 = vst [vmem:[#allocation130_spill] sm:$0xff] %v8445_v62  ;;  %v1349_v40 = vmul.f32 %v1317_v5, %v8102_v31  ;;  %v8472_v5 = vld [vmem:[%s10758_s1 + $0x2] ss:$0 sm:$0xff]  ;;  %v2444_v31 = vmul.f32 %v7203_v16, %v2412_v21  ;;  %v11032_v57 = vrot.slane %v8127_v56, 7  ;;  %v11040_v56 = vld [vmem:[#allocation22_spill] sm:$0xff] }
 0x196   :  { %11022 = vst [vmem:[#allocation129_spill] sm:$0xff] %v8436_v20  ;;  %2513 = vperm.xlu0 %7198, %v2429_v19   ;;  %v1051_v19 = vmul.f32 %v1019_v50, %v8445_v62  ;;  %v8467_v50 = vld [vmem:[%s10758_s1 + $0x1] ss:$0 sm:$0xff]  ;;  %v1230_v21 = vmul.f32 %v8472_v5, %v7969_v15 }
 0x197   :  { %v11030_v62 = vld [vmem:[#allocation39_spill] sm:$0xff]  ;;  %v835_v16 = vmul.f32 %v8467_v50, %v11033_v51  ;;  %v865_v63 = vmul.f32 %v8467_v50, %v11038_v12  ;;  %v11042_v12 = vrot.slane %v8261_v24, 1 }
 0x198   :  { %v8447_v35 = vpop.permute.xlu1 %2528  ;;  %v8513_v51 = vld [vmem:[%s10758_s1 + $0x4] ss:$0 sm:$0xff] }
 0x199   :  { %v8449_v48 = vpop.permute.xlu0 %2226  ;;  %775 = vperm.xlu1 %7197, %v655_v26   ;;  %v8462_v26 = vld [vmem:[%s10758_s1] ss:$0 sm:$0xff] }
 0x19a   :  { %11025 = vst [vmem:[#allocation131_spill] sm:$0xff] %v8449_v48  ;;  %478 = vperm.xlu0 %7198, %v359_v17   ;;  %v2114_v17 = vld [vmem:[#allocation2 + $0x6d0] sm:$0xff]  ;;  %v537_v46 = vmul.f32 %v8462_v26, %v11030_v62  ;;  %v11034_v62 = vld [vmem:[#allocation35_spill] sm:$0xff] }
 0x19b   :  { %v2146_v18 = vmul.f32 %v2114_v17, %v7768_v60  ;;  %v8502_v60 = vld [vmem:[%s10758_s1 + $0x3] ss:$0 sm:$0xff]  ;;  %v834_v17 = vmul.f32 %v8467_v50, %v11034_v62  ;;  %v11036_v48 = vld [vmem:[#allocation53_spill] sm:$0xff] }
 0x19c   :  { %v8453_v43 = vpop.permute.xlu1 %2538  ;;  %v1527_v62 = vmul.f32 %v8502_v60, %v8042_v52  ;;  %v1526_v4 = vmul.f32 %v8502_v60, %v8027_v44  ;;  %v1003_v52 = vld [vmem:[#allocation2 + $0x230] sm:$0xff]  ;;  %v8541_v44 = vld [vmem:[%s10758_s1 + $0x5] ss:$0 sm:$0xff] }
 0x19d   :  { %v8455_v3 = vpop.permute.xlu0 %2533  ;;  %1477 = vperm.xlu1 %7197, %v1349_v40  }
 0x19e   :  { %11026 = vst [vmem:[#allocation132_spill] sm:$0xff] %v8455_v3  ;;  %1175 = vperm.xlu0 %7198, %v1051_v19   ;;  %v11028_v19 = vld [vmem:[#allocation41_spill] sm:$0xff] }
 0x19f   :  { %v538_v53 = vmul.f32 %v8462_v26, %v11028_v19 }
 0x1a0   :  { %v8474_v40 = vpop.permute.xlu1 %790 }
 0x1a1   :  { %11027 = vst [vmem:[#allocation133_spill] sm:$0xff] %v8474_v40  ;;  %v8478_v20 = vpop.permute.xlu0 %493  ;;  %1984 = vperm.xlu1 %7197, %v1848_v2   ;;  %v11031_v40 = vrot.slane %v8361_v58, 7  ;;  %v311_v2 = vld [vmem:[#allocation2 + $0x28] sm:$0xff]  ;;  %v867_v8 = vadd.f32 %v835_v16, %v538_v53 }
 0x1a2   :  { %11029 = vst [vmem:[#allocation41_spill] sm:$0xff] %v8478_v20  ;;  %1689 = vperm.xlu0 %7198, %v7869_v38   ;;  %v2710_v38 = vld [vmem:[#allocation2 + $0x8e0] sm:$0xff]  ;;  %v1229_v20 = vmul.f32 %v8472_v5, %v11036_v48  ;;  %v866_v48 = vadd.f32 %v834_v17, %v537_v46  ;;  %v1727_v46 = vmul.f32 %v8513_v51, %v8105_v11 }
 0x1a3   :  { %v8492_v19 = vsel %vm178_vm0, %v11032_v57, %v11031_v40  ;;  %v11035_v57 = vld [vmem:[#allocation40_spill] sm:$0xff]  ;;  %v2742_v3 = vmul.f32 %v2710_v38, %v11040_v56  ;;  %v1262_v16 = vadd.f32 %v1230_v21, %v867_v8  ;;  %v8548_v8 = vld [vmem:[%s10758_s1 + $0x6] ss:$0 sm:$0xff]  ;;  %v11044_v21 = vld [vmem:[#allocation66_spill] sm:$0xff]  ;;  %v2024_v17 = vmul.f32 %v8541_v44, %v8200_v49 }
 0x1a4   :  { %v568_v40 = vmul.f32 %v8462_v26, %v11035_v57  ;;  %v8515_v15 = vpop.permute.xlu1 %1492  ;;  %v343_v57 = vmul.f32 %v311_v2, %v8492_v19  ;;  %v1726_v2 = vmul.f32 %v8513_v51, %v8107_v7  ;;  %v1557_v11 = vmul.f32 %v8502_v60, %v11044_v21  ;;  %v8567_v49 = vld [vmem:[%s10758_s1 + $0x7] ss:$0 sm:$0xff] }
 0x1a5   :  { %11037 = vst [vmem:[#allocation39_spill] sm:$0xff] %v8515_v15  ;;  %v8521_v14 = vpop.permute.xlu0 %1190  ;;  %2588 = vperm.xlu1 %7197, %v2444_v31   ;;  %v11041_v15 = vrot.slane %v8138_v28, 1  ;;  %v1261_v28 = vadd.f32 %v1229_v20, %v866_v48  ;;  %v1559_v38 = vadd.f32 %v1527_v62, %v1262_v16  ;;  %v2023_v20 = vmul.f32 %v8541_v44, %v8188_v47 }
 0x1a6   :  { %11039 = vst [vmem:[#allocation36_spill] sm:$0xff] %v8521_v14  ;;  %2286 = vperm.xlu0 %7198, %v2146_v18   ;;  %v11043_v14 = vld [vmem:[#allocation56_spill] sm:$0xff]  ;;  %v897_v56 = vadd.f32 %v865_v63, %v568_v40  ;;  %v2321_v62 = vmul.f32 %v8548_v8, %v8299_v33  ;;  %v2320_v47 = vmul.f32 %v8548_v8, %v8301_v0 }
 0x1a7   :  { %v8532_v53 = vsel %vm900_vm1, %v11042_v12, %v11041_v15  ;;  %v1260_v31 = vmul.f32 %v8472_v5, %v11043_v14  ;;  %v607_v18 = vld [vmem:[#allocation2 + $0x128] sm:$0xff]  ;;  %v1558_v7 = vadd.f32 %v1526_v4, %v1261_v28  ;;  %v1759_v12 = vadd.f32 %v1727_v46, %v1559_v38 }
 0x1a8   :  { %v8550_v14 = vpop.permute.xlu1 %1999  ;;  %v1035_v63 = vmul.f32 %v1003_v52, %v8532_v53  ;;  %v639_v40 = vmul.f32 %v607_v18, %v8361_v58  ;;  %v1757_v4 = vmul.f32 %v8513_v51, %v8120_v23  ;;  %v2618_v33 = vmul.f32 %v8567_v49, %v8407_v13  ;;  %v8586_v0 = vld [vmem:[%s10758_s1 + $0x8] ss:$0 sm:$0xff] }
 0x1a9   :  { %v8556_v15 = vpop.permute.xlu0 %1701  ;;  %398 = vperm.xlu1 %7197, %v343_v57   ;;  %v1292_v48 = vadd.f32 %v1260_v31, %v897_v56  ;;  %v1301_v57 = vld [vmem:[#allocation2 + $0x338] sm:$0xff]  ;;  %v1758_v16 = vadd.f32 %v1726_v2, %v1558_v7  ;;  %v2056_v31 = vadd.f32 %v2024_v17, %v1759_v12  ;;  %v2054_v56 = vmul.f32 %v8541_v44, %v8198_v29  ;;  %v2098_v2 = vld [vmem:[#allocation2 + $0x650] sm:$0xff]  ;;  %v1800_v13 = vld [vmem:[#allocation2 + $0x548] sm:$0xff] }
 0x1aa   :  { %2890 = vperm.xlu0 %7198, %v2742_v3   ;;  %v2617_v23 = vmul.f32 %v8567_v49, %v8399_v37  ;;  %v1333_v28 = vmul.f32 %v1301_v57, %v8166_v9  ;;  %v2351_v29 = vmul.f32 %v8548_v8, %v8307_v32  ;;  %v2130_v12 = vmul.f32 %v2098_v2, %v7785_v30  ;;  %v11047_v30 = vld [vmem:[#allocation44_spill] sm:$0xff]  ;;  %v11048_v2 = vld [vmem:[#allocation47_spill] sm:$0xff] }
 0x1ab   :  { %v1589_v52 = vadd.f32 %v1557_v11, %v1292_v48  ;;  %v2055_v18 = vadd.f32 %v2023_v20, %v1758_v16  ;;  %v2353_v21 = vadd.f32 %v2321_v62, %v2056_v31  ;;  %v11045_v11 = vld [vmem:[#allocation46_spill] sm:$0xff]  ;;  %v8597_v48 = vld [vmem:[%s10757_s0 + $0x40] sm:$0xff]  ;;  %v1832_v62 = vmul.f32 %v1800_v13, %v8065_v39  ;;  %v11049_v13 = vld [vmem:[#allocation49_spill] sm:$0xff] }
 0x1ac   :  { %v8573_v3 = vpop.permute.xlu1 %2603  ;;  %v849_v38 = vmul.f32 %v8467_v50, %v11045_v11  ;;  %v2648_v32 = vmul.f32 %v8567_v49, %v8405_v42  ;;  %v11046_v31 = vld [vmem:[#allocation43_spill] sm:$0xff]  ;;  %v554_v42 = vmul.f32 %v8462_v26, %v11048_v2 }
 0x1ad   :  { %v8577_v46 = vpop.permute.xlu0 %2301  ;;  %1095 = vperm.xlu1 %7197, %v1035_v63   ;;  %v1789_v17 = vadd.f32 %v1757_v4, %v1589_v52  ;;  %v2352_v63 = vadd.f32 %v2320_v47, %v2055_v18  ;;  %v2650_v7 = vadd.f32 %v2618_v33, %v2353_v21  ;;  %v8607_v4 = vld [vmem:[%s10759_s2] ss:$0 sm:$0xff]  ;;  %v553_v33 = vmul.f32 %v8462_v26, %v11046_v31 }
 0x1ae   :  { %695 = vperm.xlu0 %7198, %v639_v40   ;;  %v2694_v52 = vld [vmem:[#allocation2 + $0x860] sm:$0xff]  ;;  %v552_v18 = vmul.f32 %v8462_v26, %v11047_v30  ;;  %v851_v21 = vmul.f32 %v8467_v50, %v11049_v13 }
 0x1af   :  { %v2086_v57 = vadd.f32 %v2054_v56, %v1789_v17  ;;  %v2649_v16 = vadd.f32 %v2617_v23, %v2352_v63  ;;  %v2396_v23 = vld [vmem:[#allocation2 + $0x758] sm:$0xff] }
 0x1b0   :  { %v2756_v37 = vpop.permute.xlu1 %2755  ;;  %v883_v13 = vadd.f32 %v851_v21, %v554_v42  ;;  %v1316_v21 = vld [vmem:[#allocation2 + $0x3b0] sm:$0xff] }
 0x1b1   :  { %v2915_v20 = vmul.f32 %v8586_v0, %v2756_v37  ;;  %v2751_v40 = vpop.permute.xlu0 %2750  ;;  %1625 = vperm.xlu1 %7197, %v8597_v48   ;;  %v2383_v11 = vadd.f32 %v2351_v29, %v2086_v57  ;;  %v11051_v37 = vld [vmem:[#allocation50_spill] sm:$0xff]  ;;  %v7205_v29 = vld [vmem:[%s10757_s0 + $0x60] sm:$0xff] }
 0x1b2   :  { %v2914_v47 = vmul.f32 %v8586_v0, %v2751_v40  ;;  %1397 = vperm.xlu0 %7198, %v1333_v28   ;;  %v881_v28 = vadd.f32 %v849_v38, %v552_v18  ;;  %v850_v40 = vmul.f32 %v8467_v50, %v11051_v37  ;;  %v2428_v57 = vmul.f32 %v7205_v29, %v2396_v23  ;;  %v622_v38 = vld [vmem:[#allocation2 + $0x1a0] sm:$0xff]  ;;  %v11057_v23 = vld [vmem:[#allocation61_spill] sm:$0xff] }
 0x1b3   :  { %v2947_v56 = vadd.f32 %v2915_v20, %v2650_v7  ;;  %v2726_v7 = vmul.f32 %v2694_v52, %v7748_v36  ;;  %v2680_v20 = vadd.f32 %v2648_v32, %v2383_v11  ;;  %v11055_v36 = vrot.slane %v7861_v27, 7 }
 0x1b4   :  { %v2946_v17 = vadd.f32 %v2914_v47, %v2649_v16  ;;  %v8618_v63 = vpop.permute.xlu1 %413  ;;  %v11053_v47 = vld [vmem:[#allocation58_spill] sm:$0xff]  ;;  %v10860_v52 = vrot.slane %v8315_v61, 1  ;;  %v1246_v11 = vmul.f32 %v8472_v5, %v11057_v23  ;;  %v882_v29 = vadd.f32 %v850_v40, %v553_v33  ;;  %v11064_v23 = vld [vmem:[#allocation72_spill] sm:$0xff] }
 0x1b5   :  { %11050 = vst [vmem:[#allocation35_spill] sm:$0xff] %v8618_v63  ;;  %v8623_v31 = vadd.f32 %v8607_v4, %v2947_v56  ;;  %v2906_v30 = vpop.permute.xlu0 %2905  ;;  %2206 = vperm.xlu1 %7197, %v2130_v12   ;;  %v1244_v18 = vmul.f32 %v8472_v5, %v11053_v47  ;;  %v11054_v12 = vrot.slane %v8196_v41, 7  ;;  %v11059_v47 = vld [vmem:[#allocation62_spill] sm:$0xff] }
 0x1b6   :  { %v2945_v2 = vmul.f32 %v8586_v0, %v2906_v30  ;;  %1904 = vperm.xlu0 %7198, %v1832_v62   ;;  %v2985_v16 = vadd.f32 %v8607_v4, %v2946_v17  ;;  %v326_v62 = vld [vmem:[#allocation2 + $0xa0] sm:$0xff]  ;;  %v1245_v56 = vmul.f32 %v8472_v5, %v11059_v47  ;;  %v11060_v63 = vld [vmem:[#allocation70_spill] sm:$0xff]  ;;  %v11065_v47 = vld [vmem:[#allocation84_spill] sm:$0xff] }
 0x1b7   :  { %11052 = vst [vmem:[#allocation40_spill] sm:$0xff] %v8623_v31  ;;  %v8639_v32 = vsel %vm178_vm0, %v11055_v36, %v11054_v12  ;;  %v1541_v27 = vmul.f32 %v8502_v60, %v11060_v63  ;;  %v654_v36 = vmul.f32 %v622_v38, %v8196_v41  ;;  %v11062_v33 = vmax.f32 %v8623_v31, 0.0 }
 0x1b8   :  { %11056 = vst [vmem:[#allocation53_spill] sm:$0xff] %v8639_v32  ;;  %v2977_v17 = vadd.f32 %v2945_v2, %v2680_v20  ;;  %v8644_v37 = vpop.permute.xlu1 %1110  ;;  %v3017_v30 = vmax.f32 %v2985_v16, 0.0  ;;  %v358_v42 = vmul.f32 %v326_v62, %v8639_v32  ;;  %v1276_v16 = vadd.f32 %v1244_v18, %v881_v28  ;;  %v1018_v62 = vld [vmem:[#allocation2 + $0x2a8] sm:$0xff] }
 0x1b9   :  { %11058 = vst [vmem:[#allocation38_spill] sm:$0xff] %v8644_v37  ;;  %v8650_v12 = vpop.permute.xlu0 %710  ;;  %2810 = vperm.xlu1 %7197, %v2726_v7   ;;  %v8657_v40 = vrot.slane %v11062_v33, 1  ;;  %v1543_v63 = vmul.f32 %v8502_v60, %v11064_v23  ;;  %v1741_v7 = vmul.f32 %v8513_v51, %v11065_v47  ;;  %v11066_v38 = vrot.slane %v8211_v10, 1 }
 0x1ba   :  { %11061 = vst [vmem:[#allocation22_spill] sm:$0xff] %v8650_v12  ;;  %2508 = vperm.xlu0 %7198, %v2428_v57   ;;  %v3016_v20 = vadd.f32 %v8607_v4, %v2977_v17  ;;  %v3097_v2 = vrot.slane %v3017_v30, 1  ;;  %v1278_v17 = vadd.f32 %v1246_v11, %v883_v13  ;;  %v11067_v12 = vld [vmem:[#allocation73_spill] sm:$0xff]  ;;  %v1277_v18 = vadd.f32 %v1245_v56, %v882_v29 }
 0x1bb   :  { %11063 = vst [vmem:[#allocation56_spill] sm:$0xff] %v8657_v40  ;;  %v8668_v57 = vsel %vm900_vm1, %v10860_v52, %v11066_v38  ;;  %v1542_v33 = vmul.f32 %v8502_v60, %v11067_v12  ;;  %v1573_v23 = vadd.f32 %v1541_v27, %v1276_v16  ;;  %v2038_v47 = vmul.f32 %v8541_v44, %v8239_v59  ;;  %v1815_v38 = vld [vmem:[#allocation2 + $0x5c0] sm:$0xff] }
 0x1bc   :  { %v8672_v31 = vpop.permute.xlu1 %1637  ;;  %v3048_v28 = vmax.f32 %v3016_v20, 0.0  ;;  %v1348_v10 = vmul.f32 %v1316_v21, %v8236_v1  ;;  %v1743_v13 = vmul.f32 %v8513_v51, %v8155_v25  ;;  %v1050_v11 = vmul.f32 %v1018_v62, %v8668_v57  ;;  %v11069_v16 = vld [vmem:[#allocation79_spill] sm:$0xff] }
 0x1bd   :  { %v8676_v37 = vpop.permute.xlu0 %1412  ;;  %770 = vperm.xlu1 %7197, %v654_v36   ;;  %v3099_v12 = vsel %vm900_vm1, %v3097_v2, %v8657_v40  ;;  %v1575_v29 = vadd.f32 %v1543_v63, %v1278_v17  ;;  %v1773_v27 = vadd.f32 %v1741_v7, %v1573_v23  ;;  %v1742_v59 = vmul.f32 %v8513_v51, %v8157_v55  ;;  %v2411_v17 = vld [vmem:[#allocation2 + $0x7d0] sm:$0xff] }
 0x1be   :  { %11068 = vst [vmem:[#allocation66_spill] sm:$0xff] %v8676_v37  ;;  %473 = vperm.xlu0 %7198, %v358_v42   ;;  %v8684_v56 = vrot.slane %v3048_v28, 1  ;;  %v2335_v36 = vmul.f32 %v8548_v8, %v8339_v22  ;;  %v1574_v21 = vadd.f32 %v1542_v33, %v1277_v18  ;;  %v2040_v25 = vmul.f32 %v8541_v44, %v8252_v54  ;;  %v2113_v54 = vld [vmem:[#allocation2 + $0x6c8] sm:$0xff]  ;;  %v11096_v40 = vld [vmem:[#allocation105_spill] sm:$0xff] }
 0x1bf   :  { %v1847_v62 = vmul.f32 %v1815_v38, %v11069_v16  ;;  %v2070_v52 = vadd.f32 %v2038_v47, %v1773_v27  ;;  %v2632_v63 = vmul.f32 %v8567_v49, %v8447_v35  ;;  %v8701_v55 = vmax.f32 %v3017_v30, %v3099_v12  ;;  %v7206_v38 = vld [vmem:[%s10757_s0 + $0xd8] sm:$0xff] }
 0x1c0   :  { %v8692_v42 = vpop.permute.xlu1 %2221  ;;  %v3193_v20 = vsel %vm900_vm1, %v8684_v56, %v3097_v2  ;;  %v1775_v33 = vadd.f32 %v1743_v13, %v1575_v29  ;;  %v2039_v18 = vmul.f32 %v8541_v44, %v8254_v45  ;;  %v1774_v2 = vadd.f32 %v1742_v59, %v1574_v21  ;;  %v11071_v45 = vld [vmem:[#allocation27_spill] sm:$0xff]  ;;  %v11073_v21 = vld [vmem:[#allocation81_spill] sm:$0xff] }
 0x1c1   :  { %v8699_v7 = vpop.permute.xlu0 %1919  ;;  %1472 = vperm.xlu1 %7197, %v1348_v10   ;;  %11070 = vst [vmem:[#allocation46_spill] sm:$0xff] %v8701_v55  ;;  %v8703_v22 = vmax.f32 %v3048_v28, %v3193_v20  ;;  %v2367_v23 = vadd.f32 %v2335_v36, %v2070_v52  ;;  %v2337_v47 = vmul.f32 %v8548_v8, %v8352_v34  ;;  %v8727_v36 = vld [vmem:[%s10757_s0 + $0xb8] sm:$0xff] }
 0x1c2   :  { %1170 = vperm.xlu0 %7198, %v1050_v11   ;;  %v2072_v10 = vadd.f32 %v2040_v25, %v1775_v33  ;;  %v2336_v30 = vmul.f32 %v8548_v8, %v8354_v6  ;;  %v2443_v13 = vmul.f32 %v7206_v38, %v2411_v17  ;;  %v2145_v11 = vmul.f32 %v2113_v54, %v11071_v45  ;;  %v11072_v6 = vld [vmem:[#allocation132_spill] sm:$0xff]  ;;  %v310_v17 = vld [vmem:[#allocation2 + $0x20] sm:$0xff] }
 0x1c3   :  { %v3257_v35 = vmax.f32 %v8703_v22, %v8701_v55  ;;  %v2664_v12 = vadd.f32 %v2632_v63, %v2367_v23  ;;  %v2634_v52 = vmul.f32 %v8567_v49, %v8453_v43  ;;  %v2071_v27 = vadd.f32 %v2039_v18, %v1774_v2  ;;  %v11075_v43 = vld [vmem:[#allocation29_spill] sm:$0xff] }
 0x1c4   :  { %v2826_v28 = vpop.permute.xlu1 %2825  ;;  %v2633_v59 = vmul.f32 %v8567_v49, %v11072_v6  ;;  %v11074_v25 = vrot.slane %v11073_v21, 7  ;;  %v11076_v20 = vrot.slane %v11075_v43, 7  ;;  %v10863_v54 = vrot.slane %v8361_v58, 1  ;;  %v11077_v6 = vld [vmem:[#allocation25_spill] sm:$0xff] }
 0x1c5   :  { %v2929_v34 = vmul.f32 %v8586_v0, %v2826_v28  ;;  %6739 = vmatprep.subr.mxu0 %v3257_v35  ;;  %v8720_v29 = vpop.permute.xlu0 %2523  ;;  %1979 = vperm.xlu1 %7197, %v1847_v62   ;;  %v2709_v62 = vld [vmem:[#allocation2 + $0x8d8] sm:$0xff]  ;;  %v2369_v33 = vadd.f32 %v2337_v47, %v2072_v10  ;;  %v2368_v2 = vadd.f32 %v2336_v30, %v2071_v27  ;;  %v11078_v47 = vrot.slane %v8261_v24, 1  ;;  %v1002_v30 = vld [vmem:[#allocation2 + $0x228] sm:$0xff]  ;;  %v11081_v27 = vld [vmem:[#allocation51_spill] sm:$0xff] }
 0x1c6   :  { %1685 = vperm.xlu0 %7198, %v8727_v36   ;;  %v8735_v63 = vsel %vm178_vm0, %v11076_v20, %v11074_v25  ;;  %v2741_v43 = vmul.f32 %v2709_v62, %v11077_v6 }
 0x1c7   :  { %v2961_v18 = vadd.f32 %v2929_v34, %v2664_v12  ;;  %v2666_v35 = vadd.f32 %v2634_v52, %v2369_v33  ;;  %v342_v45 = vmul.f32 %v310_v17, %v8735_v63  ;;  %v2665_v55 = vadd.f32 %v2633_v59, %v2368_v2  ;;  %v11082_v17 = vld [vmem:[#allocation52_spill] sm:$0xff] }
 0x1c8   :  { %v2836_v23 = vpop.permute.xlu1 %2835  ;;  %v8748_v10 = vsel %vm900_vm1, %v10863_v54, %v11078_v47  ;;  %v864_v59 = vmul.f32 %v8467_v50, %v11081_v27  ;;  %v567_v62 = vmul.f32 %v8462_v26, %v11082_v17  ;;  %v2097_v17 = vld [vmem:[#allocation2 + $0x648] sm:$0xff] }
 0x1c9   :  { %v2931_v28 = vmul.f32 %v8586_v0, %v2836_v23  ;;  %v2831_v38 = vpop.permute.xlu0 %2830  ;;  %2583 = vperm.xlu1 %7197, %v2443_v13   ;;  %v3000_v25 = vadd.f32 %v8607_v4, %v2961_v18  ;;  %11079 = vst [vmem:[#allocation43_spill] sm:$0xff] %v8748_v10  ;;  %v606_v13 = vld [vmem:[#allocation2 + $0x120] sm:$0xff]  ;;  %v1034_v33 = vmul.f32 %v1002_v30, %v8748_v10 }
 0x1ca   :  { %v2930_v20 = vmul.f32 %v8586_v0, %v2831_v38  ;;  %2281 = vperm.xlu0 %7198, %v2145_v11   ;;  %v896_v47 = vadd.f32 %v864_v59, %v567_v62  ;;  %v11091_v59 = vld [vmem:[#allocation92_spill] sm:$0xff] }
 0x1cb   :  { %v2963_v12 = vadd.f32 %v2931_v28, %v2666_v35  ;;  %v3032_v2 = vmax.f32 %v3000_v25, 0.0  ;;  %v1300_v35 = vld [vmem:[#allocation2 + $0x330] sm:$0xff]  ;;  %v1756_v62 = vmul.f32 %v8513_v51, %v11091_v59  ;;  %v11095_v59 = vld [vmem:[#allocation31_spill] sm:$0xff] }
 0x1cc   :  { %v2962_v52 = vadd.f32 %v2930_v20, %v2665_v55  ;;  %v8750_v34 = vpop.permute.xlu1 %785  ;;  %v638_v55 = vmul.f32 %v606_v13, %v11073_v21  ;;  %v11085_v28 = vld [vmem:[#allocation65_spill] sm:$0xff]  ;;  %v2129_v54 = vmul.f32 %v2097_v17, %v11095_v59 }
 0x1cd   :  { %11080 = vst [vmem:[#allocation44_spill] sm:$0xff] %v8750_v34  ;;  %v8757_v11 = vadd.f32 %v8607_v4, %v2963_v12  ;;  %v8759_v24 = vpop.permute.xlu0 %488  ;;  %393 = vperm.xlu1 %7197, %v342_v45   ;;  %v1259_v38 = vmul.f32 %v8472_v5, %v11085_v28  ;;  %v11090_v12 = vld [vmem:[#allocation104_spill] sm:$0xff]  ;;  %v1799_v28 = vld [vmem:[#allocation2 + $0x540] sm:$0xff]  ;;  %v2693_v34 = vld [vmem:[#allocation2 + $0x858] sm:$0xff] }
 0x1ce   :  { %11084 = vst [vmem:[#allocation49_spill] sm:$0xff] %v8759_v24  ;;  %v3001_v18 = vadd.f32 %v8607_v4, %v2962_v52  ;;  %2885 = vperm.xlu0 %7198, %v2741_v43   ;;  %v11089_v43 = vld [vmem:[#allocation76_spill] sm:$0xff]  ;;  %v1332_v13 = vmul.f32 %v1300_v35, %v11090_v12  ;;  %v8778_v52 = vrot.slane %v3032_v2, 1  ;;  %v8793_v35 = vld [vmem:[%s10757_s0 + $0x38] sm:$0xff]  ;;  %v2053_v24 = vmul.f32 %v8541_v44, %v11096_v40 }
 0x1cf   :  { %11083 = vst [vmem:[#allocation47_spill] sm:$0xff] %v8757_v11  ;;  %v10862_v23 = vmax.f32 %v8757_v11, 0.0  ;;  %v1556_v25 = vmul.f32 %v8502_v60, %v11089_v43  ;;  %11093 = vst [vmem:[#allocation70_spill] sm:$0xff] %v8793_v35 }
 0x1d0   :  { %v8767_v6 = vpop.permute.xlu1 %1487  ;;  %v3033_v20 = vmax.f32 %v3001_v18, 0.0  ;;  %v1291_v18 = vadd.f32 %v1259_v38, %v896_v47 }
 0x1d1   :  { %11086 = vst [vmem:[#allocation50_spill] sm:$0xff] %v8767_v6  ;;  %v8771_v45 = vrot.slane %v10862_v23, 1  ;;  %v8773_v30 = vpop.permute.xlu0 %1185  ;;  %1090 = vperm.xlu1 %7197, %v1034_v33   ;;  %v2395_v6 = vld [vmem:[#allocation2 + $0x750] sm:$0xff] }
 0x1d2   :  { %11088 = vst [vmem:[#allocation61_spill] sm:$0xff] %v8773_v30  ;;  %690 = vperm.xlu0 %7198, %v638_v55   ;;  %v3128_v27 = vrot.slane %v3033_v20, 1  ;;  %v1588_v11 = vadd.f32 %v1556_v25, %v1291_v18  ;;  %v11099_v25 = vld [vmem:[#allocation26_spill] sm:$0xff] }
 0x1d3   :  { %11087 = vst [vmem:[#allocation58_spill] sm:$0xff] %v8771_v45  ;;  %v2725_v40 = vmul.f32 %v2693_v34, %v11099_v25  ;;  %v11104_v25 = vld [vmem:[#allocation55_spill] sm:$0xff] }
 0x1d4   :  { %v8782_v23 = vpop.permute.xlu1 %1994  ;;  %v3129_v33 = vsel %vm900_vm1, %v8778_v52, %v3128_v27  ;;  %v3131_v43 = vsel %vm900_vm1, %v3128_v27, %v8771_v45  ;;  %v11097_v27 = vld [vmem:[#allocation89_spill] sm:$0xff]  ;;  %v1788_v37 = vadd.f32 %v1756_v62, %v1588_v11  ;;  %v7209_v11 = vld [vmem:[%s10757_s0 + $0x58] sm:$0xff] }
 0x1d5   :  { %v8788_v55 = vpop.permute.xlu0 %1697  ;;  %1621 = vperm.xlu1 %7197, %v8793_v35   ;;  %v8796_v38 = vmax.f32 %v3032_v2, %v3129_v33  ;;  %v8798_v47 = vmax.f32 %v3033_v20, %v3131_v43  ;;  %v1831_v45 = vmul.f32 %v1799_v28, %v11097_v27  ;;  %v2647_v28 = vmul.f32 %v8567_v49, %v8573_v3  ;;  %v621_v62 = vld [vmem:[#allocation2 + $0x198] sm:$0xff]  ;;  %v8825_v3 = vld [vmem:[%s10757_s0 + $0x90] sm:$0xff] }
 0x1d6   :  { %11092 = vst [vmem:[#allocation62_spill] sm:$0xff] %v8788_v55  ;;  %1392 = vperm.xlu0 %7198, %v1332_v13   ;;  %v11098_v55 = vld [vmem:[#allocation122_spill] sm:$0xff]  ;;  %v2085_v13 = vadd.f32 %v2053_v24, %v1788_v37  ;;  %v2427_v18 = vmul.f32 %v7209_v11, %v2395_v6  ;;  %11102 = vst [vmem:[#allocation73_spill] sm:$0xff] %v8825_v3  ;;  %v653_v37 = vmul.f32 %v8825_v3, %v621_v62  ;;  %v11105_v11 = vld [vmem:[#allocation71_spill] sm:$0xff] }
 0x1d7   :  { %11094 = vst [vmem:[#allocation72_spill] sm:$0xff] %v8798_v47  ;;  %v3241_v30 = vmax.f32 %v8796_v38, %v8798_v47  ;;  %v2350_v2 = vmul.f32 %v8548_v8, %v11098_v55  ;;  %v325_v33 = vld [vmem:[#allocation2 + $0x98] sm:$0xff]  ;;  %v11107_v47 = vrot.slane %v8196_v41, 1 }
 0x1d8   :  { %v8808_v20 = vpop.permute.xlu1 %2598  ;;  %v11103_v6 = vld [vmem:[#allocation54_spill] sm:$0xff] }
 0x1d9   :  { %6740 = vmatpush3.msra.mxu0 %v3241_v30  ;;  %v8810_v17 = vpop.permute.xlu0 %2296  ;;  %2201 = vperm.xlu1 %7197, %v2129_v54   ;;  %v2382_v43 = vadd.f32 %v2350_v2, %v2085_v13  ;;  %v11101_v30 = vld [vmem:[#allocation59_spill] sm:$0xff]  ;;  %v1315_v2 = vld [vmem:[#allocation2 + $0x3a8] sm:$0xff]  ;;  %v551_v13 = vmul.f32 %v8462_v26, %v11104_v25  ;;  %v11112_v25 = vld [vmem:[#allocation113_spill] sm:$0xff] }
 0x1da   :  { %1899 = vperm.xlu0 %7198, %v1831_v45   ;;  %v848_v54 = vmul.f32 %v8467_v50, %v11101_v30  ;;  %v357_v45 = vmul.f32 %v325_v33, %v11103_v6  ;;  %v11106_v30 = vrot.slane %v8315_v61, 1  ;;  %v11110_v33 = vld [vmem:[#allocation85_spill] sm:$0xff]  ;;  %v11113_v35 = vld [vmem:[#allocation98_spill] sm:$0xff] }
 0x1db   :  { %v2679_v34 = vadd.f32 %v2647_v28, %v2382_v43  ;;  %v1017_v28 = vld [vmem:[#allocation2 + $0x2a0] sm:$0xff] }
 0x1dc   :  { %v8818_v55 = vpop.permute.xlu1 %408 }
 0x1dd   :  { %11100 = vst [vmem:[#allocation84_spill] sm:$0xff] %v8818_v55  ;;  %v2901_v59 = vpop.permute.xlu0 %2900  ;;  %2805 = vperm.xlu1 %7197, %v2725_v40   ;;  %v1243_v40 = vmul.f32 %v8472_v5, %v11105_v11  ;;  %v8839_v55 = vsel %vm900_vm1, %v11107_v47, %v11106_v30  ;;  %v1347_v11 = vmul.f32 %v1315_v2, %v11112_v25  ;;  %v1814_v47 = vld [vmem:[#allocation2 + $0x5b8] sm:$0xff]  ;;  %v11117_v2 = vld [vmem:[#allocation99_spill] sm:$0xff] }
 0x1de   :  { %v2944_v24 = vmul.f32 %v8586_v0, %v2901_v59  ;;  %2503 = vperm.xlu0 %7198, %v2427_v18   ;;  %11108 = vst [vmem:[#allocation79_spill] sm:$0xff] %v8839_v55  ;;  %v880_v18 = vadd.f32 %v848_v54, %v551_v13  ;;  %v1540_v59 = vmul.f32 %v8502_v60, %v11110_v33  ;;  %v11115_v33 = vld [vmem:[#allocation114_spill] sm:$0xff] }
 0x1df   :  { %v1049_v41 = vmul.f32 %v1017_v28, %v8839_v55  ;;  %v2410_v28 = vld [vmem:[#allocation2 + $0x7c8] sm:$0xff] }
 0x1e0   :  { %v2976_v62 = vadd.f32 %v2944_v24, %v2679_v34  ;;  %v8841_v43 = vpop.permute.xlu1 %1105  ;;  %v1275_v30 = vadd.f32 %v1243_v40, %v880_v18  ;;  %v1740_v34 = vmul.f32 %v8513_v51, %v11113_v35  ;;  %v11118_v18 = vld [vmem:[#allocation131_spill] sm:$0xff]  ;;  %v11150_v55 = vld [vmem:[#allocation96_spill] sm:$0xff] }
 0x1e1   :  { %11109 = vst [vmem:[#allocation27_spill] sm:$0xff] %v8841_v43  ;;  %v8845_v3 = vpop.permute.xlu0 %705  ;;  %765 = vperm.xlu1 %7197, %v653_v37   ;;  %v2334_v35 = vmul.f32 %v8548_v8, %v11118_v18  ;;  %v1539_v27 = vmul.f32 %v8502_v60, %v11150_v55  ;;  %v11156_v55 = vld [vmem:[#allocation128_spill] sm:$0xff] }
 0x1e2   :  { %11111 = vst [vmem:[#allocation132_spill] sm:$0xff] %v8845_v3  ;;  %v3015_v61 = vadd.f32 %v8607_v4, %v2976_v62  ;;  %468 = vperm.xlu0 %7198, %v357_v45   ;;  %v1572_v13 = vadd.f32 %v1540_v59, %v1275_v30  ;;  %v2037_v3 = vmul.f32 %v8541_v44, %v11115_v33  ;;  %v8880_v33 = vld [vmem:[%s10757_s0 + $0xb0] sm:$0xff] }
 0x1e3   :  { %v1846_v62 = vmul.f32 %v1814_v47, %v11117_v2  ;;  %11119 = vst [vmem:[#allocation25_spill] sm:$0xff] %v8880_v33  ;;  %v11122_v2 = vld [vmem:[#allocation28_spill] sm:$0xff] }
 0x1e4   :  { %v3047_v24 = vmax.f32 %v3015_v61, 0.0  ;;  %v8852_v54 = vpop.permute.xlu1 %1633  ;;  %v1772_v40 = vadd.f32 %v1740_v34, %v1572_v13  ;;  %v2112_v61 = vld [vmem:[#allocation2 + $0x6c0] sm:$0xff]  ;;  %v7211_v34 = vld [vmem:[%s10757_s0 + $0xd0] sm:$0xff] }
 0x1e5   :  { %11114 = vst [vmem:[#allocation81_spill] sm:$0xff] %v8852_v54  ;;  %v8856_v37 = vpop.permute.xlu0 %1407  ;;  %1467 = vperm.xlu1 %7197, %v1347_v11   ;;  %v2631_v11 = vmul.f32 %v8567_v49, %v8720_v29  ;;  %v2442_v13 = vmul.f32 %v7211_v34, %v2410_v28  ;;  %v309_v29 = vld [vmem:[#allocation2 + $0x18] sm:$0xff] }
 0x1e6   :  { %11116 = vst [vmem:[#allocation29_spill] sm:$0xff] %v8856_v37  ;;  %v8859_v45 = vrot.slane %v3047_v24, 1  ;;  %1165 = vperm.xlu0 %7198, %v1049_v41   ;;  %v2069_v30 = vadd.f32 %v2037_v3, %v1772_v40  ;;  %v11121_v34 = vld [vmem:[#allocation42_spill] sm:$0xff] }
 0x1e7   :  { %v341_v54 = vmul.f32 %v309_v29, %v11121_v34  ;;  %v11129_v29 = vld [vmem:[#allocation64_spill] sm:$0xff] }
 0x1e8   :  { %v8863_v43 = vpop.permute.xlu1 %2216  ;;  %v3159_v59 = vsel %vm900_vm1, %v8859_v45, %v8684_v56  ;;  %v11120_v56 = vld [vmem:[#allocation34_spill] sm:$0xff]  ;;  %v2366_v40 = vadd.f32 %v2334_v35, %v2069_v30  ;;  %v11124_v35 = vrot.slane %v11073_v21, 1  ;;  %v1001_v30 = vld [vmem:[#allocation2 + $0x220] sm:$0xff]  ;;  %v566_v21 = vmul.f32 %v8462_v26, %v11129_v29 }
 0x1e9   :  { %v8870_v47 = vpop.permute.xlu0 %1914  ;;  %1974 = vperm.xlu1 %7197, %v1846_v62   ;;  %v8872_v41 = vmax.f32 %v3047_v24, %v3159_v59  ;;  %v2144_v3 = vmul.f32 %v2112_v61, %v11120_v56  ;;  %v2708_v62 = vld [vmem:[#allocation2 + $0x8d0] sm:$0xff]  ;;  %v11123_v61 = vrot.slane %v8361_v58, 1  ;;  %v605_v56 = vld [vmem:[#allocation2 + $0x118] sm:$0xff] }
 0x1ea   :  { %1681 = vperm.xlu0 %7198, %v8880_v33   ;;  %v2663_v59 = vadd.f32 %v2631_v11, %v2366_v40  ;;  %v2740_v25 = vmul.f32 %v2708_v62, %v11122_v2  ;;  %v11128_v2 = vld [vmem:[#allocation63_spill] sm:$0xff] }
 0x1eb   :  { %v3256_v24 = vmax.f32 %v8872_v41, %v8703_v22  ;;  %v8896_v22 = vsel %vm900_vm1, %v11124_v35, %v11123_v61  ;;  %v863_v58 = vmul.f32 %v8467_v50, %v11128_v2  ;;  %v11131_v61 = vld [vmem:[#allocation77_spill] sm:$0xff]  ;;  %v11134_v2 = vld [vmem:[#allocation90_spill] sm:$0xff] }
 0x1ec   :  { %v2821_v18 = vpop.permute.xlu1 %2820  ;;  %11125 = vst [vmem:[#allocation51_spill] sm:$0xff] %v8896_v22  ;;  %v1555_v29 = vmul.f32 %v8502_v60, %v11134_v2 }
 0x1ed   :  { %v2928_v37 = vmul.f32 %v8586_v0, %v2821_v18  ;;  %6741 = vmatprep.subr.mxu0 %v3256_v24  ;;  %v8887_v28 = vpop.permute.xlu0 %2518  ;;  %2578 = vperm.xlu1 %7197, %v2442_v13  }
 0x1ee   :  { %2276 = vperm.xlu0 %7198, %v2144_v3   ;;  %v1033_v3 = vmul.f32 %v1001_v30, %v8896_v22 }
 0x1ef   :  { %v2960_v11 = vadd.f32 %v2928_v37, %v2663_v59  ;;  %v8911_v37 = vld [vmem:[%s10757_s0 + $0x10] sm:$0xff]  ;;  %v1299_v59 = vld [vmem:[#allocation2 + $0x328] sm:$0xff] }
 0x1f0   :  { %v8898_v40 = vpop.permute.xlu1 %780  ;;  %11130 = vst [vmem:[#allocation76_spill] sm:$0xff] %v8911_v37  ;;  %v637_v62 = vmul.f32 %v8911_v37, %v605_v56  ;;  %v2096_v56 = vld [vmem:[#allocation2 + $0x640] sm:$0xff] }
 0x1f1   :  { %11126 = vst [vmem:[#allocation52_spill] sm:$0xff] %v8898_v40  ;;  %v2999_v24 = vadd.f32 %v8607_v4, %v2960_v11  ;;  %v8901_v13 = vpop.permute.xlu0 %483  ;;  %388 = vperm.xlu1 %7197, %v341_v54   ;;  %v1258_v54 = vmul.f32 %v8472_v5, %v11131_v61  ;;  %v1798_v61 = vld [vmem:[#allocation2 + $0x538] sm:$0xff] }
 0x1f2   :  { %11127 = vst [vmem:[#allocation65_spill] sm:$0xff] %v8901_v13  ;;  %2880 = vperm.xlu0 %7198, %v2740_v25   ;;  %v895_v25 = vadd.f32 %v863_v58, %v566_v21  ;;  %v11135_v13 = vld [vmem:[#allocation21_spill] sm:$0xff] }
 0x1f3   :  { %v3031_v18 = vmax.f32 %v2999_v24, 0.0  ;;  %v1331_v40 = vmul.f32 %v1299_v59, %v11135_v13  ;;  %v8939_v21 = vld [vmem:[%s10757_s0 + $0x30] sm:$0xff] }
 0x1f4   :  { %v8916_v35 = vpop.permute.xlu1 %1482  ;;  %v1290_v22 = vadd.f32 %v1258_v54, %v895_v25  ;;  %11139 = vst [vmem:[#allocation122_spill] sm:$0xff] %v8939_v21  ;;  %v11141_v54 = vld [vmem:[#allocation120_spill] sm:$0xff] }
 0x1f5   :  { %11132 = vst [vmem:[#allocation104_spill] sm:$0xff] %v8916_v35  ;;  %v8918_v30 = vrot.slane %v3031_v18, 1  ;;  %v8920_v11 = vpop.permute.xlu0 %1180  ;;  %1085 = vperm.xlu1 %7197, %v1033_v3   ;;  %v11136_v35 = vld [vmem:[#allocation106_spill] sm:$0xff]  ;;  %v2052_v25 = vmul.f32 %v8541_v44, %v11141_v54 }
 0x1f6   :  { %11133 = vst [vmem:[#allocation92_spill] sm:$0xff] %v8920_v11  ;;  %685 = vperm.xlu0 %7198, %v637_v62   ;;  %v1755_v37 = vmul.f32 %v8513_v51, %v11136_v35  ;;  %v11140_v62 = vld [vmem:[#allocation45_spill] sm:$0xff]  ;;  %v1587_v59 = vadd.f32 %v1555_v29, %v1290_v22  ;;  %v11142_v35 = vld [vmem:[#allocation107_spill] sm:$0xff]  ;;  %v2394_v11 = vld [vmem:[#allocation2 + $0x748] sm:$0xff] }
 0x1f7   :  { %v3127_v24 = vsel %vm900_vm1, %v8918_v30, %v8778_v52  ;;  %v2128_v52 = vmul.f32 %v2096_v56, %v11140_v62  ;;  %v1830_v2 = vmul.f32 %v1798_v61, %v11142_v35  ;;  %v11143_v22 = vld [vmem:[#allocation32_spill] sm:$0xff]  ;;  %v620_v62 = vld [vmem:[#allocation2 + $0x190] sm:$0xff] }
 0x1f8   :  { %v8930_v33 = vpop.permute.xlu1 %1989  ;;  %v8932_v3 = vmax.f32 %v3031_v18, %v3127_v24  ;;  %v2692_v24 = vld [vmem:[#allocation2 + $0x850] sm:$0xff] }
 0x1f9   :  { %11137 = vst [vmem:[#allocation31_spill] sm:$0xff] %v8930_v33  ;;  %v8934_v58 = vpop.permute.xlu0 %1693  ;;  %1617 = vperm.xlu1 %7197, %v8939_v21   ;;  %v2349_v33 = vmul.f32 %v8548_v8, %v8577_v46  ;;  %v2724_v29 = vmul.f32 %v2692_v24, %v11143_v22  ;;  %v324_v46 = vld [vmem:[#allocation2 + $0x90] sm:$0xff] }
 0x1fa   :  { %11138 = vst [vmem:[#allocation105_spill] sm:$0xff] %v8934_v58  ;;  %1387 = vperm.xlu0 %7198, %v1331_v40   ;;  %v3240_v18 = vmax.f32 %v8932_v3, %v8796_v38  ;;  %v1787_v58 = vadd.f32 %v1755_v37, %v1587_v59  ;;  %v2646_v38 = vmul.f32 %v8567_v49, %v8808_v20  ;;  %v7215_v37 = vld [vmem:[%s10757_s0 + $0x50] sm:$0xff]  ;;  %v7216_v20 = vld [vmem:[%s10757_s0 + $0x88] sm:$0xff] }
 0x1fb   :  { %v2426_v61 = vmul.f32 %v7215_v37, %v2394_v11  ;;  %v11146_v21 = vld [vmem:[#allocation69_spill] sm:$0xff]  ;;  %v11148_v37 = vld [vmem:[#allocation82_spill] sm:$0xff] }
 0x1fc   :  { %v8950_v13 = vpop.permute.xlu1 %2593  ;;  %6742 = vmatpush3.msra.mxu0 %v3240_v18  ;;  %v2084_v40 = vadd.f32 %v2052_v25, %v1787_v58  ;;  %v11145_v18 = vld [vmem:[#allocation68_spill] sm:$0xff]  ;;  %v550_v58 = vmul.f32 %v8462_v26, %v11146_v21 }
 0x1fd   :  { %v8952_v56 = vpop.permute.xlu0 %2291  ;;  %2196 = vperm.xlu1 %7197, %v2128_v52   ;;  %v847_v52 = vmul.f32 %v8467_v50, %v11145_v18  ;;  %v1242_v18 = vmul.f32 %v8472_v5, %v11148_v37  ;;  %v2036_v37 = vmul.f32 %v8541_v44, %v11156_v55 }
 0x1fe   :  { %1894 = vperm.xlu0 %7198, %v1830_v2   ;;  %v2381_v59 = vadd.f32 %v2349_v33, %v2084_v40  ;;  %v652_v2 = vmul.f32 %v7216_v20, %v620_v62  ;;  %v11147_v33 = vld [vmem:[#allocation24_spill] sm:$0xff]  ;;  %v1314_v40 = vld [vmem:[#allocation2 + $0x3a0] sm:$0xff] }
 0x1ff   :  { %v356_v22 = vmul.f32 %v324_v46, %v11147_v33  ;;  %v11153_v46 = vld [vmem:[#allocation95_spill] sm:$0xff] }
 0x200   :  { %v8960_v54 = vpop.permute.xlu1 %403  ;;  %v2678_v24 = vadd.f32 %v2646_v38, %v2381_v59  ;;  %v11152_v38 = vld [vmem:[#allocation127_spill] sm:$0xff] }
 0x201   :  { %11144 = vst [vmem:[#allocation26_spill] sm:$0xff] %v8960_v54  ;;  %v2896_v25 = vpop.permute.xlu0 %2895  ;;  %2800 = vperm.xlu1 %7197, %v2724_v29   ;;  %v1016_v54 = vld [vmem:[#allocation2 + $0x298] sm:$0xff]  ;;  %v879_v29 = vadd.f32 %v847_v52, %v550_v58  ;;  %v1346_v62 = vmul.f32 %v1314_v40, %v11152_v38  ;;  %v11154_v33 = vld [vmem:[#allocation111_spill] sm:$0xff] }
 0x202   :  { %v2943_v11 = vmul.f32 %v8586_v0, %v2896_v25  ;;  %2498 = vperm.xlu0 %7198, %v2426_v61   ;;  %v1048_v59 = vmul.f32 %v1016_v54, %v11153_v46  ;;  %v1813_v25 = vld [vmem:[#allocation2 + $0x5b0] sm:$0xff]  ;;  %v11158_v40 = vld [vmem:[#allocation115_spill] sm:$0xff] }
 0x203   :  { %v1274_v20 = vadd.f32 %v1242_v18, %v879_v29  ;;  %v2409_v54 = vld [vmem:[#allocation2 + $0x7c0] sm:$0xff]  ;;  %v2333_v29 = vmul.f32 %v8548_v8, %v8692_v42  ;;  %v7217_v42 = vld [vmem:[%s10757_s0 + $0xc8] sm:$0xff] }
 0x204   :  { %v2975_v35 = vadd.f32 %v2943_v11, %v2678_v24  ;;  %v8973_v21 = vpop.permute.xlu1 %1100  ;;  %v1739_v24 = vmul.f32 %v8513_v51, %v11154_v33 }
 0x205   :  { %11149 = vst [vmem:[#allocation59_spill] sm:$0xff] %v8973_v21  ;;  %v8977_v10 = vpop.permute.xlu0 %700  ;;  %760 = vperm.xlu1 %7197, %v652_v2   ;;  %v1571_v58 = vadd.f32 %v1539_v27, %v1274_v20 }
 0x206   :  { %11151 = vst [vmem:[#allocation54_spill] sm:$0xff] %v8977_v10  ;;  %v3014_v61 = vadd.f32 %v8607_v4, %v2975_v35  ;;  %463 = vperm.xlu0 %7198, %v356_v22   ;;  %v1845_v35 = vmul.f32 %v1813_v25, %v11158_v40 }
 0x207   :  { %v1771_v18 = vadd.f32 %v1739_v24, %v1571_v58  ;;  %v2441_v24 = vmul.f32 %v7217_v42, %v2409_v54  ;;  %v9012_v58 = vld [vmem:[%s10757_s0 + $0xa8] sm:$0xff]  ;;  %v11161_v42 = vld [vmem:[#allocation23_spill] sm:$0xff] }
 0x208   :  { %v3046_v11 = vmax.f32 %v3014_v61, 0.0  ;;  %v8984_v52 = vpop.permute.xlu1 %1629  ;;  %v2111_v61 = vld [vmem:[#allocation2 + $0x6b8] sm:$0xff] }
 0x209   :  { %11155 = vst [vmem:[#allocation55_spill] sm:$0xff] %v8984_v52  ;;  %v8988_v2 = vpop.permute.xlu0 %1402  ;;  %1462 = vperm.xlu1 %7197, %v1346_v62   ;;  %v2068_v20 = vadd.f32 %v2036_v37, %v1771_v18  ;;  %v2630_v62 = vmul.f32 %v8567_v49, %v8887_v28  ;;  %v308_v28 = vld [vmem:[#allocation2 + $0x10] sm:$0xff] }
 0x20a   :  { %11157 = vst [vmem:[#allocation71_spill] sm:$0xff] %v8988_v2  ;;  %v8991_v22 = vrot.slane %v3046_v11, 1  ;;  %1160 = vperm.xlu0 %7198, %v1048_v59   ;;  %v340_v21 = vmul.f32 %v308_v28, %v11161_v42  ;;  %v11162_v2 = vld [vmem:[#allocation37_spill] sm:$0xff] }
 0x20b   :  { %v2365_v37 = vadd.f32 %v2333_v29, %v2068_v20  ;;  %v604_v29 = vld [vmem:[#allocation2 + $0x110] sm:$0xff] }
 0x20c   :  { %v8995_v33 = vpop.permute.xlu1 %2211  ;;  %v3157_v27 = vsel %vm900_vm1, %v8991_v22, %v8859_v45  ;;  %v11160_v45 = vld [vmem:[#allocation57_spill] sm:$0xff] }
 0x20d   :  { %v9002_v25 = vpop.permute.xlu0 %1909  ;;  %1969 = vperm.xlu1 %7197, %v1845_v35   ;;  %v9004_v59 = vmax.f32 %v3046_v11, %v3157_v27  ;;  %v2143_v55 = vmul.f32 %v2111_v61, %v11160_v45  ;;  %v2707_v35 = vld [vmem:[#allocation2 + $0x8c8] sm:$0xff]  ;;  %v2662_v27 = vadd.f32 %v2630_v62, %v2365_v37  ;;  %v1000_v61 = vld [vmem:[#allocation2 + $0x218] sm:$0xff] }
 0x20e   :  { %11159 = vst [vmem:[#allocation85_spill] sm:$0xff] %v9002_v25  ;;  %1677 = vperm.xlu0 %7198, %v9012_v58   ;;  %v2739_v52 = vmul.f32 %v2707_v35, %v11162_v2  ;;  %v11165_v62 = vld [vmem:[#allocation86_spill] sm:$0xff]  ;;  %v1298_v35 = vld [vmem:[#allocation2 + $0x320] sm:$0xff] }
 0x20f   :  { %v3255_v11 = vmax.f32 %v9004_v59, %v8872_v41  ;;  %v1032_v37 = vmul.f32 %v1000_v61, %v11165_v62 }
 0x210   :  { %v2816_v18 = vpop.permute.xlu1 %2815 }
 0x211   :  { %v2927_v10 = vmul.f32 %v8586_v0, %v2816_v18  ;;  %6743 = vmatprep.subr.mxu0 %v3255_v11  ;;  %v9019_v54 = vpop.permute.xlu0 %2513  ;;  %2573 = vperm.xlu1 %7197, %v2441_v24   ;;  %v11166_v11 = vld [vmem:[#allocation74_spill] sm:$0xff]  ;;  %v11167_v18 = vld [vmem:[#allocation75_spill] sm:$0xff] }
 0x212   :  { %2271 = vperm.xlu0 %7198, %v2143_v55   ;;  %v862_v24 = vmul.f32 %v8467_v50, %v11166_v11  ;;  %v565_v55 = vmul.f32 %v8462_v26, %v11167_v18  ;;  %v11171_v26 = vld [vmem:[#allocation102_spill] sm:$0xff]  ;;  %v1330_v11 = vmul.f32 %v1298_v35, %v8492_v19  ;;  %v2051_v35 = vmul.f32 %v8541_v44, %v8550_v14 }
 0x213   :  { %v2959_v45 = vadd.f32 %v2927_v10, %v2662_v27  ;;  %v7219_v10 = vld [vmem:[%s10757_s0 + $0x8] sm:$0xff]  ;;  %v11168_v27 = vld [vmem:[#allocation91_spill] sm:$0xff] }
 0x214   :  { %v9023_v20 = vpop.permute.xlu1 %775  ;;  %v636_v2 = vmul.f32 %v7219_v10, %v604_v29  ;;  %v1257_v42 = vmul.f32 %v8472_v5, %v11168_v27  ;;  %v894_v50 = vadd.f32 %v862_v24, %v565_v55  ;;  %v2095_v29 = vld [vmem:[#allocation2 + $0x638] sm:$0xff]  ;;  %v1797_v5 = vld [vmem:[#allocation2 + $0x530] sm:$0xff]  ;;  %v11175_v55 = vld [vmem:[#allocation67_spill] sm:$0xff] }
 0x215   :  { %11163 = vst [vmem:[#allocation98_spill] sm:$0xff] %v9023_v20  ;;  %v2998_v41 = vadd.f32 %v8607_v4, %v2959_v45  ;;  %v9026_v25 = vpop.permute.xlu0 %478  ;;  %383 = vperm.xlu1 %7197, %v340_v21   ;;  %v11172_v10 = vld [vmem:[#allocation121_spill] sm:$0xff] }
 0x216   :  { %11164 = vst [vmem:[#allocation114_spill] sm:$0xff] %v9026_v25  ;;  %2875 = vperm.xlu0 %7198, %v2739_v52   ;;  %v1554_v52 = vmul.f32 %v8502_v60, %v11171_v26  ;;  %v1289_v18 = vadd.f32 %v1257_v42, %v894_v50  ;;  %v1754_v27 = vmul.f32 %v8513_v51, %v11172_v10  ;;  %v9061_v60 = vld [vmem:[%s10757_s0 + $0x28] sm:$0xff]  ;;  %v2393_v26 = vld [vmem:[#allocation2 + $0x740] sm:$0xff] }
 0x217   :  { %v3030_v28 = vmax.f32 %v2998_v41, 0.0  ;;  %v2691_v50 = vld [vmem:[#allocation2 + $0x848] sm:$0xff]  ;;  %v2348_v10 = vmul.f32 %v8548_v8, %v8810_v17  ;;  %v1015_v17 = vld [vmem:[#allocation2 + $0x290] sm:$0xff] }
 0x218   :  { %v9038_v21 = vpop.permute.xlu1 %1477 }
 0x219   :  { %11169 = vst [vmem:[#allocation131_spill] sm:$0xff] %v9038_v21  ;;  %v9040_v61 = vrot.slane %v3030_v28, 1  ;;  %v9042_v45 = vpop.permute.xlu0 %1175  ;;  %1080 = vperm.xlu1 %7197, %v1032_v37  }
 0x21a   :  { %11170 = vst [vmem:[#allocation34_spill] sm:$0xff] %v9042_v45  ;;  %680 = vperm.xlu0 %7198, %v636_v2   ;;  %v1586_v2 = vadd.f32 %v1554_v52, %v1289_v18  ;;  %v11177_v52 = vld [vmem:[#allocation48_spill] sm:$0xff]  ;;  %v11186_v45 = vld [vmem:[#allocation130_spill] sm:$0xff] }
 0x21b   :  { %v3125_v41 = vsel %vm900_vm1, %v9040_v61, %v8918_v30  ;;  %v2127_v30 = vmul.f32 %v2095_v29, %v11175_v55  ;;  %v2723_v14 = vmul.f32 %v2691_v50, %v11177_v52  ;;  %v1812_v52 = vld [vmem:[#allocation2 + $0x5a8] sm:$0xff] }
 0x21c   :  { %v9052_v25 = vpop.permute.xlu1 %1984  ;;  %v9054_v37 = vmax.f32 %v3030_v28, %v3125_v41  ;;  %v11176_v28 = vld [vmem:[#allocation20_spill] sm:$0xff]  ;;  %v1786_v41 = vadd.f32 %v1754_v27, %v1586_v2  ;;  %v1313_v27 = vld [vmem:[#allocation2 + $0x398] sm:$0xff]  ;;  %v1844_v21 = vmul.f32 %v1812_v52, %v11186_v45  ;;  %v2035_v52 = vmul.f32 %v8541_v44, %v8699_v7  ;;  %v999_v44 = vld [vmem:[#allocation2 + $0x210] sm:$0xff] }
 0x21d   :  { %11173 = vst [vmem:[#allocation42_spill] sm:$0xff] %v9052_v25  ;;  %v9056_v24 = vpop.permute.xlu0 %1689  ;;  %1613 = vperm.xlu1 %7197, %v9061_v60   ;;  %v1829_v42 = vmul.f32 %v1797_v5, %v11176_v28  ;;  %v7221_v5 = vld [vmem:[%s10757_s0 + $0x48] sm:$0xff] }
 0x21e   :  { %11174 = vst [vmem:[#allocation28_spill] sm:$0xff] %v9056_v24  ;;  %1382 = vperm.xlu0 %7198, %v1330_v11   ;;  %v3239_v51 = vmax.f32 %v9054_v37, %v8932_v3  ;;  %v2083_v11 = vadd.f32 %v2051_v35, %v1786_v41  ;;  %v2645_v3 = vmul.f32 %v8567_v49, %v8950_v13  ;;  %v11179_v35 = vld [vmem:[#allocation83_spill] sm:$0xff]  ;;  %v11180_v41 = vld [vmem:[#allocation33_spill] sm:$0xff] }
 0x21f   :  { %v2425_v18 = vmul.f32 %v7221_v5, %v2393_v26  ;;  %v11181_v5 = vld [vmem:[#allocation80_spill] sm:$0xff] }
 0x220   :  { %v9072_v20 = vpop.permute.xlu1 %2588  ;;  %6744 = vmatpush3.msra.mxu0 %v3239_v51  ;;  %v2380_v55 = vadd.f32 %v2348_v10, %v2083_v11  ;;  %v1047_v10 = vmul.f32 %v1015_v17, %v11180_v41  ;;  %v9097_v11 = vld [vmem:[%s10758_s1] ss:$0 sm:$0xff] }
 0x221   :  { %v9074_v29 = vpop.permute.xlu0 %2286  ;;  %2191 = vperm.xlu1 %7197, %v2127_v30   ;;  %v9087_v30 = vld [vmem:[%s10758_s1 + $0x1] ss:$0 sm:$0xff] }
 0x222   :  { %1889 = vperm.xlu0 %7198, %v1829_v42   ;;  %v846_v51 = vmul.f32 %v9087_v30, %v11179_v35  ;;  %v1345_v42 = vmul.f32 %v1313_v27, %v8639_v32  ;;  %v2677_v50 = vadd.f32 %v2645_v3, %v2380_v55  ;;  %v11182_v3 = vld [vmem:[#allocation97_spill] sm:$0xff]  ;;  %v9113_v35 = vld [vmem:[%s10758_s1 + $0x3] ss:$0 sm:$0xff]  ;;  %v1297_v32 = vld [vmem:[#allocation2 + $0x318] sm:$0xff] }
 0x224   :  { %v9082_v2 = vpop.permute.xlu1 %398 }
 0x225   :  { %11178 = vst [vmem:[#allocation63_spill] sm:$0xff] %v9082_v2  ;;  %v2891_v13 = vpop.permute.xlu0 %2890  ;;  %2795 = vperm.xlu1 %7197, %v2723_v14   ;;  %v549_v2 = vmul.f32 %v9097_v11, %v11181_v5  ;;  %v9104_v14 = vld [vmem:[%s10758_s1 + $0x2] ss:$0 sm:$0xff] }
 0x226   :  { %v2942_v26 = vmul.f32 %v8586_v0, %v2891_v13  ;;  %2493 = vperm.xlu0 %7198, %v2425_v18   ;;  %v1241_v27 = vmul.f32 %v9104_v14, %v11182_v3  ;;  %v11184_v13 = vld [vmem:[#allocation112_spill] sm:$0xff] }
 0x227   :  { %v878_v17 = vadd.f32 %v846_v51, %v549_v2  ;;  %v1538_v41 = vmul.f32 %v9113_v35, %v11184_v13  ;;  %v9124_v2 = vld [vmem:[%s10758_s1 + $0x4] ss:$0 sm:$0xff]  ;;  %v11187_v51 = vld [vmem:[#allocation129_spill] sm:$0xff] }
 0x228   :  { %v2974_v18 = vadd.f32 %v2942_v26, %v2677_v50  ;;  %v9108_v55 = vpop.permute.xlu1 %1095  ;;  %v2408_v50 = vld [vmem:[#allocation2 + $0x7b8] sm:$0xff]  ;;  %v1738_v3 = vmul.f32 %v9124_v2, %v11187_v51  ;;  %v2706_v51 = vld [vmem:[#allocation2 + $0x8c0] sm:$0xff] }
 0x229   :  { %11183 = vst [vmem:[#allocation64_spill] sm:$0xff] %v9108_v55  ;;  %v9117_v5 = vpop.permute.xlu0 %695  ;;  %1457 = vperm.xlu1 %7197, %v1345_v42   ;;  %v1273_v26 = vadd.f32 %v1241_v27, %v878_v17  ;;  %v2110_v55 = vld [vmem:[#allocation2 + $0x6b0] sm:$0xff] }
 0x22a   :  { %11185 = vst [vmem:[#allocation77_spill] sm:$0xff] %v9117_v5  ;;  %v3013_v24 = vadd.f32 %v8607_v4, %v2974_v18  ;;  %1155 = vperm.xlu0 %7198, %v1047_v10   ;;  %v7227_v10 = vld [vmem:[%s10757_s0 + $0xc0] sm:$0xff] }
 0x22b   :  { %v1570_v42 = vadd.f32 %v1538_v41, %v1273_v26  ;;  %v2440_v27 = vmul.f32 %v7227_v10, %v2408_v50  ;;  %v11190_v41 = vld [vmem:[#allocation78_spill] sm:$0xff] }
 0x22c   :  { %v3045_v13 = vmax.f32 %v3013_v24, 0.0  ;;  %v9128_v25 = vpop.permute.xlu1 %1625  ;;  %v9142_v24 = vld [vmem:[%s10757_s0 + $0xa0] sm:$0xff]  ;;  %v2142_v26 = vmul.f32 %v2110_v55, %v11190_v41 }
 0x22d   :  { %11188 = vst [vmem:[#allocation90_spill] sm:$0xff] %v9128_v25  ;;  %v9132_v18 = vpop.permute.xlu0 %1397  ;;  %1964 = vperm.xlu1 %7197, %v1844_v21   ;;  %v1770_v7 = vadd.f32 %v1738_v3, %v1570_v42  ;;  %v2332_v21 = vmul.f32 %v8548_v8, %v8863_v43  ;;  %v11191_v3 = vld [vmem:[#allocation30_spill] sm:$0xff]  ;;  %v11192_v8 = vld [vmem:[#allocation60_spill] sm:$0xff] }
 0x22e   :  { %11189 = vst [vmem:[#allocation106_spill] sm:$0xff] %v9132_v18  ;;  %v9137_v17 = vrot.slane %v3045_v13, 1  ;;  %1673 = vperm.xlu0 %7198, %v9142_v24   ;;  %v2629_v18 = vmul.f32 %v8567_v49, %v9019_v54  ;;  %v1031_v42 = vmul.f32 %v999_v44, %v11191_v3  ;;  %v2738_v43 = vmul.f32 %v2706_v51, %v11192_v8  ;;  %v11196_v51 = vld [vmem:[#allocation88_spill] sm:$0xff]  ;;  %v11197_v8 = vld [vmem:[#allocation103_spill] sm:$0xff] }
 0x22f   :  { %v2067_v10 = vadd.f32 %v2035_v52, %v1770_v7  ;;  %v1329_v54 = vmul.f32 %v1297_v32, %v8735_v63 }
 0x230   :  { %v9148_v5 = vpop.permute.xlu1 %2206  ;;  %v3155_v50 = vsel %vm900_vm1, %v9137_v17, %v8991_v22 }
 0x231   :  { %v9155_v25 = vpop.permute.xlu0 %1904  ;;  %2568 = vperm.xlu1 %7197, %v2440_v27   ;;  %v9157_v55 = vmax.f32 %v3045_v13, %v3155_v50  ;;  %v2364_v41 = vadd.f32 %v2332_v21, %v2067_v10  ;;  %v2094_v13 = vld [vmem:[#allocation2 + $0x630] sm:$0xff]  ;;  %v564_v50 = vmul.f32 %v9097_v11, %v11196_v51  ;;  %v2690_v10 = vld [vmem:[#allocation2 + $0x840] sm:$0xff]  ;;  %v1753_v51 = vmul.f32 %v9124_v2, %v8556_v15 }
 0x232   :  { %2266 = vperm.xlu0 %7198, %v2142_v26   ;;  %v1796_v26 = vld [vmem:[#allocation2 + $0x528] sm:$0xff] }
 0x233   :  { %v3254_v45 = vmax.f32 %v9157_v55, %v9004_v59  ;;  %v2661_v52 = vadd.f32 %v2629_v18, %v2364_v41  ;;  %v11195_v18 = vld [vmem:[#allocation87_spill] sm:$0xff] }
 0x234   :  { %v2811_v22 = vpop.permute.xlu1 %2810  ;;  %v861_v32 = vmul.f32 %v9087_v30, %v11195_v18 }
 0x235   :  { %v2926_v7 = vmul.f32 %v8586_v0, %v2811_v22  ;;  %6745 = vmatprep.subr.mxu0 %v3254_v45  ;;  %v9164_v49 = vpop.permute.xlu0 %2508  ;;  %1075 = vperm.xlu1 %7197, %v1031_v42   ;;  %v9175_v0 = vld [vmem:[%s10757_s0 + $0x20] sm:$0xff]  ;;  %v2126_v45 = vmul.f32 %v2094_v13, %v8166_v9  ;;  %v2392_v42 = vld [vmem:[#allocation2 + $0x738] sm:$0xff] }
 0x236   :  { %2870 = vperm.xlu0 %7198, %v2738_v43   ;;  %v1256_v43 = vmul.f32 %v9104_v14, %v11197_v8  ;;  %v11200_v13 = vld [vmem:[#allocation118_spill] sm:$0xff] }
 0x237   :  { %v2958_v27 = vadd.f32 %v2926_v7, %v2661_v52  ;;  %v2722_v52 = vmul.f32 %v2690_v10, %v8065_v39  ;;  %v893_v7 = vadd.f32 %v861_v32, %v564_v50  ;;  %v1811_v10 = vld [vmem:[#allocation2 + $0x5a0] sm:$0xff] }
 0x238   :  { %v9167_v44 = vpop.permute.xlu1 %770 }
 0x239   :  { %11193 = vst [vmem:[#allocation45_spill] sm:$0xff] %v9167_v44  ;;  %v2997_v21 = vadd.f32 %v8607_v4, %v2958_v27  ;;  %v9170_v59 = vpop.permute.xlu0 %473  ;;  %1609 = vperm.xlu1 %7197, %v9175_v0   ;;  %v1828_v4 = vmul.f32 %v1796_v26, %v8532_v53  ;;  %v2424_v27 = vmul.f32 %v8597_v48, %v2392_v42  ;;  %v9210_v48 = vld [vmem:[%s10758_s1 + $0x5] ss:$0 sm:$0xff]  ;;  %v9220_v42 = vld [vmem:[%s10758_s1 + $0x6] ss:$0 sm:$0xff] }
 0x23a   :  { %11194 = vst [vmem:[#allocation120_spill] sm:$0xff] %v9170_v59  ;;  %1377 = vperm.xlu0 %7198, %v1329_v54   ;;  %v1553_v54 = vmul.f32 %v9113_v35, %v11200_v13  ;;  %v1288_v18 = vadd.f32 %v1256_v43, %v893_v7  ;;  %v2347_v43 = vmul.f32 %v9220_v42, %v8952_v56  ;;  %v9238_v13 = vld [vmem:[%s10758_s1 + $0x7] ss:$0 sm:$0xff] }
 0x23b   :  { %v3029_v3 = vmax.f32 %v2997_v21, 0.0  ;;  %v1312_v21 = vld [vmem:[#allocation2 + $0x390] sm:$0xff]  ;;  %v2644_v56 = vmul.f32 %v9238_v13, %v9072_v20  ;;  %v9253_v20 = vld [vmem:[%s10758_s1 + $0x8] ss:$0 sm:$0xff] }
 0x23c   :  { %v9186_v41 = vpop.permute.xlu1 %1472  ;;  %v1585_v32 = vadd.f32 %v1553_v54, %v1288_v18  ;;  %v1344_v50 = vmul.f32 %v1312_v21, %v11103_v6  ;;  %v9231_v6 = vld [vmem:[%s10757_s0 + $0x98] sm:$0xff]  ;;  %v1843_v54 = vmul.f32 %v1811_v10, %v8668_v57 }
 0x23d   :  { %11198 = vst [vmem:[#allocation32_spill] sm:$0xff] %v9186_v41  ;;  %v9188_v22 = vrot.slane %v3029_v3, 1  ;;  %v9190_v9 = vpop.permute.xlu0 %1170  ;;  %2186 = vperm.xlu1 %7197, %v2126_v45   ;;  %v2390_v41 = vld [vmem:[#allocation2 + $0x728] sm:$0xff] }
 0x23e   :  { %11199 = vst [vmem:[#allocation68_spill] sm:$0xff] %v9190_v9  ;;  %1884 = vperm.xlu0 %7198, %v1828_v4   ;;  %v2109_v4 = vld [vmem:[#allocation2 + $0x6a8] sm:$0xff] }
 0x23f   :  { %v3123_v26 = vsel %vm900_vm1, %v9188_v22, %v9040_v61  ;;  %v2050_v61 = vmul.f32 %v9210_v48, %v8782_v23 }
 0x240   :  { %v9201_v8 = vpop.permute.xlu1 %1979  ;;  %v9203_v45 = vmax.f32 %v3029_v3, %v3123_v26  ;;  %v1785_v3 = vadd.f32 %v1753_v51, %v1585_v32  ;;  %v2407_v26 = vld [vmem:[#allocation2 + $0x7b0] sm:$0xff]  ;;  %v11203_v32 = vld [vmem:[#allocation94_spill] sm:$0xff] }
 0x241   :  { %v9205_v39 = vpop.permute.xlu0 %1685  ;;  %2790 = vperm.xlu1 %7197, %v2722_v52   ;;  %v11202_v51 = vld [vmem:[#allocation93_spill] sm:$0xff]  ;;  %v2439_v10 = vmul.f32 %v8727_v36, %v2407_v26 }
 0x242   :  { %2488 = vperm.xlu0 %7198, %v2424_v27   ;;  %v3238_v15 = vmax.f32 %v9203_v45, %v9054_v37  ;;  %v2141_v37 = vmul.f32 %v2109_v4, %v8236_v1  ;;  %v2082_v7 = vadd.f32 %v2050_v61, %v1785_v3  ;;  %v2705_v27 = vld [vmem:[#allocation2 + $0x8b8] sm:$0xff]  ;;  %v845_v1 = vmul.f32 %v9087_v30, %v11202_v51  ;;  %v1296_v51 = vld [vmem:[#allocation2 + $0x310] sm:$0xff] }
 0x243   :  { %v548_v61 = vmul.f32 %v9097_v11, %v11203_v32  ;;  %v2737_v4 = vmul.f32 %v2705_v27, %v11069_v16  ;;  %v11206_v16 = vld [vmem:[#allocation125_spill] sm:$0xff]  ;;  %v1328_v26 = vmul.f32 %v1296_v51, %v11121_v34 }
 0x244   :  { %v9224_v52 = vpop.permute.xlu1 %2583  ;;  %6746 = vmatpush3.msra.mxu0 %v3238_v15  ;;  %v2379_v21 = vadd.f32 %v2347_v43, %v2082_v7  ;;  %v11204_v43 = vld [vmem:[#allocation109_spill] sm:$0xff] }
 0x245   :  { %v9226_v23 = vpop.permute.xlu0 %2281  ;;  %1669 = vperm.xlu1 %7197, %v9231_v6   ;;  %v1240_v7 = vmul.f32 %v9104_v14, %v11204_v43  ;;  %v2034_v43 = vmul.f32 %v9210_v48, %v8870_v47  ;;  %v2331_v47 = vmul.f32 %v9220_v42, %v8995_v33  ;;  %v11212_v33 = vld [vmem:[#allocation70_spill] sm:$0xff] }
 0x246   :  { %1452 = vperm.xlu0 %7198, %v1344_v50   ;;  %v2676_v3 = vadd.f32 %v2644_v56, %v2379_v21  ;;  %v1537_v56 = vmul.f32 %v9113_v35, %v11206_v16  ;;  %v2093_v21 = vld [vmem:[#allocation2 + $0x628] sm:$0xff] }
 0x247   :  { %v2125_v34 = vmul.f32 %v2093_v21, %v11090_v12  ;;  %v2628_v12 = vmul.f32 %v9238_v13, %v9164_v49 }
 0x248   :  { %v9243_v18 = vpop.permute.xlu1 %393 }
 0x249   :  { %11201 = vst [vmem:[#allocation69_spill] sm:$0xff] %v9243_v18  ;;  %v2886_v15 = vpop.permute.xlu0 %2885  ;;  %2261 = vperm.xlu1 %7197, %v2141_v37   ;;  %v877_v37 = vadd.f32 %v845_v1, %v548_v61  ;;  %v1737_v1 = vmul.f32 %v9124_v2, %v8672_v31  ;;  %v1795_v61 = vld [vmem:[#allocation2 + $0x520] sm:$0xff] }
 0x24a   :  { %v2941_v50 = vmul.f32 %v9253_v20, %v2886_v15  ;;  %1959 = vperm.xlu0 %7198, %v1843_v54   ;;  %v9268_v54 = vld [vmem:[%s10759_s2] ss:$0 sm:$0xff] }
 0x24b   :  { %v1272_v15 = vadd.f32 %v1240_v7, %v877_v37  ;;  %v11210_v7 = vld [vmem:[#allocation43_spill] sm:$0xff] }
 0x24c   :  { %v2973_v32 = vadd.f32 %v2941_v50, %v2676_v3  ;;  %v9259_v18 = vpop.permute.xlu1 %1090  ;;  %v1827_v51 = vmul.f32 %v1795_v61, %v11210_v7 }
 0x24d   :  { %11205 = vst [vmem:[#allocation24_spill] sm:$0xff] %v9259_v18  ;;  %v9263_v27 = vpop.permute.xlu0 %690  ;;  %2865 = vperm.xlu1 %7197, %v2737_v4   ;;  %v1569_v4 = vadd.f32 %v1537_v56, %v1272_v15  ;;  %v2391_v56 = vld [vmem:[#allocation2 + $0x730] sm:$0xff]  ;;  %v1810_v18 = vld [vmem:[#allocation2 + $0x598] sm:$0xff] }
 0x24e   :  { %11207 = vst [vmem:[#allocation82_spill] sm:$0xff] %v9263_v27  ;;  %v3012_v36 = vadd.f32 %v9268_v54, %v2973_v32  ;;  %2563 = vperm.xlu0 %7198, %v2439_v10   ;;  %v9283_v10 = vld [vmem:[%s10757_s0 + $0x18] sm:$0xff] }
 0x24f   :  { %v2689_v32 = vld [vmem:[#allocation2 + $0x838] sm:$0xff]  ;;  %v1769_v37 = vadd.f32 %v1737_v1, %v1569_v4  ;;  %v11211_v1 = vld [vmem:[#allocation89_spill] sm:$0xff]  ;;  %v2423_v4 = vmul.f32 %v11212_v33, %v2391_v56 }
 0x250   :  { %v3044_v3 = vmax.f32 %v3012_v36, 0.0  ;;  %v9274_v50 = vpop.permute.xlu1 %1621  ;;  %v2721_v61 = vmul.f32 %v2689_v32, %v11211_v1  ;;  %v2406_v32 = vld [vmem:[#allocation2 + $0x7a8] sm:$0xff]  ;;  %v11218_v1 = vld [vmem:[#allocation101_spill] sm:$0xff] }
 0x251   :  { %11208 = vst [vmem:[#allocation96_spill] sm:$0xff] %v9274_v50  ;;  %v9278_v16 = vpop.permute.xlu0 %1392  ;;  %1605 = vperm.xlu1 %7197, %v9283_v10   ;;  %v2066_v27 = vadd.f32 %v2034_v43, %v1769_v37  ;;  %v11220_v33 = vld [vmem:[#allocation113_spill] sm:$0xff] }
 0x252   :  { %11209 = vst [vmem:[#allocation127_spill] sm:$0xff] %v9278_v16  ;;  %v9287_v31 = vrot.slane %v3044_v3, 1  ;;  %1372 = vperm.xlu0 %7198, %v1328_v26  }
 0x253   :  { %v2363_v59 = vadd.f32 %v2331_v47, %v2066_v27 }
 0x254   :  { %v9292_v36 = vpop.permute.xlu1 %2201  ;;  %v3153_v15 = vsel %vm900_vm1, %v9287_v31, %v9137_v17 }
 0x255   :  { %v9299_v21 = vpop.permute.xlu0 %1899  ;;  %2181 = vperm.xlu1 %7197, %v2125_v34   ;;  %v9301_v26 = vmax.f32 %v3044_v3, %v3153_v15  ;;  %v2660_v43 = vadd.f32 %v2628_v12, %v2363_v59  ;;  %v11213_v3 = vld [vmem:[#allocation79_spill] sm:$0xff]  ;;  %v11217_v12 = vld [vmem:[#allocation100_spill] sm:$0xff] }
 0x256   :  { %1879 = vperm.xlu0 %7198, %v1827_v51   ;;  %v1842_v34 = vmul.f32 %v1810_v18, %v11213_v3  ;;  %v2108_v15 = vld [vmem:[#allocation2 + $0x6a0] sm:$0xff]  ;;  %v11219_v18 = vld [vmem:[#allocation73_spill] sm:$0xff] }
 0x257   :  { %v3253_v44 = vmax.f32 %v9301_v26, %v9157_v55  ;;  %v11216_v55 = vld [vmem:[#allocation25_spill] sm:$0xff] }
 0x258   :  { %v2806_v17 = vpop.permute.xlu1 %2805  ;;  %v2438_v59 = vmul.f32 %v11216_v55, %v2406_v32 }
 0x259   :  { %v2925_v37 = vmul.f32 %v9253_v20, %v2806_v17  ;;  %6747 = vmatprep.subr.mxu0 %v3253_v44  ;;  %v9308_v49 = vpop.permute.xlu0 %2503  ;;  %2785 = vperm.xlu1 %7197, %v2721_v61   ;;  %v860_v44 = vmul.f32 %v9087_v30, %v11217_v12  ;;  %v563_v61 = vmul.f32 %v9097_v11, %v11218_v1  ;;  %v11224_v12 = vld [vmem:[#allocation39_spill] sm:$0xff] }
 0x25a   :  { %2483 = vperm.xlu0 %7198, %v2423_v4   ;;  %v2140_v4 = vmul.f32 %v2108_v15, %v11220_v33  ;;  %v1552_v1 = vmul.f32 %v9113_v35, %v11224_v12  ;;  %v2092_v15 = vld [vmem:[#allocation2 + $0x620] sm:$0xff]  ;;  %v1794_v33 = vld [vmem:[#allocation2 + $0x518] sm:$0xff] }
 0x25b   :  { %v2957_v51 = vadd.f32 %v2925_v37, %v2660_v43  ;;  %v2704_v43 = vld [vmem:[#allocation2 + $0x8b0] sm:$0xff]  ;;  %v11221_v37 = vld [vmem:[#allocation119_spill] sm:$0xff]  ;;  %v892_v55 = vadd.f32 %v860_v44, %v563_v61  ;;  %v11228_v61 = vld [vmem:[#allocation76_spill] sm:$0xff] }
 0x25c   :  { %v9311_v56 = vpop.permute.xlu1 %765 }
 0x25d   :  { %11214 = vst [vmem:[#allocation95_spill] sm:$0xff] %v9311_v56  ;;  %v2996_v27 = vadd.f32 %v9268_v54, %v2957_v51  ;;  %v9314_v47 = vpop.permute.xlu0 %468  ;;  %1954 = vperm.xlu1 %7197, %v1842_v34   ;;  %v1255_v51 = vmul.f32 %v9104_v14, %v11221_v37 }
 0x25e   :  { %11215 = vst [vmem:[#allocation111_spill] sm:$0xff] %v9314_v47  ;;  %1665 = vperm.xlu0 %7198, %v11219_v18   ;;  %v11225_v18 = vld [vmem:[#allocation99_spill] sm:$0xff] }
 0x25f   :  { %v3028_v17 = vmax.f32 %v2996_v27, 0.0  ;;  %v2736_v47 = vmul.f32 %v2704_v43, %v11225_v18  ;;  %v1287_v37 = vadd.f32 %v1255_v51, %v892_v55  ;;  %v11230_v18 = vld [vmem:[#allocation31_spill] sm:$0xff]  ;;  %v2688_v55 = vld [vmem:[#allocation2 + $0x830] sm:$0xff] }
 0x260   :  { %v9325_v56 = vpop.permute.xlu1 %1467  ;;  %v11231_v51 = vld [vmem:[#allocation51_spill] sm:$0xff] }
 0x261   :  { %11222 = vst [vmem:[#allocation128_spill] sm:$0xff] %v9325_v56  ;;  %v9327_v34 = vrot.slane %v3028_v17, 1  ;;  %v9329_v32 = vpop.permute.xlu0 %1165  ;;  %2558 = vperm.xlu1 %7197, %v2438_v59   ;;  %v11226_v56 = vld [vmem:[#allocation62_spill] sm:$0xff]  ;;  %v1584_v12 = vadd.f32 %v1552_v1, %v1287_v37  ;;  %v11232_v1 = vld [vmem:[#allocation107_spill] sm:$0xff] }
 0x262   :  { %11223 = vst [vmem:[#allocation115_spill] sm:$0xff] %v9329_v32  ;;  %2256 = vperm.xlu0 %7198, %v2140_v4   ;;  %v1752_v9 = vmul.f32 %v9124_v2, %v11226_v56  ;;  %v11229_v4 = vld [vmem:[#allocation21_spill] sm:$0xff]  ;;  %v2049_v32 = vmul.f32 %v9210_v48, %v11230_v18  ;;  %v1826_v56 = vmul.f32 %v1794_v33, %v11231_v51  ;;  %v11233_v33 = vld [vmem:[#allocation122_spill] sm:$0xff] }
 0x263   :  { %v3121_v27 = vsel %vm900_vm1, %v9327_v34, %v9188_v22  ;;  %v2124_v43 = vmul.f32 %v2092_v15, %v11229_v4  ;;  %v2720_v37 = vmul.f32 %v2688_v55, %v11232_v1  ;;  %v2107_v4 = vld [vmem:[#allocation2 + $0x698] sm:$0xff] }
 0x264   :  { %v9339_v16 = vpop.permute.xlu1 %1974  ;;  %v9341_v59 = vmax.f32 %v3028_v17, %v3121_v27  ;;  %v1784_v17 = vadd.f32 %v1752_v9, %v1584_v12  ;;  %v2346_v27 = vmul.f32 %v9220_v42, %v9074_v29  ;;  %v1809_v9 = vld [vmem:[#allocation2 + $0x590] sm:$0xff]  ;;  %v11235_v29 = vld [vmem:[#allocation110_spill] sm:$0xff] }
 0x265   :  { %v9343_v44 = vpop.permute.xlu0 %1681  ;;  %1601 = vperm.xlu1 %7197, %v11228_v61   ;;  %v2422_v61 = vmul.f32 %v11233_v33, %v2390_v41  ;;  %v11236_v41 = vld [vmem:[#allocation108_spill] sm:$0xff] }
 0x266   :  { %11227 = vst [vmem:[#allocation57_spill] sm:$0xff] %v9343_v44  ;;  %2860 = vperm.xlu0 %7198, %v2736_v47   ;;  %v3237_v22 = vmax.f32 %v9341_v59, %v9203_v45  ;;  %v2081_v47 = vadd.f32 %v2049_v32, %v1784_v17  ;;  %v2643_v45 = vmul.f32 %v9238_v13, %v9224_v52 }
 0x267   :  { %v1841_v52 = vmul.f32 %v1809_v9, %v11153_v46  ;;  %v547_v17 = vmul.f32 %v9097_v11, %v11236_v41 }
 0x268   :  { %v9354_v44 = vpop.permute.xlu1 %2578  ;;  %6748 = vmatpush3.msra.mxu0 %v3237_v22  ;;  %v2378_v12 = vadd.f32 %v2346_v27, %v2081_v47  ;;  %v844_v22 = vmul.f32 %v9087_v30, %v11235_v29  ;;  %v11237_v27 = vld [vmem:[#allocation126_spill] sm:$0xff]  ;;  %v2405_v47 = vld [vmem:[#allocation2 + $0x7a0] sm:$0xff] }
 0x269   :  { %v9356_v15 = vpop.permute.xlu0 %2276  ;;  %2176 = vperm.xlu1 %7197, %v2124_v43   ;;  %v2139_v43 = vmul.f32 %v2107_v4, %v11152_v38  ;;  %v1239_v1 = vmul.f32 %v9104_v14, %v11237_v27  ;;  %v2091_v4 = vld [vmem:[#allocation2 + $0x618] sm:$0xff] }
 0x26a   :  { %1874 = vperm.xlu0 %7198, %v1826_v56   ;;  %v2675_v55 = vadd.f32 %v2643_v45, %v2378_v12  ;;  %v2703_v56 = vld [vmem:[#allocation2 + $0x8a8] sm:$0xff]  ;;  %v11239_v12 = vld [vmem:[#allocation81_spill] sm:$0xff] }
 0x26b   :  { %v2735_v46 = vmul.f32 %v2703_v56, %v11158_v40  ;;  %v2123_v40 = vmul.f32 %v2091_v4, %v8492_v19  ;;  %v2687_v56 = vld [vmem:[#allocation2 + $0x828] sm:$0xff]  ;;  %v2627_v19 = vmul.f32 %v9238_v13, %v9308_v49  ;;  %v2404_v4 = vld [vmem:[#allocation2 + $0x798] sm:$0xff] }
 0x26c   :  { %v9362_v18 = vpop.permute.xlu1 %388 }
 0x26d   :  { %11234 = vst [vmem:[#allocation23_spill] sm:$0xff] %v9362_v18  ;;  %v2881_v50 = vpop.permute.xlu0 %2880  ;;  %2780 = vperm.xlu1 %7197, %v2720_v37   ;;  %v876_v37 = vadd.f32 %v844_v22, %v547_v17  ;;  %v11238_v18 = vld [vmem:[#allocation66_spill] sm:$0xff]  ;;  %v11240_v17 = vld [vmem:[#allocation85_spill] sm:$0xff] }
 0x26e   :  { %v2940_v32 = vmul.f32 %v9253_v20, %v2881_v50  ;;  %2478 = vperm.xlu0 %7198, %v2422_v61   ;;  %v1536_v38 = vmul.f32 %v9113_v35, %v11238_v18  ;;  %v2437_v61 = vmul.f32 %v9012_v58, %v2405_v47  ;;  %v2330_v47 = vmul.f32 %v9220_v42, %v9148_v5 }
 0x26f   :  { %v1271_v9 = vadd.f32 %v1239_v1, %v876_v37 }
 0x270   :  { %v2972_v33 = vadd.f32 %v2940_v32, %v2675_v55  ;;  %v9373_v29 = vpop.permute.xlu1 %1085  ;;  %v1736_v55 = vmul.f32 %v9124_v2, %v11239_v12  ;;  %v1793_v32 = vld [vmem:[#allocation2 + $0x510] sm:$0xff] }
 0x271   :  { %v9377_v45 = vpop.permute.xlu0 %685  ;;  %2251 = vperm.xlu1 %7197, %v2139_v43   ;;  %v1568_v18 = vadd.f32 %v1536_v38, %v1271_v9  ;;  %v2033_v43 = vmul.f32 %v9210_v48, %v11240_v17  ;;  %v1825_v58 = vmul.f32 %v1793_v32, %v11165_v62 }
 0x272   :  { %v3011_v50 = vadd.f32 %v9268_v54, %v2972_v33  ;;  %1949 = vperm.xlu0 %7198, %v1841_v52   ;;  %v2389_v33 = vld [vmem:[#allocation2 + $0x720] sm:$0xff] }
 0x273   :  { %v1768_v1 = vadd.f32 %v1736_v55, %v1568_v18  ;;  %v2421_v5 = vmul.f32 %v9061_v60, %v2389_v33  ;;  %v2090_v60 = vld [vmem:[#allocation2 + $0x610] sm:$0xff] }
 0x274   :  { %v3043_v22 = vmax.f32 %v3011_v50, 0.0  ;;  %v9384_v41 = vpop.permute.xlu1 %1617 }
 0x275   :  { %v9388_v27 = vpop.permute.xlu0 %1387  ;;  %2855 = vperm.xlu1 %7197, %v2735_v46   ;;  %v2065_v46 = vadd.f32 %v2033_v43, %v1768_v1  ;;  %v2122_v1 = vmul.f32 %v2090_v60, %v8735_v63  ;;  %v2701_v60 = vld [vmem:[#allocation2 + $0x898] sm:$0xff] }
 0x276   :  { %v9391_v52 = vrot.slane %v3043_v22, 1  ;;  %2553 = vperm.xlu0 %7198, %v2437_v61   ;;  %v2719_v61 = vmul.f32 %v2687_v56, %v11176_v28  ;;  %v11241_v28 = vld [vmem:[#allocation53_spill] sm:$0xff] }
 0x277   :  { %v2362_v9 = vadd.f32 %v2330_v47, %v2065_v46  ;;  %v11242_v47 = vld [vmem:[#allocation116_spill] sm:$0xff]  ;;  %v11244_v46 = vld [vmem:[#allocation130_spill] sm:$0xff] }
 0x278   :  { %v9396_v37 = vpop.permute.xlu1 %2196  ;;  %v3151_v38 = vsel %vm900_vm1, %v9391_v52, %v9287_v31  ;;  %v2106_v31 = vld [vmem:[#allocation2 + $0x690] sm:$0xff]  ;;  %v859_v33 = vmul.f32 %v9087_v30, %v11242_v47 }
 0x279   :  { %v9403_v50 = vpop.permute.xlu0 %1894  ;;  %2171 = vperm.xlu1 %7197, %v2123_v40   ;;  %v9405_v62 = vmax.f32 %v3043_v22, %v3151_v38  ;;  %v2659_v32 = vadd.f32 %v2627_v19, %v2362_v9  ;;  %v2436_v22 = vmul.f32 %v9142_v24, %v2404_v4  ;;  %v2138_v17 = vmul.f32 %v2106_v31, %v11241_v28  ;;  %v2702_v40 = vld [vmem:[#allocation2 + $0x8a0] sm:$0xff]  ;;  %v11243_v38 = vld [vmem:[#allocation117_spill] sm:$0xff]  ;;  %v2388_v4 = vld [vmem:[#allocation2 + $0x718] sm:$0xff] }
 0x27a   :  { %1869 = vperm.xlu0 %7198, %v1825_v58   ;;  %v562_v24 = vmul.f32 %v9097_v11, %v11243_v38  ;;  %v2734_v19 = vmul.f32 %v2702_v40, %v11244_v46  ;;  %v11245_v9 = vld [vmem:[#allocation36_spill] sm:$0xff]  ;;  %v2403_v40 = vld [vmem:[#allocation2 + $0x790] sm:$0xff]  ;;  %v11248_v46 = vld [vmem:[#allocation42_spill] sm:$0xff] }
 0x27b   :  { %v3252_v12 = vmax.f32 %v9405_v62, %v9301_v26  ;;  %v11247_v47 = vld [vmem:[#allocation105_spill] sm:$0xff] }
 0x27c   :  { %v2801_v55 = vpop.permute.xlu1 %2800  ;;  %v1751_v38 = vmul.f32 %v9124_v2, %v11247_v47 }
 0x27d   :  { %v2924_v49 = vmul.f32 %v9253_v20, %v2801_v55  ;;  %6749 = vmatprep.subr.mxu0 %v3252_v12  ;;  %v9412_v18 = vpop.permute.xlu0 %2498  ;;  %2775 = vperm.xlu1 %7197, %v2719_v61   ;;  %v2686_v61 = vld [vmem:[#allocation2 + $0x820] sm:$0xff]  ;;  %v1254_v12 = vmul.f32 %v9104_v14, %v11245_v9  ;;  %v2387_v9 = vld [vmem:[#allocation2 + $0x710] sm:$0xff] }
 0x27e   :  { %2473 = vperm.xlu0 %7198, %v2421_v5  }
 0x27f   :  { %v2956_v43 = vadd.f32 %v2924_v49, %v2659_v32  ;;  %v2718_v32 = vmul.f32 %v2686_v61, %v8532_v53  ;;  %v891_v49 = vadd.f32 %v859_v33, %v562_v24  ;;  %v2733_v24 = vmul.f32 %v2701_v60, %v8668_v57 }
 0x280   :  { %v9416_v58 = vpop.permute.xlu1 %760  ;;  %v2435_v61 = vmul.f32 %v9231_v6, %v2403_v40  ;;  %v2419_v6 = vmul.f32 %v9283_v10, %v2387_v9 }
 0x281   :  { %v2995_v26 = vadd.f32 %v9268_v54, %v2956_v43  ;;  %v9419_v56 = vpop.permute.xlu0 %463  ;;  %2548 = vperm.xlu1 %7197, %v2436_v22   ;;  %v11246_v22 = vld [vmem:[#allocation50_spill] sm:$0xff] }
 0x282   :  { %2246 = vperm.xlu0 %7198, %v2138_v17   ;;  %v1551_v28 = vmul.f32 %v9113_v35, %v11246_v22  ;;  %v2420_v17 = vmul.f32 %v9175_v0, %v2388_v4  ;;  %v2685_v4 = vld [vmem:[#allocation2 + $0x818] sm:$0xff] }
 0x283   :  { %v3027_v5 = vmax.f32 %v2995_v26, 0.0  ;;  %v1286_v26 = vadd.f32 %v1254_v12, %v891_v49 }
 0x284   :  { %v9429_v31 = vpop.permute.xlu1 %1462 }
 0x285   :  { %v9431_v55 = vrot.slane %v3027_v5, 1  ;;  %v9433_v63 = vpop.permute.xlu0 %1160  ;;  %2166 = vperm.xlu1 %7197, %v2122_v1   ;;  %v1583_v0 = vadd.f32 %v1551_v28, %v1286_v26  ;;  %v2684_v28 = vld [vmem:[#allocation2 + $0x810] sm:$0xff]  ;;  %v11250_v26 = vld [vmem:[#allocation124_spill] sm:$0xff] }
 0x286   :  { %2850 = vperm.xlu0 %7198, %v2734_v19   ;;  %v2048_v19 = vmul.f32 %v9210_v48, %v11248_v46  ;;  %v546_v47 = vmul.f32 %v9097_v11, %v11250_v26  ;;  %v3484_v26 = vld [vmem:[#allocation7 + $0x58] sm:$0xff] }
 0x287   :  { %v3119_v43 = vsel %vm900_vm1, %v9431_v55, %v9327_v34  ;;  %v1783_v12 = vadd.f32 %v1751_v38, %v1583_v0  ;;  %v11251_v0 = vld [vmem:[#allocation38_spill] sm:$0xff] }
 0x288   :  { %v9444_v1 = vpop.permute.xlu1 %1969  ;;  %v9446_v53 = vmax.f32 %v3027_v5, %v3119_v43  ;;  %v2345_v5 = vmul.f32 %v9220_v42, %v9226_v23  ;;  %v11249_v23 = vld [vmem:[#allocation123_spill] sm:$0xff]  ;;  %v1238_v46 = vmul.f32 %v9104_v14, %v11251_v0 }
 0x289   :  { %v9448_v33 = vpop.permute.xlu0 %1677  ;;  %2770 = vperm.xlu1 %7197, %v2718_v32   ;;  %v2717_v32 = vmul.f32 %v2685_v4, %v11210_v7  ;;  %v2080_v22 = vadd.f32 %v2048_v19, %v1783_v12  ;;  %v843_v40 = vmul.f32 %v9087_v30, %v11249_v23  ;;  %v2716_v7 = vmul.f32 %v2684_v28, %v11231_v51  ;;  %v11252_v4 = vld [vmem:[#allocation29_spill] sm:$0xff] }
 0x28a   :  { %2468 = vperm.xlu0 %7198, %v2420_v17   ;;  %v3236_v34 = vmax.f32 %v9446_v53, %v9341_v59  ;;  %v2642_v59 = vmul.f32 %v9238_v13, %v9354_v44  ;;  %v2700_v17 = vld [vmem:[#allocation2 + $0x890] sm:$0xff]  ;;  %v1535_v9 = vmul.f32 %v9113_v35, %v11252_v4  ;;  %v3485_v4 = vld [vmem:[#allocation7 + $0x60] sm:$0xff] }
 0x28b   :  { %v2377_v60 = vadd.f32 %v2345_v5, %v2080_v22  ;;  %v2732_v10 = vmul.f32 %v2700_v17, %v11213_v3  ;;  %v3482_v5 = vld [vmem:[#allocation7 + $0x48] sm:$0xff]  ;;  %v11253_v22 = vld [vmem:[#allocation55_spill] sm:$0xff] }
 0x28c   :  { %v9458_v49 = vpop.permute.xlu1 %2573  ;;  %6750 = vmatpush3.msra.mxu0 %v3236_v34  ;;  %v1735_v3 = vmul.f32 %v9124_v2, %v11253_v22  ;;  %v11255_v22 = vld [vmem:[#allocation41_spill] sm:$0xff] }
 0x28d   :  { %v9460_v57 = vpop.permute.xlu0 %2271  ;;  %2845 = vperm.xlu1 %7197, %v2733_v24   ;;  %v2674_v24 = vadd.f32 %v2642_v59, %v2377_v60  ;;  %v3481_v59 = vld [vmem:[#allocation7 + $0x40] sm:$0xff]  ;;  %v2032_v60 = vmul.f32 %v9210_v48, %v9155_v25  ;;  %v2626_v25 = vmul.f32 %v9238_v13, %v9412_v18  ;;  %v11254_v18 = vld [vmem:[#allocation133_spill] sm:$0xff] }
 0x28e   :  { %2543 = vperm.xlu0 %7198, %v2435_v61   ;;  %v875_v61 = vadd.f32 %v843_v40, %v546_v47 }
 0x290   :  { %v9466_v43 = vpop.permute.xlu1 %383 }
 0x291   :  { %v2876_v38 = vpop.permute.xlu0 %2875  ;;  %2765 = vperm.xlu1 %7197, %v2717_v32   ;;  %v1270_v32 = vadd.f32 %v1238_v46, %v875_v61 }
 0x292   :  { %v2939_v44 = vmul.f32 %v9253_v20, %v2876_v38  ;;  %2463 = vperm.xlu0 %7198, %v2419_v6   ;;  %v2329_v38 = vmul.f32 %v9220_v42, %v9292_v36 }
 0x293   :  { %v1567_v17 = vadd.f32 %v1535_v9, %v1270_v32  ;;  %v858_v32 = vmul.f32 %v9087_v30, %v11254_v18 }
 0x294   :  { %v2971_v19 = vadd.f32 %v2939_v44, %v2674_v24  ;;  %v9477_v34 = vpop.permute.xlu1 %1080 }
 0x295   :  { %v9481_v12 = vpop.permute.xlu0 %680  ;;  %2760 = vperm.xlu1 %7197, %v2716_v7   ;;  %v1767_v47 = vadd.f32 %v1735_v3, %v1567_v17  ;;  %v3483_v7 = vld [vmem:[#allocation7 + $0x50] sm:$0xff]  ;;  %v561_v3 = vmul.f32 %v9097_v11, %v11255_v22 }
 0x296   :  { %v3010_v51 = vadd.f32 %v9268_v54, %v2971_v19  ;;  %2840 = vperm.xlu0 %7198, %v2732_v10   ;;  %v3486_v19 = vld [vmem:[#allocation7 + $0x68] sm:$0xff]  ;;  %v3487_v17 = vld [vmem:[#allocation7 + $0x70] sm:$0xff] }
 0x297   :  { %v2064_v10 = vadd.f32 %v2032_v60, %v1767_v47 }
 0x298   :  { %v3042_v6 = vmax.f32 %v3010_v51, 0.0  ;;  %v9486_v28 = vpop.permute.xlu1 %1613 }
 0x299   :  { %v9490_v23 = vpop.permute.xlu0 %1382  ;;  %3496 = vperm.xlu1 %7197, %v3482_v5   ;;  %v2361_v61 = vadd.f32 %v2329_v38, %v2064_v10  ;;  %v11259_v10 = vld [vmem:[#allocation104_spill] sm:$0xff] }
 0x29a   :  { %v9492_v40 = vrot.slane %v3042_v6, 1  ;;  %3491 = vperm.xlu0 %7198, %v3481_v59   ;;  %v3488_v59 = vld [vmem:[#allocation7 + $0x78] sm:$0xff] }
 0x29b   :  { %v2658_v51 = vadd.f32 %v2626_v25, %v2361_v61  ;;  %v1550_v25 = vmul.f32 %v9113_v35, %v11259_v10 }
 0x29c   :  { %v9496_v24 = vpop.permute.xlu1 %2191  ;;  %v3149_v44 = vsel %vm900_vm1, %v9492_v40, %v9391_v52 }
 0x29d   :  { %v9503_v0 = vpop.permute.xlu0 %1889  ;;  %3506 = vperm.xlu1 %7197, %v3484_v26   ;;  %v9505_v46 = vmax.f32 %v3042_v6, %v3149_v44  ;;  %v890_v44 = vadd.f32 %v858_v32, %v561_v3  ;;  %v2047_v3 = vmul.f32 %v9210_v48, %v9201_v8 }
 0x29e   :  { %3501 = vperm.xlu0 %7198, %v3483_v7   ;;  %v3050_v7 = vld [vmem:[#allocation5 + $0x8] sm:$0xff] }
 0x29f   :  { %v3251_v36 = vmax.f32 %v9505_v46, %v9405_v62  ;;  %v11256_v62 = vld [vmem:[#allocation61_spill] sm:$0xff]  ;;  %3322 = vmatprep.mubr.f32.mxu0 %v3050_v7 }
 0x2a0   :  { %v2796_v9 = vpop.permute.xlu1 %2795  ;;  %v1253_v60 = vmul.f32 %v9104_v14, %v11256_v62 }
 0x2a1   :  { %6751 = vmatprep.subr.mxu0 %v3251_v36  ;;  %v9509_v52 = vpop.permute.xlu0 %2493  ;;  %v2923_v5 = vmul.f32 %v9253_v20, %v2796_v9  ;;  %3516 = vperm.xlu1 %7197, %v3486_v19   ;;  %v3398_v19 = vld [vmem:[#allocation7 + $0x8] sm:$0xff]  ;;  %v3397_v36 = vld [vmem:[#allocation7] sm:$0xff] }
 0x2a2   :  { %3511 = vperm.xlu0 %7198, %v3485_v4   ;;  %v1285_v4 = vadd.f32 %v1253_v60, %v890_v44  ;;  %v11260_v9 = vld [vmem:[#allocation28_spill] sm:$0xff]  ;;  %v2344_v60 = vmul.f32 %v9220_v42, %v9356_v15  ;;  %v11261_v44 = vld [vmem:[#allocation22_spill] sm:$0xff]  ;;  %v11262_v15 = vld [vmem:[#allocation35_spill] sm:$0xff] }
 0x2a3   :  { %v2955_v6 = vadd.f32 %v2923_v5, %v2658_v51  ;;  %v1750_v51 = vmul.f32 %v9124_v2, %v11260_v9  ;;  %v842_v10 = vmul.f32 %v9087_v30, %v11261_v44  ;;  %v3404_v44 = vld [vmem:[#allocation7 + $0x38] sm:$0xff] }
 0x2a4   :  { %v9518_v26 = vpop.permute.xlu1 %1457  ;;  %v1582_v32 = vadd.f32 %v1550_v25, %v1285_v4  ;;  %v545_v4 = vmul.f32 %v9097_v11, %v11262_v15 }
 0x2a5   :  { %11257 = vst [vmem:[#allocation37_spill] sm:$0xff] %v9518_v26  ;;  %v2994_v47 = vadd.f32 %v9268_v54, %v2955_v6  ;;  %v9521_v38 = vpop.permute.xlu0 %1155  ;;  %3526 = vperm.xlu1 %7197, %v3488_v59   ;;  %v3400_v59 = vld [vmem:[#allocation7 + $0x18] sm:$0xff]  ;;  %v3399_v6 = vld [vmem:[#allocation7 + $0x10] sm:$0xff] }
 0x2a6   :  { %11258 = vst [vmem:[#allocation86_spill] sm:$0xff] %v9521_v38  ;;  %3521 = vperm.xlu0 %7198, %v3487_v17   ;;  %v1782_v62 = vadd.f32 %v1750_v51, %v1582_v32  ;;  %v3401_v51 = vld [vmem:[#allocation7 + $0x20] sm:$0xff]  ;;  %v11265_v38 = vld [vmem:[#allocation90_spill] sm:$0xff]  ;;  %v3403_v26 = vld [vmem:[#allocation7 + $0x30] sm:$0xff] }
 0x2a7   :  { %v3026_v61 = vmax.f32 %v2994_v47, 0.0 }
 0x2a8   :  { %v9527_v5 = vpop.permute.xlu1 %1964  ;;  %v2079_v8 = vadd.f32 %v2047_v3, %v1782_v62  ;;  %v874_v3 = vadd.f32 %v842_v10, %v545_v4  ;;  %v2031_v10 = vmul.f32 %v9210_v48, %v9299_v21 }
 0x2a9   :  { %v9529_v18 = vrot.slane %v3026_v61, 1  ;;  %v9531_v22 = vpop.permute.xlu0 %1673  ;;  %3412 = vperm.xlu1 %7197, %v3398_v19   ;;  %v2641_v19 = vmul.f32 %v9238_v13, %v9458_v49 }
 0x2aa   :  { %3407 = vperm.xlu0 %7198, %v3397_v36   ;;  %v3402_v36 = vld [vmem:[#allocation7 + $0x28] sm:$0xff]  ;;  %v2376_v32 = vadd.f32 %v2344_v60, %v2079_v8 }
 0x2ab   :  { %v3117_v17 = vsel %vm900_vm1, %v9529_v18, %v9431_v55 }
 0x2ac   :  { %v9540_v47 = vpop.permute.xlu1 %2568  ;;  %v9542_v7 = vmax.f32 %v3026_v61, %v3117_v17  ;;  %v11263_v61 = vld [vmem:[#allocation27_spill] sm:$0xff]  ;;  %v2673_v62 = vadd.f32 %v2641_v19, %v2376_v32  ;;  %v11266_v32 = vld [vmem:[#allocation44_spill] sm:$0xff] }
 0x2ad   :  { %v9546_v25 = vpop.permute.xlu0 %2266  ;;  %3422 = vperm.xlu1 %7197, %v3400_v59   ;;  %v1237_v9 = vmul.f32 %v9104_v14, %v11263_v61  ;;  %v11264_v59 = vld [vmem:[#allocation71_spill] sm:$0xff]  ;;  %v1734_v61 = vmul.f32 %v9124_v2, %v11265_v38 }
 0x2ae   :  { %3417 = vperm.xlu0 %7198, %v3399_v6   ;;  %v3235_v55 = vmax.f32 %v9542_v7, %v9446_v53  ;;  %v1534_v49 = vmul.f32 %v9113_v35, %v11264_v59  ;;  %v3825_v38 = vld [vmem:[#allocation7 + $0x80] sm:$0xff]  ;;  %v11267_v59 = vld [vmem:[#allocation49_spill] sm:$0xff] }
 0x2af   :  { %v1269_v15 = vadd.f32 %v1237_v9, %v874_v3  ;;  %v2328_v9 = vmul.f32 %v9220_v42, %v9396_v37  ;;  %v857_v3 = vmul.f32 %v9087_v30, %v11266_v32  ;;  %v3828_v37 = vld [vmem:[#allocation7 + $0x98] sm:$0xff] }
 0x2b0   :  { %6752 = vmatpush3.msra.mxu0 %v3235_v55  ;;  %v9556_v17 = vpop.permute.xlu1 %1075 }
 0x2b1   :  { %v2871_v6 = vpop.permute.xlu0 %2870  ;;  %3432 = vperm.xlu1 %7197, %v3402_v36   ;;  %v1566_v55 = vadd.f32 %v1534_v49, %v1269_v15  ;;  %v3826_v36 = vld [vmem:[#allocation7 + $0x88] sm:$0xff]  ;;  %v560_v49 = vmul.f32 %v9097_v11, %v11267_v59 }
 0x2b2   :  { %v2938_v53 = vmul.f32 %v9253_v20, %v2871_v6  ;;  %3427 = vperm.xlu0 %7198, %v3401_v51   ;;  %v11268_v15 = vld [vmem:[#allocation92_spill] sm:$0xff] }
 0x2b3   :  { %v1766_v51 = vadd.f32 %v1734_v61, %v1566_v55  ;;  %v1252_v30 = vmul.f32 %v9104_v14, %v11268_v15  ;;  %v889_v11 = vadd.f32 %v857_v3, %v560_v49  ;;  %v3830_v14 = vld [vmem:[#allocation7 + $0xa8] sm:$0xff]  ;;  %v1749_v3 = vmul.f32 %v9124_v2, %v9205_v39  ;;  %v3829_v49 = vld [vmem:[#allocation7 + $0xa0] sm:$0xff]  ;;  %v3832_v15 = vld [vmem:[#allocation7 + $0xb8] sm:$0xff] }
 0x2b4   :  { %v2970_v60 = vadd.f32 %v2938_v53, %v2673_v62  ;;  %v9563_v8 = vpop.permute.xlu1 %1609  ;;  %v2625_v53 = vmul.f32 %v9238_v13, %v9509_v52  ;;  %v2343_v39 = vmul.f32 %v9220_v42, %v9460_v57  ;;  %v4047_v57 = vld [vmem:[#allocation7 + $0xc8] sm:$0xff] }
 0x2b5   :  { %v9567_v4 = vpop.permute.xlu0 %1377  ;;  %3442 = vperm.xlu1 %7197, %v3404_v44   ;;  %v2063_v62 = vadd.f32 %v2031_v10, %v1766_v51 }
 0x2b6   :  { %v3009_v19 = vadd.f32 %v9268_v54, %v2970_v60  ;;  %3437 = vperm.xlu0 %7198, %v3403_v26   ;;  %v3827_v60 = vld [vmem:[#allocation7 + $0x90] sm:$0xff] }
 0x2b7   :  { %v2360_v61 = vadd.f32 %v2328_v9, %v2063_v62  ;;  %v1284_v9 = vadd.f32 %v1252_v30, %v889_v11  ;;  %v3831_v30 = vld [vmem:[#allocation7 + $0xb0] sm:$0xff] }
 0x2b8   :  { %v3041_v6 = vmax.f32 %v3009_v19, 0.0  ;;  %v9576_v21 = vpop.permute.xlu1 %2186  ;;  %v11269_v19 = vld [vmem:[#allocation131_spill] sm:$0xff] }
 0x2b9   :  { %v9580_v26 = vpop.permute.xlu0 %1884  ;;  %3840 = vperm.xlu1 %7197, %v3826_v36   ;;  %v1549_v52 = vmul.f32 %v9113_v35, %v11269_v19  ;;  %v2657_v51 = vadd.f32 %v2625_v53, %v2360_v61  ;;  %v2046_v53 = vmul.f32 %v9210_v48, %v9339_v16  ;;  %v9614_v16 = vld [vmem:[%s10758_s1 + $0x1] ss:$0 sm:$0xff] }
 0x2ba   :  { %v9582_v44 = vrot.slane %v3041_v6, 1  ;;  %3835 = vperm.xlu0 %7198, %v3825_v38  }
 0x2bb   :  { %v1581_v62 = vadd.f32 %v1549_v52, %v1284_v9  ;;  %v9634_v9 = vld [vmem:[%s10758_s1 + $0x2] ss:$0 sm:$0xff] }
 0x2bc   :  { %v2791_v55 = vpop.permute.xlu1 %2790  ;;  %v3147_v10 = vsel %vm900_vm1, %v9582_v44, %v9492_v40 }
 0x2bd   :  { %v9591_v36 = vpop.permute.xlu0 %2488  ;;  %v2922_v38 = vmul.f32 %v9253_v20, %v2791_v55  ;;  %3850 = vperm.xlu1 %7197, %v3828_v37   ;;  %v9594_v32 = vmax.f32 %v3041_v6, %v3147_v10  ;;  %v1781_v2 = vadd.f32 %v1749_v3, %v1581_v62  ;;  %v2640_v10 = vmul.f32 %v9238_v13, %v9540_v47  ;;  %v11274_v47 = vld [vmem:[#allocation59_spill] sm:$0xff] }
 0x2be   :  { %3845 = vperm.xlu0 %7198, %v3827_v60   ;;  %v11272_v60 = vld [vmem:[#allocation132_spill] sm:$0xff]  ;;  %v1236_v3 = vmul.f32 %v9634_v9, %v11274_v47 }
 0x2bf   :  { %v2954_v59 = vadd.f32 %v2922_v38, %v2657_v51  ;;  %v3250_v40 = vmax.f32 %v9594_v32, %v9505_v46  ;;  %v841_v11 = vmul.f32 %v9614_v16, %v11272_v60  ;;  %v2078_v55 = vadd.f32 %v2046_v53, %v1781_v2  ;;  %v9627_v51 = vld [vmem:[%s10758_s1] ss:$0 sm:$0xff]  ;;  %v11273_v38 = vld [vmem:[#allocation84_spill] sm:$0xff]  ;;  %v11275_v2 = vld [vmem:[#allocation106_spill] sm:$0xff] }
 0x2c0   :  { %v9600_v35 = vpop.permute.xlu1 %1669 }
 0x2c1   :  { %11270 = vst [vmem:[#allocation74_spill] sm:$0xff] %v9600_v35  ;;  %v2993_v6 = vadd.f32 %v9268_v54, %v2954_v59  ;;  %v9605_v37 = vpop.permute.xlu0 %1452  ;;  %6753 = vmatprep.subr.mxu0 %v3250_v40  ;;  %3860 = vperm.xlu1 %7197, %v3830_v14   ;;  %v544_v14 = vmul.f32 %v9627_v51, %v11273_v38  ;;  %v4046_v40 = vld [vmem:[#allocation7 + $0xc0] sm:$0xff] }
 0x2c2   :  { %11271 = vst [vmem:[#allocation75_spill] sm:$0xff] %v9605_v37  ;;  %3855 = vperm.xlu0 %7198, %v3829_v49   ;;  %v2375_v59 = vadd.f32 %v2343_v39, %v2078_v55  ;;  %v9658_v55 = vld [vmem:[%s10758_s1 + $0x4] ss:$0 sm:$0xff] }
 0x2c3   :  { %v3025_v46 = vmax.f32 %v2993_v6, 0.0  ;;  %v873_v6 = vadd.f32 %v841_v11, %v544_v14  ;;  %v11276_v14 = vld [vmem:[#allocation96_spill] sm:$0xff] }
 0x2c4   :  { %v9609_v61 = vpop.permute.xlu1 %2261  ;;  %v2672_v60 = vadd.f32 %v2640_v10, %v2375_v59  ;;  %v1733_v47 = vmul.f32 %v9658_v55, %v11276_v14  ;;  %v4048_v59 = vld [vmem:[#allocation7 + $0xd0] sm:$0xff] }
 0x2c5   :  { %v9620_v19 = vrot.slane %v3025_v46, 1  ;;  %v9622_v52 = vpop.permute.xlu0 %1959  ;;  %3870 = vperm.xlu1 %7197, %v3832_v15   ;;  %v9646_v15 = vld [vmem:[%s10758_s1 + $0x3] ss:$0 sm:$0xff]  ;;  %v1268_v11 = vadd.f32 %v1236_v3, %v873_v6 }
 0x2c6   :  { %3865 = vperm.xlu0 %7198, %v3831_v30   ;;  %v1533_v30 = vmul.f32 %v9646_v15, %v11275_v2  ;;  %v2327_v2 = vmul.f32 %v9220_v42, %v9496_v24  ;;  %v4053_v24 = vld [vmem:[#allocation7 + $0xf8] sm:$0xff] }
 0x2c7   :  { %v3115_v49 = vsel %vm900_vm1, %v9620_v19, %v9529_v18 }
 0x2c8   :  { %v2866_v62 = vpop.permute.xlu1 %2865  ;;  %v9641_v53 = vmax.f32 %v3025_v46, %v3115_v49  ;;  %v4049_v46 = vld [vmem:[#allocation7 + $0xd8] sm:$0xff] }
 0x2c9   :  { %v9650_v38 = vpop.permute.xlu0 %2563  ;;  %v2937_v39 = vmul.f32 %v9253_v20, %v2866_v62  ;;  %4061 = vperm.xlu1 %7197, %v4047_v57   ;;  %v1565_v57 = vadd.f32 %v1533_v30, %v1268_v11  ;;  %v4051_v62 = vld [vmem:[#allocation7 + $0xe8] sm:$0xff]  ;;  %v2624_v30 = vmul.f32 %v9238_v13, %v9591_v36  ;;  %v11282_v36 = vld [vmem:[#allocation34_spill] sm:$0xff] }
 0x2ca   :  { %4056 = vperm.xlu0 %7198, %v4046_v40   ;;  %v3234_v18 = vmax.f32 %v9641_v53, %v9542_v7  ;;  %v2030_v40 = vmul.f32 %v9210_v48, %v9403_v50 }
 0x2cb   :  { %v2969_v10 = vadd.f32 %v2937_v39, %v2672_v60  ;;  %v1765_v6 = vadd.f32 %v1733_v47, %v1565_v57  ;;  %v4050_v39 = vld [vmem:[#allocation7 + $0xe0] sm:$0xff]  ;;  %v11281_v47 = vld [vmem:[#allocation65_spill] sm:$0xff] }
 0x2cc   :  { %6754 = vmatpush3.msra.mxu0 %v3234_v18  ;;  %v9662_v49 = vpop.permute.xlu1 %1605 }
 0x2cd   :  { %11277 = vst [vmem:[#allocation91_spill] sm:$0xff] %v9662_v49  ;;  %v3008_v7 = vadd.f32 %v9268_v54, %v2969_v10  ;;  %v9667_v3 = vpop.permute.xlu0 %1372  ;;  %4071 = vperm.xlu1 %7197, %v4049_v46   ;;  %v2062_v14 = vadd.f32 %v2030_v40, %v1765_v6  ;;  %v11280_v46 = vld [vmem:[#allocation52_spill] sm:$0xff]  ;;  %v1251_v6 = vmul.f32 %v9634_v9, %v11282_v36  ;;  %v4398_v36 = vld [vmem:[#allocation7 + $0x140] sm:$0xff] }
 0x2ce   :  { %11278 = vst [vmem:[#allocation102_spill] sm:$0xff] %v9667_v3  ;;  %4066 = vperm.xlu0 %7198, %v4048_v59   ;;  %v856_v10 = vmul.f32 %v9614_v16, %v11280_v46  ;;  %v559_v59 = vmul.f32 %v9627_v51, %v11281_v47  ;;  %v11283_v47 = vld [vmem:[#allocation32_spill] sm:$0xff] }
 0x2cf   :  { %v3040_v60 = vmax.f32 %v3008_v7, 0.0  ;;  %v2359_v57 = vadd.f32 %v2327_v2, %v2062_v14  ;;  %v4052_v7 = vld [vmem:[#allocation7 + $0xf0] sm:$0xff]  ;;  %v1548_v2 = vmul.f32 %v9646_v15, %v11283_v47  ;;  %v4399_v14 = vld [vmem:[#allocation7 + $0x148] sm:$0xff] }
 0x2d0   :  { %v9671_v18 = vpop.permute.xlu1 %2181 }
 0x2d1   :  { %v9675_v50 = vrot.slane %v3040_v60, 1  ;;  %v9677_v11 = vpop.permute.xlu0 %1879  ;;  %4081 = vperm.xlu1 %7197, %v4051_v62   ;;  %v2656_v62 = vadd.f32 %v2624_v30, %v2359_v57 }
 0x2d2   :  { %11279 = vst [vmem:[#allocation121_spill] sm:$0xff] %v9677_v11  ;;  %4076 = vperm.xlu0 %7198, %v4050_v39   ;;  %v888_v39 = vadd.f32 %v856_v10, %v559_v59 }
 0x2d3   :  { %v3145_v40 = vsel %vm900_vm1, %v9675_v50, %v9582_v44 }
 0x2d4   :  { %v2786_v3 = vpop.permute.xlu1 %2785  ;;  %v9688_v49 = vmax.f32 %v3040_v60, %v3145_v40  ;;  %v1283_v35 = vadd.f32 %v1251_v6, %v888_v39  ;;  %v11284_v60 = vld [vmem:[#allocation57_spill] sm:$0xff]  ;;  %v4595_v40 = vld [vmem:[#allocation7 + $0x188] sm:$0xff]  ;;  %v11288_v6 = vld [vmem:[#allocation26_spill] sm:$0xff] }
 0x2d5   :  { %v9690_v37 = vpop.permute.xlu0 %2483  ;;  %v2921_v46 = vmul.f32 %v9253_v20, %v2786_v3  ;;  %4091 = vperm.xlu1 %7197, %v4053_v24   ;;  %v1748_v30 = vmul.f32 %v9658_v55, %v11284_v60  ;;  %v11286_v3 = vld [vmem:[#allocation54_spill] sm:$0xff] }
 0x2d6   :  { %4086 = vperm.xlu0 %7198, %v4052_v7   ;;  %v3249_v44 = vmax.f32 %v9688_v49, %v9594_v32  ;;  %v840_v10 = vmul.f32 %v9614_v16, %v11286_v3  ;;  %v1580_v7 = vadd.f32 %v1548_v2, %v1283_v35  ;;  %v2045_v32 = vmul.f32 %v9210_v48, %v9444_v1  ;;  %v11290_v2 = vld [vmem:[#allocation127_spill] sm:$0xff] }
 0x2d7   :  { %v2953_v11 = vadd.f32 %v2921_v46, %v2656_v62  ;;  %v543_v62 = vmul.f32 %v9627_v51, %v11288_v6  ;;  %v11289_v46 = vld [vmem:[#allocation64_spill] sm:$0xff]  ;;  %v1532_v48 = vmul.f32 %v9646_v15, %v11290_v2  ;;  %v2639_v3 = vmul.f32 %v9238_v13, %v9650_v38  ;;  %v11294_v13 = vld [vmem:[#allocation114_spill] sm:$0xff] }
 0x2d8   :  { %6755 = vmatprep.subr.mxu0 %v3249_v44  ;;  %v9699_v57 = vpop.permute.xlu1 %1954  ;;  %v1235_v39 = vmul.f32 %v9634_v9, %v11289_v46  ;;  %v4594_v44 = vld [vmem:[#allocation7 + $0x180] sm:$0xff]  ;;  %v1780_v60 = vadd.f32 %v1748_v30, %v1580_v7  ;;  %v4401_v30 = vld [vmem:[#allocation7 + $0x158] sm:$0xff]  ;;  %v558_v38 = vmul.f32 %v9627_v51, %v11294_v13 }
 0x2d9   :  { %11285 = vst [vmem:[#allocation67_spill] sm:$0xff] %v9699_v57  ;;  %v2992_v59 = vadd.f32 %v9268_v54, %v2953_v11  ;;  %v9704_v24 = vpop.permute.xlu0 %1665  ;;  %4413 = vperm.xlu1 %7197, %v4399_v14   ;;  %v2342_v54 = vmul.f32 %v9220_v42, %v9546_v25  ;;  %v872_v35 = vadd.f32 %v840_v10, %v543_v62  ;;  %v4400_v25 = vld [vmem:[#allocation7 + $0x150] sm:$0xff] }
 0x2da   :  { %11287 = vst [vmem:[#allocation20_spill] sm:$0xff] %v9704_v24  ;;  %4408 = vperm.xlu0 %7198, %v4398_v36   ;;  %v2077_v36 = vadd.f32 %v2045_v32, %v1780_v60  ;;  %v1732_v42 = vmul.f32 %v9658_v55, %v9384_v41  ;;  %v11293_v32 = vld [vmem:[#allocation98_spill] sm:$0xff]  ;;  %v9740_v41 = vld [vmem:[%s10758_s1 + $0x5] ss:$0 sm:$0xff] }
 0x2db   :  { %v3024_v47 = vmax.f32 %v2992_v59, 0.0  ;;  %v1267_v59 = vadd.f32 %v1235_v39, %v872_v35  ;;  %v11295_v35 = vld [vmem:[#allocation68_spill] sm:$0xff] }
 0x2dc   :  { %v9714_v11 = vpop.permute.xlu1 %2558  ;;  %v2374_v7 = vadd.f32 %v2342_v54, %v2077_v36  ;;  %v4597_v54 = vld [vmem:[#allocation7 + $0x198] sm:$0xff]  ;;  %v1250_v2 = vmul.f32 %v9634_v9, %v11295_v35  ;;  %v9752_v36 = vld [vmem:[%s10758_s1 + $0x6] ss:$0 sm:$0xff] }
 0x2dd   :  { %v9718_v1 = vrot.slane %v3024_v47, 1  ;;  %v9720_v14 = vpop.permute.xlu0 %2256  ;;  %4609 = vperm.xlu1 %7197, %v4595_v40   ;;  %v855_v40 = vmul.f32 %v9614_v16, %v11293_v32  ;;  %v1564_v46 = vadd.f32 %v1532_v48, %v1267_v59  ;;  %v9765_v32 = vld [vmem:[%s10758_s1 + $0x7] ss:$0 sm:$0xff] }
 0x2de   :  { %11291 = vst [vmem:[#allocation48_spill] sm:$0xff] %v9720_v14  ;;  %4604 = vperm.xlu0 %7198, %v4594_v44   ;;  %v2671_v44 = vadd.f32 %v2639_v3, %v2374_v7  ;;  %v4596_v3 = vld [vmem:[#allocation7 + $0x190] sm:$0xff] }
 0x2df   :  { %v3113_v10 = vsel %vm900_vm1, %v9718_v1, %v9620_v19  ;;  %v2029_v19 = vmul.f32 %v9740_v41, %v9503_v0  ;;  %v1764_v48 = vadd.f32 %v1732_v42, %v1564_v46  ;;  %v2326_v0 = vmul.f32 %v9752_v36, %v9576_v21  ;;  %v11300_v46 = vld [vmem:[#allocation63_spill] sm:$0xff] }
 0x2e0   :  { %v9729_v6 = vpop.permute.xlu1 %1601  ;;  %v9731_v62 = vmax.f32 %v3024_v47, %v3113_v10  ;;  %v11298_v10 = vld [vmem:[#allocation128_spill] sm:$0xff]  ;;  %v2623_v21 = vmul.f32 %v9765_v32, %v9690_v37 }
 0x2e1   :  { %11292 = vst [vmem:[#allocation83_spill] sm:$0xff] %v9729_v6  ;;  %v2861_v39 = vpop.permute.xlu0 %2860  ;;  %4423 = vperm.xlu1 %7197, %v4401_v30   ;;  %v11296_v30 = vld [vmem:[#allocation77_spill] sm:$0xff]  ;;  %v1547_v42 = vmul.f32 %v9646_v15, %v11298_v10  ;;  %v2061_v7 = vadd.f32 %v2029_v19, %v1764_v48  ;;  %v4403_v19 = vld [vmem:[#allocation7 + $0x168] sm:$0xff] }
 0x2e2   :  { %v2936_v47 = vmul.f32 %v9253_v20, %v2861_v39  ;;  %4418 = vperm.xlu0 %7198, %v4400_v25   ;;  %v3233_v60 = vmax.f32 %v9731_v62, %v9641_v53  ;;  %v839_v20 = vmul.f32 %v9614_v16, %v11296_v30  ;;  %v887_v25 = vadd.f32 %v855_v40, %v558_v38  ;;  %v9776_v40 = vld [vmem:[%s10759_s2] ss:$0 sm:$0xff]  ;;  %v11302_v30 = vld [vmem:[#allocation120_spill] sm:$0xff] }
 0x2e3   :  { %v542_v39 = vmul.f32 %v9627_v51, %v11300_v46  ;;  %v2358_v37 = vadd.f32 %v2326_v0, %v2061_v7  ;;  %v557_v10 = vmul.f32 %v9627_v51, %v11302_v30  ;;  %v11304_v7 = vld [vmem:[#allocation24_spill] sm:$0xff]  ;;  %v4598_v30 = vld [vmem:[#allocation7 + $0x1a0] sm:$0xff] }
 0x2e4   :  { %v2968_v59 = vadd.f32 %v2936_v47, %v2671_v44  ;;  %6756 = vmatpush3.msra.mxu0 %v3233_v60  ;;  %v9758_v53 = vpop.permute.xlu1 %2176  ;;  %v1282_v44 = vadd.f32 %v1250_v2, %v887_v25  ;;  %v1747_v47 = vmul.f32 %v9658_v55, %v9448_v33  ;;  %v4402_v60 = vld [vmem:[#allocation7 + $0x160] sm:$0xff]  ;;  %v9792_v33 = vld [vmem:[%s10758_s1 + $0x8] ss:$0 sm:$0xff] }
 0x2e5   :  { %11297 = vst [vmem:[#allocation33_spill] sm:$0xff] %v9758_v53  ;;  %v9769_v13 = vpop.permute.xlu0 %1874  ;;  %4619 = vperm.xlu1 %7197, %v4597_v54   ;;  %v871_v35 = vadd.f32 %v839_v20, %v542_v39  ;;  %v11301_v54 = vld [vmem:[#allocation45_spill] sm:$0xff]  ;;  %v11305_v39 = vld [vmem:[#allocation82_spill] sm:$0xff]  ;;  %v1731_v53 = vmul.f32 %v9658_v55, %v9486_v28 }
 0x2e6   :  { %11299 = vst [vmem:[#allocation80_spill] sm:$0xff] %v9769_v13  ;;  %v3007_v38 = vadd.f32 %v9776_v40, %v2968_v59  ;;  %4614 = vperm.xlu0 %7198, %v4596_v3   ;;  %v854_v48 = vmul.f32 %v9614_v16, %v11301_v54  ;;  %v1579_v6 = vadd.f32 %v1547_v42, %v1282_v44  ;;  %v11303_v20 = vld [vmem:[#allocation69_spill] sm:$0xff]  ;;  %v11306_v44 = vld [vmem:[#allocation95_spill] sm:$0xff] }
 0x2e7   :  { %v2044_v3 = vmul.f32 %v9740_v41, %v9527_v5  ;;  %v2655_v59 = vadd.f32 %v2623_v21, %v2358_v37  ;;  %v541_v25 = vmul.f32 %v9627_v51, %v11303_v20  ;;  %v1234_v42 = vmul.f32 %v9634_v9, %v11304_v7  ;;  %v11307_v20 = vld [vmem:[#allocation111_spill] sm:$0xff] }
 0x2e8   :  { %v3039_v46 = vmax.f32 %v3007_v38, 0.0  ;;  %v2781_v24 = vpop.permute.xlu1 %2780  ;;  %v838_v5 = vmul.f32 %v9614_v16, %v11305_v39  ;;  %v4599_v38 = vld [vmem:[#allocation7 + $0x1a8] sm:$0xff]  ;;  %v853_v37 = vmul.f32 %v9614_v16, %v11306_v44  ;;  %v1779_v54 = vadd.f32 %v1747_v47, %v1579_v6  ;;  %v11308_v7 = vld [vmem:[#allocation115_spill] sm:$0xff] }
 0x2e9   :  { %v9787_v2 = vpop.permute.xlu0 %2478  ;;  %v2920_v0 = vmul.f32 %v9792_v33, %v2781_v24  ;;  %4433 = vperm.xlu1 %7197, %v4403_v19   ;;  %v2341_v24 = vmul.f32 %v9752_v36, %v9609_v61  ;;  %v556_v13 = vmul.f32 %v9627_v51, %v11307_v20  ;;  %v1249_v57 = vmul.f32 %v9634_v9, %v11308_v7 }
 0x2ea   :  { %v9801_v21 = vrot.slane %v3039_v46, 1  ;;  %4428 = vperm.xlu0 %7198, %v4402_v60   ;;  %v1531_v39 = vmul.f32 %v9646_v15, %v9388_v27  ;;  %v2076_v47 = vadd.f32 %v2044_v3, %v1779_v54  ;;  %v2638_v61 = vmul.f32 %v9765_v32, %v9714_v11  ;;  %v4404_v54 = vld [vmem:[#allocation7 + $0x170] sm:$0xff] }
 0x2eb   :  { %v2952_v19 = vadd.f32 %v2920_v0, %v2655_v59  ;;  %v886_v20 = vadd.f32 %v854_v48, %v557_v10  ;;  %v1266_v7 = vadd.f32 %v1234_v42, %v871_v35  ;;  %v870_v27 = vadd.f32 %v838_v5, %v541_v25  ;;  %v4601_v5 = vld [vmem:[#allocation7 + $0x1b8] sm:$0xff] }
 0x2ec   :  { %v9813_v60 = vpop.permute.xlu1 %2251  ;;  %v3143_v6 = vsel %vm900_vm1, %v9801_v21, %v9675_v50  ;;  %v2373_v50 = vadd.f32 %v2341_v24, %v2076_v47  ;;  %v2028_v35 = vmul.f32 %v9740_v41, %v9580_v26  ;;  %v555_v26 = vmul.f32 %v9627_v51, %v9419_v56 }
 0x2ed   :  { %11309 = vst [vmem:[#allocation97_spill] sm:$0xff] %v9813_v60  ;;  %v2991_v59 = vadd.f32 %v9776_v40, %v2952_v19  ;;  %v9821_v0 = vpop.permute.xlu0 %1949  ;;  %4629 = vperm.xlu1 %7197, %v4599_v38   ;;  %v9823_v44 = vmax.f32 %v3039_v46, %v3143_v6  ;;  %v4405_v60 = vld [vmem:[#allocation7 + $0x178] sm:$0xff]  ;;  %v885_v19 = vadd.f32 %v853_v37, %v556_v13 }
 0x2ee   :  { %4624 = vperm.xlu0 %7198, %v4598_v30   ;;  %v1281_v14 = vadd.f32 %v1249_v57, %v886_v20  ;;  %v1233_v46 = vmul.f32 %v9634_v9, %v9373_v29  ;;  %v1563_v38 = vadd.f32 %v1531_v39, %v1266_v7  ;;  %v2670_v10 = vadd.f32 %v2638_v61, %v2373_v50  ;;  %v4600_v39 = vld [vmem:[#allocation7 + $0x1b0] sm:$0xff]  ;;  %v4791_v7 = vld [vmem:[#allocation7 + $0x1c8] sm:$0xff] }
 0x2ef   :  { %v3023_v3 = vmax.f32 %v2991_v59, 0.0  ;;  %v3248_v11 = vmax.f32 %v9823_v44, %v9688_v49  ;;  %v11310_v49 = vld [vmem:[#allocation23_spill] sm:$0xff]  ;;  %v837_v29 = vmul.f32 %v9614_v16, %v9377_v45  ;;  %v852_v13 = vmul.f32 %v9614_v16, %v9416_v58 }
 0x2f0   :  { %v2856_v48 = vpop.permute.xlu1 %2855  ;;  %v540_v57 = vmul.f32 %v9627_v51, %v11310_v49  ;;  %v1763_v37 = vadd.f32 %v1731_v53, %v1563_v38  ;;  %v2325_v24 = vmul.f32 %v9752_v36, %v9671_v18  ;;  %v1546_v45 = vmul.f32 %v9646_v15, %v9429_v31  ;;  %v11311_v38 = vld [vmem:[#allocation37_spill] sm:$0xff] }
 0x2f1   :  { %v9833_v25 = vrot.slane %v3023_v3, 1  ;;  %v9835_v28 = vpop.permute.xlu0 %2553  ;;  %6757 = vmatprep.subr.mxu0 %v3248_v11  ;;  %v2935_v42 = vmul.f32 %v9792_v33, %v2856_v48  ;;  %4443 = vperm.xlu1 %7197, %v4405_v60   ;;  %v1248_v58 = vmul.f32 %v9634_v9, %v9433_v63  ;;  %v1232_v56 = vmul.f32 %v9634_v9, %v9477_v34  ;;  %v4790_v11 = vld [vmem:[#allocation7 + $0x1c0] sm:$0xff] }
 0x2f2   :  { %4438 = vperm.xlu0 %7198, %v4404_v54   ;;  %v1265_v18 = vadd.f32 %v1233_v46, %v870_v27  ;;  %v2060_v47 = vadd.f32 %v2028_v35, %v1763_v37  ;;  %v2622_v61 = vmul.f32 %v9765_v32, %v9787_v2  ;;  %v869_v31 = vadd.f32 %v837_v29, %v540_v57 }
 0x2f3   :  { %v2967_v30 = vadd.f32 %v2935_v42, %v2670_v10  ;;  %v3111_v60 = vsel %vm900_vm1, %v9833_v25, %v9718_v1  ;;  %v836_v63 = vmul.f32 %v9614_v16, %v9481_v12  ;;  %v1530_v34 = vmul.f32 %v9646_v15, %v9490_v23 }
 0x2f4   :  { %v9857_v6 = vpop.permute.xlu1 %2171  ;;  %v9859_v53 = vmax.f32 %v3023_v3, %v3111_v60  ;;  %v884_v27 = vadd.f32 %v852_v13, %v555_v26  ;;  %v1746_v2 = vmul.f32 %v9658_v55, %v9531_v22  ;;  %v2357_v50 = vadd.f32 %v2325_v24, %v2060_v47  ;;  %v4986_v26 = vld [vmem:[#allocation7 + $0x200] sm:$0xff] }
 0x2f5   :  { %v3006_v1 = vadd.f32 %v9776_v40, %v2967_v30  ;;  %v9864_v59 = vpop.permute.xlu0 %1869  ;;  %4639 = vperm.xlu1 %7197, %v4601_v5   ;;  %v1578_v54 = vadd.f32 %v1546_v45, %v1281_v14  ;;  %v1280_v46 = vadd.f32 %v1248_v58, %v885_v19  ;;  %v539_v12 = vmul.f32 %v9627_v51, %v9466_v43  ;;  %v11312_v14 = vld [vmem:[#allocation86_spill] sm:$0xff]  ;;  %v4987_v51 = vld [vmem:[#allocation7 + $0x208] sm:$0xff] }
 0x2f6   :  { %4634 = vperm.xlu0 %7198, %v4600_v39   ;;  %v3232_v20 = vmax.f32 %v9859_v53, %v9731_v62  ;;  %v1264_v16 = vadd.f32 %v1232_v56, %v869_v31  ;;  %v1545_v48 = vmul.f32 %v9646_v15, %v11311_v38  ;;  %v2654_v62 = vadd.f32 %v2622_v61, %v2357_v50  ;;  %v11313_v30 = vld [vmem:[#allocation48_spill] sm:$0xff]  ;;  %v11315_v56 = vld [vmem:[#allocation121_spill] sm:$0xff]  ;;  %v4793_v31 = vld [vmem:[#allocation7 + $0x1d8] sm:$0xff] }
 0x2f7   :  { %v3038_v3 = vmax.f32 %v3006_v1, 0.0  ;;  %v868_v42 = vadd.f32 %v836_v63, %v539_v12  ;;  %v1562_v49 = vadd.f32 %v1530_v34, %v1265_v18  ;;  %v1247_v19 = vmul.f32 %v9634_v9, %v11312_v14  ;;  %v4792_v50 = vld [vmem:[#allocation7 + $0x1d0] sm:$0xff]  ;;  %v4989_v14 = vld [vmem:[#allocation7 + $0x218] sm:$0xff] }
 0x2f8   :  { %6758 = vmatpush3.msra.mxu0 %v3232_v20  ;;  %v2776_v23 = vpop.permute.xlu1 %2775  ;;  %v2043_v43 = vmul.f32 %v9740_v41, %v9622_v52  ;;  %v1778_v57 = vadd.f32 %v1746_v2, %v1578_v54  ;;  %v1730_v29 = vmul.f32 %v9658_v55, %v9563_v8  ;;  %v1231_v37 = vmul.f32 %v9634_v9, %v9556_v17  ;;  %v11314_v8 = vld [vmem:[#allocation74_spill] sm:$0xff]  ;;  %v11316_v17 = vld [vmem:[#allocation75_spill] sm:$0xff]  ;;  %v11317_v20 = vld [vmem:[#allocation33_spill] sm:$0xff] }
 0x2f9   :  { %v9878_v35 = vrot.slane %v3038_v3, 1  ;;  %v2474_v10 = vpop.permute.xlu0 %2473  ;;  %v2919_v22 = vmul.f32 %v9792_v33, %v2776_v23  ;;  %4805 = vperm.xlu1 %7197, %v4791_v7   ;;  %v1529_v24 = vmul.f32 %v9646_v15, %v9567_v4  ;;  %v2340_v52 = vmul.f32 %v9752_v36, %v11313_v30  ;;  %v11318_v54 = vld [vmem:[#allocation67_spill] sm:$0xff] }
 0x2fa   :  { %4800 = vperm.xlu0 %7198, %v4790_v11   ;;  %v1577_v45 = vadd.f32 %v1545_v48, %v1280_v46  ;;  %v1745_v58 = vmul.f32 %v9658_v55, %v11314_v8  ;;  %v2027_v18 = vmul.f32 %v9740_v41, %v11315_v56  ;;  %v1544_v4 = vmul.f32 %v9646_v15, %v11316_v17 }
 0x2fb   :  { %v2951_v13 = vadd.f32 %v2919_v22, %v2654_v62  ;;  %v3141_v5 = vsel %vm900_vm1, %v9878_v35, %v9801_v21  ;;  %v2075_v9 = vadd.f32 %v2043_v43, %v1778_v57  ;;  %v2637_v61 = vmul.f32 %v9765_v32, %v9835_v28  ;;  %v11319_v22 = vld [vmem:[#allocation91_spill] sm:$0xff]  ;;  %v11321_v57 = vld [vmem:[#allocation97_spill] sm:$0xff] }
 0x2fc   :  { %v2549_v39 = vpop.permute.xlu1 %2548  ;;  %v9896_v60 = vmax.f32 %v3038_v3, %v3141_v5  ;;  %v1279_v63 = vadd.f32 %v1247_v19, %v884_v27  ;;  %v1762_v34 = vadd.f32 %v1730_v29, %v1562_v49  ;;  %v2324_v7 = vmul.f32 %v9752_v36, %v11317_v20  ;;  %v11320_v19 = vld [vmem:[#allocation102_spill] sm:$0xff]  ;;  %v4988_v29 = vld [vmem:[#allocation7 + $0x210] sm:$0xff]  ;;  %v11322_v5 = vld [vmem:[#allocation80_spill] sm:$0xff] }
 0x2fd   :  { %v2990_v21 = vadd.f32 %v9776_v40, %v2951_v13  ;;  %v9903_v47 = vpop.permute.xlu0 %2246  ;;  %5001 = vperm.xlu1 %7197, %v4987_v51   ;;  %v1263_v3 = vadd.f32 %v1231_v37, %v868_v42  ;;  %v1561_v11 = vadd.f32 %v1529_v24, %v1264_v16  ;;  %v2042_v46 = vmul.f32 %v9740_v41, %v11318_v54 }
 0x2fe   :  { %4996 = vperm.xlu0 %7198, %v4986_v26   ;;  %v3247_v1 = vmax.f32 %v9896_v60, %v9823_v44  ;;  %v2372_v12 = vadd.f32 %v2340_v52, %v2075_v9  ;;  %v1777_v23 = vadd.f32 %v1745_v58, %v1577_v45  ;;  %v2059_v38 = vadd.f32 %v2027_v18, %v1762_v34  ;;  %v11323_v45 = vld [vmem:[#allocation83_spill] sm:$0xff]  ;;  %v4795_v9 = vld [vmem:[#allocation7 + $0x1e8] sm:$0xff] }
 0x2ff   :  { %v3022_v2 = vmax.f32 %v2990_v21, 0.0  ;;  %v2621_v44 = vmul.f32 %v9765_v32, %v2474_v10  ;;  %v1576_v62 = vadd.f32 %v1544_v4, %v1279_v63  ;;  %v1729_v49 = vmul.f32 %v9658_v55, %v11319_v22  ;;  %v4794_v34 = vld [vmem:[#allocation7 + $0x1e0] sm:$0xff] }
 0x300   :  { %6759 = vmatprep.subr.mxu0 %v3247_v1  ;;  %v2167_v28 = vpop.permute.xlu1 %2166  ;;  %v2669_v42 = vadd.f32 %v2637_v61, %v2372_v12  ;;  %v1528_v43 = vmul.f32 %v9646_v15, %v11320_v19  ;;  %v2356_v51 = vadd.f32 %v2324_v7, %v2059_v38  ;;  %v2339_v10 = vmul.f32 %v9752_v36, %v11321_v57  ;;  %v11324_v1 = vld [vmem:[#allocation20_spill] sm:$0xff] }
 0x301   :  { %v9916_v48 = vrot.slane %v3022_v2, 1  ;;  %v2851_v27 = vpop.permute.xlu0 %2850  ;;  %4815 = vperm.xlu1 %7197, %v4793_v31   ;;  %v2074_v26 = vadd.f32 %v2042_v46, %v1777_v23  ;;  %v2026_v37 = vmul.f32 %v9740_v41, %v11322_v5  ;;  %v1728_v15 = vmul.f32 %v9658_v55, %v11323_v45  ;;  %v4991_v38 = vld [vmem:[#allocation7 + $0x228] sm:$0xff]  ;;  %v4796_v5 = vld [vmem:[#allocation7 + $0x1f0] sm:$0xff] }
 0x302   :  { %v2934_v16 = vmul.f32 %v9792_v33, %v2851_v27  ;;  %4810 = vperm.xlu0 %7198, %v4792_v50   ;;  %v2653_v8 = vadd.f32 %v2621_v44, %v2356_v51  ;;  %v2636_v58 = vmul.f32 %v9765_v32, %v2549_v39  ;;  %v1761_v21 = vadd.f32 %v1729_v49, %v1561_v11  ;;  %v4990_v49 = vld [vmem:[#allocation7 + $0x220] sm:$0xff] }
 0x303   :  { %v3109_v13 = vsel %vm900_vm1, %v9916_v48, %v9833_v25  ;;  %v2323_v25 = vmul.f32 %v9752_v36, %v9857_v6  ;;  %v1560_v61 = vadd.f32 %v1528_v43, %v1263_v3  ;;  %v1744_v31 = vmul.f32 %v9658_v55, %v11324_v1 }
 0x304   :  { %v2966_v24 = vadd.f32 %v2934_v16, %v2669_v42  ;;  %v2771_v30 = vpop.permute.xlu1 %2770  ;;  %v9930_v52 = vmax.f32 %v3022_v2, %v3109_v13  ;;  %v2371_v39 = vadd.f32 %v2339_v10, %v2074_v26  ;;  %v2058_v20 = vadd.f32 %v2026_v37, %v1761_v21 }
 0x305   :  { %v2469_v56 = vpop.permute.xlu0 %2468  ;;  %v2918_v18 = vmul.f32 %v9792_v33, %v2771_v30  ;;  %5011 = vperm.xlu1 %7197, %v4989_v14   ;;  %v2025_v7 = vmul.f32 %v9740_v41, %v9864_v59  ;;  %v1760_v11 = vadd.f32 %v1728_v15, %v1560_v61  ;;  %v2041_v55 = vmul.f32 %v9740_v41, %v9821_v0 }
 0x306   :  { %v3005_v17 = vadd.f32 %v9776_v40, %v2966_v24  ;;  %5006 = vperm.xlu0 %7198, %v4988_v29   ;;  %v3231_v4 = vmax.f32 %v9930_v52, %v9859_v53  ;;  %v2620_v6 = vmul.f32 %v9765_v32, %v2469_v56  ;;  %v2668_v54 = vadd.f32 %v2636_v58, %v2371_v39 }
 0x307   :  { %v2950_v63 = vadd.f32 %v2918_v18, %v2653_v8  ;;  %v2355_v12 = vadd.f32 %v2323_v25, %v2058_v20  ;;  %v2322_v59 = vmul.f32 %v9752_v36, %v2167_v28  ;;  %v1776_v44 = vadd.f32 %v1744_v31, %v1576_v62  ;;  %v4993_v25 = vld [vmem:[#allocation7 + $0x238] sm:$0xff] }
 0x308   :  { %v3037_v2 = vmax.f32 %v3005_v17, 0.0  ;;  %6760 = vmatpush3.msra.mxu0 %v3231_v4  ;;  %v2846_v50 = vpop.permute.xlu1 %2845  ;;  %v2057_v42 = vadd.f32 %v2025_v7, %v1760_v11  ;;  %v2338_v16 = vmul.f32 %v9752_v36, %v9903_v47  ;;  %v4797_v36 = vld [vmem:[#allocation7 + $0x1f8] sm:$0xff]  ;;  %v4992_v4 = vld [vmem:[#allocation7 + $0x230] sm:$0xff] }
 0x309   :  { %v2989_v53 = vadd.f32 %v9776_v40, %v2950_v63  ;;  %v2544_v3 = vpop.permute.xlu0 %2543  ;;  %v2933_v46 = vmul.f32 %v9792_v33, %v2846_v50  ;;  %4825 = vperm.xlu1 %7197, %v4795_v9   ;;  %v2652_v14 = vadd.f32 %v2620_v6, %v2355_v12  ;;  %v2073_v57 = vadd.f32 %v2041_v55, %v1776_v44 }
 0x30a   :  { %v3136_v23 = vrot.slane %v3037_v2, 1  ;;  %4820 = vperm.xlu0 %7198, %v4794_v34   ;;  %v2354_v10 = vadd.f32 %v2322_v59, %v2057_v42  ;;  %v2635_v29 = vmul.f32 %v9765_v32, %v2544_v3  ;;  %v5405_v34 = vld [vmem:[#allocation10 + $0x18] sm:$0xff]  ;;  %v5379_v3 = vld [vmem:[#allocation10] sm:$0xff]  ;;  %v11326_v59 = vld [vmem:[#allocation58_spill] sm:$0xff] }
 0x30b   :  { %v3021_v27 = vmax.f32 %v2989_v53, 0.0  ;;  %v2965_v22 = vadd.f32 %v2933_v46, %v2668_v54  ;;  %v2370_v24 = vadd.f32 %v2338_v16, %v2073_v57  ;;  %v5380_v53 = vld [vmem:[#allocation10 + $0x8] sm:$0xff]  ;;  %v11331_v57 = vld [vmem:[#allocation72_spill] sm:$0xff] }
 0x30c   :  { %v2766_v19 = vpop.permute.xlu1 %2765  ;;  %v3139_v43 = vsel %vm900_vm1, %v3136_v23, %v9878_v35  ;;  %v5593_v42 = vld [vmem:[#allocation10 + $0x28] sm:$0xff] }
 0x30d   :  { %v3104_v41 = vrot.slane %v3021_v27, 1  ;;  %v3004_v0 = vadd.f32 %v9776_v40, %v2965_v22  ;;  %v2464_v51 = vpop.permute.xlu0 %2463  ;;  %v2917_v28 = vmul.f32 %v9792_v33, %v2766_v19  ;;  %5021 = vperm.xlu1 %7197, %v4991_v38   ;;  %v3214_v62 = vmax.f32 %v3037_v2, %v3139_v43 }
 0x30e   :  { %v2619_v13 = vmul.f32 %v9765_v32, %v2464_v51  ;;  %5016 = vperm.xlu0 %7198, %v4990_v49   ;;  %v2667_v18 = vadd.f32 %v2635_v29, %v2370_v24  ;;  %v5693_v29 = vld [vmem:[#allocation10 + $0x30] sm:$0xff]  ;;  %v3054_v24 = vld [vmem:[#allocation5 + $0x28] sm:$0xff] }
 0x30f   :  { %v3036_v47 = vmax.f32 %v3004_v0, 0.0  ;;  %v2949_v26 = vadd.f32 %v2917_v28, %v2652_v14  ;;  %v3246_v35 = vmax.f32 %v3214_v62, %v9896_v60  ;;  %v3107_v37 = vsel %vm900_vm1, %v3104_v41, %v9916_v48  ;;  %v11329_v14 = vld [vmem:[#allocation40_spill] sm:$0xff]  ;;  %v5592_v0 = vld [vmem:[#allocation10 + $0x20] sm:$0xff] }
 0x310   :  { %v2761_v30 = vpop.permute.xlu1 %2760  ;;  %v3198_v45 = vmax.f32 %v3021_v27, %v3107_v37  ;;  %v2651_v8 = vadd.f32 %v2619_v13, %v2354_v10  ;;  %v11327_v27 = vld [vmem:[#allocation47_spill] sm:$0xff]  ;;  %v11330_v19 = vmax.f32 %v11329_v14, 0.0  ;;  %v11332_v13 = vld [vmem:[#allocation46_spill] sm:$0xff]  ;;  %v3051_v37 = vld [vmem:[#allocation5 + $0x10] sm:$0xff] }
 0x311   :  { %v3134_v15 = vrot.slane %v3036_v47, 1  ;;  %v2988_v58 = vadd.f32 %v9776_v40, %v2949_v26  ;;  %v2841_v56 = vpop.permute.xlu0 %2840  ;;  %6761 = vmatprep.subr.mxu0 %v3246_v35  ;;  %v2916_v32 = vmul.f32 %v9792_v33, %v2761_v30  ;;  %4835 = vperm.xlu1 %7197, %v4797_v36   ;;  %v11328_v22 = vmax.f32 %v11327_v27, 0.0  ;;  %v3052_v26 = vld [vmem:[#allocation5 + $0x18] sm:$0xff]  ;;  %v5886_v35 = vld [vmem:[#allocation10 + $0x58] sm:$0xff] }
 0x312   :  { %v2932_v21 = vmul.f32 %v9792_v33, %v2841_v56  ;;  %4830 = vperm.xlu0 %7198, %v4796_v5   ;;  %v3230_v60 = vmax.f32 %v3198_v45, %v9930_v52  ;;  %v5404_v52 = vld [vmem:[#allocation10 + $0x10] sm:$0xff]  ;;  %v5987_v30 = vld [vmem:[#allocation10 + $0x68] sm:$0xff] }
 0x313   :  { %v3020_v48 = vmax.f32 %v2988_v58, 0.0  ;;  %v2948_v17 = vadd.f32 %v2916_v32, %v2651_v8  ;;  %v3137_v9 = vsel %vm900_vm1, %v3134_v15, %v3136_v23  ;;  %v5885_v5 = vld [vmem:[#allocation10 + $0x50] sm:$0xff]  ;;  %v3056_v8 = vld [vmem:[#allocation5 + $0x38] sm:$0xff]  ;;  %v6096_v58 = vld [vmem:[#allocation10 + $0x78] sm:$0xff] }
 0x314   :  { %v2964_v61 = vadd.f32 %v2932_v21, %v2667_v18  ;;  %6762 = vmatpush3.msra.mxu0 %v3230_v60  ;;  %v3213_v1 = vmax.f32 %v3036_v47, %v3137_v9  ;;  %v3049_v47 = vld [vmem:[#allocation5] sm:$0xff]  ;;  %v3055_v32 = vld [vmem:[#allocation5 + $0x30] sm:$0xff]  ;;  %v3058_v18 = vld [vmem:[#allocation5 + $0x48] sm:$0xff] }
 0x315   :  { %v3102_v31 = vrot.slane %v3020_v48, 1  ;;  %v2987_v39 = vadd.f32 %v9776_v40, %v2948_v17  ;;  %5031 = vperm.xlu1 %7197, %v4993_v25   ;;  %v6095_v56 = vld [vmem:[#allocation10 + $0x70] sm:$0xff]  ;;  %v6204_v21 = vld [vmem:[#allocation10 + $0x88] sm:$0xff]  ;;  %v6203_v60 = vld [vmem:[#allocation10 + $0x80] sm:$0xff] }
 0x316   :  { %v3003_v63 = vadd.f32 %v9776_v40, %v2964_v61  ;;  %5026 = vperm.xlu0 %7198, %v4992_v4   ;;  %v3245_v33 = vmax.f32 %v3213_v1, %v3214_v62  ;;  %v11325_v40 = vld [vmem:[#allocation56_spill] sm:$0xff]  ;;  %v3057_v25 = vld [vmem:[#allocation5 + $0x40] sm:$0xff]  ;;  %v3059_v17 = vld [vmem:[#allocation5 + $0x50] sm:$0xff] }
 0x317   :  { %v3019_v20 = vmax.f32 %v2987_v39, 0.0  ;;  %v3105_v7 = vsel %vm900_vm1, %v3102_v31, %v3104_v41  ;;  %v5694_v62 = vld [vmem:[#allocation10 + $0x38] sm:$0xff]  ;;  %v3061_v9 = vld [vmem:[#allocation5 + $0x60] sm:$0xff]  ;;  %v3064_v61 = vld [vmem:[#allocation5 + $0x78] sm:$0xff]  ;;  %v9984_v39 = vpop.permute.xlu1 %3496 }
 0x318   :  { %v3035_v2 = vmax.f32 %v3003_v63, 0.0  ;;  %6763 = vmatprep.subr.mxu0 %v3245_v33  ;;  %v3197_v6 = vmax.f32 %v3020_v48, %v3105_v7  ;;  %v3060_v48 = vld [vmem:[#allocation5 + $0x58] sm:$0xff]  ;;  %v3062_v4 = vld [vmem:[#allocation5 + $0x68] sm:$0xff] }
 0x319   :  { %v3100_v50 = vrot.slane %v3019_v20, 1  ;;  %5413 = vperm.xlu1 %7197, %v5405_v34  }
 0x31a   :  { %v3132_v11 = vrot.slane %v3035_v2, 1  ;;  %5408 = vperm.xlu0 %7198, %v5404_v52   ;;  %v3229_v54 = vmax.f32 %v3197_v6, %v3198_v45  ;;  %v5986_v45 = vld [vmem:[#allocation10 + $0x60] sm:$0xff] }
 0x31b   :  { %v3103_v46 = vsel %vm900_vm1, %v3100_v50, %v3102_v31  ;;  %v3101_v55 = vsel %vm900_vm1, %v11325_v40, %v3100_v50  ;;  %v9982_v31 = vpop.permute.xlu0 %3491  ;;  %v9988_v33 = vpop.permute.xlu1 %3506  ;;  %v6617_v40 = vld [vmem:[%s10762_s5 + $0x8] sm:$0xff] }
 0x31c   :  { %6764 = vmatpush3.msra.mxu0 %v3229_v54  ;;  %v3135_v12 = vsel %vm900_vm1, %v3132_v11, %v3134_v15  ;;  %v3196_v23 = vmax.f32 %v3019_v20, %v3103_v46  ;;  %v3133_v38 = vsel %vm900_vm1, %v11326_v59, %v3132_v11  ;;  %v3195_v43 = vmax.f32 %v11330_v19, %v3101_v55  ;;  %v3053_v15 = vld [vmem:[#allocation5 + $0x20] sm:$0xff] }
 0x31d   :  { %5388 = vperm.xlu1 %7197, %v5380_v53   ;;  %v3212_v44 = vmax.f32 %v3035_v2, %v3135_v12  ;;  %v3211_v49 = vmax.f32 %v11328_v22, %v3133_v38  ;;  %v9995_v20 = vld [vmem:[%s10762_s5 + $0x20] sm:$0xff]  ;;  %v6670_v53 = vld [vmem:[%s10762_s5 + $0x30] sm:$0xff]  ;;  %6937 = vmatprep.subr.mxu1 %v6617_v40 }
 0x31e   :  { %5383 = vperm.xlu0 %7198, %v5379_v3   ;;  %v3228_v16 = vmax.f32 %v3196_v23, %v3197_v6  ;;  %v3227_v28 = vmax.f32 %v3195_v43, %v3196_v23  ;;  %v3226_v36 = vmax.f32 %v11332_v13, %v3195_v43  ;;  %6938 = vmatpush3.msra.mxu1 %v6617_v40  ;;  %v10030_v23 = vld [vmem:[%s10762_s5] sm:$0xff] }
 0x31f   :  { %v3244_v41 = vmax.f32 %v3212_v44, %v3213_v1  ;;  %v3243_v51 = vmax.f32 %v3211_v49, %v3212_v44  ;;  %v3242_v10 = vmax.f32 %v11331_v57, %v3211_v49  ;;  %v3063_v1 = vld [vmem:[#allocation5 + $0x70] sm:$0xff]  ;;  %v9986_v63 = vpop.permute.xlu0 %3501  ;;  %v9998_v52 = vpop.permute.xlu1 %3516  ;;  %6951 = vmatprep.subr.mxu1 %v10030_v23 }
 0x321   :  { %6765 = vmatprep.subr.mxu0 %v3244_v41  ;;  %5601 = vperm.xlu1 %7197, %v5593_v42  }
 0x322   :  { %5596 = vperm.xlu0 %7198, %v5592_v0   ;;  %6766 = vmatpush3.msra.mxu0 %v3228_v16 }
 0x323   :  { %6767 = vmatprep.subr.mxu0 %v3243_v51  ;;  %v9990_v34 = vpop.permute.xlu0 %3511  ;;  %v10003_v2 = vpop.permute.xlu1 %3526 }
 0x324   :  { %6768 = vmatpush3.msra.mxu0 %v3227_v28 }
 0x325   :  { %6769 = vmatprep.subr.mxu0 %v3242_v10  ;;  %5702 = vperm.xlu1 %7197, %v5694_v62  }
 0x326   :  { %5697 = vperm.xlu0 %7198, %v5693_v29   ;;  %6770 = vmatpush3.msra.mxu0 %v3226_v36 }
 0x327   :  { %3323 = vmatmul.mubr.f32.vlgmr.msra.gmra.mxu0 %v3049_v47  ;;  %6993 = vmatprep.subr.mxu0 %v9995_v20  ;;  %v10001_v7 = vpop.permute.xlu0 %3521  ;;  %v10007_v50 = vpop.permute.xlu1 %3412 }
 0x328   :  { %3327 = vmatprep.mubr.f32.mxu0 %v3052_v26  ;;  %6994 = vmatpush3.msra.mxu0 %v9995_v20 }
 0x329   :  { %5894 = vperm.xlu1 %7197, %v5886_v35   ;;  %7021 = vmatprep.subr.mxu0 %v6670_v53 }
 0x32a   :  { %5889 = vperm.xlu0 %7198, %v5885_v5  }
 0x32b   :  { %3328 = vmatmul.mubr.f32.gmra.mxu0 %v3051_v37  ;;  %v10005_v6 = vpop.permute.xlu0 %3407  ;;  %v10011_v54 = vpop.permute.xlu1 %3422 }
 0x32c   :  { %3332 = vmatprep.mubr.f32.mxu0 %v3054_v24 }
 0x32d   :  { %5995 = vperm.xlu1 %7197, %v5987_v30  }
 0x32e   :  { %5990 = vperm.xlu0 %7198, %v5986_v45  }
 0x32f   :  { %3333 = vmatmul.mubr.f32.gmra.mxu0 %v3053_v15  ;;  %v10009_v11 = vpop.permute.xlu0 %3417  ;;  %v10018_v46 = vpop.permute.xlu1 %3432 }
 0x330   :  { %3337 = vmatprep.mubr.f32.mxu0 %v3056_v8 }
 0x331   :  { %6104 = vperm.xlu1 %7197, %v6096_v58  }
 0x332   :  { %6099 = vperm.xlu0 %7198, %v6095_v56  }
 0x333   :  { %3338 = vmatmul.mubr.f32.gmra.mxu0 %v3055_v32  ;;  %v10016_v3 = vpop.permute.xlu0 %3427  ;;  %v10025_v12 = vpop.permute.xlu1 %3442 }
 0x334   :  { %3342 = vmatprep.mubr.f32.mxu0 %v3058_v18 }
 0x335   :  { %6212 = vperm.xlu1 %7197, %v6204_v21  }
 0x336   :  { %6207 = vperm.xlu0 %7198, %v6203_v60  }
 0x337   :  { %3343 = vmatmul.mubr.f32.gmra.mxu0 %v3057_v25  ;;  %v10023_v55 = vpop.permute.xlu0 %3437  ;;  %v10035_v38 = vpop.permute.xlu1 %3840 }
 0x338   :  { %3347 = vmatprep.mubr.f32.mxu0 %v3060_v48 }
 0x33b   :  { %3348 = vmatmul.mubr.f32.gmra.mxu0 %v3059_v17  ;;  %v10033_v59 = vpop.permute.xlu0 %3835  ;;  %v10039_v27 = vpop.permute.xlu1 %3850  ;;  %v10106_v17 = vld [vmem:[%s10762_s5 + $0x40] sm:$0xff] }
 0x33c   :  { %3352 = vmatprep.mubr.f32.mxu0 %v3062_v4 }
 0x33f   :  { %3353 = vmatmul.mubr.f32.gmra.mxu0 %v3061_v9  ;;  %v10037_v44 = vpop.permute.xlu0 %3845  ;;  %v10043_v49 = vpop.permute.xlu1 %3860 }
 0x340   :  { %3357 = vmatprep.mubr.f32.mxu0 %v3064_v61 }
 0x343   :  { %3358 = vmatmul.mubr.f32.gmra.mxu0 %v3063_v1  ;;  %v10041_v22 = vpop.permute.xlu0 %3855  ;;  %v10047_v16 = vpop.permute.xlu1 %3870 }
 0x344   :  { %11333 = vst [vmem:[#allocation112_spill] sm:$0xff] %v10047_v16 }
 0x347   :  { %v10045_v42 = vpop.permute.xlu0 %3865  ;;  %v10051_v19 = vpop.permute.xlu1 %4061 }
 0x348   :  { %11335 = vst [vmem:[#allocation78_spill] sm:$0xff] %v10051_v19 }
 0x34b   :  { %v10049_v14 = vpop.permute.xlu0 %4056  ;;  %v10055_v41 = vpop.permute.xlu1 %4071 }
 0x34c   :  { %11334 = vst [vmem:[#allocation129_spill] sm:$0xff] %v10049_v14  ;;  %11337 = vst [vmem:[#allocation60_spill] sm:$0xff] %v10055_v41 }
 0x34f   :  { %v10053_v43 = vpop.permute.xlu0 %4066  ;;  %v10059_v51 = vpop.permute.xlu1 %4081 }
 0x350   :  { %11336 = vst [vmem:[#allocation30_spill] sm:$0xff] %v10053_v43  ;;  %11339 = vst [vmem:[#allocation88_spill] sm:$0xff] %v10059_v51 }
 0x353   :  { %v10057_v0 = vpop.permute.xlu0 %4076  ;;  %v10063_v62 = vpop.permute.xlu1 %4091 }
 0x354   :  { %11338 = vst [vmem:[#allocation87_spill] sm:$0xff] %v10057_v0  ;;  %11341 = vst [vmem:[#allocation118_spill] sm:$0xff] %v10063_v62 }
 0x357   :  { %v10061_v28 = vpop.permute.xlu0 %4086  ;;  %v10067_v10 = vpop.permute.xlu1 %4413 }
 0x358   :  { %11340 = vst [vmem:[#allocation103_spill] sm:$0xff] %v10061_v28  ;;  %11343 = vst [vmem:[#allocation94_spill] sm:$0xff] %v10067_v10 }
 0x35b   :  { %v10065_v57 = vpop.permute.xlu0 %4408  ;;  %v10071_v13 = vpop.permute.xlu1 %4609 }
 0x35c   :  { %11342 = vst [vmem:[#allocation93_spill] sm:$0xff] %v10065_v57 }
 0x35f   :  { %v10069_v29 = vpop.permute.xlu0 %4604  ;;  %v10075_v47 = vpop.permute.xlu1 %4423 }
 0x360   :  { %11345 = vst [vmem:[#allocation125_spill] sm:$0xff] %v10075_v47 }
 0x363   :  { %v10073_v36 = vpop.permute.xlu0 %4418  ;;  %v10079_v35 = vpop.permute.xlu1 %4619 }
 0x364   :  { %11344 = vst [vmem:[#allocation109_spill] sm:$0xff] %v10073_v36 }
 0x367   :  { %v10077_v26 = vpop.permute.xlu0 %4614  ;;  %v10083_v37 = vpop.permute.xlu1 %4433 }
 0x368   :  { %11347 = vst [vmem:[#allocation89_spill] sm:$0xff] %v10083_v37 }
 0x36b   :  { %v10081_v5 = vpop.permute.xlu0 %4428  ;;  %v10087_v30 = vpop.permute.xlu1 %4629 }
 0x36c   :  { %11346 = vst [vmem:[#allocation43_spill] sm:$0xff] %v10081_v5 }
 0x36f   :  { %v10085_v24 = vpop.permute.xlu0 %4624  ;;  %v10091_v15 = vpop.permute.xlu1 %4443 }
 0x370   :  { %11349 = vst [vmem:[#allocation79_spill] sm:$0xff] %v10091_v15 }
 0x373   :  { %v10089_v45 = vpop.permute.xlu0 %4438  ;;  %v10099_v21 = vpop.permute.xlu1 %4639 }
 0x374   :  { %11348 = vst [vmem:[#allocation70_spill] sm:$0xff] %v10089_v45 }
 0x377   :  { %v10093_v56 = vpop.permute.xlu0 %4634 }
 0x37b   :  { %v10108_v4 = vpop.permute.xlu0 %4800 }
 0x37c   :  { %11350 = vst [vmem:[#allocation25_spill] sm:$0xff] %v10108_v4 }
 0x3e7   :  { %v6771_v8 = vpop.f32.mrf.mxu0 }
 0x3e9   :  { %v6772_v58 = vpop.f32.mrf.mxu0 }
 0x3ea   :  { %v10095_v32 = vadd.f32 %v6772_v58, %v6771_v8  ;;  %v10117_v8 = vpop.permute.xlu1 %4805 }
 0x3eb   :  { %v6774_v18 = vpop.f32.mrf.mxu0  ;;  %11351 = vst [vmem:[#allocation100_spill] sm:$0xff] %v10117_v8  ;;  %v10134_v8 = vpop.permute.xlu0 %4996 }
 0x3ec   :  { %6995 = vmatprep.mubr.msk.f32.mxu0 %vm3539_vm2, %v10095_v32 }
 0x3ed   :  { %v6775_v60 = vpop.f32.mrf.mxu0 }
 0x3ee   :  { %v10101_v25 = vadd.f32 %v6775_v60, %v6774_v18  ;;  %v10880_v18 = vrot.slane %v10095_v32, 7  ;;  %v10881_v60 = vrot.slane %v10095_v32, 1  ;;  %v10141_v5 = vpop.permute.xlu1 %5001 }
 0x3ef   :  { %v6777_v48 = vpop.f32.mrf.mxu0  ;;  %v10151_v57 = vpop.permute.xlu0 %4810 }
 0x3f0   :  { %6996 = vmatmul.mubr.msk.f32.vlgmr.msra.gmra.mxu0 %vm3539_vm2, %v10101_v25  ;;  %v4023_v9 = vrot.slane %v10101_v25, 7  ;;  %v4373_v1 = vrot.slane %v10101_v25, 1  ;;  %v3375_v37 = vrot.slane %v10101_v25, 3  ;;  %11355 = vst [vmem:[#allocation119_spill] sm:$0xff] %v10151_v57 }
 0x3f1   :  { %v6778_v61 = vpop.f32.mrf.mxu0  ;;  %7022 = vmatpush3.msra.mxu0 %v6670_v53 }
 0x3f2   :  { %v10114_v40 = vadd.f32 %v6778_v61, %v6777_v48  ;;  %7049 = vmatprep.subr.mxu0 %v10106_v17  ;;  %v10126_v53 = vsel %vm178_vm0, %v10880_v18, %v4023_v9  ;;  %v10132_v61 = vsel %vm900_vm1, %v10881_v60, %v4373_v1  ;;  %v10168_v57 = vpop.permute.xlu1 %4815 }
 0x3f3   :  { %v6780_v58 = vpop.f32.mrf.mxu0  ;;  %11352 = vst [vmem:[#allocation101_spill] sm:$0xff] %v10126_v53  ;;  %11353 = vst [vmem:[#allocation73_spill] sm:$0xff] %v10132_v61 }
 0x3f4   :  { %6998 = vmatprep.mubr.msk.f32.mxu0 %vm3539_vm2, %v10114_v40  ;;  %v4025_v48 = vrot.slane %v10114_v40, 7  ;;  %11357 = vst [vmem:[#allocation99_spill] sm:$0xff] %v10168_v57 }
 0x3f5   :  { %v6781_v4 = vpop.f32.mrf.mxu0 }
 0x3f6   :  { %v10136_v15 = vadd.f32 %v6781_v4, %v6780_v58  ;;  %v10144_v47 = vsel %vm178_vm0, %v4023_v9, %v4025_v48  ;;  %v10882_v4 = vrot.slane %v10095_v32, 3  ;;  %v3377_v58 = vrot.slane %v10114_v40, 3 }
 0x3f7   :  { %v6783_v45 = vpop.f32.mrf.mxu0  ;;  %11354 = vst [vmem:[#allocation113_spill] sm:$0xff] %v10144_v47 }
 0x3f8   :  { %6999 = vmatmul.mubr.msk.f32.gmra.mxu0 %vm3539_vm2, %v10136_v15  ;;  %v4027_v60 = vrot.slane %v10136_v15, 7  ;;  %v10158_v61 = vsel %vm3373_vm3, %v10882_v4, %v3375_v37  ;;  %v3379_v9 = vrot.slane %v10136_v15, 3  ;;  %v10171_v41 = vsel %vm3373_vm3, %v3375_v37, %v3377_v58 }
 0x3f9   :  { %v6784_v18 = vpop.f32.mrf.mxu0  ;;  %v4642_v4 = vmul.f32 %v10069_v29, %v10158_v61  ;;  %v11359_v29 = vrot.slane %v10114_v40, 1 }
 0x3fa   :  { %v10147_v36 = vadd.f32 %v6784_v18, %v6783_v45  ;;  %v10162_v45 = vsel %vm178_vm0, %v4025_v48, %v4027_v60  ;;  %v10179_v48 = vsel %vm3373_vm3, %v3377_v58, %v3379_v9  ;;  %v4643_v58 = vmul.f32 %v10071_v13, %v10171_v41 }
 0x3fb   :  { %v6786_v10 = vpop.f32.mrf.mxu0  ;;  %11356 = vst [vmem:[#allocation39_spill] sm:$0xff] %v10162_v45  ;;  %v10190_v57 = vsel %vm900_vm1, %v4373_v1, %v11359_v29  ;;  %v10192_v45 = vpop.permute.xlu0 %5006  ;;  %v3460_v13 = vrot.slane %v10114_v40, 4 }
 0x3fc   :  { %7001 = vmatprep.mubr.msk.f32.mxu0 %vm3539_vm2, %v10147_v36  ;;  %v4029_v18 = vrot.slane %v10147_v36, 7  ;;  %v3381_v43 = vrot.slane %v10147_v36, 3  ;;  %11360 = vst [vmem:[#allocation76_spill] sm:$0xff] %v10190_v57 }
 0x3fd   :  { %v6787_v62 = vpop.f32.mrf.mxu0 }
 0x3fe   :  { %v10166_v51 = vadd.f32 %v6787_v62, %v6786_v10  ;;  %v10184_v28 = vsel %vm178_vm0, %v4027_v60, %v4029_v18  ;;  %v10201_v60 = vsel %vm3373_vm3, %v3379_v9, %v3381_v43 }
 0x3ff   :  { %v6789_v0 = vpop.f32.mrf.mxu0  ;;  %11358 = vst [vmem:[#allocation62_spill] sm:$0xff] %v10184_v28  ;;  %v4645_v57 = vmul.f32 %v10079_v35, %v10201_v60  ;;  %v3457_v28 = vrot.slane %v10095_v32, 4  ;;  %v10231_v53 = vpop.permute.xlu0 %4820 }
 0x400   :  { %7002 = vmatmul.mubr.msk.f32.gmra.mxu0 %vm3539_vm2, %v10166_v51  ;;  %v3383_v62 = vrot.slane %v10166_v51, 3  ;;  %v11361_v9 = vrot.slane %v10166_v51, 7  ;;  %11363 = vst [vmem:[#allocation31_spill] sm:$0xff] %v10231_v53 }
 0x401   :  { %v6790_v10 = vpop.f32.mrf.mxu0  ;;  %7023 = vmatprep.mubr.msk.f32.mxu0 %vm3539_vm2, %v4642_v4  ;;  %v4644_v4 = vmul.f32 %v10077_v26, %v10179_v48  ;;  %v3802_v26 = vrot.slane %v10101_v25, 5 }
 0x402   :  { %v10194_v47 = vadd.f32 %v6790_v10, %v6789_v0  ;;  %v10205_v37 = vsel %vm3373_vm3, %v3381_v43, %v3383_v62  ;;  %v3458_v0 = vrot.slane %v10101_v25, 4  ;;  %v10209_v10 = vpop.permute.xlu1 %5011  ;;  %v10218_v43 = vsel %vm178_vm0, %v4029_v18, %v11361_v9 }
 0x403   :  { %v6792_v19 = vpop.f32.mrf.mxu0  ;;  %11362 = vst [vmem:[#allocation21_spill] sm:$0xff] %v10218_v43 }
 0x404   :  { %7024 = vmatmul.mubr.msk.f32.vlgmr.msra.gmra.mxu0 %vm3539_vm2, %v4643_v58  ;;  %v3385_v1 = vrot.slane %v10194_v47, 3  ;;  %v10237_v35 = vsel %vm3456_vm4, %v3457_v28, %v3458_v0 }
 0x405   :  { %v6793_v29 = vpop.f32.mrf.mxu0  ;;  %7026 = vmatprep.mubr.msk.f32.mxu0 %vm3539_vm2, %v4644_v4  ;;  %7050 = vmatpush3.msra.mxu0 %v10106_v17  ;;  %v4646_v4 = vmul.f32 %v10085_v24, %v10205_v37  ;;  %v10883_v17 = vrot.slane %v10095_v32, 5  ;;  %v10242_v24 = vsel %vm3456_vm4, %v3458_v0, %v3460_v13  ;;  %v3464_v0 = vrot.slane %v10147_v36, 4 }
 0x406   :  { %v10220_v58 = vadd.f32 %v6793_v29, %v6792_v19  ;;  %v10228_v25 = vsel %vm3373_vm3, %v3383_v62, %v3385_v1  ;;  %v3804_v29 = vrot.slane %v10114_v40, 5  ;;  %v10261_v43 = vpop.permute.xlu1 %4825 }
 0x407   :  { %v10247_v62 = vsel %vm3800_vm5, %v10883_v17, %v3802_v26  ;;  %v4647_v9 = vmul.f32 %v10087_v30, %v10228_v25  ;;  %v11365_v30 = vrot.slane %v10095_v32, 3 }
 0x408   :  { %7027 = vmatmul.mubr.msk.f32.gmra.mxu0 %vm3539_vm2, %v4645_v57  ;;  %v10884_v19 = vrot.slane %v10220_v58, 4  ;;  %v3364_v18 = vrot.slane %v10220_v58, 3  ;;  %v3462_v57 = vrot.slane %v10136_v15, 4 }
 0x409   :  { %7029 = vmatprep.mubr.msk.f32.mxu0 %vm3539_vm2, %v4646_v4 }
 0x40a   :  { %v10255_v53 = vsel %vm3456_vm4, %v10884_v19, %v3457_v28  ;;  %v10258_v4 = vsel %vm3373_vm3, %v3385_v1, %v3364_v18  ;;  %v3396_v16 = vsel %vm3373_vm3, %v3364_v18, %v11365_v30  ;;  %v4377_v28 = vrot.slane %v10136_v15, 1 }
 0x40b   :  { %11364 = vst [vmem:[#allocation51_spill] sm:$0xff] %v10255_v53  ;;  %v3529_v17 = vmul.f32 %v9982_v31, %v10255_v53  ;;  %v4648_v14 = vmul.f32 %v10093_v56, %v10258_v4  ;;  %v3530_v1 = vmul.f32 %v9984_v39, %v10237_v35  ;;  %v3806_v19 = vrot.slane %v10136_v15, 5  ;;  %v5017_v15 = vpop.permute.xlu0 %5016 }
 0x40c   :  { %7030 = vmatmul.mubr.msk.f32.gmra.mxu0 %vm3539_vm2, %v4647_v9  ;;  %v3531_v31 = vmul.f32 %v9986_v63, %v10242_v24  ;;  %v10280_v56 = vsel %vm3456_vm4, %v3460_v13, %v3462_v57  ;;  %v3466_v18 = vrot.slane %v10166_v51, 4  ;;  %v10286_v9 = vld [vmem:[%s10762_s5 + $0x10] sm:$0xff]  ;;  %v4379_v39 = vrot.slane %v10147_v36, 1 }
 0x40d   :  { %6939 = vmatprep.mubr.msk.f32.mxu1 %vm3539_vm2, %v3529_v17  ;;  %7032 = vmatprep.mubr.msk.f32.mxu0 %vm3539_vm2, %v4648_v14  ;;  %v4649_v14 = vmul.f32 %v10099_v21, %v3396_v16  ;;  %v5034_v63 = vmul.f32 %v10134_v8, %v10247_v62  ;;  %v10294_v13 = vsel %vm3456_vm4, %v3462_v57, %v3464_v0  ;;  %v3468_v17 = vrot.slane %v10194_v47, 4 }
 0x40e   :  { %6940 = vmatmul.mubr.msk.f32.vlgmr.msra.gmra.mxu1 %vm3539_vm2, %v3530_v1  ;;  %v10300_v30 = vsel %vm3800_vm5, %v3802_v26, %v3804_v29  ;;  %v3808_v53 = vrot.slane %v10147_v36, 5  ;;  %v11366_v1 = vrot.slane %v10114_v40, 1  ;;  %v4381_v8 = vrot.slane %v10166_v51, 1  ;;  %v5022_v40 = vpop.permute.xlu1 %5021 }
 0x40f   :  { %6942 = vmatprep.mubr.msk.f32.mxu1 %vm3539_vm2, %v3531_v31  ;;  %6952 = vmatpush3.msra.mxu1 %v10030_v23  ;;  %v3532_v57 = vmul.f32 %v9988_v33, %v10280_v56  ;;  %v10313_v31 = vsel %vm3800_vm5, %v3804_v29, %v3806_v19  ;;  %v3810_v23 = vrot.slane %v10166_v51, 5  ;;  %v10318_v36 = vsel %vm900_vm1, %v4377_v28, %v4379_v39 }
 0x410   :  { %v10306_v21 = vsel %vm900_vm1, %v11366_v1, %v4377_v28  ;;  %7033 = vmatmul.mubr.msk.f32.gmra.mxu0 %vm3539_vm2, %v4649_v14  ;;  %6965 = vmatprep.subr.mxu1 %v10286_v9  ;;  %v3533_v26 = vmul.f32 %v9990_v34, %v10294_v13  ;;  %v10324_v14 = vsel %vm3456_vm4, %v3464_v0, %v3466_v18  ;;  %v10342_v1 = vpop.permute.xlu0 %4830 }
 0x411   :  { %7051 = vmatprep.mubr.msk.f32.mxu0 %vm3539_vm2, %v5034_v63  ;;  %v10329_v33 = vsel %vm900_vm1, %v4379_v39, %v4381_v8  ;;  %v5035_v29 = vmul.f32 %v10141_v5, %v10300_v30  ;;  %v10335_v28 = vsel %vm3456_vm4, %v3466_v18, %v3468_v17  ;;  %v5036_v34 = vmul.f32 %v10192_v45, %v10313_v31 }
 0x412   :  { %6943 = vmatmul.mubr.msk.f32.gmra.mxu1 %vm3539_vm2, %v3532_v57  ;;  %v3809_v0 = vsel %vm3800_vm5, %v3806_v19, %v3808_v53  ;;  %v3812_v63 = vrot.slane %v10194_v47, 5  ;;  %v3534_v39 = vmul.f32 %v9998_v52, %v10324_v14  ;;  %v3811_v5 = vsel %vm3800_vm5, %v3808_v53, %v3810_v23 }
 0x413   :  { %6945 = vmatprep.mubr.msk.f32.mxu1 %vm3539_vm2, %v3533_v26  ;;  %v3798_v18 = vrot.slane %v10220_v58, 5  ;;  %v3535_v45 = vmul.f32 %v10001_v7, %v10335_v28  ;;  %v11367_v19 = vrot.slane %v10220_v58, 4  ;;  %v5037_v26 = vmul.f32 %v10209_v10, %v3809_v0 }
 0x414   :  { %7052 = vmatmul.mubr.msk.f32.vlgmr.msra.gmra.mxu0 %vm3539_vm2, %v5035_v29  ;;  %v10359_v29 = vpop.permute.xlu1 %4835  ;;  %v5038_v52 = vmul.f32 %v5017_v15, %v3811_v5  ;;  %v3813_v53 = vsel %vm3800_vm5, %v3810_v23, %v3812_v63  ;;  %v11368_v23 = vrot.slane %v10095_v32, 5 }
 0x415   :  { %7054 = vmatprep.mubr.msk.f32.mxu0 %vm3539_vm2, %v5036_v34  ;;  %v10355_v57 = vsel %vm3456_vm4, %v3468_v17, %v11367_v19  ;;  %v3814_v34 = vsel %vm3800_vm5, %v3812_v63, %v3798_v18  ;;  %v3445_v17 = vmul.f32 %v10005_v6, %v3396_v16  ;;  %v5039_v10 = vmul.f32 %v5022_v40, %v3813_v53  ;;  %v6643_v16 = vld [vmem:[%s10762_s5 + $0x18] sm:$0xff]  ;;  %v11377_v19 = vld [vmem:[#allocation60_spill] sm:$0xff] }
 0x416   :  { %6946 = vmatmul.mubr.msk.f32.gmra.mxu1 %vm3539_vm2, %v3534_v39  ;;  %v3536_v7 = vmul.f32 %v10003_v2, %v10355_v57  ;;  %v5027_v39 = vpop.permute.xlu0 %5026  ;;  %v3446_v2 = vmul.f32 %v10007_v50, %v10158_v61  ;;  %v3447_v6 = vmul.f32 %v10009_v11, %v10171_v41  ;;  %v3448_v50 = vmul.f32 %v10011_v54, %v10179_v48 }
 0x417   :  { %6948 = vmatprep.mubr.msk.f32.mxu1 %vm3539_vm2, %v3535_v45  ;;  %v5040_v15 = vmul.f32 %v5027_v39, %v3814_v34  ;;  %v3823_v45 = vsel %vm3800_vm5, %v3798_v18, %v11368_v23  ;;  %v3449_v11 = vmul.f32 %v10016_v3, %v10201_v60  ;;  %v3450_v41 = vmul.f32 %v10018_v46, %v10205_v37  ;;  %v11370_v60 = vld [vmem:[#allocation112_spill] sm:$0xff]  ;;  %v11376_v18 = vld [vmem:[#allocation39_spill] sm:$0xff]  ;;  %v11381_v39 = vld [vmem:[#allocation21_spill] sm:$0xff] }
 0x418   :  { %7055 = vmatmul.mubr.msk.f32.gmra.mxu0 %vm3539_vm2, %v5037_v26  ;;  %v5032_v63 = vpop.permute.xlu1 %5031  ;;  %v3451_v61 = vmul.f32 %v10023_v55, %v10228_v25  ;;  %v3452_v54 = vmul.f32 %v10025_v12, %v10258_v4  ;;  %v3873_v48 = vmul.f32 %v10033_v59, %v3823_v45  ;;  %v3874_v3 = vmul.f32 %v10035_v38, %v10247_v62  ;;  %v11371_v25 = vld [vmem:[#allocation129_spill] sm:$0xff]  ;;  %v11383_v23 = vld [vmem:[#allocation103_spill] sm:$0xff] }
 0x419   :  { %7057 = vmatprep.mubr.msk.f32.mxu0 %vm3539_vm2, %v5038_v52  ;;  %v5041_v40 = vmul.f32 %v5032_v63, %v3823_v45  ;;  %v3875_v46 = vmul.f32 %v10037_v44, %v10300_v30  ;;  %v3876_v55 = vmul.f32 %v10039_v27, %v10313_v31  ;;  %v3877_v12 = vmul.f32 %v10041_v22, %v3809_v0  ;;  %v11372_v4 = vld [vmem:[#allocation101_spill] sm:$0xff]  ;;  %v11375_v30 = vld [vmem:[#allocation30_spill] sm:$0xff]  ;;  %v6661_v0 = vld [vmem:[%s10762_s5 + $0x28] sm:$0xff] }
 0x41a   :  { %6949 = vmatmul.mubr.msk.f32.gmra.mxu1 %vm3539_vm2, %v3536_v7  ;;  %v4020_v59 = vrot.slane %v10220_v58, 7  ;;  %v3878_v38 = vmul.f32 %v10043_v49, %v3811_v5  ;;  %v3879_v44 = vmul.f32 %v10045_v42, %v3813_v53  ;;  %v11369_v37 = vrot.slane %v10095_v32, 7  ;;  %v11373_v49 = vld [vmem:[#allocation78_spill] sm:$0xff]  ;;  %v11374_v42 = vld [vmem:[#allocation113_spill] sm:$0xff]  ;;  %v11379_v53 = vld [vmem:[#allocation87_spill] sm:$0xff] }
 0x41b   :  { %6953 = vmatprep.mubr.msk.f32.mxu1 %vm3539_vm2, %v3445_v17  ;;  %v3880_v22 = vmul.f32 %v11370_v60, %v3814_v34  ;;  %v4096_v31 = vmul.f32 %v11375_v30, %v11374_v42  ;;  %v4033_v5 = vrot.slane %v10194_v47, 7  ;;  %v4097_v26 = vmul.f32 %v11377_v19, %v11376_v18  ;;  %v11378_v52 = vld [vmem:[#allocation62_spill] sm:$0xff]  ;;  %v11400_v42 = vld [vmem:[#allocation31_spill] sm:$0xff] }
 0x41c   :  { %7058 = vmatmul.mubr.msk.f32.gmra.mxu0 %vm3539_vm2, %v5039_v10  ;;  %v4044_v27 = vsel %vm178_vm0, %v4020_v59, %v11369_v37  ;;  %v4098_v7 = vmul.f32 %v11379_v53, %v11378_v52  ;;  %v11380_v34 = vrot.slane %v10166_v51, 7  ;;  %v11382_v10 = vld [vmem:[#allocation88_spill] sm:$0xff]  ;;  %v11393_v37 = vld [vmem:[#allocation70_spill] sm:$0xff]  ;;  %v11394_v60 = vrot.slane %v10095_v32, 1  ;;  %v11395_v51 = vld [vmem:[#allocation79_spill] sm:$0xff] }
 0x41d   :  { %7060 = vmatprep.mubr.msk.f32.mxu0 %vm3539_vm2, %v5040_v15  ;;  %v4094_v62 = vmul.f32 %v11371_v25, %v4044_v27  ;;  %v4099_v15 = vmul.f32 %v11382_v10, %v11381_v39  ;;  %v4035_v45 = vsel %vm178_vm0, %v4033_v5, %v4020_v59  ;;  %v11391_v59 = vld [vmem:[#allocation43_spill] sm:$0xff]  ;;  %v11397_v25 = vld [vmem:[#allocation100_spill] sm:$0xff] }
 0x41e   :  { %6954 = vmatmul.mubr.msk.f32.vlgmr.msra.gmra.mxu1 %vm3539_vm2, %v3446_v2  ;;  %v4034_v17 = vsel %vm178_vm0, %v11380_v34, %v4033_v5  ;;  %v11384_v2 = vld [vmem:[#allocation118_spill] sm:$0xff]  ;;  %v11398_v32 = vld [vmem:[#allocation119_spill] sm:$0xff] }
 0x41f   :  { %6956 = vmatprep.mubr.msk.f32.mxu1 %vm3539_vm2, %v3447_v6  ;;  %6966 = vmatpush3.msra.mxu1 %v10286_v9  ;;  %v4095_v9 = vmul.f32 %v11373_v49, %v11372_v4  ;;  %v4101_v63 = vmul.f32 %v11384_v2, %v4035_v45  ;;  %v11385_v6 = vld [vmem:[#allocation73_spill] sm:$0xff]  ;;  %v4840_v4 = vmul.f32 %v11398_v32, %v10280_v56  ;;  %v11399_v49 = vld [vmem:[#allocation99_spill] sm:$0xff] }
 0x420   :  { %7061 = vmatmul.mubr.msk.f32.gmra.mxu0 %vm3539_vm2, %v5041_v40  ;;  %6979 = vmatprep.subr.mxu1 %v6643_v16  ;;  %v4844_v56 = vmul.f32 %v10342_v1, %v10355_v57  ;;  %v11401_v30 = vld [vmem:[#allocation51_spill] sm:$0xff] }
 0x422   :  { %6957 = vmatmul.mubr.msk.f32.gmra.mxu1 %vm3539_vm2, %v3448_v50  ;;  %v6679_v50 = vld [vmem:[%s10762_s5 + $0x38] sm:$0xff] }
 0x423   :  { %6959 = vmatprep.mubr.msk.f32.mxu1 %vm3539_vm2, %v3449_v11  ;;  %v11387_v11 = vld [vmem:[#allocation76_spill] sm:$0xff] }
 0x426   :  { %6960 = vmatmul.mubr.msk.f32.gmra.mxu1 %vm3539_vm2, %v3450_v41  ;;  %v11388_v41 = vld [vmem:[#allocation94_spill] sm:$0xff] }
 0x427   :  { %6962 = vmatprep.mubr.msk.f32.mxu1 %vm3539_vm2, %v3451_v61  ;;  %v4447_v61 = vmul.f32 %v11388_v41, %v11387_v11 }
 0x42a   :  { %6963 = vmatmul.mubr.msk.f32.gmra.mxu1 %vm3539_vm2, %v3452_v54  ;;  %v11389_v54 = vld [vmem:[#allocation109_spill] sm:$0xff] }
 0x42b   :  { %6967 = vmatprep.mubr.msk.f32.mxu1 %vm3539_vm2, %v3873_v48  ;;  %v4448_v48 = vmul.f32 %v11389_v54, %v10306_v21 }
 0x42e   :  { %6968 = vmatmul.mubr.msk.f32.vlgmr.msra.gmra.mxu1 %vm3539_vm2, %v3874_v3  ;;  %v4383_v3 = vrot.slane %v10194_v47, 1 }
 0x42f   :  { %6970 = vmatprep.mubr.msk.f32.mxu1 %vm3539_vm2, %v3875_v46  ;;  %6980 = vmatpush3.msra.mxu1 %v6643_v16  ;;  %v11386_v16 = vld [vmem:[#allocation93_spill] sm:$0xff]  ;;  %v4385_v46 = vrot.slane %v10220_v58, 1 }
 0x430   :  { %7178 = vmatprep.subr.mxu1 %v9995_v20  ;;  %v4446_v40 = vmul.f32 %v11386_v16, %v11385_v6 }
 0x432   :  { %6971 = vmatmul.mubr.msk.f32.gmra.mxu1 %vm3539_vm2, %v3876_v55  ;;  %v11390_v55 = vld [vmem:[#allocation125_spill] sm:$0xff] }
 0x433   :  { %6973 = vmatprep.mubr.msk.f32.mxu1 %vm3539_vm2, %v3877_v12  ;;  %v4449_v12 = vmul.f32 %v11390_v55, %v10318_v36  ;;  %v4396_v36 = vsel %vm900_vm1, %v4385_v46, %v11394_v60 }
 0x436   :  { %6974 = vmatmul.mubr.msk.f32.gmra.mxu1 %vm3539_vm2, %v3878_v38  ;;  %v4450_v38 = vmul.f32 %v11391_v59, %v10329_v33  ;;  %v11396_v33 = vld [vmem:[#allocation25_spill] sm:$0xff] }
 0x437   :  { %6976 = vmatprep.mubr.msk.f32.mxu1 %vm3539_vm2, %v3879_v44  ;;  %v4384_v44 = vsel %vm900_vm1, %v4381_v8, %v4383_v3  ;;  %v4453_v8 = vmul.f32 %v11395_v51, %v4396_v36 }
 0x43a   :  { %6977 = vmatmul.mubr.msk.f32.gmra.mxu1 %vm3539_vm2, %v3880_v22  ;;  %v4838_v22 = vmul.f32 %v11396_v33, %v10237_v35  ;;  %v4842_v35 = vmul.f32 %v11400_v42, %v10324_v14 }
 0x43b   :  { %6981 = vmatprep.mubr.msk.f32.mxu1 %vm3539_vm2, %v4094_v62  ;;  %v4839_v62 = vmul.f32 %v11397_v25, %v10242_v24  ;;  %v4843_v24 = vmul.f32 %v10261_v43, %v10335_v28 }
 0x43e   :  { %6982 = vmatmul.mubr.msk.f32.vlgmr.msra.gmra.mxu1 %vm3539_vm2, %v4095_v9  ;;  %v4841_v9 = vmul.f32 %v11399_v49, %v10294_v13  ;;  %v4845_v13 = vmul.f32 %v10359_v29, %v11401_v30 }
 0x43f   :  { %6984 = vmatprep.mubr.msk.f32.mxu1 %vm3539_vm2, %v4096_v31  ;;  %7179 = vmatpush3.msra.mxu1 %v9995_v20  ;;  %v4100_v20 = vmul.f32 %v11383_v23, %v4034_v17 }
 0x440   :  { %7007 = vmatprep.subr.mxu1 %v6661_v0 }
 0x442   :  { %6985 = vmatmul.mubr.msk.f32.gmra.mxu1 %vm3539_vm2, %v4097_v26 }
 0x443   :  { %6987 = vmatprep.mubr.msk.f32.mxu1 %vm3539_vm2, %v4098_v7 }
 0x446   :  { %6988 = vmatmul.mubr.msk.f32.gmra.mxu1 %vm3539_vm2, %v4099_v15 }
 0x447   :  { %6990 = vmatprep.mubr.msk.f32.mxu1 %vm3539_vm2, %v4100_v20 }
 0x44a   :  { %6991 = vmatmul.mubr.msk.f32.gmra.mxu1 %vm3539_vm2, %v4101_v63 }
 0x44b   :  { %7004 = vmatprep.mubr.msk.f32.mxu1 %vm3539_vm2, %v10194_v47  ;;  %v4386_v47 = vsel %vm900_vm1, %v4383_v3, %v4385_v46 }
 0x44c   :  { %v4452_v27 = vmul.f32 %v11393_v37, %v4386_v47 }
 0x44e   :  { %7005 = vmatmul.mubr.msk.f32.vlgmr.msra.gmra.mxu1 %vm3539_vm2, %v10220_v58  ;;  %v11392_v58 = vld [vmem:[#allocation89_spill] sm:$0xff] }
 0x44f   :  { %7008 = vmatpush3.msra.mxu1 %v6661_v0  ;;  %7009 = vmatprep.mubr.msk.f32.mxu1 %vm3539_vm2, %v4446_v40  ;;  %v4451_v21 = vmul.f32 %v11392_v58, %v4384_v44  ;;  %v5204_v0 = vld [vmem:[#allocation8] sm:$0xff] }
 0x450   :  { %7035 = vmatprep.subr.mxu1 %v6679_v50 }
 0x452   :  { %7010 = vmatmul.mubr.msk.f32.vlgmr.msra.gmra.mxu1 %vm3539_vm2, %v4447_v61 }
 0x453   :  { %7012 = vmatprep.mubr.msk.f32.mxu1 %vm3539_vm2, %v4448_v48  ;;  %7036 = vmatpush3.msra.mxu1 %v6679_v50 }
 0x456   :  { %7013 = vmatmul.mubr.msk.f32.gmra.mxu1 %vm3539_vm2, %v4449_v12 }
 0x457   :  { %7015 = vmatprep.mubr.msk.f32.mxu1 %vm3539_vm2, %v4450_v38 }
 0x45a   :  { %7016 = vmatmul.mubr.msk.f32.gmra.mxu1 %vm3539_vm2, %v4451_v21 }
 0x45b   :  { %7018 = vmatprep.mubr.msk.f32.mxu1 %vm3539_vm2, %v4452_v27 }
 0x45e   :  { %7019 = vmatmul.mubr.msk.f32.gmra.mxu1 %vm3539_vm2, %v4453_v8 }
 0x45f   :  { %7037 = vmatprep.mubr.msk.f32.mxu1 %vm3539_vm2, %v4838_v22 }
 0x462   :  { %7038 = vmatmul.mubr.msk.f32.vlgmr.msra.gmra.mxu1 %vm3539_vm2, %v4839_v62 }
 0x463   :  { %7040 = vmatprep.mubr.msk.f32.mxu1 %vm3539_vm2, %v4840_v4 }
 0x466   :  { %7041 = vmatmul.mubr.msk.f32.gmra.mxu1 %vm3539_vm2, %v4841_v9 }
 0x467   :  { %7043 = vmatprep.mubr.msk.f32.mxu1 %vm3539_vm2, %v4842_v35 }
 0x46a   :  { %7044 = vmatmul.mubr.msk.f32.gmra.mxu1 %vm3539_vm2, %v4843_v24 }
 0x46b   :  { %7046 = vmatprep.mubr.msk.f32.mxu1 %vm3539_vm2, %v4844_v56 }
 0x46e   :  { %7047 = vmatmul.mubr.msk.f32.gmra.mxu1 %vm3539_vm2, %v4845_v13 }
 0x46f   :  { %7079 = vmatprep.mubr.msk.f32.mxu1 %vm5288_vm6, %v5204_v0 }
 0x4b0   :  { %v6997_v53 = vpop.f32.mrf.mxu0 }
 0x4b2   :  { %v4325_v10 = vpop.f32.mrf.mxu0 }
 0x4b8   :  { %v7000_v20 = vpop.f32.mrf.mxu0 }
 0x4ba   :  { %v4335_v6 = vpop.f32.mrf.mxu0 }
 0x4c0   :  { %v10524_v40 = vpop.f32.mrf.mxu0 }
 0x4c2   :  { %v10526_v41 = vpop.f32.mrf.mxu0 }
 0x4c4   :  { %v7025_v48 = vpop.f32.mrf.mxu0 }
 0x4c6   :  { %v4742_v55 = vpop.f32.mrf.mxu0 }
 0x4c8   :  { %v7028_v38 = vpop.f32.mrf.mxu0 }
 0x4ca   :  { %v10528_v58 = vpop.f32.mrf.mxu0 }
 0x4cc   :  { %v10530_v27 = vpop.f32.mrf.mxu0 }
 0x4ce   :  { %v6941_v14 = vpop.f32.mrf.mxu1  ;;  %v10532_v51 = vpop.f32.mrf.mxu0 }
 0x4d0   :  { %v3630_v31 = vpop.f32.mrf.mxu1  ;;  %v10534_v22 = vpop.f32.mrf.mxu0 }
 0x4d2   :  { %v6944_v5 = vpop.f32.mrf.mxu1  ;;  %v10536_v32 = vpop.f32.mrf.mxu0 }
 0x4d3   :  { %11402 = vst [vmem:[#allocation107_spill] sm:$0xff] %v10536_v32 }
 0x4d4   :  { %v3640_v43 = vpop.f32.mrf.mxu1  ;;  %v7053_v42 = vpop.f32.mrf.mxu0 }
 0x4d6   :  { %v6947_v28 = vpop.f32.mrf.mxu1 }
 0x4d8   :  { %v3650_v18 = vpop.f32.mrf.mxu1 }
 0x4da   :  { %v10518_v1 = vpop.f32.mrf.mxu1 }
 0x4dc   :  { %v10520_v57 = vpop.f32.mrf.mxu1 }
 0x4de   :  { %v6955_v19 = vpop.f32.mrf.mxu1 }
 0x4df   :  { %v3765_v26 = vadd.f32 %v6955_v19, %v6941_v14 }
 0x4e0   :  { %v3759_v52 = vpop.f32.mrf.mxu1 }
 0x4e1   :  { %v3760_v29 = vadd.f32 %v3759_v52, %v3630_v31  ;;  %v5134_v31 = vpop.f32.mrf.mxu0 }
 0x4e2   :  { %v6958_v7 = vpop.f32.mrf.mxu1 }
 0x4e3   :  { %v3775_v34 = vadd.f32 %v6958_v7, %v6944_v5 }
 0x4e4   :  { %v3769_v17 = vpop.f32.mrf.mxu1 }
 0x4e5   :  { %v3770_v39 = vadd.f32 %v3769_v17, %v3640_v43  ;;  %v7056_v17 = vpop.f32.mrf.mxu0 }
 0x4e6   :  { %v6961_v15 = vpop.f32.mrf.mxu1 }
 0x4e7   :  { %v3785_v23 = vadd.f32 %v6961_v15, %v6947_v28 }
 0x4e8   :  { %v3779_v45 = vpop.f32.mrf.mxu1 }
 0x4e9   :  { %v3780_v2 = vadd.f32 %v3779_v45, %v3650_v18 }
 0x4ea   :  { %v10522_v63 = vpop.f32.mrf.mxu1 }
 0x4ec   :  { %v3789_v16 = vpop.f32.mrf.mxu1 }
 0x4ee   :  { %v6969_v50 = vpop.f32.mrf.mxu1 }
 0x4ef   :  { %v4013_v9 = vadd.f32 %v6969_v50, %v3765_v26 }
 0x4f0   :  { %v3973_v11 = vpop.f32.mrf.mxu1 }
 0x4f1   :  { %v4012_v24 = vadd.f32 %v3973_v11, %v3760_v29 }
 0x4f2   :  { %v6972_v61 = vpop.f32.mrf.mxu1 }
 0x4f3   :  { %v4015_v13 = vadd.f32 %v6972_v61, %v3775_v34 }
 0x4f4   :  { %v3983_v54 = vpop.f32.mrf.mxu1 }
 0x4f5   :  { %v4014_v5 = vadd.f32 %v3983_v54, %v3770_v39  ;;  %v3790_v39 = vadd.f32 %v3789_v16, %v10520_v57 }
 0x4f6   :  { %v6975_v3 = vpop.f32.mrf.mxu1 }
 0x4f7   :  { %v4017_v15 = vadd.f32 %v6975_v3, %v3785_v23 }
 0x4f8   :  { %v3993_v46 = vpop.f32.mrf.mxu1 }
 0x4f9   :  { %v4016_v45 = vadd.f32 %v3993_v46, %v3780_v2 }
 0x4fa   :  { %v6978_v12 = vpop.f32.mrf.mxu1 }
 0x4fc   :  { %v4003_v59 = vpop.f32.mrf.mxu1 }
 0x4fd   :  { %v4018_v3 = vadd.f32 %v4003_v59, %v3790_v39 }
 0x4fe   :  { %v6983_v44 = vpop.f32.mrf.mxu1 }
 0x4ff   :  { %v4234_v56 = vadd.f32 %v6983_v44, %v4013_v9  ;;  %v5144_v9 = vpop.f32.mrf.mxu0 }
 0x500   :  { %v4194_v47 = vpop.f32.mrf.mxu1 }
 0x501   :  { %v4233_v14 = vadd.f32 %v4194_v47, %v4012_v24  ;;  %v4365_v28 = vadd.f32 %v6997_v53, %v4234_v56  ;;  %v3795_v53 = vadd.f32 %v10522_v63, %v10518_v1  ;;  %v7059_v57 = vpop.f32.mrf.mxu0 }
 0x502   :  { %v6986_v21 = vpop.f32.mrf.mxu1 }
 0x503   :  { %v4236_v43 = vadd.f32 %v6986_v21, %v4015_v13  ;;  %v4364_v7 = vadd.f32 %v4325_v10, %v4233_v14  ;;  %v4019_v2 = vadd.f32 %v6978_v12, %v3795_v53 }
 0x504   :  { %v4204_v37 = vpop.f32.mrf.mxu1 }
 0x505   :  { %v4235_v19 = vadd.f32 %v4204_v37, %v4014_v5  ;;  %v4367_v32 = vadd.f32 %v7000_v20, %v4236_v43 }
 0x506   :  { %v6989_v60 = vpop.f32.mrf.mxu1 }
 0x507   :  { %v4238_v29 = vadd.f32 %v6989_v60, %v4017_v15  ;;  %v4366_v61 = vadd.f32 %v4335_v6, %v4235_v19  ;;  %v10546_v6 = vld [vmem:[%s10763_s6] ss:$0 sm:$0xff]  ;;  %s7433_s6 = smov [#allocation14]  }
 0x508   :  { %v4214_v36 = vpop.f32.mrf.mxu1  ;;  %s6587_s29 = sshll.u32 %s7433_s6, 4  ;;  %s6588_s29 = int_to_ptr.vmem [resolvable:$true] %s6587_s29 }
 0x509   :  { %v4237_v11 = vadd.f32 %v4214_v36, %v4016_v45  ;;  %v4369_v20 = vadd.f32 %v10524_v40, %v4238_v29  ;;  %p7392_p8 = scmp.lt.s32.totalorder %s6588_s29, %s6588_s29 }
 0x50a   :  { %v6992_v8 = vpop.f32.mrf.mxu1 }
 0x50b   :  { %v4368_v46 = vadd.f32 %v10526_v41, %v4237_v11  ;;  %v4240_v16 = vadd.f32 %v6992_v8, %v4019_v2 }
 0x50c   :  { %v4224_v33 = vpop.f32.mrf.mxu1 }
 0x50d   :  { %v4239_v60 = vadd.f32 %v4224_v33, %v4018_v3 }
 0x50e   :  { %v7006_v25 = vpop.f32.mrf.mxu1 }
 0x510   :  { %v4355_v62 = vpop.f32.mrf.mxu1 }
 0x512   :  { %v7011_v4 = vpop.f32.mrf.mxu1 }
 0x513   :  { %v4586_v52 = vadd.f32 %v7011_v4, %v4365_v28  ;;  %v4371_v4 = vadd.f32 %v7006_v25, %v4240_v16 }
 0x514   :  { %v4546_v49 = vpop.f32.mrf.mxu1 }
 0x515   :  { %v4585_v50 = vadd.f32 %v4546_v49, %v4364_v7  ;;  %v4782_v47 = vadd.f32 %v7025_v48, %v4586_v52  ;;  %v4370_v49 = vadd.f32 %v4355_v62, %v4239_v60 }
 0x516   :  { %v7014_v35 = vpop.f32.mrf.mxu1 }
 0x517   :  { %v4588_v34 = vadd.f32 %v7014_v35, %v4367_v32  ;;  %v4781_v23 = vadd.f32 %v4742_v55, %v4585_v50  ;;  %v11403_v50 = vld [vmem:[#allocation107_spill] sm:$0xff] }
 0x518   :  { %v4556_v30 = vpop.f32.mrf.mxu1 }
 0x519   :  { %v4587_v10 = vadd.f32 %v4556_v30, %v4366_v61  ;;  %v4784_v63 = vadd.f32 %v7028_v38, %v4588_v34  ;;  %v5154_v30 = vpop.f32.mrf.mxu0 }
 0x51a   :  { %v7017_v0 = vpop.f32.mrf.mxu1 }
 0x51b   :  { %v4590_v36 = vadd.f32 %v7017_v0, %v4369_v20  ;;  %v4783_v41 = vadd.f32 %v10528_v58, %v4587_v10  ;;  %v7062_v7 = vpop.f32.mrf.mxu0 }
 0x51c   :  { %v4566_v18 = vpop.f32.mrf.mxu1 }
 0x51d   :  { %v4589_v55 = vadd.f32 %v4566_v18, %v4368_v46  ;;  %v4786_v33 = vadd.f32 %v10530_v27, %v4590_v36 }
 0x51e   :  { %v7020_v26 = vpop.f32.mrf.mxu1 }
 0x51f   :  { %v4592_v8 = vadd.f32 %v7020_v26, %v4371_v4  ;;  %v4785_v14 = vadd.f32 %v10532_v51, %v4589_v55 }
 0x520   :  { %v4576_v44 = vpop.f32.mrf.mxu1 }
 0x521   :  { %v4591_v0 = vadd.f32 %v4576_v44, %v4370_v49  ;;  %v4788_v27 = vadd.f32 %v10534_v22, %v4592_v8 }
 0x522   :  { %v7039_v54 = vpop.f32.mrf.mxu1 }
 0x523   :  { %v4978_v21 = vadd.f32 %v7039_v54, %v4782_v47  ;;  %v4787_v29 = vadd.f32 %v11403_v50, %v4591_v0  ;;  %v5164_v54 = vpop.f32.mrf.mxu0  ;;  %v6700_v50 = vld [vmem:[%s10766_s9 + $0x10] sm:$0xff] }
 0x524   :  { %v4938_v48 = vpop.f32.mrf.mxu1 }
 0x525   :  { %v5174_v37 = vadd.f32 %v7053_v42, %v4978_v21  ;;  %v4977_v1 = vadd.f32 %v4938_v48, %v4781_v23 }
 0x526   :  { %v7042_v12 = vpop.f32.mrf.mxu1 }
 0x527   :  { %v5189_v59 = vadd.f32 %v10546_v6, %v5174_v37  ;;  %v5173_v40 = vadd.f32 %v5134_v31, %v4977_v1  ;;  %v4980_v32 = vadd.f32 %v7042_v12, %v4784_v63 }
 0x528   :  { %v4948_v35 = vpop.f32.mrf.mxu1 }
 0x529   :  { %v5197_v24 = vmax.f32 %v5189_v59, 0.0  ;;  %v5188_v42 = vadd.f32 %v10546_v6, %v5173_v40  ;;  %v5176_v56 = vadd.f32 %v7056_v17, %v4980_v32  ;;  %v4979_v38 = vadd.f32 %v4948_v35, %v4783_v41 }
 0x52a   :  { %v7045_v13 = vpop.f32.mrf.mxu1 }
 0x52b   :  { %v5196_v31 = vmax.f32 %v5188_v42, 0.0  ;;  %v5191_v5 = vadd.f32 %v10546_v6, %v5176_v56  ;;  %v5175_v58 = vadd.f32 %v5144_v9, %v4979_v38  ;;  %v5215_v25 = vrot.slane %v5197_v24, 1 }
 0x52c   :  { %v4982_v62 = vadd.f32 %v7045_v13, %v4786_v33  ;;  %v4958_v43 = vpop.f32.mrf.mxu1 }
 0x52d   :  { %v5214_v28 = vrot.slane %v5196_v31, 1  ;;  %v5199_v18 = vmax.f32 %v5191_v5, 0.0  ;;  %v5190_v19 = vadd.f32 %v10546_v6, %v5175_v58  ;;  %v4981_v52 = vadd.f32 %v4958_v43, %v4785_v14 }
 0x52e   :  { %v5178_v17 = vadd.f32 %v7059_v57, %v4982_v62  ;;  %v7048_v15 = vpop.f32.mrf.mxu1 }
 0x52f   :  { %v5216_v51 = vsel %vm900_vm1, %v5214_v28, %v5215_v25  ;;  %v5198_v45 = vmax.f32 %v5190_v19, 0.0  ;;  %v5177_v26 = vadd.f32 %v5154_v30, %v4981_v52  ;;  %v4984_v34 = vadd.f32 %v7048_v15, %v4788_v27 }
 0x530   :  { %v5239_v11 = vmax.f32 %v5196_v31, %v5216_v51  ;;  %v5193_v44 = vadd.f32 %v10546_v6, %v5178_v17  ;;  %v4968_v61 = vpop.f32.mrf.mxu1  ;;  %v5219_v47 = vrot.slane %v5199_v18, 1  ;;  %v5205_v51 = vld [vmem:[#allocation8 + $0x8] sm:$0xff] }
 0x531   :  { %v5217_v9 = vrot.slane %v5198_v45, 1  ;;  %v5192_v53 = vadd.f32 %v10546_v6, %v5177_v26  ;;  %v4983_v39 = vadd.f32 %v4968_v61, %v4787_v29  ;;  %v5180_v22 = vadd.f32 %v7062_v7, %v4984_v34  ;;  %v6719_v26 = vld [vmem:[%s10766_s9 + $0x58] sm:$0xff]  ;;  %v6718_v29 = vld [vmem:[%s10766_s9 + $0x50] sm:$0xff]  ;;  %v5409_v34 = vpop.permute.xlu0 %5408  ;;  %v5414_v61 = vpop.permute.xlu1 %5413 }
 0x532   :  { %v5201_v10 = vmax.f32 %v5193_v44, 0.0  ;;  %v5255_v36 = vrot.slane %v5239_v11, 4  ;;  %7117 = vmatprep.subr.mxu0 %v6719_v26  ;;  %v6727_v44 = vld [vmem:[%s10766_s9 + $0x78] sm:$0xff] }
 0x533   :  { %v5200_v21 = vmax.f32 %v5192_v53, 0.0  ;;  %v5179_v23 = vadd.f32 %v5164_v54, %v4983_v39  ;;  %v5220_v2 = vsel %vm900_vm1, %v5217_v9, %v5219_v47  ;;  %v5218_v3 = vsel %vm900_vm1, %v5215_v25, %v5217_v9  ;;  %7118 = vmatpush3.msra.mxu0 %v6719_v26 }
 0x534   :  { %v5195_v20 = vadd.f32 %v10546_v6, %v5180_v22  ;;  %v5241_v46 = vmax.f32 %v5198_v45, %v5220_v2  ;;  %v5240_v48 = vmax.f32 %v5197_v24, %v5218_v3  ;;  %v5223_v37 = vrot.slane %v5201_v10, 1  ;;  %v6701_v45 = vld [vmem:[%s10766_s9 + $0x18] sm:$0xff]  ;;  %7119 = vmatprep.subr.mxu0 %v6718_v29 }
 0x535   :  { %v5221_v1 = vrot.slane %v5200_v21, 1  ;;  %v5194_v63 = vadd.f32 %v10546_v6, %v5179_v23  ;;  %7120 = vmatpush3.msra.mxu0 %v6718_v29  ;;  %v5389_v9 = vpop.permute.xlu1 %5388 }
 0x536   :  { %v5203_v57 = vmax.f32 %v5195_v20, 0.0  ;;  %v5258_v16 = vrot.slane %v5241_v46, 4  ;;  %v5256_v60 = vrot.slane %v5240_v48, 4  ;;  %7131 = vmatprep.subr.mxu0 %v6727_v44 }
 0x537   :  { %v5202_v55 = vmax.f32 %v5194_v63, 0.0  ;;  %v5224_v12 = vsel %vm900_vm1, %v5221_v1, %v5223_v37  ;;  %v5222_v59 = vsel %vm900_vm1, %v5219_v47, %v5221_v1  ;;  %v5384_v47 = vpop.permute.xlu0 %5383 }
 0x538   :  { %v5227_v40 = vrot.slane %v5203_v57, 1  ;;  %v5243_v32 = vmax.f32 %v5200_v21, %v5224_v12  ;;  %v5242_v41 = vmax.f32 %v5199_v18, %v5222_v59  ;;  %v5259_v4 = vsel %vm3456_vm4, %v5256_v60, %v5258_v16 }
 0x539   :  { %v5225_v49 = vrot.slane %v5202_v55, 1  ;;  %v5281_v35 = vmax.f32 %v5240_v48, %v5259_v4  ;;  %v5257_v24 = vsel %vm3456_vm4, %v5255_v36, %v5256_v60  ;;  %v10596_v39 = vpop.permute.xlu1 %5601 }
 0x53a   :  { %v5238_v6 = vsel %vm900_vm1, %v5227_v40, %v5214_v28  ;;  %v5262_v42 = vrot.slane %v5243_v32, 4  ;;  %v5260_v56 = vrot.slane %v5242_v41, 4  ;;  %v5280_v38 = vmax.f32 %v5239_v11, %v5257_v24  ;;  %v5394_v11 = vld [vmem:[%s10766_s9 + $0x8] sm:$0xff] }
 0x53b   :  { %v5246_v30 = vmax.f32 %v5203_v57, %v5238_v6  ;;  %v5228_v8 = vsel %vm900_vm1, %v5225_v49, %v5227_v40  ;;  %v5226_v33 = vsel %vm900_vm1, %v5223_v37, %v5225_v49  ;;  %v5597_v53 = vpop.permute.xlu0 %5596 }
 0x53c   :  { %v5245_v13 = vmax.f32 %v5202_v55, %v5228_v8  ;;  %v5244_v14 = vmax.f32 %v5201_v10, %v5226_v33  ;;  %v5263_v0 = vsel %vm3456_vm4, %v5260_v56, %v5262_v42  ;;  %v5261_v31 = vsel %vm3456_vm4, %v5258_v16, %v5260_v56 }
 0x53d   :  { %v5268_v5 = vrot.slane %v5246_v30, 4  ;;  %v5283_v58 = vmax.f32 %v5242_v41, %v5263_v0  ;;  %v5282_v25 = vmax.f32 %v5241_v46, %v5261_v31  ;;  %v10600_v10 = vpop.permute.xlu1 %5702 }
 0x53e   :  { %v5266_v62 = vrot.slane %v5245_v13, 4  ;;  %v5264_v43 = vrot.slane %v5244_v14, 4 }
 0x53f   :  { %v5279_v28 = vsel %vm3456_vm4, %v5268_v5, %v5255_v36  ;;  %v10598_v54 = vpop.permute.xlu0 %5697 }
 0x540   :  { %v5287_v18 = vmax.f32 %v5246_v30, %v5279_v28  ;;  %v5269_v19 = vsel %vm3456_vm4, %v5266_v62, %v5268_v5  ;;  %v5267_v52 = vsel %vm3456_vm4, %v5264_v43, %v5266_v62  ;;  %v5265_v7 = vsel %vm3456_vm4, %v5262_v42, %v5264_v43  ;;  %v6726_v30 = vld [vmem:[%s10766_s9 + $0x70] sm:$0xff]  ;;  %v6711_v28 = vld [vmem:[%s10766_s9 + $0x38] sm:$0xff] }
 0x541   :  { %v5286_v17 = vmax.f32 %v5245_v13, %v5269_v19  ;;  %v5285_v27 = vmax.f32 %v5244_v14, %v5267_v52  ;;  %v5284_v15 = vmax.f32 %v5243_v32, %v5265_v7  ;;  %v5895_v21 = vpop.permute.xlu1 %5894  ;;  %v6707_v14 = vld [vmem:[%s10766_s9 + $0x28] sm:$0xff]  ;;  %v6710_v52 = vld [vmem:[%s10766_s9 + $0x30] sm:$0xff] }
 0x542   :  { %7063 = vmatprep.subr.mxu1 %v5287_v18  ;;  %v6715_v7 = vld [vmem:[%s10766_s9 + $0x48] sm:$0xff] }
 0x543   :  { %7064 = vmatpush3.msra.mxu1 %v5287_v18  ;;  %v5890_v22 = vpop.permute.xlu0 %5889 }
 0x544   :  { %7065 = vmatprep.subr.mxu1 %v5286_v17 }
 0x545   :  { %7066 = vmatpush3.msra.mxu1 %v5286_v17  ;;  %v10622_v59 = vpop.permute.xlu1 %5995 }
 0x546   :  { %7067 = vmatprep.subr.mxu1 %v5285_v27 }
 0x547   :  { %7068 = vmatpush3.msra.mxu1 %v5285_v27  ;;  %v10604_v2 = vpop.permute.xlu0 %5990  ;;  %v6714_v27 = vld [vmem:[%s10766_s9 + $0x40] sm:$0xff] }
 0x548   :  { %7069 = vmatprep.subr.mxu1 %v5284_v15 }
 0x549   :  { %7070 = vmatpush3.msra.mxu1 %v5284_v15  ;;  %v6105_v31 = vpop.permute.xlu1 %6104 }
 0x54a   :  { %7071 = vmatprep.subr.mxu1 %v5283_v58 }
 0x54b   :  { %7072 = vmatpush3.msra.mxu1 %v5283_v58  ;;  %v6100_v6 = vpop.permute.xlu0 %6099 }
 0x54c   :  { %7073 = vmatprep.subr.mxu1 %v5282_v25 }
 0x54d   :  { %7074 = vmatpush3.msra.mxu1 %v5282_v25  ;;  %v6706_v25 = vld [vmem:[%s10766_s9 + $0x20] sm:$0xff] }
 0x54e   :  { %7075 = vmatprep.subr.mxu1 %v5281_v35 }
 0x54f   :  { %7076 = vmatpush3.msra.mxu1 %v5281_v35 }
 0x550   :  { %7077 = vmatprep.subr.mxu1 %v5280_v38 }
 0x551   :  { %7078 = vmatpush3.msra.mxu1 %v5280_v38  ;;  %v5393_v38 = vld [vmem:[%s10766_s9] sm:$0xff] }
 0x552   :  { %7080 = vmatmul.mubr.msk.f32.vlgmr.msra.gmra.mxu1 %vm5288_vm6, %v5205_v51  ;;  %7082 = vmatprep.subr.mxu1 %v6701_v45  ;;  %v6723_v51 = vld [vmem:[%s10766_s9 + $0x68] sm:$0xff] }
 0x553   :  { %7083 = vmatpush3.msra.mxu1 %v6701_v45 }
 0x554   :  { %7084 = vmatprep.subr.mxu1 %v6700_v50 }
 0x555   :  { %7085 = vmatpush3.msra.mxu1 %v6700_v50  ;;  %v6722_v50 = vld [vmem:[%s10766_s9 + $0x60] sm:$0xff] }
 0x556   :  { %7089 = vmatprep.subr.mxu1 %v5394_v11 }
 0x612   :  { %v10602_v23 = vpop.f32.mrf.mxu1 }
 0x613   :  { %v5395_v20 = vrot.slane %v10602_v23, 6  ;;  %v5878_v46 = vrot.slane %v10602_v23, 1  ;;  %v5371_v57 = vrot.slane %v10602_v23, 5  ;;  %v6088_v16 = vrot.slane %v10602_v23, 2 }
 0x614   :  { %v10606_v3 = vpop.f32.mrf.mxu1  ;;  %v5584_v33 = vrot.slane %v10602_v23, 7  ;;  %v6196_v45 = vrot.slane %v10602_v23, 3 }
 0x615   :  { %v5398_v48 = vrot.slane %v10606_v3, 6  ;;  %v5877_v37 = vrot.slane %v10606_v3, 1  ;;  %v5374_v1 = vrot.slane %v10606_v3, 5  ;;  %v6087_v63 = vrot.slane %v10606_v3, 2 }
 0x616   :  { %v5586_v24 = vrot.slane %v10606_v3, 7  ;;  %v6195_v15 = vrot.slane %v10606_v3, 3 }
 0x617   :  { %v5402_v60 = vsel %vm5397_vm7, %v5395_v20, %v5398_v48  ;;  %v10617_v36 = vsel %vm900_vm1, %v5877_v37, %v5878_v46  ;;  %v10620_v55 = vsel %vm900_vm1, %v5878_v46, %v5877_v37  ;;  %v5399_v12 = vsel %vm5397_vm7, %v5398_v48, %v5395_v20 }
 0x618   :  { %v5416_v40 = vmul.f32 %v5409_v34, %v5402_v60  ;;  %v5897_v32 = vmul.f32 %v5890_v22, %v10617_v36  ;;  %v5417_v41 = vmul.f32 %v5414_v61, %v5399_v12  ;;  %v5898_v4 = vmul.f32 %v5895_v21, %v10620_v55 }
 0x619   :  { %v5378_v49 = vsel %vm3800_vm5, %v5371_v57, %v5374_v1  ;;  %v6089_v35 = vsel %vm6086_vm9, %v6087_v63, %v6088_v16  ;;  %v5375_v8 = vsel %vm3800_vm5, %v5374_v1, %v5371_v57  ;;  %v6093_v13 = vsel %vm6086_vm9, %v6088_v16, %v6087_v63 }
 0x61a   :  { %7086 = vmatprep.mubr.msk.f32.mxu1 %vm5421_vm8, %v5416_v40  ;;  %7121 = vmatprep.mubr.msk.f32.mxu0 %vm5421_vm8, %v5897_v32  ;;  %v5391_v42 = vmul.f32 %v5384_v47, %v5378_v49  ;;  %v6107_v56 = vmul.f32 %v6100_v6, %v6089_v35  ;;  %v5590_v0 = vsel %vm178_vm0, %v5584_v33, %v5586_v24  ;;  %v6730_v47 = vld [vmem:[%s10766_s9 + $0x80] sm:$0xff] }
 0x61b   :  { %7087 = vmatmul.mubr.msk.f32.vlgmr.msra.gmra.mxu1 %vm5421_vm8, %v5417_v41  ;;  %7122 = vmatmul.mubr.msk.f32.vlgmr.msra.gmra.mxu0 %vm5421_vm8, %v5898_v4  ;;  %v5392_v5 = vmul.f32 %v5389_v9, %v5375_v8  ;;  %v6108_v58 = vmul.f32 %v6105_v31, %v6093_v13  ;;  %v5587_v62 = vsel %vm178_vm0, %v5586_v24, %v5584_v33 }
 0x61c   :  { %7090 = vmatpush3.msra.mxu1 %v5394_v11  ;;  %7093 = vmatprep.mubr.msk.f32.mxu1 %vm5421_vm8, %v5391_v42  ;;  %v5604_v43 = vmul.f32 %v5597_v53, %v5590_v0  ;;  %v5605_v18 = vmul.f32 %v10596_v39, %v5587_v62  ;;  %v5705_v19 = vmul.f32 %v10598_v54, %v5590_v0  ;;  %v6731_v11 = vld [vmem:[%s10766_s9 + $0x88] sm:$0xff]  ;;  %v6213_v53 = vpop.permute.xlu1 %6212  ;;  %v7431_v54 = vmov 0.0  }
 0x61d   :  { %7132 = vmatpush3.msra.mxu0 %v6727_v44  ;;  %7135 = vmatprep.mubr.msk.f32.mxu0 %vm5421_vm8, %v6107_v56  ;;  %v5706_v17 = vmul.f32 %v10600_v10, %v5587_v62  ;;  %v5998_v26 = vmul.f32 %v10604_v2, %v10617_v36  ;;  %v6197_v29 = vsel %vm3373_vm3, %v6195_v15, %v6196_v45  ;;  %v6208_v44 = vpop.permute.xlu0 %6207 }
 0x61e   :  { %7091 = vmatprep.subr.mxu1 %v5393_v38  ;;  %7133 = vmatprep.subr.mxu0 %v6726_v30  ;;  %v5999_v34 = vmul.f32 %v10622_v59, %v10620_v55  ;;  %v6215_v61 = vmul.f32 %v6208_v44, %v6197_v29  ;;  %v6201_v9 = vsel %vm3373_vm3, %v6196_v45, %v6195_v15  ;;  %v6411_v45 = vld [vmem:[#allocation11 + $0x2] sm:$0x3]  ;;  %v6497_v29 = vld [vmem:[%s10770_s13 + $0x30] sm:$0xff] }
 0x61f   :  { %7092 = vmatpush3.msra.mxu1 %v5393_v38  ;;  %7134 = vmatpush3.msra.mxu0 %v6726_v30  ;;  %v6216_v39 = vmul.f32 %v6213_v53, %v6201_v9  ;;  %v6734_v30 = vld [vmem:[%s10767_s10] ss:$0 sm:$0xff] }
 0x620   :  { %7094 = vmatmul.mubr.msk.f32.vlgmr.msra.gmra.mxu1 %vm5421_vm8, %v5392_v5  ;;  %7096 = vmatprep.subr.mxu1 %v6707_v14  ;;  %v6495_v44 = vld [vmem:[%s10770_s13 + $0x20] sm:$0xff] }
 0x621   :  { %7136 = vmatmul.mubr.msk.f32.vlgmr.msra.gmra.mxu0 %vm5421_vm8, %v6108_v58  ;;  %7097 = vmatpush3.msra.mxu1 %v6707_v14  ;;  %v6491_v9 = vld [vmem:[%s10770_s13] sm:$0xff] }
 0x622   :  { %7100 = vmatprep.mubr.msk.f32.mxu1 %vm5421_vm8, %v5604_v43  ;;  %7098 = vmatprep.subr.mxu1 %v6706_v25 }
 0x623   :  { %7099 = vmatpush3.msra.mxu1 %v6706_v25  ;;  %7145 = vmatprep.subr.mxu0 %v7431_v54 }
 0x624   :  { %7101 = vmatmul.mubr.msk.f32.vlgmr.msra.gmra.mxu1 %vm5421_vm8, %v5605_v18  ;;  %7103 = vmatprep.subr.mxu1 %v6711_v28 }
 0x625   :  { %7104 = vmatpush3.msra.mxu1 %v6711_v28  ;;  %7107 = vmatprep.mubr.msk.f32.mxu1 %vm5421_vm8, %v5705_v19 }
 0x626   :  { %7105 = vmatprep.subr.mxu1 %v6710_v52  ;;  %7149 = vmatprep.mubr.msk.f32.mxu0 %vm7432_vm10, %v7431_v54 }
 0x627   :  { %7106 = vmatpush3.msra.mxu1 %v6710_v52 }
 0x628   :  { %7108 = vmatmul.mubr.msk.f32.vlgmr.msra.gmra.mxu1 %vm5421_vm8, %v5706_v17  ;;  %7110 = vmatprep.subr.mxu1 %v6715_v7 }
 0x629   :  { %7111 = vmatpush3.msra.mxu1 %v6715_v7  ;;  %7114 = vmatprep.mubr.msk.f32.mxu1 %vm5421_vm8, %v10606_v3 }
 0x62a   :  { %7112 = vmatprep.subr.mxu1 %v6714_v27 }
 0x62b   :  { %7113 = vmatpush3.msra.mxu1 %v6714_v27 }
 0x62c   :  { %7115 = vmatmul.mubr.msk.f32.vlgmr.msra.gmra.mxu1 %vm5421_vm8, %v10602_v23  ;;  %7124 = vmatprep.subr.mxu1 %v6723_v51 }
 0x62d   :  { %7125 = vmatpush3.msra.mxu1 %v6723_v51  ;;  %7128 = vmatprep.mubr.msk.f32.mxu1 %vm5421_vm8, %v5998_v26  ;;  %v6336_v26 = vld [vmem:[#allocation11] sm:$0x3] }
 0x62e   :  { %7126 = vmatprep.subr.mxu1 %v6722_v50 }
 0x62f   :  { %7127 = vmatpush3.msra.mxu1 %v6722_v50  ;;  %v6498_v50 = vld [vmem:[%s10770_s13 + $0x38] sm:$0xff] }
 0x630   :  { %7129 = vmatmul.mubr.msk.f32.vlgmr.msra.gmra.mxu1 %vm5421_vm8, %v5999_v34  ;;  %7138 = vmatprep.subr.mxu1 %v6731_v11  ;;  %v6494_v34 = vld [vmem:[%s10770_s13 + $0x18] sm:$0xff] }
 0x631   :  { %7139 = vmatpush3.msra.mxu1 %v6731_v11  ;;  %7142 = vmatprep.mubr.msk.f32.mxu1 %vm5421_vm8, %v6215_v61  ;;  %v6496_v11 = vld [vmem:[%s10770_s13 + $0x28] sm:$0xff]  ;;  %v6493_v61 = vld [vmem:[%s10770_s13 + $0x10] sm:$0xff] }
 0x632   :  { %7140 = vmatprep.subr.mxu1 %v6730_v47 }
 0x633   :  { %7141 = vmatpush3.msra.mxu1 %v6730_v47  ;;  %v6492_v47 = vld [vmem:[%s10770_s13 + $0x8] sm:$0xff]  ;;  %s7387_s13 = scalar_lea.vmem %s6588_s29, 32 }
 0x634   :  { %7143 = vmatmul.mubr.msk.f32.vlgmr.msra.gmra.mxu1 %vm5421_vm8, %v6216_v39  ;;  %7152 = vmatprep.subr.mxu1 %v7431_v54  ;;  %p7388_p7 = scmp.ne.s32.totalorder %s6588_s29, %s7387_s13  ;;  %p7393_p9 = scmp.lt.s32.totalorder %s7387_s13, %s7387_s13 }
 0x635   :  { %7156 = vmatprep.mubr.msk.f32.mxu1 %vm7432_vm10, %v7431_v54 }
 0x636   :  { %p7394_p10 = por %p7393_p9, %p7392_p8 }
 0x638   :  { %p7395_p11 = pnand %p7394_p10, %p7388_p7 }
 0x6db   :  { %v7088_v10 = vpop.f32.mrf.mxu1  ;;  %v7123_v46 = vpop.f32.mrf.mxu0 }
 0x6dd   :  { %v5494_v22 = vpop.f32.mrf.mxu1  ;;  %v5974_v60 = vpop.f32.mrf.mxu0 }
 0x6e0   :  { %v7095_v21 = vpop.f32.mrf.mxu1 }
 0x6e1   :  { %v5581_v20 = vadd.f32 %v7095_v21, %v7088_v10  ;;  %v7137_v41 = vpop.f32.mrf.mxu0 }
 0x6e2   :  { %v5575_v23 = vpop.f32.mrf.mxu1 }
 0x6e3   :  { %v5576_v37 = vadd.f32 %v5575_v23, %v5494_v22  ;;  %v6184_v56 = vpop.f32.mrf.mxu0 }
 0x6e4   :  { %v7102_v2 = vpop.f32.mrf.mxu1 }
 0x6e5   :  { %v5691_v1 = vadd.f32 %v7102_v2, %v5581_v20  ;;  %v6737_v2 = vld [vmem:[#allocation13] ss:$0 sm:$0xff] }
 0x6e6   :  { %v5681_v3 = vpop.f32.mrf.mxu1 }
 0x6e7   :  { %v5690_v57 = vadd.f32 %v5681_v3, %v5576_v37 }
 0x6e8   :  { %v7109_v48 = vpop.f32.mrf.mxu1 }
 0x6e9   :  { %v5792_v16 = vadd.f32 %v7109_v48, %v5691_v1 }
 0x6ea   :  { %v5782_v63 = vpop.f32.mrf.mxu1 }
 0x6eb   :  { %v5791_v55 = vadd.f32 %v5782_v63, %v5690_v57 }
 0x6ec   :  { %v7116_v36 = vpop.f32.mrf.mxu1 }
 0x6ed   :  { %v5876_v12 = vadd.f32 %v7116_v36, %v5792_v16 }
 0x6ee   :  { %v5866_v59 = vpop.f32.mrf.mxu1 }
 0x6ef   :  { %v5875_v40 = vadd.f32 %v5866_v59, %v5791_v55  ;;  %v5984_v32 = vadd.f32 %v7123_v46, %v5876_v12 }
 0x6f0   :  { %v7130_v4 = vpop.f32.mrf.mxu1 }
 0x6f1   :  { %v6085_v49 = vadd.f32 %v7130_v4, %v5984_v32  ;;  %v5983_v35 = vadd.f32 %v5974_v60, %v5875_v40 }
 0x6f2   :  { %v6075_v24 = vpop.f32.mrf.mxu1 }
 0x6f3   :  { %v6084_v6 = vadd.f32 %v6075_v24, %v5983_v35  ;;  %v6194_v42 = vadd.f32 %v7137_v41, %v6085_v49 }
 0x6f4   :  { %v7144_v38 = vpop.f32.mrf.mxu1 }
 0x6f5   :  { %v6302_v8 = vadd.f32 %v7144_v38, %v6194_v42  ;;  %v6193_v33 = vadd.f32 %v6184_v56, %v6084_v6 }
 0x6f6   :  { %v6292_v13 = vpop.f32.mrf.mxu1 }
 0x6f7   :  { %v6311_v14 = vadd.f32 %v6734_v30, %v6302_v8  ;;  %v6301_v0 = vadd.f32 %v6292_v13, %v6193_v33 }
 0x6f9   :  { %v6313_v31 = vmax.f32 %v6311_v14, 0.0  ;;  %v6310_v5 = vadd.f32 %v6734_v30, %v6301_v0 }
 0x6fb   :  { %v6312_v58 = vmax.f32 %v6310_v5, 0.0  ;;  %v6317_v25 = vrot.slane %v6313_v31, 1 }
 0x6fd   :  { %v6316_v62 = vrot.slane %v6312_v58, 1 }
 0x6ff   :  { %v6318_v43 = vsel %vm900_vm1, %v6316_v62, %v6317_v25  ;;  %v6322_v28 = vsel %vm900_vm1, %v6317_v25, %v6316_v62 }
 0x700   :  { %v6323_v18 = vmax.f32 %v6312_v58, %v6318_v43  ;;  %v6324_v19 = vmax.f32 %v6313_v31, %v6322_v28 }
 0x702   :  { %v6327_v52 = vrot.slane %v6323_v18, 2  ;;  %v6328_v7 = vrot.slane %v6324_v19, 2 }
 0x704   :  { %v6329_v17 = vsel %vm6086_vm9, %v6327_v52, %v6328_v7  ;;  %v6333_v27 = vsel %vm6086_vm9, %v6328_v7, %v6327_v52 }
 0x705   :  { %v6335_v15 = vmax.f32 %v6324_v19, %v6333_v27  ;;  %v6334_v51 = vmax.f32 %v6323_v18, %v6329_v17 }
 0x707   :  { %7146 = vmatpush3.msra.mxu0 %v6335_v15  ;;  %7153 = vmatpush3.msra.mxu1 %v6335_v15 }
 0x708   :  { %7147 = vmatprep.subr.mxu0 %v7431_v54  ;;  %7154 = vmatprep.subr.mxu1 %v7431_v54 }
 0x709   :  { %7148 = vmatpush3.msra.mxu0 %v6334_v51  ;;  %7155 = vmatpush3.msra.mxu1 %v6334_v51 }
 0x70a   :  { %7157 = vmatmul.mubr.msk.f32.vlgmr.msra.gmra.mxu1 %vm5421_vm8, %v6411_v45  ;;  %7150 = vmatmul.mubr.msk.f32.vlgmr.msra.gmra.mxu0 %vm5421_vm8, %v6336_v26 }
 0x70b   :  { %7159 = vmatprep.subr.mxu0 %v7431_v54  ;;  %7175 = vmatprep.mubr.msk.f32.mxu0 %vm7432_vm10, %v7431_v54 }
 0x70c   :  { %7160 = vmatpush3.msra.mxu0 %v6498_v50 }
 0x70d   :  { %7161 = vmatprep.subr.mxu0 %v7431_v54 }
 0x70e   :  { %7162 = vmatpush3.msra.mxu0 %v6497_v29 }
 0x70f   :  { %7163 = vmatprep.subr.mxu0 %v7431_v54 }
 0x710   :  { %7164 = vmatpush3.msra.mxu0 %v6496_v11 }
 0x711   :  { %7165 = vmatprep.subr.mxu0 %v7431_v54 }
 0x712   :  { %7166 = vmatpush3.msra.mxu0 %v6495_v44 }
 0x713   :  { %7167 = vmatprep.subr.mxu0 %v7431_v54 }
 0x714   :  { %7168 = vmatpush3.msra.mxu0 %v6494_v34 }
 0x715   :  { %7169 = vmatprep.subr.mxu0 %v7431_v54 }
 0x716   :  { %7170 = vmatpush3.msra.mxu0 %v6493_v61 }
 0x717   :  { %7171 = vmatprep.subr.mxu0 %v7431_v54 }
 0x718   :  { %7172 = vmatpush3.msra.mxu0 %v6492_v47 }
 0x719   :  { %7173 = vmatprep.subr.mxu0 %v7431_v54 }
 0x71a   :  { %7174 = vmatpush3.msra.mxu0 %v6491_v9 }
 0x7ca   :  { %v6481_v53 = vpop.f32.mrf.mxu1  ;;  %v6406_v39 = vpop.f32.mrf.mxu0 }
 0x7cb   :  { %6486 = vrot.lane.b32.xlu0 %v6481_v53, %s7424_s19 }
 0x7cc   :  { %v7158_v10 = vpop.f32.mrf.mxu1  ;;  %v7151_v22 = vpop.f32.mrf.mxu0 }
 0x83d   :  { %v6487_v21 = vpop.permute.xlu0 %6486 }
 0x83e   :  { %v6490_v23 = vsel %vm6489_vm11, %v6406_v39, %v6487_v21 }
 0x83f   :  { %7176 = vmatmul.mubr.msk.f32.vlgmr.msra.gmra.mxu0 %vm5288_vm6, %v6490_v23 }
 0x8ff   :  { %v6575_v54 = vpop.f32.mrf.mxu0 }
 0x900   :  { %v6576_v3 = vadd.f32 %v6737_v2, %v6575_v54 }
 0x901   :  { %v7177_v20 = vpop.f32.mrf.mxu0 }
 0x902   :  { %6580 = vst.msk [vmem:[#allocation14] sm:$0x3] %vm6579_vm12, %v6576_v3 }
 0x903   :  { %7398 = shalt.err (!%p7395_p11)
}
 0x904   :  { %6590 = dma.vmem_to_hbm [thread:$0]  %s6588_s29, 32, %s10772_s15, [#allocation4]  }
 0x905   :  { %7415 = dma.done.wait [#allocation4], 32  }
 0x906   :  { %7416 = vsyncadd [#allocation4], 4294967264 }
 0x907   :  { %6594 = vsyncpa [#allocation3], 1 }
 0x908   :  { %6595 = vsyncpa [#allocation6], 1 }
 0x909   :  { %6596 = vsyncpa [#allocation9], 1 }
 0x90a   :  { %6597 = vsyncpa [#allocation12], 1 }
 0x90b   :  { %6598 = vsyncpa [#allocation4], 1 }

</bundles_post_ra>
